<compile_context>
chip_gen: v5e
topology: v5e:2x2
jax: 0.10.0
libtpu: 0.0.40
codegen_flags: <defaults>
</compile_context>

<pallas_src>
import functools
import numpy as np
import jax
import jax.numpy as jnp
from jax.experimental import pallas as pl
from jax.experimental.pallas import tpu as pltpu

LRELU_SLOPE = 0.1
HALO = 128  # right halo per tile/chunk; multiple of 128 and >= K - 1


def _round_up(n, m):
    return ((n + m - 1) // m) * m


def decoder_kernel(xb_ref, xh_ref, ws_ref, bs_ref, we_ref, be_ref, out_ref,
                   xwin_ref, *, total_t):
    """One (batch, time-tile) grid step.

    xb_ref:   (1, 1, Tt)      body lanes of the padded input window
    xh_ref:   (1, 1, HALO)    right halo lanes
    ws_ref:   (Dp, Wc)        start-conv weight, lane-pre-broadcast
    bs_ref:   (Dp, Wc)        start-conv bias,   lane-pre-broadcast
    we_ref:   (K, Dp, CHUNK)  end-conv weight,   lane-pre-broadcast
    be_ref:   (1, 1)          end-conv bias
    out_ref:  (1, 1, Tt)
    xwin_ref: (1, Tt + HALO)  VMEM scratch: joined input window (1 row, tiny)
    """
    K, Dp, CHUNK = we_ref.shape
    Wc = ws_ref.shape[1]
    Tt = out_ref.shape[2]
    P = K // 2
    assert Wc == CHUNK + HALO and Tt % CHUNK == 0 and Dp % 8 == 0
    n_chunks = Tt // CHUNK
    DBLK = 16 if (Dp % 16 == 0 and Dp >= 16) else 8
    n_db = Dp // DBLK

    j = pl.program_id(1)

    # Join body + halo into one contiguous lane window (single row -> cheap).
    xwin_ref[:, :Tt] = xb_ref[0]
    xwin_ref[:, Tt:] = xh_ref[0]

    be = be_ref[0, 0]
    lane = jax.lax.broadcasted_iota(jnp.int32, (1, Wc), 1)

    for c in range(n_chunks):                       # static unroll over chunks
        cs = c * CHUNK
        x_c = xwin_ref[:, cs:cs + Wc]               # (1, Wc)

        # Boundary mask folded into the bias: x is zero-padded host-side, so
        # only the bias leaks outside [0, T); lrelu(0) == 0 keeps it exact.
        g = lane + (j * Tt + cs - P)                # global time index
        m = ((g >= 0) & (g < total_t)).astype(jnp.float32)   # (1, Wc)

        acc = jnp.zeros((8, CHUNK), jnp.float32)    # slim accumulator
        for db in range(n_db):                      # channel blocks (vreg cap)
            rs = db * DBLK
            # start: weight-normed 1x1 conv (1 -> D channels), in registers.
            h = ws_ref[rs:rs + DBLK, :] * x_c + bs_ref[rs:rs + DBLK, :] * m
            # TODO(synk): modules.UNet blocks would transform h here (skipped).
            h = jnp.maximum(h, LRELU_SLOPE * h)     # leaky_relu, 2 VPU ops
            # end: conv1d(D -> 1, kernel K).  K shifted taps via XLU roll,
            # folded straight into the (8, CHUNK) accumulator.
            # (A bf16 tap path would halve roll/VALU work on v6e/v7x; kept
            #  f32 here for v5e portability and exact matching.)
            for k in range(K):
                if k == 0:
                    sh = h[:, :CHUNK]
                else:
                    sh = pltpu.roll(h, shift=Wc - k, axis=1)[:, :CHUNK]
                wk = we_ref[k, rs:rs + DBLK, :]     # (DBLK, CHUNK), plain vregs
                for s in range(DBLK // 8):
                    acc = acc + (wk[s * 8:(s + 1) * 8, :] *
                                 sh[s * 8:(s + 1) * 8, :])

        y = jnp.sum(acc, axis=0, keepdims=True)     # one cross-sublane reduce
        out_ref[0, :, cs:cs + CHUNK] = jnp.tanh(y + be)


def decoder_forward(x, c_list, params, *, t_tile=2048, chunk=512):
    """x: (B, 1, T) float32 -> (B, 1, T) float32.  c_list unused (see TODO)."""
    del c_list  # TODO(synk): UNet stack skipped (external module).
    B, Cin, T = x.shape
    assert Cin == 1
    w_start = jnp.asarray(params["w_start"], jnp.float32).reshape(-1, 1)  # (D,1)
    b_start = jnp.asarray(params["b_start"], jnp.float32).reshape(-1, 1)  # (D,1)
    w_end = jnp.asarray(params["w_end"], jnp.float32)                     # (1,D,K)
    b_end = jnp.asarray(params["b_end"], jnp.float32).reshape(1, 1)       # (1,1)
    D = w_start.shape[0]
    K = w_end.shape[2]
    P = K // 2
    assert K % 2 == 1, "end conv assumes odd kernel (PyTorch padding=K//2)"
    assert K - 1 <= HALO

    # Lane-aligned tiling: Tt outputs per grid step, CHUNK-lane inner
    # sub-tiles.  Big tiles amortize per-step overhead + halo recompute.
    chunk = max(128, _round_up(chunk, 128))
    T128 = _round_up(T, 128)
    if T128 <= chunk:
        Tt = CH = T128
    else:
        CH = chunk
        Tt = min(_round_up(t_tile, CH), _round_up(T128, CH))
    T_r = _round_up(T, Tt)
    nT = T_r // Tt
    Wc = CH + HALO
    T_pad = T_r + HALO

    # Zero-pad x once (left P for the end conv, right up to T_r + HALO).  The
    # kernel reads a body block + a 128-lane halo block per tile -- no
    # host-side materialization of overlapping windows.
    x_pad = jnp.pad(x.reshape(B, T).astype(jnp.float32),
                    ((0, 0), (P, T_pad - T - P))).reshape(B, 1, T_pad)

    # Pre-broadcast the per-channel scalar weights along lanes so every tap
    # multiply is a plain vreg op.  Channels zero-padded to a multiple of 8.
    Dp = _round_up(D, 8)
    ws = jnp.pad(w_start, ((0, Dp - D), (0, 0)))
    bs = jnp.pad(b_start, ((0, Dp - D), (0, 0)))
    we = jnp.pad(w_end.reshape(D, K).T, ((0, 0), (0, Dp - D)))            # (K,Dp)
    ws_b = jnp.broadcast_to(ws, (Dp, Wc))
    bs_b = jnp.broadcast_to(bs, (Dp, Wc))
    we_b = jnp.broadcast_to(we[:, :, None], (K, Dp, CH))

    n_halo_blocks = Tt // HALO

    out = pl.pallas_call(
        functools.partial(decoder_kernel, total_t=T),
        out_shape=jax.ShapeDtypeStruct((B, 1, T_r), jnp.float32),
        grid=(B, nT),
        in_specs=[
            pl.BlockSpec((1, 1, Tt), lambda b, j: (b, 0, j)),              # body
            pl.BlockSpec((1, 1, HALO),
                         lambda b, j: (b, 0, (j + 1) * n_halo_blocks)),    # halo
            pl.BlockSpec((Dp, Wc), lambda b, j: (0, 0)),                   # ws_b
            pl.BlockSpec((Dp, Wc), lambda b, j: (0, 0)),                   # bs_b
            pl.BlockSpec((K, Dp, CH), lambda b, j: (0, 0, 0)),             # we_b
            pl.BlockSpec((1, 1), lambda b, j: (0, 0)),                     # b_end
        ],
        out_specs=pl.BlockSpec((1, 1, Tt), lambda b, j: (b, 0, j)),
        scratch_shapes=[pltpu.VMEM((1, Tt + HALO), jnp.float32)],
        compiler_params=pltpu.CompilerParams(
            dimension_semantics=("parallel", "parallel")),
    )(x_pad, x_pad, ws_b, bs_b, we_b, b_end)
    return out[:, :, :T]


def make_params(key, unet_dim, kernel_end=11):
    """Deterministic synthetic parameters (weight_norm folded for `start`)."""
    k0, k1, k2, k3, k4 = jax.random.split(key, 5)
    D, K = unet_dim, kernel_end
    # weight_norm(Conv1d(1, D, 1)): v (D,1,1), g (D,1,1); w = g * v / ||v||
    v_start = jax.random.normal(k0, (D, 1, 1), jnp.float32)
    g_start = 1.0 + 0.1 * jax.random.normal(k1, (D, 1, 1), jnp.float32)
    v_norm = jnp.sqrt(jnp.sum(v_start ** 2, axis=(1, 2), keepdims=True))
    w_start = g_start * v_start / v_norm                       # (D, 1, 1)
    b_start = 0.1 * jax.random.normal(k2, (D,), jnp.float32)
    # Conv1d(D, 1, K, padding=K//2)
    w_end = jax.random.normal(k3, (1, D, K), jnp.float32) / np.sqrt(D * K)
    b_end = 0.1 * jax.random.normal(k4, (1,), jnp.float32)
    return {"w_start": w_start, "b_start": b_start,
            "w_end": w_end, "b_end": b_end}


def decoder_reference(x, params):
    """Pure-JAX reference (start conv -> lrelu -> end conv -> tanh)."""
    D = params["w_start"].shape[0]
    K = params["w_end"].shape[2]
    h = params["w_start"].reshape(1, D, 1) * x + params["b_start"].reshape(1, D, 1)
    h = jnp.where(h > 0.0, h, LRELU_SLOPE * h)
    y = jax.lax.conv_general_dilated(
        h, params["w_end"], window_strides=(1,), padding=[(K // 2, K // 2)],
        dimension_numbers=("NCH", "OIH", "NCH"))
    y = y + params["b_end"].reshape(1, 1, 1)
    return jnp.tanh(y)


if __name__ == "__main__":
    B, T, unet_dim = 2, 1600, 32
    key = jax.random.PRNGKey(0)
    kx, kx2, kp = jax.random.split(key, 3)

    x = jax.random.normal(kx, (B, 1, T), jnp.float32)
    params = make_params(kp, unet_dim)
    c_list = [jnp.zeros((B, 80, T // 256 + 1), jnp.float32)]  # unused (UNet skipped)

    # Multi-tile / multi-chunk path: Tt=1024 (2 tiles), CHUNK=512 (2 chunks),
    # grid (2, 2) -> even parallel extent for v7x megacore.
    out = decoder_forward(x, c_list, params, t_tile=1024, chunk=512)
    out = jax.block_until_ready(out)
    ref = decoder_reference(x, params)
    np.testing.assert_allclose(np.asarray(out), np.asarray(ref),
                               rtol=1e-4, atol=1e-5)

    # Short-sequence path: single tile, single chunk (defaults).
    x2 = jax.random.normal(kx2, (B, 1, 200), jnp.float32)
    out2 = jax.block_until_ready(decoder_forward(x2, c_list, params))
    ref2 = decoder_reference(x2, params)
    np.testing.assert_allclose(np.asarray(out2), np.asarray(ref2),
                               rtol=1e-4, atol=1e-5)

    print("KERNEL_OK")
</pallas_src>

<mosaic_0001>
module attributes {stable_mosaic.version = 11 : i64} {
  func.func @decoder_kernel(%arg0: i32, %arg1: i32, %arg2: memref<1x1x1024xf32, #tpu.memory_space<vmem>>, %arg3: memref<1x1x128xf32, #tpu.memory_space<vmem>>, %arg4: memref<32x640xf32, #tpu.memory_space<vmem>>, %arg5: memref<32x640xf32, #tpu.memory_space<vmem>>, %arg6: memref<11x32x512xf32, #tpu.memory_space<vmem>>, %arg7: memref<1x1xf32, #tpu.memory_space<vmem>>, %arg8: memref<1x1x1024xf32, #tpu.memory_space<vmem>>, %arg9: memref<1x1152xf32, #tpu.memory_space<vmem>>) attributes {dimension_semantics = [#tpu.dimension_semantics<parallel>, #tpu.dimension_semantics<parallel>], iteration_bounds = array<i64: 2, 2>, scalar_prefetch = 0 : i64, scratch_operands = 1 : i64, tpu.core_type = #tpu.core_type<tc>, window_params = [{transform_indices = @transform_0, window_bounds = array<i64: 1, 1, 1024>}, {transform_indices = @transform_1, window_bounds = array<i64: 1, 1, 128>}, {pipeline_mode = #tpu.pipeline_mode<synchronous>, transform_indices = @transform_2, window_bounds = array<i64: 32, 640>}, {pipeline_mode = #tpu.pipeline_mode<synchronous>, transform_indices = @transform_3, window_bounds = array<i64: 32, 640>}, {pipeline_mode = #tpu.pipeline_mode<synchronous>, transform_indices = @transform_4, window_bounds = array<i64: 11, 32, 512>}, {pipeline_mode = #tpu.pipeline_mode<synchronous>, transform_indices = @transform_5, window_bounds = array<i64: 1, 1>}, {transform_indices = @transform_6, window_bounds = array<i64: 1, 1, 1024>}]} {
    %c0 = arith.constant 0 : index
    %c0_0 = arith.constant 0 : index
    %c0_1 = arith.constant 0 : index
    %0 = vector.load %arg2[%c0, %c0_0, %c0_1] : memref<1x1x1024xf32, #tpu.memory_space<vmem>>, vector<1x1x1024xf32>
    %1 = vector.shape_cast %0 : vector<1x1x1024xf32> to vector<1x1024xf32>
    %c0_2 = arith.constant 0 : index
    %c0_3 = arith.constant 0 : index
    %2 = vector.load %arg9[%c0_2, %c0_3] : memref<1x1152xf32, #tpu.memory_space<vmem>>, vector<1x1024xf32>
    tpu.vector_store %arg9[%c0_2, %c0_3], %1 {strides = array<i32>} : memref<1x1152xf32, #tpu.memory_space<vmem>>, vector<1x1024xf32>,
    %c0_4 = arith.constant 0 : index
    %c0_5 = arith.constant 0 : index
    %c0_6 = arith.constant 0 : index
    %3 = vector.load %arg3[%c0_4, %c0_5, %c0_6] : memref<1x1x128xf32, #tpu.memory_space<vmem>>, vector<1x1x128xf32>
    %4 = vector.shape_cast %3 : vector<1x1x128xf32> to vector<1x128xf32>
    %c0_7 = arith.constant 0 : index
    %c1024 = arith.constant 1024 : index
    %5 = vector.load %arg9[%c0_7, %c1024] : memref<1x1152xf32, #tpu.memory_space<vmem>>, vector<1x128xf32>
    tpu.vector_store %arg9[%c0_7, %c1024], %4 {strides = array<i32>} : memref<1x1152xf32, #tpu.memory_space<vmem>>, vector<1x128xf32>,
    %c0_8 = arith.constant 0 : index
    %c0_9 = arith.constant 0 : index
    %6 = vector.load %arg7[%c0_8, %c0_9] : memref<1x1xf32, #tpu.memory_space<vmem>>, vector<1x1xf32>
    %7 = vector.extract %6[0, 0] : f32 from vector<1x1xf32>
    %8 = tpu.iota {dimensions = array<i32: 1>} : vector<1x640xi32>
    %c0_10 = arith.constant 0 : index
    %c0_11 = arith.constant 0 : index
    %9 = vector.load %arg9[%c0_10, %c0_11] : memref<1x1152xf32, #tpu.memory_space<vmem>>, vector<1x640xf32>
    %c1024_i32 = arith.constant 1024 : i32
    %10 = arith.muli %arg1, %c1024_i32 : i32
    %c0_i32 = arith.constant 0 : i32
    %11 = arith.addi %10, %c0_i32 : i32
    %c5_i32 = arith.constant 5 : i32
    %12 = arith.subi %11, %c5_i32 : i32
    %13 = vector.broadcast %12 : i32 to vector<1x640xi32>
    %14 = arith.addi %8, %13 : vector<1x640xi32>
    %c0_i32_12 = arith.constant 0 : i32
    %15 = vector.broadcast %c0_i32_12 : i32 to vector<1x640xi32>
    %16 = arith.cmpi sge, %14, %15 : vector<1x640xi32>
    %c1600_i32 = arith.constant 1600 : i32
    %17 = vector.broadcast %c1600_i32 : i32 to vector<1x640xi32>
    %18 = arith.cmpi slt, %14, %17 : vector<1x640xi32>
    %19 = arith.andi %16, %18 : vector<1x640xi1>
    %20 = arith.extui %19 : vector<1x640xi1> to vector<1x640xi32>
    %21 = arith.sitofp %20 : vector<1x640xi32> to vector<1x640xf32>
    %cst = arith.constant 0.000000e+00 : f32
    %22 = vector.broadcast %cst : f32 to vector<8x512xf32>
    %c0_13 = arith.constant 0 : index
    %c0_14 = arith.constant 0 : index
    %23 = vector.load %arg4[%c0_13, %c0_14] : memref<32x640xf32, #tpu.memory_space<vmem>>, vector<16x640xf32>
    %24 = vector.broadcast %9 : vector<1x640xf32> to vector<16x640xf32>
    %25 = arith.mulf %23, %24 : vector<16x640xf32>
    %c0_15 = arith.constant 0 : index
    %c0_16 = arith.constant 0 : index
    %26 = vector.load %arg5[%c0_15, %c0_16] : memref<32x640xf32, #tpu.memory_space<vmem>>, vector<16x640xf32>
    %27 = vector.broadcast %21 : vector<1x640xf32> to vector<16x640xf32>
    %28 = arith.mulf %26, %27 : vector<16x640xf32>
    %29 = arith.addf %25, %28 : vector<16x640xf32>
    %cst_17 = arith.constant 1.000000e-01 : f32
    %30 = vector.broadcast %cst_17 : f32 to vector<16x640xf32>
    %31 = arith.mulf %30, %29 : vector<16x640xf32>
    %32 = arith.maximumf %29, %31 : vector<16x640xf32>
    %33 = vector.extract_strided_slice %32 {offsets = [0, 0], sizes = [16, 512], strides = [1, 1]} : vector<16x640xf32> to vector<16x512xf32>
    %c0_18 = arith.constant 0 : index
    %c0_19 = arith.constant 0 : index
    %c0_20 = arith.constant 0 : index
    %34 = vector.load %arg6[%c0_18, %c0_19, %c0_20] : memref<11x32x512xf32, #tpu.memory_space<vmem>>, vector<1x16x512xf32>
    %35 = vector.shape_cast %34 : vector<1x16x512xf32> to vector<16x512xf32>
    %36 = vector.extract_strided_slice %35 {offsets = [0, 0], sizes = [8, 512], strides = [1, 1]} : vector<16x512xf32> to vector<8x512xf32>
    %37 = vector.extract_strided_slice %33 {offsets = [0, 0], sizes = [8, 512], strides = [1, 1]} : vector<16x512xf32> to vector<8x512xf32>
    %38 = arith.mulf %36, %37 : vector<8x512xf32>
    %39 = arith.addf %22, %38 : vector<8x512xf32>
    %40 = vector.extract_strided_slice %35 {offsets = [8, 0], sizes = [8, 512], strides = [1, 1]} : vector<16x512xf32> to vector<8x512xf32>
    %41 = vector.extract_strided_slice %33 {offsets = [8, 0], sizes = [8, 512], strides = [1, 1]} : vector<16x512xf32> to vector<8x512xf32>
    %42 = arith.mulf %40, %41 : vector<8x512xf32>
    %43 = arith.addf %39, %42 : vector<8x512xf32>
    %c639_i32 = arith.constant 639 : i32
    %44 = tpu.dynamic_rotate %32 by %c639_i32 dim 1 : vector<16x640xf32>, i32 -> vector<16x640xf32>
    %45 = vector.extract_strided_slice %44 {offsets = [0, 0], sizes = [16, 512], strides = [1, 1]} : vector<16x640xf32> to vector<16x512xf32>
    %c1 = arith.constant 1 : index
    %c0_21 = arith.constant 0 : index
    %c0_22 = arith.constant 0 : index
    %46 = vector.load %arg6[%c1, %c0_21, %c0_22] : memref<11x32x512xf32, #tpu.memory_space<vmem>>, vector<1x16x512xf32>
    %47 = vector.shape_cast %46 : vector<1x16x512xf32> to vector<16x512xf32>
    %48 = vector.extract_strided_slice %47 {offsets = [0, 0], sizes = [8, 512], strides = [1, 1]} : vector<16x512xf32> to vector<8x512xf32>
    %49 = vector.extract_strided_slice %45 {offsets = [0, 0], sizes = [8, 512], strides = [1, 1]} : vector<16x512xf32> to vector<8x512xf32>
    %50 = arith.mulf %48, %49 : vector<8x512xf32>
    %51 = arith.addf %43, %50 : vector<8x512xf32>
    %52 = vector.extract_strided_slice %47 {offsets = [8, 0], sizes = [8, 512], strides = [1, 1]} : vector<16x512xf32> to vector<8x512xf32>
    %53 = vector.extract_strided_slice %45 {offsets = [8, 0], sizes = [8, 512], strides = [1, 1]} : vector<16x512xf32> to vector<8x512xf32>
    %54 = arith.mulf %52, %53 : vector<8x512xf32>
    %55 = arith.addf %51, %54 : vector<8x512xf32>
    %c638_i32 = arith.constant 638 : i32
    %56 = tpu.dynamic_rotate %32 by %c638_i32 dim 1 : vector<16x640xf32>, i32 -> vector<16x640xf32>
    %57 = vector.extract_strided_slice %56 {offsets = [0, 0], sizes = [16, 512], strides = [1, 1]} : vector<16x640xf32> to vector<16x512xf32>
    %c2 = arith.constant 2 : index
    %c0_23 = arith.constant 0 : index
    %c0_24 = arith.constant 0 : index
    %58 = vector.load %arg6[%c2, %c0_23, %c0_24] : memref<11x32x512xf32, #tpu.memory_space<vmem>>, vector<1x16x512xf32>
    %59 = vector.shape_cast %58 : vector<1x16x512xf32> to vector<16x512xf32>
    %60 = vector.extract_strided_slice %59 {offsets = [0, 0], sizes = [8, 512], strides = [1, 1]} : vector<16x512xf32> to vector<8x512xf32>
    %61 = vector.extract_strided_slice %57 {offsets = [0, 0], sizes = [8, 512], strides = [1, 1]} : vector<16x512xf32> to vector<8x512xf32>
    %62 = arith.mulf %60, %61 : vector<8x512xf32>
    %63 = arith.addf %55, %62 : vector<8x512xf32>
    %64 = vector.extract_strided_slice %59 {offsets = [8, 0], sizes = [8, 512], strides = [1, 1]} : vector<16x512xf32> to vector<8x512xf32>
    %65 = vector.extract_strided_slice %57 {offsets = [8, 0], sizes = [8, 512], strides = [1, 1]} : vector<16x512xf32> to vector<8x512xf32>
    %66 = arith.mulf %64, %65 : vector<8x512xf32>
    %67 = arith.addf %63, %66 : vector<8x512xf32>
    %c637_i32 = arith.constant 637 : i32
    %68 = tpu.dynamic_rotate %32 by %c637_i32 dim 1 : vector<16x640xf32>, i32 -> vector<16x640xf32>
    %69 = vector.extract_strided_slice %68 {offsets = [0, 0], sizes = [16, 512], strides = [1, 1]} : vector<16x640xf32> to vector<16x512xf32>
    %c3 = arith.constant 3 : index
    %c0_25 = arith.constant 0 : index
    %c0_26 = arith.constant 0 : index
    %70 = vector.load %arg6[%c3, %c0_25, %c0_26] : memref<11x32x512xf32, #tpu.memory_space<vmem>>, vector<1x16x512xf32>
    %71 = vector.shape_cast %70 : vector<1x16x512xf32> to vector<16x512xf32>
    %72 = vector.extract_strided_slice %71 {offsets = [0, 0], sizes = [8, 512], strides = [1, 1]} : vector<16x512xf32> to vector<8x512xf32>
    %73 = vector.extract_strided_slice %69 {offsets = [0, 0], sizes = [8, 512], strides = [1, 1]} : vector<16x512xf32> to vector<8x512xf32>
    %74 = arith.mulf %72, %73 : vector<8x512xf32>
    %75 = arith.addf %67, %74 : vector<8x512xf32>
    %76 = vector.extract_strided_slice %71 {offsets = [8, 0], sizes = [8, 512], strides = [1, 1]} : vector<16x512xf32> to vector<8x512xf32>
    %77 = vector.extract_strided_slice %69 {offsets = [8, 0], sizes = [8, 512], strides = [1, 1]} : vector<16x512xf32> to vector<8x512xf32>
    %78 = arith.mulf %76, %77 : vector<8x512xf32>
    %79 = arith.addf %75, %78 : vector<8x512xf32>
    %c636_i32 = arith.constant 636 : i32
    %80 = tpu.dynamic_rotate %32 by %c636_i32 dim 1 : vector<16x640xf32>, i32 -> vector<16x640xf32>
    %81 = vector.extract_strided_slice %80 {offsets = [0, 0], sizes = [16, 512], strides = [1, 1]} : vector<16x640xf32> to vector<16x512xf32>
    %c4 = arith.constant 4 : index
    %c0_27 = arith.constant 0 : index
    %c0_28 = arith.constant 0 : index
    %82 = vector.load %arg6[%c4, %c0_27, %c0_28] : memref<11x32x512xf32, #tpu.memory_space<vmem>>, vector<1x16x512xf32>
    %83 = vector.shape_cast %82 : vector<1x16x512xf32> to vector<16x512xf32>
    %84 = vector.extract_strided_slice %83 {offsets = [0, 0], sizes = [8, 512], strides = [1, 1]} : vector<16x512xf32> to vector<8x512xf32>
    %85 = vector.extract_strided_slice %81 {offsets = [0, 0], sizes = [8, 512], strides = [1, 1]} : vector<16x512xf32> to vector<8x512xf32>
    %86 = arith.mulf %84, %85 : vector<8x512xf32>
    %87 = arith.addf %79, %86 : vector<8x512xf32>
    %88 = vector.extract_strided_slice %83 {offsets = [8, 0], sizes = [8, 512], strides = [1, 1]} : vector<16x512xf32> to vector<8x512xf32>
    %89 = vector.extract_strided_slice %81 {offsets = [8, 0], sizes = [8, 512], strides = [1, 1]} : vector<16x512xf32> to vector<8x512xf32>
    %90 = arith.mulf %88, %89 : vector<8x512xf32>
    %91 = arith.addf %87, %90 : vector<8x512xf32>
    %c635_i32 = arith.constant 635 : i32
    %92 = tpu.dynamic_rotate %32 by %c635_i32 dim 1 : vector<16x640xf32>, i32 -> vector<16x640xf32>
    %93 = vector.extract_strided_slice %92 {offsets = [0, 0], sizes = [16, 512], strides = [1, 1]} : vector<16x640xf32> to vector<16x512xf32>
    %c5 = arith.constant 5 : index
    %c0_29 = arith.constant 0 : index
    %c0_30 = arith.constant 0 : index
    %94 = vector.load %arg6[%c5, %c0_29, %c0_30] : memref<11x32x512xf32, #tpu.memory_space<vmem>>, vector<1x16x512xf32>
    %95 = vector.shape_cast %94 : vector<1x16x512xf32> to vector<16x512xf32>
    %96 = vector.extract_strided_slice %95 {offsets = [0, 0], sizes = [8, 512], strides = [1, 1]} : vector<16x512xf32> to vector<8x512xf32>
    %97 = vector.extract_strided_slice %93 {offsets = [0, 0], sizes = [8, 512], strides = [1, 1]} : vector<16x512xf32> to vector<8x512xf32>
    %98 = arith.mulf %96, %97 : vector<8x512xf32>
    %99 = arith.addf %91, %98 : vector<8x512xf32>
    %100 = vector.extract_strided_slice %95 {offsets = [8, 0], sizes = [8, 512], strides = [1, 1]} : vector<16x512xf32> to vector<8x512xf32>
    %101 = vector.extract_strided_slice %93 {offsets = [8, 0], sizes = [8, 512], strides = [1, 1]} : vector<16x512xf32> to vector<8x512xf32>
    %102 = arith.mulf %100, %101 : vector<8x512xf32>
    %103 = arith.addf %99, %102 : vector<8x512xf32>
    %c634_i32 = arith.constant 634 : i32
    %104 = tpu.dynamic_rotate %32 by %c634_i32 dim 1 : vector<16x640xf32>, i32 -> vector<16x640xf32>
    %105 = vector.extract_strided_slice %104 {offsets = [0, 0], sizes = [16, 512], strides = [1, 1]} : vector<16x640xf32> to vector<16x512xf32>
    %c6 = arith.constant 6 : index
    %c0_31 = arith.constant 0 : index
    %c0_32 = arith.constant 0 : index
    %106 = vector.load %arg6[%c6, %c0_31, %c0_32] : memref<11x32x512xf32, #tpu.memory_space<vmem>>, vector<1x16x512xf32>
    %107 = vector.shape_cast %106 : vector<1x16x512xf32> to vector<16x512xf32>
    %108 = vector.extract_strided_slice %107 {offsets = [0, 0], sizes = [8, 512], strides = [1, 1]} : vector<16x512xf32> to vector<8x512xf32>
    %109 = vector.extract_strided_slice %105 {offsets = [0, 0], sizes = [8, 512], strides = [1, 1]} : vector<16x512xf32> to vector<8x512xf32>
    %110 = arith.mulf %108, %109 : vector<8x512xf32>
    %111 = arith.addf %103, %110 : vector<8x512xf32>
    %112 = vector.extract_strided_slice %107 {offsets = [8, 0], sizes = [8, 512], strides = [1, 1]} : vector<16x512xf32> to vector<8x512xf32>
    %113 = vector.extract_strided_slice %105 {offsets = [8, 0], sizes = [8, 512], strides = [1, 1]} : vector<16x512xf32> to vector<8x512xf32>
    %114 = arith.mulf %112, %113 : vector<8x512xf32>
    %115 = arith.addf %111, %114 : vector<8x512xf32>
    %c633_i32 = arith.constant 633 : i32
    %116 = tpu.dynamic_rotate %32 by %c633_i32 dim 1 : vector<16x640xf32>, i32 -> vector<16x640xf32>
    %117 = vector.extract_strided_slice %116 {offsets = [0, 0], sizes = [16, 512], strides = [1, 1]} : vector<16x640xf32> to vector<16x512xf32>
    %c7 = arith.constant 7 : index
    %c0_33 = arith.constant 0 : index
    %c0_34 = arith.constant 0 : index
    %118 = vector.load %arg6[%c7, %c0_33, %c0_34] : memref<11x32x512xf32, #tpu.memory_space<vmem>>, vector<1x16x512xf32>
    %119 = vector.shape_cast %118 : vector<1x16x512xf32> to vector<16x512xf32>
    %120 = vector.extract_strided_slice %119 {offsets = [0, 0], sizes = [8, 512], strides = [1, 1]} : vector<16x512xf32> to vector<8x512xf32>
    %121 = vector.extract_strided_slice %117 {offsets = [0, 0], sizes = [8, 512], strides = [1, 1]} : vector<16x512xf32> to vector<8x512xf32>
    %122 = arith.mulf %120, %121 : vector<8x512xf32>
    %123 = arith.addf %115, %122 : vector<8x512xf32>
    %124 = vector.extract_strided_slice %119 {offsets = [8, 0], sizes = [8, 512], strides = [1, 1]} : vector<16x512xf32> to vector<8x512xf32>
    %125 = vector.extract_strided_slice %117 {offsets = [8, 0], sizes = [8, 512], strides = [1, 1]} : vector<16x512xf32> to vector<8x512xf32>
    %126 = arith.mulf %124, %125 : vector<8x512xf32>
    %127 = arith.addf %123, %126 : vector<8x512xf32>
    %c632_i32 = arith.constant 632 : i32
    %128 = tpu.dynamic_rotate %32 by %c632_i32 dim 1 : vector<16x640xf32>, i32 -> vector<16x640xf32>
    %129 = vector.extract_strided_slice %128 {offsets = [0, 0], sizes = [16, 512], strides = [1, 1]} : vector<16x640xf32> to vector<16x512xf32>
    %c8 = arith.constant 8 : index
    %c0_35 = arith.constant 0 : index
    %c0_36 = arith.constant 0 : index
    %130 = vector.load %arg6[%c8, %c0_35, %c0_36] : memref<11x32x512xf32, #tpu.memory_space<vmem>>, vector<1x16x512xf32>
    %131 = vector.shape_cast %130 : vector<1x16x512xf32> to vector<16x512xf32>
    %132 = vector.extract_strided_slice %131 {offsets = [0, 0], sizes = [8, 512], strides = [1, 1]} : vector<16x512xf32> to vector<8x512xf32>
    %133 = vector.extract_strided_slice %129 {offsets = [0, 0], sizes = [8, 512], strides = [1, 1]} : vector<16x512xf32> to vector<8x512xf32>
    %134 = arith.mulf %132, %133 : vector<8x512xf32>
    %135 = arith.addf %127, %134 : vector<8x512xf32>
    %136 = vector.extract_strided_slice %131 {offsets = [8, 0], sizes = [8, 512], strides = [1, 1]} : vector<16x512xf32> to vector<8x512xf32>
    %137 = vector.extract_strided_slice %129 {offsets = [8, 0], sizes = [8, 512], strides = [1, 1]} : vector<16x512xf32> to vector<8x512xf32>
    %138 = arith.mulf %136, %137 : vector<8x512xf32>
    %139 = arith.addf %135, %138 : vector<8x512xf32>
    %c631_i32 = arith.constant 631 : i32
    %140 = tpu.dynamic_rotate %32 by %c631_i32 dim 1 : vector<16x640xf32>, i32 -> vector<16x640xf32>
    %141 = vector.extract_strided_slice %140 {offsets = [0, 0], sizes = [16, 512], strides = [1, 1]} : vector<16x640xf32> to vector<16x512xf32>
    %c9 = arith.constant 9 : index
    %c0_37 = arith.constant 0 : index
    %c0_38 = arith.constant 0 : index
    %142 = vector.load %arg6[%c9, %c0_37, %c0_38] : memref<11x32x512xf32, #tpu.memory_space<vmem>>, vector<1x16x512xf32>
    %143 = vector.shape_cast %142 : vector<1x16x512xf32> to vector<16x512xf32>
    %144 = vector.extract_strided_slice %143 {offsets = [0, 0], sizes = [8, 512], strides = [1, 1]} : vector<16x512xf32> to vector<8x512xf32>
    %145 = vector.extract_strided_slice %141 {offsets = [0, 0], sizes = [8, 512], strides = [1, 1]} : vector<16x512xf32> to vector<8x512xf32>
    %146 = arith.mulf %144, %145 : vector<8x512xf32>
    %147 = arith.addf %139, %146 : vector<8x512xf32>
    %148 = vector.extract_strided_slice %143 {offsets = [8, 0], sizes = [8, 512], strides = [1, 1]} : vector<16x512xf32> to vector<8x512xf32>
    %149 = vector.extract_strided_slice %141 {offsets = [8, 0], sizes = [8, 512], strides = [1, 1]} : vector<16x512xf32> to vector<8x512xf32>
    %150 = arith.mulf %148, %149 : vector<8x512xf32>
    %151 = arith.addf %147, %150 : vector<8x512xf32>
    %c630_i32 = arith.constant 630 : i32
    %152 = tpu.dynamic_rotate %32 by %c630_i32 dim 1 : vector<16x640xf32>, i32 -> vector<16x640xf32>
    %153 = vector.extract_strided_slice %152 {offsets = [0, 0], sizes = [16, 512], strides = [1, 1]} : vector<16x640xf32> to vector<16x512xf32>
    %c10 = arith.constant 10 : index
    %c0_39 = arith.constant 0 : index
    %c0_40 = arith.constant 0 : index
    %154 = vector.load %arg6[%c10, %c0_39, %c0_40] : memref<11x32x512xf32, #tpu.memory_space<vmem>>, vector<1x16x512xf32>
    %155 = vector.shape_cast %154 : vector<1x16x512xf32> to vector<16x512xf32>
    %156 = vector.extract_strided_slice %155 {offsets = [0, 0], sizes = [8, 512], strides = [1, 1]} : vector<16x512xf32> to vector<8x512xf32>
    %157 = vector.extract_strided_slice %153 {offsets = [0, 0], sizes = [8, 512], strides = [1, 1]} : vector<16x512xf32> to vector<8x512xf32>
    %158 = arith.mulf %156, %157 : vector<8x512xf32>
    %159 = arith.addf %151, %158 : vector<8x512xf32>
    %160 = vector.extract_strided_slice %155 {offsets = [8, 0], sizes = [8, 512], strides = [1, 1]} : vector<16x512xf32> to vector<8x512xf32>
    %161 = vector.extract_strided_slice %153 {offsets = [8, 0], sizes = [8, 512], strides = [1, 1]} : vector<16x512xf32> to vector<8x512xf32>
    %162 = arith.mulf %160, %161 : vector<8x512xf32>
    %163 = arith.addf %159, %162 : vector<8x512xf32>
    %c16 = arith.constant 16 : index
    %c0_41 = arith.constant 0 : index
    %164 = vector.load %arg4[%c16, %c0_41] : memref<32x640xf32, #tpu.memory_space<vmem>>, vector<16x640xf32>
    %165 = vector.broadcast %9 : vector<1x640xf32> to vector<16x640xf32>
    %166 = arith.mulf %164, %165 : vector<16x640xf32>
    %c16_42 = arith.constant 16 : index
    %c0_43 = arith.constant 0 : index
    %167 = vector.load %arg5[%c16_42, %c0_43] : memref<32x640xf32, #tpu.memory_space<vmem>>, vector<16x640xf32>
    %168 = vector.broadcast %21 : vector<1x640xf32> to vector<16x640xf32>
    %169 = arith.mulf %167, %168 : vector<16x640xf32>
    %170 = arith.addf %166, %169 : vector<16x640xf32>
    %cst_44 = arith.constant 1.000000e-01 : f32
    %171 = vector.broadcast %cst_44 : f32 to vector<16x640xf32>
    %172 = arith.mulf %171, %170 : vector<16x640xf32>
    %173 = arith.maximumf %170, %172 : vector<16x640xf32>
    %174 = vector.extract_strided_slice %173 {offsets = [0, 0], sizes = [16, 512], strides = [1, 1]} : vector<16x640xf32> to vector<16x512xf32>
    %c0_45 = arith.constant 0 : index
    %c16_46 = arith.constant 16 : index
    %c0_47 = arith.constant 0 : index
    %175 = vector.load %arg6[%c0_45, %c16_46, %c0_47] : memref<11x32x512xf32, #tpu.memory_space<vmem>>, vector<1x16x512xf32>
    %176 = vector.shape_cast %175 : vector<1x16x512xf32> to vector<16x512xf32>
    %177 = vector.extract_strided_slice %176 {offsets = [0, 0], sizes = [8, 512], strides = [1, 1]} : vector<16x512xf32> to vector<8x512xf32>
    %178 = vector.extract_strided_slice %174 {offsets = [0, 0], sizes = [8, 512], strides = [1, 1]} : vector<16x512xf32> to vector<8x512xf32>
    %179 = arith.mulf %177, %178 : vector<8x512xf32>
    %180 = arith.addf %163, %179 : vector<8x512xf32>
    %181 = vector.extract_strided_slice %176 {offsets = [8, 0], sizes = [8, 512], strides = [1, 1]} : vector<16x512xf32> to vector<8x512xf32>
    %182 = vector.extract_strided_slice %174 {offsets = [8, 0], sizes = [8, 512], strides = [1, 1]} : vector<16x512xf32> to vector<8x512xf32>
    %183 = arith.mulf %181, %182 : vector<8x512xf32>
    %184 = arith.addf %180, %183 : vector<8x512xf32>
    %c639_i32_48 = arith.constant 639 : i32
    %185 = tpu.dynamic_rotate %173 by %c639_i32_48 dim 1 : vector<16x640xf32>, i32 -> vector<16x640xf32>
    %186 = vector.extract_strided_slice %185 {offsets = [0, 0], sizes = [16, 512], strides = [1, 1]} : vector<16x640xf32> to vector<16x512xf32>
    %c1_49 = arith.constant 1 : index
    %c16_50 = arith.constant 16 : index
    %c0_51 = arith.constant 0 : index
    %187 = vector.load %arg6[%c1_49, %c16_50, %c0_51] : memref<11x32x512xf32, #tpu.memory_space<vmem>>, vector<1x16x512xf32>
    %188 = vector.shape_cast %187 : vector<1x16x512xf32> to vector<16x512xf32>
    %189 = vector.extract_strided_slice %188 {offsets = [0, 0], sizes = [8, 512], strides = [1, 1]} : vector<16x512xf32> to vector<8x512xf32>
    %190 = vector.extract_strided_slice %186 {offsets = [0, 0], sizes = [8, 512], strides = [1, 1]} : vector<16x512xf32> to vector<8x512xf32>
    %191 = arith.mulf %189, %190 : vector<8x512xf32>
    %192 = arith.addf %184, %191 : vector<8x512xf32>
    %193 = vector.extract_strided_slice %188 {offsets = [8, 0], sizes = [8, 512], strides = [1, 1]} : vector<16x512xf32> to vector<8x512xf32>
    %194 = vector.extract_strided_slice %186 {offsets = [8, 0], sizes = [8, 512], strides = [1, 1]} : vector<16x512xf32> to vector<8x512xf32>
    %195 = arith.mulf %193, %194 : vector<8x512xf32>
    %196 = arith.addf %192, %195 : vector<8x512xf32>
    %c638_i32_52 = arith.constant 638 : i32
    %197 = tpu.dynamic_rotate %173 by %c638_i32_52 dim 1 : vector<16x640xf32>, i32 -> vector<16x640xf32>
    %198 = vector.extract_strided_slice %197 {offsets = [0, 0], sizes = [16, 512], strides = [1, 1]} : vector<16x640xf32> to vector<16x512xf32>
    %c2_53 = arith.constant 2 : index
    %c16_54 = arith.constant 16 : index
    %c0_55 = arith.constant 0 : index
    %199 = vector.load %arg6[%c2_53, %c16_54, %c0_55] : memref<11x32x512xf32, #tpu.memory_space<vmem>>, vector<1x16x512xf32>
    %200 = vector.shape_cast %199 : vector<1x16x512xf32> to vector<16x512xf32>
    %201 = vector.extract_strided_slice %200 {offsets = [0, 0], sizes = [8, 512], strides = [1, 1]} : vector<16x512xf32> to vector<8x512xf32>
    %202 = vector.extract_strided_slice %198 {offsets = [0, 0], sizes = [8, 512], strides = [1, 1]} : vector<16x512xf32> to vector<8x512xf32>
    %203 = arith.mulf %201, %202 : vector<8x512xf32>
    %204 = arith.addf %196, %203 : vector<8x512xf32>
    %205 = vector.extract_strided_slice %200 {offsets = [8, 0], sizes = [8, 512], strides = [1, 1]} : vector<16x512xf32> to vector<8x512xf32>
    %206 = vector.extract_strided_slice %198 {offsets = [8, 0], sizes = [8, 512], strides = [1, 1]} : vector<16x512xf32> to vector<8x512xf32>
    %207 = arith.mulf %205, %206 : vector<8x512xf32>
    %208 = arith.addf %204, %207 : vector<8x512xf32>
    %c637_i32_56 = arith.constant 637 : i32
    %209 = tpu.dynamic_rotate %173 by %c637_i32_56 dim 1 : vector<16x640xf32>, i32 -> vector<16x640xf32>
    %210 = vector.extract_strided_slice %209 {offsets = [0, 0], sizes = [16, 512], strides = [1, 1]} : vector<16x640xf32> to vector<16x512xf32>
    %c3_57 = arith.constant 3 : index
    %c16_58 = arith.constant 16 : index
    %c0_59 = arith.constant 0 : index
    %211 = vector.load %arg6[%c3_57, %c16_58, %c0_59] : memref<11x32x512xf32, #tpu.memory_space<vmem>>, vector<1x16x512xf32>
    %212 = vector.shape_cast %211 : vector<1x16x512xf32> to vector<16x512xf32>
    %213 = vector.extract_strided_slice %212 {offsets = [0, 0], sizes = [8, 512], strides = [1, 1]} : vector<16x512xf32> to vector<8x512xf32>
    %214 = vector.extract_strided_slice %210 {offsets = [0, 0], sizes = [8, 512], strides = [1, 1]} : vector<16x512xf32> to vector<8x512xf32>
    %215 = arith.mulf %213, %214 : vector<8x512xf32>
    %216 = arith.addf %208, %215 : vector<8x512xf32>
    %217 = vector.extract_strided_slice %212 {offsets = [8, 0], sizes = [8, 512], strides = [1, 1]} : vector<16x512xf32> to vector<8x512xf32>
    %218 = vector.extract_strided_slice %210 {offsets = [8, 0], sizes = [8, 512], strides = [1, 1]} : vector<16x512xf32> to vector<8x512xf32>
    %219 = arith.mulf %217, %218 : vector<8x512xf32>
    %220 = arith.addf %216, %219 : vector<8x512xf32>
    %c636_i32_60 = arith.constant 636 : i32
    %221 = tpu.dynamic_rotate %173 by %c636_i32_60 dim 1 : vector<16x640xf32>, i32 -> vector<16x640xf32>
    %222 = vector.extract_strided_slice %221 {offsets = [0, 0], sizes = [16, 512], strides = [1, 1]} : vector<16x640xf32> to vector<16x512xf32>
    %c4_61 = arith.constant 4 : index
    %c16_62 = arith.constant 16 : index
    %c0_63 = arith.constant 0 : index
    %223 = vector.load %arg6[%c4_61, %c16_62, %c0_63] : memref<11x32x512xf32, #tpu.memory_space<vmem>>, vector<1x16x512xf32>
    %224 = vector.shape_cast %223 : vector<1x16x512xf32> to vector<16x512xf32>
    %225 = vector.extract_strided_slice %224 {offsets = [0, 0], sizes = [8, 512], strides = [1, 1]} : vector<16x512xf32> to vector<8x512xf32>
    %226 = vector.extract_strided_slice %222 {offsets = [0, 0], sizes = [8, 512], strides = [1, 1]} : vector<16x512xf32> to vector<8x512xf32>
    %227 = arith.mulf %225, %226 : vector<8x512xf32>
    %228 = arith.addf %220, %227 : vector<8x512xf32>
    %229 = vector.extract_strided_slice %224 {offsets = [8, 0], sizes = [8, 512], strides = [1, 1]} : vector<16x512xf32> to vector<8x512xf32>
    %230 = vector.extract_strided_slice %222 {offsets = [8, 0], sizes = [8, 512], strides = [1, 1]} : vector<16x512xf32> to vector<8x512xf32>
    %231 = arith.mulf %229, %230 : vector<8x512xf32>
    %232 = arith.addf %228, %231 : vector<8x512xf32>
    %c635_i32_64 = arith.constant 635 : i32
    %233 = tpu.dynamic_rotate %173 by %c635_i32_64 dim 1 : vector<16x640xf32>, i32 -> vector<16x640xf32>
    %234 = vector.extract_strided_slice %233 {offsets = [0, 0], sizes = [16, 512], strides = [1, 1]} : vector<16x640xf32> to vector<16x512xf32>
    %c5_65 = arith.constant 5 : index
    %c16_66 = arith.constant 16 : index
    %c0_67 = arith.constant 0 : index
    %235 = vector.load %arg6[%c5_65, %c16_66, %c0_67] : memref<11x32x512xf32, #tpu.memory_space<vmem>>, vector<1x16x512xf32>
    %236 = vector.shape_cast %235 : vector<1x16x512xf32> to vector<16x512xf32>
    %237 = vector.extract_strided_slice %236 {offsets = [0, 0], sizes = [8, 512], strides = [1, 1]} : vector<16x512xf32> to vector<8x512xf32>
    %238 = vector.extract_strided_slice %234 {offsets = [0, 0], sizes = [8, 512], strides = [1, 1]} : vector<16x512xf32> to vector<8x512xf32>
    %239 = arith.mulf %237, %238 : vector<8x512xf32>
    %240 = arith.addf %232, %239 : vector<8x512xf32>
    %241 = vector.extract_strided_slice %236 {offsets = [8, 0], sizes = [8, 512], strides = [1, 1]} : vector<16x512xf32> to vector<8x512xf32>
    %242 = vector.extract_strided_slice %234 {offsets = [8, 0], sizes = [8, 512], strides = [1, 1]} : vector<16x512xf32> to vector<8x512xf32>
    %243 = arith.mulf %241, %242 : vector<8x512xf32>
    %244 = arith.addf %240, %243 : vector<8x512xf32>
    %c634_i32_68 = arith.constant 634 : i32
    %245 = tpu.dynamic_rotate %173 by %c634_i32_68 dim 1 : vector<16x640xf32>, i32 -> vector<16x640xf32>
    %246 = vector.extract_strided_slice %245 {offsets = [0, 0], sizes = [16, 512], strides = [1, 1]} : vector<16x640xf32> to vector<16x512xf32>
    %c6_69 = arith.constant 6 : index
    %c16_70 = arith.constant 16 : index
    %c0_71 = arith.constant 0 : index
    %247 = vector.load %arg6[%c6_69, %c16_70, %c0_71] : memref<11x32x512xf32, #tpu.memory_space<vmem>>, vector<1x16x512xf32>
    %248 = vector.shape_cast %247 : vector<1x16x512xf32> to vector<16x512xf32>
    %249 = vector.extract_strided_slice %248 {offsets = [0, 0], sizes = [8, 512], strides = [1, 1]} : vector<16x512xf32> to vector<8x512xf32>
    %250 = vector.extract_strided_slice %246 {offsets = [0, 0], sizes = [8, 512], strides = [1, 1]} : vector<16x512xf32> to vector<8x512xf32>
    %251 = arith.mulf %249, %250 : vector<8x512xf32>
    %252 = arith.addf %244, %251 : vector<8x512xf32>
    %253 = vector.extract_strided_slice %248 {offsets = [8, 0], sizes = [8, 512], strides = [1, 1]} : vector<16x512xf32> to vector<8x512xf32>
    %254 = vector.extract_strided_slice %246 {offsets = [8, 0], sizes = [8, 512], strides = [1, 1]} : vector<16x512xf32> to vector<8x512xf32>
    %255 = arith.mulf %253, %254 : vector<8x512xf32>
    %256 = arith.addf %252, %255 : vector<8x512xf32>
    %c633_i32_72 = arith.constant 633 : i32
    %257 = tpu.dynamic_rotate %173 by %c633_i32_72 dim 1 : vector<16x640xf32>, i32 -> vector<16x640xf32>
    %258 = vector.extract_strided_slice %257 {offsets = [0, 0], sizes = [16, 512], strides = [1, 1]} : vector<16x640xf32> to vector<16x512xf32>
    %c7_73 = arith.constant 7 : index
    %c16_74 = arith.constant 16 : index
    %c0_75 = arith.constant 0 : index
    %259 = vector.load %arg6[%c7_73, %c16_74, %c0_75] : memref<11x32x512xf32, #tpu.memory_space<vmem>>, vector<1x16x512xf32>
    %260 = vector.shape_cast %259 : vector<1x16x512xf32> to vector<16x512xf32>
    %261 = vector.extract_strided_slice %260 {offsets = [0, 0], sizes = [8, 512], strides = [1, 1]} : vector<16x512xf32> to vector<8x512xf32>
    %262 = vector.extract_strided_slice %258 {offsets = [0, 0], sizes = [8, 512], strides = [1, 1]} : vector<16x512xf32> to vector<8x512xf32>
    %263 = arith.mulf %261, %262 : vector<8x512xf32>
    %264 = arith.addf %256, %263 : vector<8x512xf32>
    %265 = vector.extract_strided_slice %260 {offsets = [8, 0], sizes = [8, 512], strides = [1, 1]} : vector<16x512xf32> to vector<8x512xf32>
    %266 = vector.extract_strided_slice %258 {offsets = [8, 0], sizes = [8, 512], strides = [1, 1]} : vector<16x512xf32> to vector<8x512xf32>
    %267 = arith.mulf %265, %266 : vector<8x512xf32>
    %268 = arith.addf %264, %267 : vector<8x512xf32>
    %c632_i32_76 = arith.constant 632 : i32
    %269 = tpu.dynamic_rotate %173 by %c632_i32_76 dim 1 : vector<16x640xf32>, i32 -> vector<16x640xf32>
    %270 = vector.extract_strided_slice %269 {offsets = [0, 0], sizes = [16, 512], strides = [1, 1]} : vector<16x640xf32> to vector<16x512xf32>
    %c8_77 = arith.constant 8 : index
    %c16_78 = arith.constant 16 : index
    %c0_79 = arith.constant 0 : index
    %271 = vector.load %arg6[%c8_77, %c16_78, %c0_79] : memref<11x32x512xf32, #tpu.memory_space<vmem>>, vector<1x16x512xf32>
    %272 = vector.shape_cast %271 : vector<1x16x512xf32> to vector<16x512xf32>
    %273 = vector.extract_strided_slice %272 {offsets = [0, 0], sizes = [8, 512], strides = [1, 1]} : vector<16x512xf32> to vector<8x512xf32>
    %274 = vector.extract_strided_slice %270 {offsets = [0, 0], sizes = [8, 512], strides = [1, 1]} : vector<16x512xf32> to vector<8x512xf32>
    %275 = arith.mulf %273, %274 : vector<8x512xf32>
    %276 = arith.addf %268, %275 : vector<8x512xf32>
    %277 = vector.extract_strided_slice %272 {offsets = [8, 0], sizes = [8, 512], strides = [1, 1]} : vector<16x512xf32> to vector<8x512xf32>
    %278 = vector.extract_strided_slice %270 {offsets = [8, 0], sizes = [8, 512], strides = [1, 1]} : vector<16x512xf32> to vector<8x512xf32>
    %279 = arith.mulf %277, %278 : vector<8x512xf32>
    %280 = arith.addf %276, %279 : vector<8x512xf32>
    %c631_i32_80 = arith.constant 631 : i32
    %281 = tpu.dynamic_rotate %173 by %c631_i32_80 dim 1 : vector<16x640xf32>, i32 -> vector<16x640xf32>
    %282 = vector.extract_strided_slice %281 {offsets = [0, 0], sizes = [16, 512], strides = [1, 1]} : vector<16x640xf32> to vector<16x512xf32>
    %c9_81 = arith.constant 9 : index
    %c16_82 = arith.constant 16 : index
    %c0_83 = arith.constant 0 : index
    %283 = vector.load %arg6[%c9_81, %c16_82, %c0_83] : memref<11x32x512xf32, #tpu.memory_space<vmem>>, vector<1x16x512xf32>
    %284 = vector.shape_cast %283 : vector<1x16x512xf32> to vector<16x512xf32>
    %285 = vector.extract_strided_slice %284 {offsets = [0, 0], sizes = [8, 512], strides = [1, 1]} : vector<16x512xf32> to vector<8x512xf32>
    %286 = vector.extract_strided_slice %282 {offsets = [0, 0], sizes = [8, 512], strides = [1, 1]} : vector<16x512xf32> to vector<8x512xf32>
    %287 = arith.mulf %285, %286 : vector<8x512xf32>
    %288 = arith.addf %280, %287 : vector<8x512xf32>
    %289 = vector.extract_strided_slice %284 {offsets = [8, 0], sizes = [8, 512], strides = [1, 1]} : vector<16x512xf32> to vector<8x512xf32>
    %290 = vector.extract_strided_slice %282 {offsets = [8, 0], sizes = [8, 512], strides = [1, 1]} : vector<16x512xf32> to vector<8x512xf32>
    %291 = arith.mulf %289, %290 : vector<8x512xf32>
    %292 = arith.addf %288, %291 : vector<8x512xf32>
    %c630_i32_84 = arith.constant 630 : i32
    %293 = tpu.dynamic_rotate %173 by %c630_i32_84 dim 1 : vector<16x640xf32>, i32 -> vector<16x640xf32>
    %294 = vector.extract_strided_slice %293 {offsets = [0, 0], sizes = [16, 512], strides = [1, 1]} : vector<16x640xf32> to vector<16x512xf32>
    %c10_85 = arith.constant 10 : index
    %c16_86 = arith.constant 16 : index
    %c0_87 = arith.constant 0 : index
    %295 = vector.load %arg6[%c10_85, %c16_86, %c0_87] : memref<11x32x512xf32, #tpu.memory_space<vmem>>, vector<1x16x512xf32>
    %296 = vector.shape_cast %295 : vector<1x16x512xf32> to vector<16x512xf32>
    %297 = vector.extract_strided_slice %296 {offsets = [0, 0], sizes = [8, 512], strides = [1, 1]} : vector<16x512xf32> to vector<8x512xf32>
    %298 = vector.extract_strided_slice %294 {offsets = [0, 0], sizes = [8, 512], strides = [1, 1]} : vector<16x512xf32> to vector<8x512xf32>
    %299 = arith.mulf %297, %298 : vector<8x512xf32>
    %300 = arith.addf %292, %299 : vector<8x512xf32>
    %301 = vector.extract_strided_slice %296 {offsets = [8, 0], sizes = [8, 512], strides = [1, 1]} : vector<16x512xf32> to vector<8x512xf32>
    %302 = vector.extract_strided_slice %294 {offsets = [8, 0], sizes = [8, 512], strides = [1, 1]} : vector<16x512xf32> to vector<8x512xf32>
    %303 = arith.mulf %301, %302 : vector<8x512xf32>
    %304 = arith.addf %300, %303 : vector<8x512xf32>
    %cst_88 = arith.constant dense<0.000000e+00> : vector<512xf32>
    %305 = vector.multi_reduction <add>, %304, %cst_88 [0] : vector<8x512xf32> to vector<512xf32>
    %306 = vector.shape_cast %305 : vector<512xf32> to vector<1x512xf32>
    %307 = vector.broadcast %7 : f32 to vector<1x512xf32>
    %308 = arith.addf %306, %307 : vector<1x512xf32>
    %309 = math.tanh %308 : vector<1x512xf32>
    %c0_89 = arith.constant 0 : index
    %c0_90 = arith.constant 0 : index
    %c0_91 = arith.constant 0 : index
    %310 = vector.load %arg8[%c0_89, %c0_90, %c0_91] : memref<1x1x1024xf32, #tpu.memory_space<vmem>>, vector<1x1x512xf32>
    %311 = vector.shape_cast %310 : vector<1x1x512xf32> to vector<1x512xf32>
    %312 = vector.shape_cast %309 : vector<1x512xf32> to vector<1x1x512xf32>
    tpu.vector_store %arg8[%c0_89, %c0_90, %c0_91], %312 {strides = array<i32>} : memref<1x1x1024xf32, #tpu.memory_space<vmem>>, vector<1x1x512xf32>,
    %c0_92 = arith.constant 0 : index
    %c512 = arith.constant 512 : index
    %313 = vector.load %arg9[%c0_92, %c512] : memref<1x1152xf32, #tpu.memory_space<vmem>>, vector<1x640xf32>
    %c1024_i32_93 = arith.constant 1024 : i32
    %314 = arith.muli %arg1, %c1024_i32_93 : i32
    %c512_i32 = arith.constant 512 : i32
    %315 = arith.addi %314, %c512_i32 : i32
    %c5_i32_94 = arith.constant 5 : i32
    %316 = arith.subi %315, %c5_i32_94 : i32
    %317 = vector.broadcast %316 : i32 to vector<1x640xi32>
    %318 = arith.addi %8, %317 : vector<1x640xi32>
    %c0_i32_95 = arith.constant 0 : i32
    %319 = vector.broadcast %c0_i32_95 : i32 to vector<1x640xi32>
    %320 = arith.cmpi sge, %318, %319 : vector<1x640xi32>
    %c1600_i32_96 = arith.constant 1600 : i32
    %321 = vector.broadcast %c1600_i32_96 : i32 to vector<1x640xi32>
    %322 = arith.cmpi slt, %318, %321 : vector<1x640xi32>
    %323 = arith.andi %320, %322 : vector<1x640xi1>
    %324 = arith.extui %323 : vector<1x640xi1> to vector<1x640xi32>
    %325 = arith.sitofp %324 : vector<1x640xi32> to vector<1x640xf32>
    %cst_97 = arith.constant 0.000000e+00 : f32
    %326 = vector.broadcast %cst_97 : f32 to vector<8x512xf32>
    %c0_98 = arith.constant 0 : index
    %c0_99 = arith.constant 0 : index
    %327 = vector.load %arg4[%c0_98, %c0_99] : memref<32x640xf32, #tpu.memory_space<vmem>>, vector<16x640xf32>
    %328 = vector.broadcast %313 : vector<1x640xf32> to vector<16x640xf32>
    %329 = arith.mulf %327, %328 : vector<16x640xf32>
    %c0_100 = arith.constant 0 : index
    %c0_101 = arith.constant 0 : index
    %330 = vector.load %arg5[%c0_100, %c0_101] : memref<32x640xf32, #tpu.memory_space<vmem>>, vector<16x640xf32>
    %331 = vector.broadcast %325 : vector<1x640xf32> to vector<16x640xf32>
    %332 = arith.mulf %330, %331 : vector<16x640xf32>
    %333 = arith.addf %329, %332 : vector<16x640xf32>
    %cst_102 = arith.constant 1.000000e-01 : f32
    %334 = vector.broadcast %cst_102 : f32 to vector<16x640xf32>
    %335 = arith.mulf %334, %333 : vector<16x640xf32>
    %336 = arith.maximumf %333, %335 : vector<16x640xf32>
    %337 = vector.extract_strided_slice %336 {offsets = [0, 0], sizes = [16, 512], strides = [1, 1]} : vector<16x640xf32> to vector<16x512xf32>
    %c0_103 = arith.constant 0 : index
    %c0_104 = arith.constant 0 : index
    %c0_105 = arith.constant 0 : index
    %338 = vector.load %arg6[%c0_103, %c0_104, %c0_105] : memref<11x32x512xf32, #tpu.memory_space<vmem>>, vector<1x16x512xf32>
    %339 = vector.shape_cast %338 : vector<1x16x512xf32> to vector<16x512xf32>
    %340 = vector.extract_strided_slice %339 {offsets = [0, 0], sizes = [8, 512], strides = [1, 1]} : vector<16x512xf32> to vector<8x512xf32>
    %341 = vector.extract_strided_slice %337 {offsets = [0, 0], sizes = [8, 512], strides = [1, 1]} : vector<16x512xf32> to vector<8x512xf32>
    %342 = arith.mulf %340, %341 : vector<8x512xf32>
    %343 = arith.addf %326, %342 : vector<8x512xf32>
    %344 = vector.extract_strided_slice %339 {offsets = [8, 0], sizes = [8, 512], strides = [1, 1]} : vector<16x512xf32> to vector<8x512xf32>
    %345 = vector.extract_strided_slice %337 {offsets = [8, 0], sizes = [8, 512], strides = [1, 1]} : vector<16x512xf32> to vector<8x512xf32>
    %346 = arith.mulf %344, %345 : vector<8x512xf32>
    %347 = arith.addf %343, %346 : vector<8x512xf32>
    %c639_i32_106 = arith.constant 639 : i32
    %348 = tpu.dynamic_rotate %336 by %c639_i32_106 dim 1 : vector<16x640xf32>, i32 -> vector<16x640xf32>
    %349 = vector.extract_strided_slice %348 {offsets = [0, 0], sizes = [16, 512], strides = [1, 1]} : vector<16x640xf32> to vector<16x512xf32>
    %c1_107 = arith.constant 1 : index
    %c0_108 = arith.constant 0 : index
    %c0_109 = arith.constant 0 : index
    %350 = vector.load %arg6[%c1_107, %c0_108, %c0_109] : memref<11x32x512xf32, #tpu.memory_space<vmem>>, vector<1x16x512xf32>
    %351 = vector.shape_cast %350 : vector<1x16x512xf32> to vector<16x512xf32>
    %352 = vector.extract_strided_slice %351 {offsets = [0, 0], sizes = [8, 512], strides = [1, 1]} : vector<16x512xf32> to vector<8x512xf32>
    %353 = vector.extract_strided_slice %349 {offsets = [0, 0], sizes = [8, 512], strides = [1, 1]} : vector<16x512xf32> to vector<8x512xf32>
    %354 = arith.mulf %352, %353 : vector<8x512xf32>
    %355 = arith.addf %347, %354 : vector<8x512xf32>
    %356 = vector.extract_strided_slice %351 {offsets = [8, 0], sizes = [8, 512], strides = [1, 1]} : vector<16x512xf32> to vector<8x512xf32>
    %357 = vector.extract_strided_slice %349 {offsets = [8, 0], sizes = [8, 512], strides = [1, 1]} : vector<16x512xf32> to vector<8x512xf32>
    %358 = arith.mulf %356, %357 : vector<8x512xf32>
    %359 = arith.addf %355, %358 : vector<8x512xf32>
    %c638_i32_110 = arith.constant 638 : i32
    %360 = tpu.dynamic_rotate %336 by %c638_i32_110 dim 1 : vector<16x640xf32>, i32 -> vector<16x640xf32>
    %361 = vector.extract_strided_slice %360 {offsets = [0, 0], sizes = [16, 512], strides = [1, 1]} : vector<16x640xf32> to vector<16x512xf32>
    %c2_111 = arith.constant 2 : index
    %c0_112 = arith.constant 0 : index
    %c0_113 = arith.constant 0 : index
    %362 = vector.load %arg6[%c2_111, %c0_112, %c0_113] : memref<11x32x512xf32, #tpu.memory_space<vmem>>, vector<1x16x512xf32>
    %363 = vector.shape_cast %362 : vector<1x16x512xf32> to vector<16x512xf32>
    %364 = vector.extract_strided_slice %363 {offsets = [0, 0], sizes = [8, 512], strides = [1, 1]} : vector<16x512xf32> to vector<8x512xf32>
    %365 = vector.extract_strided_slice %361 {offsets = [0, 0], sizes = [8, 512], strides = [1, 1]} : vector<16x512xf32> to vector<8x512xf32>
    %366 = arith.mulf %364, %365 : vector<8x512xf32>
    %367 = arith.addf %359, %366 : vector<8x512xf32>
    %368 = vector.extract_strided_slice %363 {offsets = [8, 0], sizes = [8, 512], strides = [1, 1]} : vector<16x512xf32> to vector<8x512xf32>
    %369 = vector.extract_strided_slice %361 {offsets = [8, 0], sizes = [8, 512], strides = [1, 1]} : vector<16x512xf32> to vector<8x512xf32>
    %370 = arith.mulf %368, %369 : vector<8x512xf32>
    %371 = arith.addf %367, %370 : vector<8x512xf32>
    %c637_i32_114 = arith.constant 637 : i32
    %372 = tpu.dynamic_rotate %336 by %c637_i32_114 dim 1 : vector<16x640xf32>, i32 -> vector<16x640xf32>
    %373 = vector.extract_strided_slice %372 {offsets = [0, 0], sizes = [16, 512], strides = [1, 1]} : vector<16x640xf32> to vector<16x512xf32>
    %c3_115 = arith.constant 3 : index
    %c0_116 = arith.constant 0 : index
    %c0_117 = arith.constant 0 : index
    %374 = vector.load %arg6[%c3_115, %c0_116, %c0_117] : memref<11x32x512xf32, #tpu.memory_space<vmem>>, vector<1x16x512xf32>
    %375 = vector.shape_cast %374 : vector<1x16x512xf32> to vector<16x512xf32>
    %376 = vector.extract_strided_slice %375 {offsets = [0, 0], sizes = [8, 512], strides = [1, 1]} : vector<16x512xf32> to vector<8x512xf32>
    %377 = vector.extract_strided_slice %373 {offsets = [0, 0], sizes = [8, 512], strides = [1, 1]} : vector<16x512xf32> to vector<8x512xf32>
    %378 = arith.mulf %376, %377 : vector<8x512xf32>
    %379 = arith.addf %371, %378 : vector<8x512xf32>
    %380 = vector.extract_strided_slice %375 {offsets = [8, 0], sizes = [8, 512], strides = [1, 1]} : vector<16x512xf32> to vector<8x512xf32>
    %381 = vector.extract_strided_slice %373 {offsets = [8, 0], sizes = [8, 512], strides = [1, 1]} : vector<16x512xf32> to vector<8x512xf32>
    %382 = arith.mulf %380, %381 : vector<8x512xf32>
    %383 = arith.addf %379, %382 : vector<8x512xf32>
    %c636_i32_118 = arith.constant 636 : i32
    %384 = tpu.dynamic_rotate %336 by %c636_i32_118 dim 1 : vector<16x640xf32>, i32 -> vector<16x640xf32>
    %385 = vector.extract_strided_slice %384 {offsets = [0, 0], sizes = [16, 512], strides = [1, 1]} : vector<16x640xf32> to vector<16x512xf32>
    %c4_119 = arith.constant 4 : index
    %c0_120 = arith.constant 0 : index
    %c0_121 = arith.constant 0 : index
    %386 = vector.load %arg6[%c4_119, %c0_120, %c0_121] : memref<11x32x512xf32, #tpu.memory_space<vmem>>, vector<1x16x512xf32>
    %387 = vector.shape_cast %386 : vector<1x16x512xf32> to vector<16x512xf32>
    %388 = vector.extract_strided_slice %387 {offsets = [0, 0], sizes = [8, 512], strides = [1, 1]} : vector<16x512xf32> to vector<8x512xf32>
    %389 = vector.extract_strided_slice %385 {offsets = [0, 0], sizes = [8, 512], strides = [1, 1]} : vector<16x512xf32> to vector<8x512xf32>
    %390 = arith.mulf %388, %389 : vector<8x512xf32>
    %391 = arith.addf %383, %390 : vector<8x512xf32>
    %392 = vector.extract_strided_slice %387 {offsets = [8, 0], sizes = [8, 512], strides = [1, 1]} : vector<16x512xf32> to vector<8x512xf32>
    %393 = vector.extract_strided_slice %385 {offsets = [8, 0], sizes = [8, 512], strides = [1, 1]} : vector<16x512xf32> to vector<8x512xf32>
    %394 = arith.mulf %392, %393 : vector<8x512xf32>
    %395 = arith.addf %391, %394 : vector<8x512xf32>
    %c635_i32_122 = arith.constant 635 : i32
    %396 = tpu.dynamic_rotate %336 by %c635_i32_122 dim 1 : vector<16x640xf32>, i32 -> vector<16x640xf32>
    %397 = vector.extract_strided_slice %396 {offsets = [0, 0], sizes = [16, 512], strides = [1, 1]} : vector<16x640xf32> to vector<16x512xf32>
    %c5_123 = arith.constant 5 : index
    %c0_124 = arith.constant 0 : index
    %c0_125 = arith.constant 0 : index
    %398 = vector.load %arg6[%c5_123, %c0_124, %c0_125] : memref<11x32x512xf32, #tpu.memory_space<vmem>>, vector<1x16x512xf32>
    %399 = vector.shape_cast %398 : vector<1x16x512xf32> to vector<16x512xf32>
    %400 = vector.extract_strided_slice %399 {offsets = [0, 0], sizes = [8, 512], strides = [1, 1]} : vector<16x512xf32> to vector<8x512xf32>
    %401 = vector.extract_strided_slice %397 {offsets = [0, 0], sizes = [8, 512], strides = [1, 1]} : vector<16x512xf32> to vector<8x512xf32>
    %402 = arith.mulf %400, %401 : vector<8x512xf32>
    %403 = arith.addf %395, %402 : vector<8x512xf32>
    %404 = vector.extract_strided_slice %399 {offsets = [8, 0], sizes = [8, 512], strides = [1, 1]} : vector<16x512xf32> to vector<8x512xf32>
    %405 = vector.extract_strided_slice %397 {offsets = [8, 0], sizes = [8, 512], strides = [1, 1]} : vector<16x512xf32> to vector<8x512xf32>
    %406 = arith.mulf %404, %405 : vector<8x512xf32>
    %407 = arith.addf %403, %406 : vector<8x512xf32>
    %c634_i32_126 = arith.constant 634 : i32
    %408 = tpu.dynamic_rotate %336 by %c634_i32_126 dim 1 : vector<16x640xf32>, i32 -> vector<16x640xf32>
    %409 = vector.extract_strided_slice %408 {offsets = [0, 0], sizes = [16, 512], strides = [1, 1]} : vector<16x640xf32> to vector<16x512xf32>
    %c6_127 = arith.constant 6 : index
    %c0_128 = arith.constant 0 : index
    %c0_129 = arith.constant 0 : index
    %410 = vector.load %arg6[%c6_127, %c0_128, %c0_129] : memref<11x32x512xf32, #tpu.memory_space<vmem>>, vector<1x16x512xf32>
    %411 = vector.shape_cast %410 : vector<1x16x512xf32> to vector<16x512xf32>
    %412 = vector.extract_strided_slice %411 {offsets = [0, 0], sizes = [8, 512], strides = [1, 1]} : vector<16x512xf32> to vector<8x512xf32>
    %413 = vector.extract_strided_slice %409 {offsets = [0, 0], sizes = [8, 512], strides = [1, 1]} : vector<16x512xf32> to vector<8x512xf32>
    %414 = arith.mulf %412, %413 : vector<8x512xf32>
    %415 = arith.addf %407, %414 : vector<8x512xf32>
    %416 = vector.extract_strided_slice %411 {offsets = [8, 0], sizes = [8, 512], strides = [1, 1]} : vector<16x512xf32> to vector<8x512xf32>
    %417 = vector.extract_strided_slice %409 {offsets = [8, 0], sizes = [8, 512], strides = [1, 1]} : vector<16x512xf32> to vector<8x512xf32>
    %418 = arith.mulf %416, %417 : vector<8x512xf32>
    %419 = arith.addf %415, %418 : vector<8x512xf32>
    %c633_i32_130 = arith.constant 633 : i32
    %420 = tpu.dynamic_rotate %336 by %c633_i32_130 dim 1 : vector<16x640xf32>, i32 -> vector<16x640xf32>
    %421 = vector.extract_strided_slice %420 {offsets = [0, 0], sizes = [16, 512], strides = [1, 1]} : vector<16x640xf32> to vector<16x512xf32>
    %c7_131 = arith.constant 7 : index
    %c0_132 = arith.constant 0 : index
    %c0_133 = arith.constant 0 : index
    %422 = vector.load %arg6[%c7_131, %c0_132, %c0_133] : memref<11x32x512xf32, #tpu.memory_space<vmem>>, vector<1x16x512xf32>
    %423 = vector.shape_cast %422 : vector<1x16x512xf32> to vector<16x512xf32>
    %424 = vector.extract_strided_slice %423 {offsets = [0, 0], sizes = [8, 512], strides = [1, 1]} : vector<16x512xf32> to vector<8x512xf32>
    %425 = vector.extract_strided_slice %421 {offsets = [0, 0], sizes = [8, 512], strides = [1, 1]} : vector<16x512xf32> to vector<8x512xf32>
    %426 = arith.mulf %424, %425 : vector<8x512xf32>
    %427 = arith.addf %419, %426 : vector<8x512xf32>
    %428 = vector.extract_strided_slice %423 {offsets = [8, 0], sizes = [8, 512], strides = [1, 1]} : vector<16x512xf32> to vector<8x512xf32>
    %429 = vector.extract_strided_slice %421 {offsets = [8, 0], sizes = [8, 512], strides = [1, 1]} : vector<16x512xf32> to vector<8x512xf32>
    %430 = arith.mulf %428, %429 : vector<8x512xf32>
    %431 = arith.addf %427, %430 : vector<8x512xf32>
    %c632_i32_134 = arith.constant 632 : i32
    %432 = tpu.dynamic_rotate %336 by %c632_i32_134 dim 1 : vector<16x640xf32>, i32 -> vector<16x640xf32>
    %433 = vector.extract_strided_slice %432 {offsets = [0, 0], sizes = [16, 512], strides = [1, 1]} : vector<16x640xf32> to vector<16x512xf32>
    %c8_135 = arith.constant 8 : index
    %c0_136 = arith.constant 0 : index
    %c0_137 = arith.constant 0 : index
    %434 = vector.load %arg6[%c8_135, %c0_136, %c0_137] : memref<11x32x512xf32, #tpu.memory_space<vmem>>, vector<1x16x512xf32>
    %435 = vector.shape_cast %434 : vector<1x16x512xf32> to vector<16x512xf32>
    %436 = vector.extract_strided_slice %435 {offsets = [0, 0], sizes = [8, 512], strides = [1, 1]} : vector<16x512xf32> to vector<8x512xf32>
    %437 = vector.extract_strided_slice %433 {offsets = [0, 0], sizes = [8, 512], strides = [1, 1]} : vector<16x512xf32> to vector<8x512xf32>
    %438 = arith.mulf %436, %437 : vector<8x512xf32>
    %439 = arith.addf %431, %438 : vector<8x512xf32>
    %440 = vector.extract_strided_slice %435 {offsets = [8, 0], sizes = [8, 512], strides = [1, 1]} : vector<16x512xf32> to vector<8x512xf32>
    %441 = vector.extract_strided_slice %433 {offsets = [8, 0], sizes = [8, 512], strides = [1, 1]} : vector<16x512xf32> to vector<8x512xf32>
    %442 = arith.mulf %440, %441 : vector<8x512xf32>
    %443 = arith.addf %439, %442 : vector<8x512xf32>
    %c631_i32_138 = arith.constant 631 : i32
    %444 = tpu.dynamic_rotate %336 by %c631_i32_138 dim 1 : vector<16x640xf32>, i32 -> vector<16x640xf32>
    %445 = vector.extract_strided_slice %444 {offsets = [0, 0], sizes = [16, 512], strides = [1, 1]} : vector<16x640xf32> to vector<16x512xf32>
    %c9_139 = arith.constant 9 : index
    %c0_140 = arith.constant 0 : index
    %c0_141 = arith.constant 0 : index
    %446 = vector.load %arg6[%c9_139, %c0_140, %c0_141] : memref<11x32x512xf32, #tpu.memory_space<vmem>>, vector<1x16x512xf32>
    %447 = vector.shape_cast %446 : vector<1x16x512xf32> to vector<16x512xf32>
    %448 = vector.extract_strided_slice %447 {offsets = [0, 0], sizes = [8, 512], strides = [1, 1]} : vector<16x512xf32> to vector<8x512xf32>
    %449 = vector.extract_strided_slice %445 {offsets = [0, 0], sizes = [8, 512], strides = [1, 1]} : vector<16x512xf32> to vector<8x512xf32>
    %450 = arith.mulf %448, %449 : vector<8x512xf32>
    %451 = arith.addf %443, %450 : vector<8x512xf32>
    %452 = vector.extract_strided_slice %447 {offsets = [8, 0], sizes = [8, 512], strides = [1, 1]} : vector<16x512xf32> to vector<8x512xf32>
    %453 = vector.extract_strided_slice %445 {offsets = [8, 0], sizes = [8, 512], strides = [1, 1]} : vector<16x512xf32> to vector<8x512xf32>
    %454 = arith.mulf %452, %453 : vector<8x512xf32>
    %455 = arith.addf %451, %454 : vector<8x512xf32>
    %c630_i32_142 = arith.constant 630 : i32
    %456 = tpu.dynamic_rotate %336 by %c630_i32_142 dim 1 : vector<16x640xf32>, i32 -> vector<16x640xf32>
    %457 = vector.extract_strided_slice %456 {offsets = [0, 0], sizes = [16, 512], strides = [1, 1]} : vector<16x640xf32> to vector<16x512xf32>
    %c10_143 = arith.constant 10 : index
    %c0_144 = arith.constant 0 : index
    %c0_145 = arith.constant 0 : index
    %458 = vector.load %arg6[%c10_143, %c0_144, %c0_145] : memref<11x32x512xf32, #tpu.memory_space<vmem>>, vector<1x16x512xf32>
    %459 = vector.shape_cast %458 : vector<1x16x512xf32> to vector<16x512xf32>
    %460 = vector.extract_strided_slice %459 {offsets = [0, 0], sizes = [8, 512], strides = [1, 1]} : vector<16x512xf32> to vector<8x512xf32>
    %461 = vector.extract_strided_slice %457 {offsets = [0, 0], sizes = [8, 512], strides = [1, 1]} : vector<16x512xf32> to vector<8x512xf32>
    %462 = arith.mulf %460, %461 : vector<8x512xf32>
    %463 = arith.addf %455, %462 : vector<8x512xf32>
    %464 = vector.extract_strided_slice %459 {offsets = [8, 0], sizes = [8, 512], strides = [1, 1]} : vector<16x512xf32> to vector<8x512xf32>
    %465 = vector.extract_strided_slice %457 {offsets = [8, 0], sizes = [8, 512], strides = [1, 1]} : vector<16x512xf32> to vector<8x512xf32>
    %466 = arith.mulf %464, %465 : vector<8x512xf32>
    %467 = arith.addf %463, %466 : vector<8x512xf32>
    %c16_146 = arith.constant 16 : index
    %c0_147 = arith.constant 0 : index
    %468 = vector.load %arg4[%c16_146, %c0_147] : memref<32x640xf32, #tpu.memory_space<vmem>>, vector<16x640xf32>
    %469 = vector.broadcast %313 : vector<1x640xf32> to vector<16x640xf32>
    %470 = arith.mulf %468, %469 : vector<16x640xf32>
    %c16_148 = arith.constant 16 : index
    %c0_149 = arith.constant 0 : index
    %471 = vector.load %arg5[%c16_148, %c0_149] : memref<32x640xf32, #tpu.memory_space<vmem>>, vector<16x640xf32>
    %472 = vector.broadcast %325 : vector<1x640xf32> to vector<16x640xf32>
    %473 = arith.mulf %471, %472 : vector<16x640xf32>
    %474 = arith.addf %470, %473 : vector<16x640xf32>
    %cst_150 = arith.constant 1.000000e-01 : f32
    %475 = vector.broadcast %cst_150 : f32 to vector<16x640xf32>
    %476 = arith.mulf %475, %474 : vector<16x640xf32>
    %477 = arith.maximumf %474, %476 : vector<16x640xf32>
    %478 = vector.extract_strided_slice %477 {offsets = [0, 0], sizes = [16, 512], strides = [1, 1]} : vector<16x640xf32> to vector<16x512xf32>
    %c0_151 = arith.constant 0 : index
    %c16_152 = arith.constant 16 : index
    %c0_153 = arith.constant 0 : index
    %479 = vector.load %arg6[%c0_151, %c16_152, %c0_153] : memref<11x32x512xf32, #tpu.memory_space<vmem>>, vector<1x16x512xf32>
    %480 = vector.shape_cast %479 : vector<1x16x512xf32> to vector<16x512xf32>
    %481 = vector.extract_strided_slice %480 {offsets = [0, 0], sizes = [8, 512], strides = [1, 1]} : vector<16x512xf32> to vector<8x512xf32>
    %482 = vector.extract_strided_slice %478 {offsets = [0, 0], sizes = [8, 512], strides = [1, 1]} : vector<16x512xf32> to vector<8x512xf32>
    %483 = arith.mulf %481, %482 : vector<8x512xf32>
    %484 = arith.addf %467, %483 : vector<8x512xf32>
    %485 = vector.extract_strided_slice %480 {offsets = [8, 0], sizes = [8, 512], strides = [1, 1]} : vector<16x512xf32> to vector<8x512xf32>
    %486 = vector.extract_strided_slice %478 {offsets = [8, 0], sizes = [8, 512], strides = [1, 1]} : vector<16x512xf32> to vector<8x512xf32>
    %487 = arith.mulf %485, %486 : vector<8x512xf32>
    %488 = arith.addf %484, %487 : vector<8x512xf32>
    %c639_i32_154 = arith.constant 639 : i32
    %489 = tpu.dynamic_rotate %477 by %c639_i32_154 dim 1 : vector<16x640xf32>, i32 -> vector<16x640xf32>
    %490 = vector.extract_strided_slice %489 {offsets = [0, 0], sizes = [16, 512], strides = [1, 1]} : vector<16x640xf32> to vector<16x512xf32>
    %c1_155 = arith.constant 1 : index
    %c16_156 = arith.constant 16 : index
    %c0_157 = arith.constant 0 : index
    %491 = vector.load %arg6[%c1_155, %c16_156, %c0_157] : memref<11x32x512xf32, #tpu.memory_space<vmem>>, vector<1x16x512xf32>
    %492 = vector.shape_cast %491 : vector<1x16x512xf32> to vector<16x512xf32>
    %493 = vector.extract_strided_slice %492 {offsets = [0, 0], sizes = [8, 512], strides = [1, 1]} : vector<16x512xf32> to vector<8x512xf32>
    %494 = vector.extract_strided_slice %490 {offsets = [0, 0], sizes = [8, 512], strides = [1, 1]} : vector<16x512xf32> to vector<8x512xf32>
    %495 = arith.mulf %493, %494 : vector<8x512xf32>
    %496 = arith.addf %488, %495 : vector<8x512xf32>
    %497 = vector.extract_strided_slice %492 {offsets = [8, 0], sizes = [8, 512], strides = [1, 1]} : vector<16x512xf32> to vector<8x512xf32>
    %498 = vector.extract_strided_slice %490 {offsets = [8, 0], sizes = [8, 512], strides = [1, 1]} : vector<16x512xf32> to vector<8x512xf32>
    %499 = arith.mulf %497, %498 : vector<8x512xf32>
    %500 = arith.addf %496, %499 : vector<8x512xf32>
    %c638_i32_158 = arith.constant 638 : i32
    %501 = tpu.dynamic_rotate %477 by %c638_i32_158 dim 1 : vector<16x640xf32>, i32 -> vector<16x640xf32>
    %502 = vector.extract_strided_slice %501 {offsets = [0, 0], sizes = [16, 512], strides = [1, 1]} : vector<16x640xf32> to vector<16x512xf32>
    %c2_159 = arith.constant 2 : index
    %c16_160 = arith.constant 16 : index
    %c0_161 = arith.constant 0 : index
    %503 = vector.load %arg6[%c2_159, %c16_160, %c0_161] : memref<11x32x512xf32, #tpu.memory_space<vmem>>, vector<1x16x512xf32>
    %504 = vector.shape_cast %503 : vector<1x16x512xf32> to vector<16x512xf32>
    %505 = vector.extract_strided_slice %504 {offsets = [0, 0], sizes = [8, 512], strides = [1, 1]} : vector<16x512xf32> to vector<8x512xf32>
    %506 = vector.extract_strided_slice %502 {offsets = [0, 0], sizes = [8, 512], strides = [1, 1]} : vector<16x512xf32> to vector<8x512xf32>
    %507 = arith.mulf %505, %506 : vector<8x512xf32>
    %508 = arith.addf %500, %507 : vector<8x512xf32>
    %509 = vector.extract_strided_slice %504 {offsets = [8, 0], sizes = [8, 512], strides = [1, 1]} : vector<16x512xf32> to vector<8x512xf32>
    %510 = vector.extract_strided_slice %502 {offsets = [8, 0], sizes = [8, 512], strides = [1, 1]} : vector<16x512xf32> to vector<8x512xf32>
    %511 = arith.mulf %509, %510 : vector<8x512xf32>
    %512 = arith.addf %508, %511 : vector<8x512xf32>
    %c637_i32_162 = arith.constant 637 : i32
    %513 = tpu.dynamic_rotate %477 by %c637_i32_162 dim 1 : vector<16x640xf32>, i32 -> vector<16x640xf32>
    %514 = vector.extract_strided_slice %513 {offsets = [0, 0], sizes = [16, 512], strides = [1, 1]} : vector<16x640xf32> to vector<16x512xf32>
    %c3_163 = arith.constant 3 : index
    %c16_164 = arith.constant 16 : index
    %c0_165 = arith.constant 0 : index
    %515 = vector.load %arg6[%c3_163, %c16_164, %c0_165] : memref<11x32x512xf32, #tpu.memory_space<vmem>>, vector<1x16x512xf32>
    %516 = vector.shape_cast %515 : vector<1x16x512xf32> to vector<16x512xf32>
    %517 = vector.extract_strided_slice %516 {offsets = [0, 0], sizes = [8, 512], strides = [1, 1]} : vector<16x512xf32> to vector<8x512xf32>
    %518 = vector.extract_strided_slice %514 {offsets = [0, 0], sizes = [8, 512], strides = [1, 1]} : vector<16x512xf32> to vector<8x512xf32>
    %519 = arith.mulf %517, %518 : vector<8x512xf32>
    %520 = arith.addf %512, %519 : vector<8x512xf32>
    %521 = vector.extract_strided_slice %516 {offsets = [8, 0], sizes = [8, 512], strides = [1, 1]} : vector<16x512xf32> to vector<8x512xf32>
    %522 = vector.extract_strided_slice %514 {offsets = [8, 0], sizes = [8, 512], strides = [1, 1]} : vector<16x512xf32> to vector<8x512xf32>
    %523 = arith.mulf %521, %522 : vector<8x512xf32>
    %524 = arith.addf %520, %523 : vector<8x512xf32>
    %c636_i32_166 = arith.constant 636 : i32
    %525 = tpu.dynamic_rotate %477 by %c636_i32_166 dim 1 : vector<16x640xf32>, i32 -> vector<16x640xf32>
    %526 = vector.extract_strided_slice %525 {offsets = [0, 0], sizes = [16, 512], strides = [1, 1]} : vector<16x640xf32> to vector<16x512xf32>
    %c4_167 = arith.constant 4 : index
    %c16_168 = arith.constant 16 : index
    %c0_169 = arith.constant 0 : index
    %527 = vector.load %arg6[%c4_167, %c16_168, %c0_169] : memref<11x32x512xf32, #tpu.memory_space<vmem>>, vector<1x16x512xf32>
    %528 = vector.shape_cast %527 : vector<1x16x512xf32> to vector<16x512xf32>
    %529 = vector.extract_strided_slice %528 {offsets = [0, 0], sizes = [8, 512], strides = [1, 1]} : vector<16x512xf32> to vector<8x512xf32>
    %530 = vector.extract_strided_slice %526 {offsets = [0, 0], sizes = [8, 512], strides = [1, 1]} : vector<16x512xf32> to vector<8x512xf32>
    %531 = arith.mulf %529, %530 : vector<8x512xf32>
    %532 = arith.addf %524, %531 : vector<8x512xf32>
    %533 = vector.extract_strided_slice %528 {offsets = [8, 0], sizes = [8, 512], strides = [1, 1]} : vector<16x512xf32> to vector<8x512xf32>
    %534 = vector.extract_strided_slice %526 {offsets = [8, 0], sizes = [8, 512], strides = [1, 1]} : vector<16x512xf32> to vector<8x512xf32>
    %535 = arith.mulf %533, %534 : vector<8x512xf32>
    %536 = arith.addf %532, %535 : vector<8x512xf32>
    %c635_i32_170 = arith.constant 635 : i32
    %537 = tpu.dynamic_rotate %477 by %c635_i32_170 dim 1 : vector<16x640xf32>, i32 -> vector<16x640xf32>
    %538 = vector.extract_strided_slice %537 {offsets = [0, 0], sizes = [16, 512], strides = [1, 1]} : vector<16x640xf32> to vector<16x512xf32>
    %c5_171 = arith.constant 5 : index
    %c16_172 = arith.constant 16 : index
    %c0_173 = arith.constant 0 : index
    %539 = vector.load %arg6[%c5_171, %c16_172, %c0_173] : memref<11x32x512xf32, #tpu.memory_space<vmem>>, vector<1x16x512xf32>
    %540 = vector.shape_cast %539 : vector<1x16x512xf32> to vector<16x512xf32>
    %541 = vector.extract_strided_slice %540 {offsets = [0, 0], sizes = [8, 512], strides = [1, 1]} : vector<16x512xf32> to vector<8x512xf32>
    %542 = vector.extract_strided_slice %538 {offsets = [0, 0], sizes = [8, 512], strides = [1, 1]} : vector<16x512xf32> to vector<8x512xf32>
    %543 = arith.mulf %541, %542 : vector<8x512xf32>
    %544 = arith.addf %536, %543 : vector<8x512xf32>
    %545 = vector.extract_strided_slice %540 {offsets = [8, 0], sizes = [8, 512], strides = [1, 1]} : vector<16x512xf32> to vector<8x512xf32>
    %546 = vector.extract_strided_slice %538 {offsets = [8, 0], sizes = [8, 512], strides = [1, 1]} : vector<16x512xf32> to vector<8x512xf32>
    %547 = arith.mulf %545, %546 : vector<8x512xf32>
    %548 = arith.addf %544, %547 : vector<8x512xf32>
    %c634_i32_174 = arith.constant 634 : i32
    %549 = tpu.dynamic_rotate %477 by %c634_i32_174 dim 1 : vector<16x640xf32>, i32 -> vector<16x640xf32>
    %550 = vector.extract_strided_slice %549 {offsets = [0, 0], sizes = [16, 512], strides = [1, 1]} : vector<16x640xf32> to vector<16x512xf32>
    %c6_175 = arith.constant 6 : index
    %c16_176 = arith.constant 16 : index
    %c0_177 = arith.constant 0 : index
    %551 = vector.load %arg6[%c6_175, %c16_176, %c0_177] : memref<11x32x512xf32, #tpu.memory_space<vmem>>, vector<1x16x512xf32>
    %552 = vector.shape_cast %551 : vector<1x16x512xf32> to vector<16x512xf32>
    %553 = vector.extract_strided_slice %552 {offsets = [0, 0], sizes = [8, 512], strides = [1, 1]} : vector<16x512xf32> to vector<8x512xf32>
    %554 = vector.extract_strided_slice %550 {offsets = [0, 0], sizes = [8, 512], strides = [1, 1]} : vector<16x512xf32> to vector<8x512xf32>
    %555 = arith.mulf %553, %554 : vector<8x512xf32>
    %556 = arith.addf %548, %555 : vector<8x512xf32>
    %557 = vector.extract_strided_slice %552 {offsets = [8, 0], sizes = [8, 512], strides = [1, 1]} : vector<16x512xf32> to vector<8x512xf32>
    %558 = vector.extract_strided_slice %550 {offsets = [8, 0], sizes = [8, 512], strides = [1, 1]} : vector<16x512xf32> to vector<8x512xf32>
    %559 = arith.mulf %557, %558 : vector<8x512xf32>
    %560 = arith.addf %556, %559 : vector<8x512xf32>
    %c633_i32_178 = arith.constant 633 : i32
    %561 = tpu.dynamic_rotate %477 by %c633_i32_178 dim 1 : vector<16x640xf32>, i32 -> vector<16x640xf32>
    %562 = vector.extract_strided_slice %561 {offsets = [0, 0], sizes = [16, 512], strides = [1, 1]} : vector<16x640xf32> to vector<16x512xf32>
    %c7_179 = arith.constant 7 : index
    %c16_180 = arith.constant 16 : index
    %c0_181 = arith.constant 0 : index
    %563 = vector.load %arg6[%c7_179, %c16_180, %c0_181] : memref<11x32x512xf32, #tpu.memory_space<vmem>>, vector<1x16x512xf32>
    %564 = vector.shape_cast %563 : vector<1x16x512xf32> to vector<16x512xf32>
    %565 = vector.extract_strided_slice %564 {offsets = [0, 0], sizes = [8, 512], strides = [1, 1]} : vector<16x512xf32> to vector<8x512xf32>
    %566 = vector.extract_strided_slice %562 {offsets = [0, 0], sizes = [8, 512], strides = [1, 1]} : vector<16x512xf32> to vector<8x512xf32>
    %567 = arith.mulf %565, %566 : vector<8x512xf32>
    %568 = arith.addf %560, %567 : vector<8x512xf32>
    %569 = vector.extract_strided_slice %564 {offsets = [8, 0], sizes = [8, 512], strides = [1, 1]} : vector<16x512xf32> to vector<8x512xf32>
    %570 = vector.extract_strided_slice %562 {offsets = [8, 0], sizes = [8, 512], strides = [1, 1]} : vector<16x512xf32> to vector<8x512xf32>
    %571 = arith.mulf %569, %570 : vector<8x512xf32>
    %572 = arith.addf %568, %571 : vector<8x512xf32>
    %c632_i32_182 = arith.constant 632 : i32
    %573 = tpu.dynamic_rotate %477 by %c632_i32_182 dim 1 : vector<16x640xf32>, i32 -> vector<16x640xf32>
    %574 = vector.extract_strided_slice %573 {offsets = [0, 0], sizes = [16, 512], strides = [1, 1]} : vector<16x640xf32> to vector<16x512xf32>
    %c8_183 = arith.constant 8 : index
    %c16_184 = arith.constant 16 : index
    %c0_185 = arith.constant 0 : index
    %575 = vector.load %arg6[%c8_183, %c16_184, %c0_185] : memref<11x32x512xf32, #tpu.memory_space<vmem>>, vector<1x16x512xf32>
    %576 = vector.shape_cast %575 : vector<1x16x512xf32> to vector<16x512xf32>
    %577 = vector.extract_strided_slice %576 {offsets = [0, 0], sizes = [8, 512], strides = [1, 1]} : vector<16x512xf32> to vector<8x512xf32>
    %578 = vector.extract_strided_slice %574 {offsets = [0, 0], sizes = [8, 512], strides = [1, 1]} : vector<16x512xf32> to vector<8x512xf32>
    %579 = arith.mulf %577, %578 : vector<8x512xf32>
    %580 = arith.addf %572, %579 : vector<8x512xf32>
    %581 = vector.extract_strided_slice %576 {offsets = [8, 0], sizes = [8, 512], strides = [1, 1]} : vector<16x512xf32> to vector<8x512xf32>
    %582 = vector.extract_strided_slice %574 {offsets = [8, 0], sizes = [8, 512], strides = [1, 1]} : vector<16x512xf32> to vector<8x512xf32>
    %583 = arith.mulf %581, %582 : vector<8x512xf32>
    %584 = arith.addf %580, %583 : vector<8x512xf32>
    %c631_i32_186 = arith.constant 631 : i32
    %585 = tpu.dynamic_rotate %477 by %c631_i32_186 dim 1 : vector<16x640xf32>, i32 -> vector<16x640xf32>
    %586 = vector.extract_strided_slice %585 {offsets = [0, 0], sizes = [16, 512], strides = [1, 1]} : vector<16x640xf32> to vector<16x512xf32>
    %c9_187 = arith.constant 9 : index
    %c16_188 = arith.constant 16 : index
    %c0_189 = arith.constant 0 : index
    %587 = vector.load %arg6[%c9_187, %c16_188, %c0_189] : memref<11x32x512xf32, #tpu.memory_space<vmem>>, vector<1x16x512xf32>
    %588 = vector.shape_cast %587 : vector<1x16x512xf32> to vector<16x512xf32>
    %589 = vector.extract_strided_slice %588 {offsets = [0, 0], sizes = [8, 512], strides = [1, 1]} : vector<16x512xf32> to vector<8x512xf32>
    %590 = vector.extract_strided_slice %586 {offsets = [0, 0], sizes = [8, 512], strides = [1, 1]} : vector<16x512xf32> to vector<8x512xf32>
    %591 = arith.mulf %589, %590 : vector<8x512xf32>
    %592 = arith.addf %584, %591 : vector<8x512xf32>
    %593 = vector.extract_strided_slice %588 {offsets = [8, 0], sizes = [8, 512], strides = [1, 1]} : vector<16x512xf32> to vector<8x512xf32>
    %594 = vector.extract_strided_slice %586 {offsets = [8, 0], sizes = [8, 512], strides = [1, 1]} : vector<16x512xf32> to vector<8x512xf32>
    %595 = arith.mulf %593, %594 : vector<8x512xf32>
    %596 = arith.addf %592, %595 : vector<8x512xf32>
    %c630_i32_190 = arith.constant 630 : i32
    %597 = tpu.dynamic_rotate %477 by %c630_i32_190 dim 1 : vector<16x640xf32>, i32 -> vector<16x640xf32>
    %598 = vector.extract_strided_slice %597 {offsets = [0, 0], sizes = [16, 512], strides = [1, 1]} : vector<16x640xf32> to vector<16x512xf32>
    %c10_191 = arith.constant 10 : index
    %c16_192 = arith.constant 16 : index
    %c0_193 = arith.constant 0 : index
    %599 = vector.load %arg6[%c10_191, %c16_192, %c0_193] : memref<11x32x512xf32, #tpu.memory_space<vmem>>, vector<1x16x512xf32>
    %600 = vector.shape_cast %599 : vector<1x16x512xf32> to vector<16x512xf32>
    %601 = vector.extract_strided_slice %600 {offsets = [0, 0], sizes = [8, 512], strides = [1, 1]} : vector<16x512xf32> to vector<8x512xf32>
    %602 = vector.extract_strided_slice %598 {offsets = [0, 0], sizes = [8, 512], strides = [1, 1]} : vector<16x512xf32> to vector<8x512xf32>
    %603 = arith.mulf %601, %602 : vector<8x512xf32>
    %604 = arith.addf %596, %603 : vector<8x512xf32>
    %605 = vector.extract_strided_slice %600 {offsets = [8, 0], sizes = [8, 512], strides = [1, 1]} : vector<16x512xf32> to vector<8x512xf32>
    %606 = vector.extract_strided_slice %598 {offsets = [8, 0], sizes = [8, 512], strides = [1, 1]} : vector<16x512xf32> to vector<8x512xf32>
    %607 = arith.mulf %605, %606 : vector<8x512xf32>
    %608 = arith.addf %604, %607 : vector<8x512xf32>
    %cst_194 = arith.constant dense<0.000000e+00> : vector<512xf32>
    %609 = vector.multi_reduction <add>, %608, %cst_194 [0] : vector<8x512xf32> to vector<512xf32>
    %610 = vector.shape_cast %609 : vector<512xf32> to vector<1x512xf32>
    %611 = vector.broadcast %7 : f32 to vector<1x512xf32>
    %612 = arith.addf %610, %611 : vector<1x512xf32>
    %613 = math.tanh %612 : vector<1x512xf32>
    %c0_195 = arith.constant 0 : index
    %c0_196 = arith.constant 0 : index
    %c512_197 = arith.constant 512 : index
    %614 = vector.load %arg8[%c0_195, %c0_196, %c512_197] : memref<1x1x1024xf32, #tpu.memory_space<vmem>>, vector<1x1x512xf32>
    %615 = vector.shape_cast %614 : vector<1x1x512xf32> to vector<1x512xf32>
    %616 = vector.shape_cast %613 : vector<1x512xf32> to vector<1x1x512xf32>
    tpu.vector_store %arg8[%c0_195, %c0_196, %c512_197], %616 {strides = array<i32>} : memref<1x1x1024xf32, #tpu.memory_space<vmem>>, vector<1x1x512xf32>,
    return
  }
  func.func @transform_0(%arg0: i32, %arg1: i32) -> (i32, i32, i32) {
    %c0_i32 = arith.constant 0 : i32
    %c0_i32_0 = arith.constant 0 : i32
    return %arg0, %c0_i32, %arg1 : i32, i32, i32
  }
  func.func @transform_1(%arg0: i32, %arg1: i32) -> (i32, i32, i32) {
    %c1_i32 = arith.constant 1 : i32
    %0 = arith.addi %arg1, %c1_i32 : i32
    %c8_i32 = arith.constant 8 : i32
    %1 = arith.muli %0, %c8_i32 : i32
    %c0_i32 = arith.constant 0 : i32
    %c0_i32_0 = arith.constant 0 : i32
    return %arg0, %c0_i32, %1 : i32, i32, i32
  }
  func.func @transform_2(%arg0: i32, %arg1: i32) -> (i32, i32) {
    %c0_i32 = arith.constant 0 : i32
    %c0_i32_0 = arith.constant 0 : i32
    %c0_i32_1 = arith.constant 0 : i32
    return %c0_i32, %c0_i32_0 : i32, i32
  }
  func.func @transform_3(%arg0: i32, %arg1: i32) -> (i32, i32) {
    %c0_i32 = arith.constant 0 : i32
    %c0_i32_0 = arith.constant 0 : i32
    %c0_i32_1 = arith.constant 0 : i32
    return %c0_i32, %c0_i32_0 : i32, i32
  }
  func.func @transform_4(%arg0: i32, %arg1: i32) -> (i32, i32, i32) {
    %c0_i32 = arith.constant 0 : i32
    %c0_i32_0 = arith.constant 0 : i32
    %c0_i32_1 = arith.constant 0 : i32
    %c0_i32_2 = arith.constant 0 : i32
    return %c0_i32, %c0_i32_0, %c0_i32_1 : i32, i32, i32
  }
  func.func @transform_5(%arg0: i32, %arg1: i32) -> (i32, i32) {
    %c0_i32 = arith.constant 0 : i32
    %c0_i32_0 = arith.constant 0 : i32
    %c0_i32_1 = arith.constant 0 : i32
    return %c0_i32, %c0_i32_0 : i32, i32
  }
  func.func @transform_6(%arg0: i32, %arg1: i32) -> (i32, i32, i32) {
    %c0_i32 = arith.constant 0 : i32
    %c0_i32_0 = arith.constant 0 : i32
    return %arg0, %c0_i32, %arg1 : i32, i32, i32
  }
}

</mosaic_0001>

<bundles_post_ra>
// kernel: tpu_custom_call.1
= control target key start
LH: loop header
LB: loop body
LE: loop exit
PB: predicated region body
PF: predicated region fallthrough
CT: control target
= control target key end

     0   :  { %s6839_s0 = inlined_call_operand.hbm [shape: f32[2,1,2176], index: 0, kind: input, shape index: {}]   ;;  %s6840_s1 = inlined_call_operand.hbm [shape: f32[2,1,2176], index: 1, kind: input, shape index: {}]   ;;  %s6841_s2 = inlined_call_operand.hbm [shape: f32[32,640], index: 2, kind: input, shape index: {}]   ;;  %s6842_s3 = inlined_call_operand.hbm [shape: f32[32,640], index: 3, kind: input, shape index: {}]   ;;  %s6843_s4 = inlined_call_operand.hbm [shape: f32[11,32,512], index: 4, kind: input, shape index: {}]   ;;  %s6844_s5 = inlined_call_operand.<no memory space> [shape: f32[1,1], index: 5, kind: input, shape index: {}]   ;;  %s6845_s6 = inlined_call_operand.hbm [shape: f32[2,1,2048], index: 6, kind: output, shape index: {}]  }
   0x1   :  { %6980 = sst [smem:[#allocation150_spill]] %s6842_s3  ;;  %v11_v0 = vstv %s6844_s5 }
   0x2   :  { %6981 = sst [smem:[#allocation151_spill]] %s6845_s6  ;;  %12 = vst [vmem:[#allocation3] sm:$0x1] %v11_v0 }
   0x3   :  { %13 = vsyncpa [#allocation5], 0 }
   0x4   :  { %15 = vsyncpa [#allocation5 + $0x1], 0 }
   0x5   :  { %16 = vsyncpa [#allocation8], 0 }
   0x6   :  { %18 = vsyncpa [#allocation8 + $0x1], 0 }
   0x7   :  { %19 = vsyncpa [#allocation11], 0 }
   0x8   :  { %20 = vsyncpa [#allocation6], 0 }
   0x9   :  { %22 = vsyncpa [#allocation6 + $0x1], 0  ;;  %s3778_s23 = smov 0   ;;  %s3780_s24 = smov 0  }
   0xa   :  { %s3782_s25 = smov 0   ;;  %s3784_s26 = smov 0  }
   0xb   :  { %s3786_s27 = smov 0   ;;  %s3788_s28 = smov 0  }
   0xc   :  { %s3790_s5 = smov 0   ;;  %s3792_s29 = smov 0  }
   0xd   :  { %s3794_s30 = smov 0   ;;  %s3796_s7 = smov 0  }
   0xe   :  { %s3798_s8 = smov 0  }
   0xf LB: > { %6982 = sst [smem:[#allocation19_spill]] %s3683_s24  ;;  %s3834_s9 = sadd.s32 4294967295, %s3719_s8   ;;  %s3719_s8 = sphi %s3798_s8, %s28_s8   ;;  %s3715_s7 = sphi %s3796_s7, %s7374_s7   ;;  %s3711_s30 = sphi %s3794_s30, %s7366_s30   ;;  %s3707_s29 = sphi %s3792_s29, %s7373_s29   ;;  %s3703_s5 = sphi %s3790_s5, %s7365_s5   ;;  %s3699_s28 = sphi %s3788_s28, %s7372_s28   ;;  %s3695_s27 = sphi %s3786_s27, %s7371_s27   ;;  %s3691_s26 = sphi %s3784_s26, %s7370_s26   ;;  %s3687_s25 = sphi %s3782_s25, %s7369_s25   ;;  %s3683_s24 = sphi %s3780_s24, %s7368_s24   ;;  %s3679_s23 = sphi %s3778_s23, %s7362_s23  }
  0x10   : > { %6983 = sst [smem:[#allocation20_spill]] %s3691_s26  ;;  %s37_s11 = sadd.s32 1, %s3711_s30 }
  0x11   : > { %6984 = sst [smem:[#allocation21_spill]] %s3703_s5  ;;  %s40_s12 = sadd.s32 1, %s3715_s7 }
  0x12   : > { %6985 = sst [smem:[#allocation22_spill]] %s3707_s29  ;;  %p38_p0 = scmp.ge.s32.totalorder %s37_s11, 2 }
  0x13   : > { %6986 = sst [smem:[#allocation23_spill]] %s3711_s30  ;;  %s49_s13 = sadd.s32 1, %s3699_s28 }
  0x14   : > { %p56_p1 = scmp.ne.s32.totalorder %s3699_s28, %s3695_s27  ;;  %p57_p2 = scmp.eq.s32.totalorder %s3719_s8, 0 }
  0x15   : > { %s7376_s11 = smov (%p38_p0, %s37_s11), 0  ;;  %s7378_s12 = smov (!%p38_p0, %s40_s12), %s3715_s7 }
  0x16   : > { %6987 = sst [smem:[#allocation24_spill]] %s7376_s11  ;;  %s45_s14 = ssub.s32 %s3711_s30, %s7376_s11 }
  0x17   : > { %p3853_p3 = por %p57_p2, %p56_p1  ;;  %p42_p4 = scmp.ge.s32.totalorder %s7378_s12, 2 }
  0x18   : > { %p6849_p5 = scmp.ne.s32.totalorder %s3695_s27, %s3691_s26  ;;  %p63_p6 = scmp.eq.s32.totalorder %s3834_s9, 0 }
  0x19   : > { %s6988_s15 = scalar_select %p3853_p3, 1, 0 }
  0x1a   : > { %s3861_s16 = sshll.u32 %s3711_s30, 3  ;;  %s7380_s12 = smov (%p42_p4, %s7378_s12), 0 }
  0x1b   : > { %6989 = sst [smem:[#allocation25_spill]] %s7380_s12  ;;  %p3870_p7 = por %p63_p6, %p6849_p5 }
  0x1c   : > { %s3260_s18 = sadd.s32 8, %s3861_s16  ;;  %s44_s19 = ssub.s32 %s3715_s7, %s7380_s12 }
  0x1d   : > { %s6990_s17 = scalar_select %p3870_p7, 1, 0 }
  0x1e   : > { %s3261_s20 = sshll.u32 %s7376_s11, 3  ;;  %s46_s21 = sor.u32 %s45_s14, %s44_s19 }
  0x1f   : > { %s3262_s22 = sadd.s32 8, %s3261_s20  ;;  %p47_p8 = scmp.eq.s32.totalorder %s46_s21, 0 }
  0x20   : > { %s77_s10 = ssub.s32 %s3260_s18, %s3262_s22  ;;  %s81_s6 = sadd.s32 1, %s3687_s25 }
  0x21   : > { %s78_s30 = sor.u32 %s77_s10, %s44_s19  ;;  %p88_p10 = scmp.ne.s32.totalorder %s3687_s25, %s3683_s24 }
  0x22   : > { %s3880_s29 = scalar_select %p47_p8, %s3699_s28, %s49_s13  }
  0x23   : > { %p79_p9 = scmp.eq.s32.totalorder %s78_s30, 0  ;;  %p94_p11 = scmp.ne.s32.totalorder %s3683_s24, %s3679_s23 }
  0x24   : > { %6991 = sst [smem:[#allocation26_spill]] %s3880_s29  ;;  %p204_p12 = scmp.eq.s32.totalorder %s3834_s9, 3 }
  0x25   : > { %s3888_s12 = scalar_select %p79_p9, %s3687_s25, %s81_s6  }
  0x26   : > { %p3892_p13 = por %p88_p10, %p57_p2  ;;  %p3898_p0 = por %p94_p11, %p63_p6 }
  0x27   : > { %6992 = sst [smem:[#allocation27_spill]] %s3888_s12  ;;  %p3905_p4 = por %p204_p12, %p56_p1 }
  0x28   : > { %s6994_s20 = scalar_select %p3898_p0, 1, 0 }
  0x29   : > { %s6996_s10 = scalar_select %p3905_p4, 1, 0 }
  0x2a   : > { %6995 = sst [smem:[#allocation28_spill]] %s6994_s20  ;;  %s6998_s30 = sadd.s32 4294967294, %s3719_s8  }
  0x2b   : > { %6997 = sst [smem:[#allocation29_spill]] %s6996_s10  ;;  %p210_p8 = scmp.eq.s32.totalorder %s6998_s30, 3 }
  0x2c   : > { %p3228_p5 = scmp.ge.s32.totalorder %s3719_s8, 1  ;;  %p217_p9 = scmp.lt.s32.totalorder %s3719_s8, 5 }
  0x2d   : > { %p6999_p7 = scmp.ne.s32.totalorder %s3695_s27, %s3691_s26  ;;  %s7003_s3 = sld [smem:[#allocation150_spill]] }
  0x2e   : > { %p3920_p2 = pnand %p3228_p5, %p217_p9  ;;  %s3721_s22 = smov [#allocation10]  }
  0x2f   : > { %p3916_p3 = por %p210_p8, %p6999_p7  ;;  %s244_s30 = sshll.u32 %s3721_s22, 4  ;;  %s245_s30 = int_to_ptr.vmem [resolvable:$true] %s244_s30 }
  0x30   : > { %p3283_p1 = pneg %p3920_p2  ;;  %s3722_s11 = smov 640  }
  0x31   : > { %s7000_s6 = scalar_select %p3916_p3, 1, 0 }
  0x32   : > { %p3931_p10 = pnand %p3283_p1, %p63_p6  ;;  %s3723_s29 = smov 40  }
  0x33   : > { %7001 = sst [smem:[#allocation30_spill]] %s7000_s6  ;;  %s242_s19 = sshll.u32 %s7003_s3, 4  ;;  %s243_s19 = int_to_ptr.hbm [resolvable:$true] %s242_s19 }
  0x34   : > { %3289 = dma.hbm_to_vmem [thread:$0]  (!%p3931_p10), %s243_s19, 2560, %s245_s30, [#allocation11], %s3722_s11, %s3722_s11, %s3723_s29  }
  0x35   : > { %s228_s3 = sshll.u32 %s6841_s2, 4  ;;  %s3724_s12 = smov [#allocation9]   ;;  %s229_s3 = int_to_ptr.hbm [resolvable:$true] %s228_s3 }
  0x36   : > { %s230_s6 = sshll.u32 %s3724_s12, 4  ;;  %s256_s5 = sshll.u32 %s6843_s4, 4  ;;  %s231_s6 = int_to_ptr.vmem [resolvable:$true] %s230_s6  ;;  %s257_s5 = int_to_ptr.hbm [resolvable:$true] %s256_s5 }
  0x37   : > { %3286 = dma.hbm_to_vmem [thread:$0]  (!%p3931_p10), %s229_s3, 2560, %s231_s6, [#allocation8], %s3722_s11, %s3722_s11, %s3723_s29  }
  0x38   : > { %s3725_s22 = smov [#allocation12]   ;;  %s3726_s24 = smov 512  }
  0x39   : > { %s258_s20 = sshll.u32 %s3725_s22, 4  ;;  %s3727_s19 = smov 32   ;;  %s259_s20 = int_to_ptr.vmem [resolvable:$true] %s258_s20 }
  0x3a   : > { %3292 = dma.hbm_to_vmem [thread:$0]  (!%p3931_p10), %s257_s5, 22528, %s259_s20, [#allocation11], %s3726_s24, %s3726_s24, %s3727_s19  }
  0x3b   : > { %p3232_p5 = scmp.ge.s32.totalorder %s3719_s8, 4 }
  0x3c   : > { %p7005_p7 = scmp.ne.s32.totalorder (!%p3232_p5), %s6988_s15, 0 }
  0x3d   : > { %271 = sbr.rel (%p3232_p5) target bundleno = 96 (0x60), region = 32 }
  0x42   : > { %274 = sbr.rel (!%p7005_p7) target bundleno = 88 (0x58), region = 36  ;;  %s275_s26 = sand.u32 (%p7005_p7), 1, %s3699_s28  }
  0x43   : > { %s3233_s12 = sshll.u32 (%p7005_p7), %s275_s26, 3  ;;  %s276_s10 = scalar_lea.sflag (%p7005_p7), [#allocation5], %s275_s26 }
  0x44   : > { %s279_s3 = scalar_lea.vmem (%p7005_p7), [#allocation4], %s3233_s12  ;;  %s3263_s29 = smul.u32 (%p7005_p7), 17, %s3715_s7 }
  0x45   : > { %s294_s11 = sshll.u32 (%p7005_p7), %s279_s3, 4  ;;  %s3527_s22 = scalar_lea.hbm (%p7005_p7), %s6839_s0, 34  ;;  %s295_s11 = int_to_ptr.vmem [resolvable:$true] %s294_s11 }
  0x46   : > { %s289_s6 = sadd.s32 (%p7005_p7), %s3263_s29, %s3861_s16 }
  0x47   : > { %s290_s24 = scalar_lea.hbm %s6839_s0, %s289_s6 }
  0x48   : > { %s292_s5 = sshll.u32 %s290_s24, 4  ;;  %s293_s5 = int_to_ptr.hbm [resolvable:$true] %s292_s5 }
  0x49   : > { %s3516_s20 = sshra.s32 %s293_s5, 4  ;;  %s3517_s20 = int_to_ptr.hbm [resolvable:$true] %s3516_s20 }
  0x4a   : > { %s3523_s15 = scalar_lea.hbm %s3517_s20, 8 }
  0x4b   : > { %p3524_p11 = scmp.ne.s32.totalorder %s3517_s20, %s3523_s15  ;;  %p3529_p12 = scmp.lt.s32.totalorder %s3527_s22, %s3523_s15 }
  0x4d   : > { %p3531_p8 = pnand %p3529_p12, %p3524_p11 }
  0x4f   : > { %3534 = shalt.err (!%p3531_p8)
}
  0x50   : > { %s3535_s19 = sshra.s32 %s295_s11, 4  ;;  %s3728_s12 = smov [#allocation4]   ;;  %s3536_s19 = int_to_ptr.vmem [resolvable:$true] %s3535_s19 }
  0x51   : > { %s3542_s26 = scalar_lea.vmem %s3536_s19, 8  ;;  %s3546_s3 = scalar_lea.vmem %s3728_s12, 16 }
  0x52   : > { %p3543_p9 = scmp.ne.s32.totalorder %s3536_s19, %s3542_s26  ;;  %p3548_p1 = scmp.lt.s32.totalorder %s3546_s3, %s3542_s26 }
  0x54   : > { %p3550_p10 = pnand %p3548_p1, %p3543_p9 }
  0x56   : > { %3553 = shalt.err (!%p3550_p10)
}
  0x57   : > { %297 = dma.hbm_to_vmem [thread:$0]  %s293_s5, 128, %s295_s11, %s276_s10  }
  0x58 PF: > { %s303_s29 = sand.u32 1, %s3687_s25   ;;  %s301_s6 = sand.u32 1, %s3719_s8  }
  0x59   : > { %s3126_s30 = smul.u32 17, %s3715_s7  ;;  %s304_s13 = scalar_lea.vmem [#allocation7], %s303_s29 }
  0x5a   : > { %s315_s24 = sshll.u32 %s304_s13, 4  ;;  %s302_s10 = scalar_lea.sflag [#allocation8], %s301_s6  ;;  %s316_s24 = int_to_ptr.vmem [resolvable:$true] %s315_s24 }
  0x5b   : > { %s3127_s20 = sadd.s32 %s3861_s16, %s3126_s30 }
  0x5c   : > { %s3128_s18 = scalar_lea.hbm %s6840_s1, %s3127_s20 }
  0x5d   : > { %s3129_s22 = scalar_lea.hbm %s3128_s18, 8 }
  0x5e   : > { %s313_s19 = sshll.u32 %s3129_s22, 4  ;;  %s314_s19 = int_to_ptr.hbm [resolvable:$true] %s313_s19 }
  0x5f   : > { %3272 = dma.hbm_to_vmem [thread:$0]  (%p3892_p13), %s314_s19, 16, %s316_s24, %s302_s10  }
  0x60 PF: > { %324 = sbr.rel (%p3920_p2) target bundleno = 1350 (0x546), region = 44 }
  0x65   : > { %s3971_s11 = sand.u32 1, %s3695_s27   ;;  %p7006_p5 = scmp.ne.s32.totalorder %s6990_s17, 0 }
  0x66   : > { %s3238_s16 = sshll.u32 %s3971_s11, 3  ;;  %s327_s5 = scalar_lea.sflag [#allocation5], %s3971_s11 }
  0x67   : > { %s330_s26 = scalar_lea.vmem [#allocation4], %s3238_s16 }
  0x68   : > { %3656 = dma.done.wait (%p7006_p5), %s327_s5, 128  }
  0x69   : > { %3658 = vsyncadd (%p7006_p5), %s327_s5, 4294967168  ;;  %s7007_s14 = sld [smem:[#allocation19_spill]]  ;;  %s336_s12 = sand.u32 1, %s3834_s9  }
  0x6a   : > { %s337_s29 = scalar_lea.sflag [#allocation8], %s336_s12 }
  0x6f   : > { %s338_s3 = sand.u32 1, %s7007_s14  }
  0x70   : > { %s3983_s6 = scalar_lea.vmem [#allocation7], %s338_s3 }
  0x71   : > { %3660 = dma.done.wait (%p3898_p0), %s337_s29, 16  }
  0x72   : > { %3662 = vsyncadd (%p3898_p0), %s337_s29, 4294967280 }
  0x73   : > { %3664 = dma.done.wait (%p63_p6), [#allocation8], 2560  }
  0x74   : > { %3666 = vsyncadd (%p63_p6), [#allocation8], 4294964736 }
  0x75   : > { %3668 = dma.done.wait (%p63_p6), [#allocation11], 25088  }
  0x76   : > { %3670 = vsyncadd (%p63_p6), [#allocation11], 4294942208  ;;  %s7009_s17 = sld [smem:[#allocation21_spill]]  ;;  %v6862_v1 = vlaneseq  ;;  %v395_v9 = vld [vmem:[%s330_s26] sm:$0xff]  ;;  %v6860_v13 = vmov 0.0   ;;  %v476_v15 = vld [vmem:[#allocation10] sm:$0xff] }
  0x77   : > { %396 = vst [vmem:[#allocation2] sm:$0xff] %v395_v9  ;;  %v446_v17 = vld [vmem:[#allocation9 + $0x8] sm:$0xff]  ;;  %v445_v19 = vld [vmem:[#allocation9] sm:$0xff]  ;;  %v482_v20 = vld [vmem:[#allocation10 + $0x30] sm:$0xff]  ;;  %s3730_s9 = smov 127   ;;  %s3731_s24 = smov 126  }
  0x78   : > { %v4001_v2 = vand.u32 127, %v6862_v1  ;;  %v477_v18 = vld [vmem:[#allocation10 + $0x8] sm:$0xff]  ;;  %v478_v23 = vld [vmem:[#allocation10 + $0x10] sm:$0xff]  ;;  %v483_v41 = vld [vmem:[#allocation10 + $0x38] sm:$0xff]  ;;  %s3732_s20 = smov 125   ;;  %s3733_s15 = smov 124  }
  0x79   : > { %v481_v21 = vld [vmem:[#allocation10 + $0x28] sm:$0xff]  ;;  %v451_v26 = vld [vmem:[#allocation9 + $0x30] sm:$0xff]  ;;  %v452_v43 = vld [vmem:[#allocation9 + $0x38] sm:$0xff]  ;;  %s3734_s21 = smov 123   ;;  %s3735_s18 = smov 122  }
  0x7a   : > { %v4004_v4 = vadd.s32 128, %v4001_v2  ;;  %v4008_v6 = vadd.s32 256, %v4001_v2  ;;  %v4012_v8 = vadd.s32 384, %v4001_v2  ;;  %v4017_v12 = vadd.s32 512, %v4001_v2  ;;  %v450_v27 = vld [vmem:[#allocation9 + $0x28] sm:$0xff]  ;;  %v447_v32 = vld [vmem:[#allocation9 + $0x10] sm:$0xff] }
  0x7b   : > { %v453_v48 = vld [vmem:[#allocation9 + $0x40] sm:$0xff]  ;;  %v448_v56 = vld [vmem:[#allocation9 + $0x18] sm:$0xff]  ;;  %s3736_s22 = smov 121   ;;  %s3737_s19 = smov 120   ;;  %vm570_vm15 = vcmp.lt.s32.totalorder %v4001_v2, 127 }
  0x7c   : > { %s3243_s30 = sshll.u32 %s7009_s17, 10  ;;  %7010 = vst [vmem:[#allocation31_spill] sm:$0xff] %v4004_v4  ;;  %v484_v50 = vld [vmem:[#allocation10 + $0x40] sm:$0xff]  ;;  %v479_v57 = vld [vmem:[#allocation10 + $0x18] sm:$0xff]  ;;  %s3738_s10 = smov 119  }
  0x7d   : > { %s413_s13 = sadd.s32 4294967291, %s3243_s30  ;;  %7011 = vst [vmem:[#allocation32_spill] sm:$0xff] %v4008_v6  ;;  %v480_v9 = vld [vmem:[#allocation10 + $0x20] sm:$0xff]  ;;  %s3739_s5 = smov 118  }
  0x7e   : > { %v414_v3 = vstv %s413_s13  ;;  %7012 = vst [vmem:[#allocation33_spill] sm:$0xff] %v4012_v8  ;;  %v411_v24 = vld [vmem:[#allocation2] sm:$0x1f]  ;;  %s1755_s26 = sadd.s32 507, %s3243_s30  ;;  %s5859_s23 = scalar_lea.vmem [#allocation13], %s3238_s16 }
  0x7f   : > { %v415_v5 = vadd.s32 %v414_v3, %v4001_v2  ;;  %v416_v7 = vadd.s32 %v414_v3, %v4004_v4  ;;  %v417_v10 = vadd.s32 %v414_v3, %v4008_v6  ;;  %v418_v11 = vadd.s32 %v414_v3, %v4012_v8  ;;  %7013 = vst [vmem:[#allocation34_spill] sm:$0xff] %v4017_v12  ;;  %v1095_v4 = vld [vmem:[#allocation9 + $0x78] sm:$0xff]  ;;  %s7355_s16 = sld [smem:[#allocation22_spill]]  ;;  %s3255_s12 = sshll.u32 %s7009_s17, 3 }
  0x80   : > { %v419_v28 = vadd.s32 %v414_v3, %v4017_v12  ;;  %v4030_v29 = vperm.slane %v411_v24, 1  ;;  %v4033_v31 = vperm.slane %v411_v24, 0  ;;  %v4035_v33 = vperm.slane %v411_v24, 2  ;;  %s7357_s13 = sld [smem:[#allocation151_spill]] }
  0x81   : > { %vm420_vm0 = vcmp.ge.s32.totalorder %v415_v5, 0  ;;  %vm425_vm1 = vcmp.lt.s32.totalorder %v415_v5, 1600  ;;  %vm421_vm2 = vcmp.ge.s32.totalorder %v416_v7, 0  ;;  %vm426_vm3 = vcmp.lt.s32.totalorder %v416_v7, 1600  ;;  %v449_v7 = vld [vmem:[#allocation9 + $0x20] sm:$0xff] }
  0x82   : > { %vm430_vm4 = vmand %vm420_vm0, %vm425_vm1  ;;  %vm422_vm5 = vcmp.ge.s32.totalorder %v417_v10, 0  ;;  %vm427_vm6 = vcmp.lt.s32.totalorder %v417_v10, 1600  ;;  %vm423_vm9 = vcmp.ge.s32.totalorder %v418_v11, 0  ;;  %vm428_vm10 = vcmp.lt.s32.totalorder %v418_v11, 1600 }
  0x83   : > { %vm431_vm7 = vmand %vm421_vm2, %vm426_vm3  ;;  %v4020_v14 = vsel %vm430_vm4, 1.0, %v6860_v13  ;;  %v467_v37 = vmul.f32 %v4030_v29, %v446_v17  ;;  %v466_v38 = vmul.f32 %v4033_v31, %v445_v19  ;;  %v472_v39 = vmul.f32 %v4030_v29, %v451_v26 }
  0x84   : > { %vm432_vm8 = vmand %vm422_vm5, %vm427_vm6  ;;  %v4023_v16 = vsel %vm431_vm7, 1.0, %v6860_v13  ;;  %v486_v25 = vmul.f32 %v4020_v14, %v476_v15  ;;  %v491_v35 = vmul.f32 %v4020_v14, %v481_v21  ;;  %v471_v40 = vmul.f32 %v4033_v31, %v450_v27  ;;  %v454_v27 = vld [vmem:[#allocation9 + $0x48] sm:$0xff] }
  0x85   : > { %v4026_v22 = vsel %vm432_vm8, 1.0, %v6860_v13  ;;  %v487_v30 = vmul.f32 %v4023_v16, %v477_v18  ;;  %v492_v34 = vmul.f32 %v4023_v16, %v482_v20  ;;  %vm433_vm11 = vmand %vm423_vm9, %vm428_vm10  ;;  %v468_v42 = vmul.f32 %v4035_v33, %v447_v32  ;;  %s3256_s3 = sshll.u32 %s7355_s16, 4 }
  0x86   : > { %v488_v36 = vmul.f32 %v4026_v22, %v478_v23  ;;  %vm424_vm12 = vcmp.ge.s32.totalorder %v419_v28, 0  ;;  %v496_v45 = vadd.f32 %v486_v25, %v466_v38  ;;  %v4048_v46 = vsel %vm433_vm11, 1.0, %v6860_v13  ;;  %s3082_s29 = sadd.s32 %s3256_s3, %s3255_s12 }
  0x87   : > { %v497_v44 = vadd.f32 %v487_v30, %v467_v37  ;;  %vm429_vm13 = vcmp.lt.s32.totalorder %v419_v28, 1600  ;;  %v502_v47 = vadd.f32 %v492_v34, %v472_v39  ;;  %v4050_v49 = vperm.slane %v411_v24, 3  ;;  %v485_v28 = vld [vmem:[#allocation10 + $0x48] sm:$0xff] }
  0x88   : > { %v498_v51 = vadd.f32 %v488_v36, %v468_v42  ;;  %v493_v52 = vmul.f32 %v4026_v22, %v483_v41  ;;  %v506_v54 = vmul.f32 0.1, %v496_v45  ;;  %v501_v55 = vadd.f32 %v491_v35, %v471_v40  ;;  %vm434_vm14 = vmand %vm424_vm12, %vm429_vm13 }
  0x89   : > { %v507_v53 = vmul.f32 0.1, %v497_v44  ;;  %v473_v58 = vmul.f32 %v4035_v33, %v452_v43  ;;  %v494_v61 = vmul.f32 %v4048_v46, %v484_v50  ;;  %v474_v63 = vmul.f32 %v4050_v49, %v453_v48 }
  0x8a   : > { %v4056_v60 = vmax.f32 %v496_v45, %v506_v54  ;;  %v508_v62 = vmul.f32 0.1, %v498_v51  ;;  %v469_v0 = vmul.f32 %v4050_v49, %v448_v56  ;;  %v489_v3 = vmul.f32 %v4048_v46, %v479_v57 }
  0x8b   : > { %v4054_v59 = vmax.f32 %v497_v44, %v507_v53  ;;  %v4064_v5 = vperm.slane %v411_v24, 4  ;;  %v512_v10 = vmul.f32 0.1, %v502_v47  ;;  %v511_v11 = vmul.f32 0.1, %v501_v55 }
  0x8c   : > { %550 = vrot.lane.b32.xlu0 %v4056_v60, %s3730_s9  ;;  %v4070_v15 = vmax.f32 %v498_v51, %v508_v62  ;;  %v503_v17 = vadd.f32 %v493_v52, %v473_v58  ;;  %v4073_v18 = vsel %vm434_vm14, 1.0, %v6860_v13  ;;  %v504_v25 = vadd.f32 %v494_v61, %v474_v63 }
  0x8d   : > { %554 = vrot.lane.b32.xlu1 %v4054_v59, %s3730_s9  ;;  %v470_v20 = vmul.f32 %v4064_v5, %v449_v7  ;;  %v490_v21 = vmul.f32 %v4073_v18, %v480_v9  ;;  %v4079_v23 = vmax.f32 %v502_v47, %v512_v10  ;;  %v4081_v24 = vmax.f32 %v501_v55, %v511_v11 }
  0x8e   : > { %558 = vrot.lane.b32.xlu2 %v4070_v15, %s3730_s9  ;;  %v513_v19 = vmul.f32 0.1, %v503_v17  ;;  %v499_v26 = vadd.f32 %v489_v3, %v469_v0  ;;  %v514_v34 = vmul.f32 0.1, %v504_v25  ;;  %v475_v36 = vmul.f32 %v4064_v5, %v454_v27 }
  0x8f   : > { %v500_v32 = vadd.f32 %v490_v21, %v470_v20  ;;  %v495_v37 = vmul.f32 %v4073_v18, %v485_v28  ;;  %vm624_vm0 = vcmp.lt.s32.totalorder %v4001_v2, 126  ;;  %vm678_vm2 = vcmp.lt.s32.totalorder %v4001_v2, 125 }
  0x90   : > { %v4083_v30 = vmax.f32 %v503_v17, %v513_v19  ;;  %v509_v35 = vmul.f32 0.1, %v499_v26  ;;  %v4093_v39 = vmax.f32 %v504_v25, %v514_v34  ;;  %vm732_vm3 = vcmp.lt.s32.totalorder %v4001_v2, 124 }
  0x91   : > { %v510_v38 = vmul.f32 0.1, %v500_v32  ;;  %v505_v41 = vadd.f32 %v495_v37, %v475_v36  ;;  %vm786_vm6 = vcmp.lt.s32.totalorder %v4001_v2, 123  ;;  %vm840_vm13 = vcmp.lt.s32.totalorder %v4001_v2, 122 }
  0x92   : > { %v4095_v40 = vmax.f32 %v499_v26, %v509_v35 }
  0x93   : > { %v4097_v42 = vmax.f32 %v500_v32, %v510_v38  ;;  %v515_v43 = vmul.f32 0.1, %v505_v41 }
  0x94   : > { %552 = vrot.lane.b32.xlu0 %v4081_v24, %s3730_s9 }
  0x95   : > { %556 = vrot.lane.b32.xlu1 %v4079_v23, %s3730_s9  ;;  %v4105_v44 = vmax.f32 %v505_v41, %v515_v43 }
  0x96   : > { %560 = vrot.lane.b32.xlu2 %v4083_v30, %s3730_s9 }
  0x9c   : > { %562 = vrot.lane.b32.xlu0 %v4095_v40, %s3730_s9 }
  0x9d   : > { %564 = vrot.lane.b32.xlu1 %v4093_v39, %s3730_s9 }
  0x9e   : > { %566 = vrot.lane.b32.xlu2 %v4097_v42, %s3730_s9 }
  0xa4   : > { %568 = vrot.lane.b32.xlu0 %v4105_v44, %s3730_s9 }
  0xa5   : > { %604 = vrot.lane.b32.xlu1 %v4056_v60, %s3731_s24 }
  0xa6   : > { %606 = vrot.lane.b32.xlu2 %v4081_v24, %s3731_s24 }
  0xac   : > { %608 = vrot.lane.b32.xlu0 %v4054_v59, %s3731_s24 }
  0xad   : > { %610 = vrot.lane.b32.xlu1 %v4079_v23, %s3731_s24 }
  0xae   : > { %612 = vrot.lane.b32.xlu2 %v4070_v15, %s3731_s24 }
  0xb4   : > { %614 = vrot.lane.b32.xlu0 %v4083_v30, %s3731_s24 }
  0xb5   : > { %616 = vrot.lane.b32.xlu1 %v4095_v40, %s3731_s24 }
  0xb6   : > { %618 = vrot.lane.b32.xlu2 %v4093_v39, %s3731_s24 }
  0xbc   : > { %620 = vrot.lane.b32.xlu0 %v4097_v42, %s3731_s24 }
  0xbd   : > { %622 = vrot.lane.b32.xlu1 %v4105_v44, %s3731_s24 }
  0xbe   : > { %658 = vrot.lane.b32.xlu2 %v4056_v60, %s3732_s20 }
  0xc4   : > { %660 = vrot.lane.b32.xlu0 %v4081_v24, %s3732_s20 }
  0xc5   : > { %662 = vrot.lane.b32.xlu1 %v4054_v59, %s3732_s20 }
  0xc6   : > { %664 = vrot.lane.b32.xlu2 %v4079_v23, %s3732_s20 }
  0xcc   : > { %666 = vrot.lane.b32.xlu0 %v4070_v15, %s3732_s20 }
  0xcd   : > { %668 = vrot.lane.b32.xlu1 %v4083_v30, %s3732_s20 }
  0xce   : > { %670 = vrot.lane.b32.xlu2 %v4095_v40, %s3732_s20 }
  0xd4   : > { %672 = vrot.lane.b32.xlu0 %v4093_v39, %s3732_s20 }
  0xd5   : > { %674 = vrot.lane.b32.xlu1 %v4097_v42, %s3732_s20 }
  0xd6   : > { %676 = vrot.lane.b32.xlu2 %v4105_v44, %s3732_s20 }
  0xdc   : > { %712 = vrot.lane.b32.xlu0 %v4056_v60, %s3733_s15 }
  0xdd   : > { %714 = vrot.lane.b32.xlu1 %v4081_v24, %s3733_s15 }
  0xde   : > { %716 = vrot.lane.b32.xlu2 %v4054_v59, %s3733_s15 }
  0xe4   : > { %718 = vrot.lane.b32.xlu0 %v4079_v23, %s3733_s15 }
  0xe5   : > { %720 = vrot.lane.b32.xlu1 %v4070_v15, %s3733_s15 }
  0xe6   : > { %722 = vrot.lane.b32.xlu2 %v4083_v30, %s3733_s15 }
  0xe8   : > { %v4161_v45 = vpop.permute.xlu2 %558 }
  0xec   : > { %724 = vrot.lane.b32.xlu0 %v4095_v40, %s3733_s15 }
  0xed   : > { %726 = vrot.lane.b32.xlu1 %v4093_v39, %s3733_s15 }
  0xee   : > { %728 = vrot.lane.b32.xlu2 %v4097_v42, %s3733_s15 }
  0xf0   : > { %v4169_v47 = vpop.permute.xlu2 %560 }
  0xf4   : > { %730 = vrot.lane.b32.xlu0 %v4105_v44, %s3733_s15 }
  0xf5   : > { %766 = vrot.lane.b32.xlu1 %v4056_v60, %s3734_s21 }
  0xf6   : > { %768 = vrot.lane.b32.xlu2 %v4081_v24, %s3734_s21 }
  0xf8   : > { %v4177_v48 = vpop.permute.xlu2 %566 }
  0xfc   : > { %770 = vrot.lane.b32.xlu0 %v4054_v59, %s3734_s21 }
  0xfd   : > { %772 = vrot.lane.b32.xlu1 %v4079_v23, %s3734_s21 }
  0xfe   : > { %v4185_v51 = vpop.permute.xlu0 %550  ;;  %774 = vrot.lane.b32.xlu2 %v4070_v15, %s3734_s21 }
  0xff   : > { %v4183_v50 = vpop.permute.xlu1 %554 }
 0x100   : > { %v4189_v52 = vpop.permute.xlu2 %606 }
 0x104   : > { %776 = vrot.lane.b32.xlu0 %v4083_v30, %s3734_s21 }
 0x105   : > { %778 = vrot.lane.b32.xlu1 %v4095_v40, %s3734_s21 }
 0x106   : > { %v4197_v54 = vpop.permute.xlu0 %552  ;;  %780 = vrot.lane.b32.xlu2 %v4093_v39, %s3734_s21 }
 0x107   : > { %v4195_v53 = vpop.permute.xlu1 %556 }
 0x108   : > { %v4201_v55 = vpop.permute.xlu2 %612 }
 0x10c   : > { %782 = vrot.lane.b32.xlu0 %v4097_v42, %s3734_s21 }
 0x10d   : > { %784 = vrot.lane.b32.xlu1 %v4105_v44, %s3734_s21 }
 0x10e   : > { %v4209_v57 = vpop.permute.xlu0 %562  ;;  %820 = vrot.lane.b32.xlu2 %v4056_v60, %s3735_s18 }
 0x10f   : > { %v4207_v56 = vpop.permute.xlu1 %564 }
 0x110   : > { %v4213_v58 = vpop.permute.xlu2 %618 }
 0x114   : > { %822 = vrot.lane.b32.xlu0 %v4081_v24, %s3735_s18 }
 0x115   : > { %824 = vrot.lane.b32.xlu1 %v4054_v59, %s3735_s18 }
 0x116   : > { %v4221_v62 = vpop.permute.xlu0 %568  ;;  %826 = vrot.lane.b32.xlu2 %v4079_v23, %s3735_s18 }
 0x117   : > { %v4219_v61 = vpop.permute.xlu1 %604 }
 0x118   : > { %v4225_v63 = vpop.permute.xlu2 %658 }
 0x11c   : > { %828 = vrot.lane.b32.xlu0 %v4070_v15, %s3735_s18 }
 0x11d   : > { %830 = vrot.lane.b32.xlu1 %v4083_v30, %s3735_s18 }
 0x11e   : > { %v4233_v3 = vpop.permute.xlu0 %608  ;;  %832 = vrot.lane.b32.xlu2 %v4095_v40, %s3735_s18 }
 0x11f   : > { %v4231_v0 = vpop.permute.xlu1 %610 }
 0x120   : > { %v4237_v7 = vpop.permute.xlu2 %664 }
 0x121   : > { %7014 = vst [vmem:[#allocation35_spill] sm:$0xff] %v4237_v7 }
 0x124   : > { %834 = vrot.lane.b32.xlu0 %v4093_v39, %s3735_s18 }
 0x125   : > { %836 = vrot.lane.b32.xlu1 %v4097_v42, %s3735_s18 }
 0x126   : > { %v4245_v10 = vpop.permute.xlu0 %614  ;;  %838 = vrot.lane.b32.xlu2 %v4105_v44, %s3735_s18 }
 0x127   : > { %v4243_v9 = vpop.permute.xlu1 %616 }
 0x128   : > { %v4249_v11 = vpop.permute.xlu2 %670 }
 0x129   : > { %7015 = vst [vmem:[#allocation36_spill] sm:$0xff] %v4249_v11  ;;  %v1118_v11 = vld [vmem:[#allocation10 + $0x90] sm:$0xff] }
 0x12c   : > { %874 = vrot.lane.b32.xlu0 %v4056_v60, %s3736_s22 }
 0x12d   : > { %876 = vrot.lane.b32.xlu1 %v4081_v24, %s3736_s22 }
 0x12e   : > { %v4257_v19 = vpop.permute.xlu0 %620  ;;  %878 = vrot.lane.b32.xlu2 %v4054_v59, %s3736_s22 }
 0x12f   : > { %v4255_v17 = vpop.permute.xlu1 %622 }
 0x130   : > { %v4261_v20 = vpop.permute.xlu2 %676 }
 0x131   : > { %7016 = vst [vmem:[#allocation37_spill] sm:$0xff] %v4261_v20 }
 0x134   : > { %880 = vrot.lane.b32.xlu0 %v4079_v23, %s3736_s22 }
 0x135   : > { %882 = vrot.lane.b32.xlu1 %v4070_v15, %s3736_s22 }
 0x136   : > { %v4269_v25 = vpop.permute.xlu0 %660  ;;  %884 = vrot.lane.b32.xlu2 %v4083_v30, %s3736_s22 }
 0x137   : > { %v4267_v21 = vpop.permute.xlu1 %662  ;;  %7017 = vst [vmem:[#allocation38_spill] sm:$0xff] %v4269_v25 }
 0x138   : > { %v4273_v26 = vpop.permute.xlu2 %716 }
 0x139   : > { %7018 = vst [vmem:[#allocation39_spill] sm:$0xff] %v4273_v26  ;;  %v1116_v26 = vld [vmem:[#allocation10 + $0x80] sm:$0xff] }
 0x13c   : > { %886 = vrot.lane.b32.xlu0 %v4095_v40, %s3736_s22 }
 0x13d   : > { %888 = vrot.lane.b32.xlu1 %v4093_v39, %s3736_s22 }
 0x13e   : > { %v4281_v28 = vpop.permute.xlu0 %666  ;;  %890 = vrot.lane.b32.xlu2 %v4097_v42, %s3736_s22 }
 0x13f   : > { %v4279_v27 = vpop.permute.xlu1 %668 }
 0x140   : > { %7019 = vst [vmem:[#allocation40_spill] sm:$0xff] %v4279_v27  ;;  %v4285_v32 = vpop.permute.xlu2 %722  ;;  %v1112_v27 = vld [vmem:[#allocation10 + $0x60] sm:$0xff] }
 0x141   : > { %7020 = vst [vmem:[#allocation41_spill] sm:$0xff] %v4285_v32 }
 0x144   : > { %892 = vrot.lane.b32.xlu0 %v4105_v44, %s3736_s22 }
 0x145   : > { %928 = vrot.lane.b32.xlu1 %v4056_v60, %s3737_s19 }
 0x146   : > { %v4293_v35 = vpop.permute.xlu0 %672  ;;  %930 = vrot.lane.b32.xlu2 %v4081_v24, %s3737_s19 }
 0x147   : > { %v4291_v34 = vpop.permute.xlu1 %674  ;;  %7022 = vst [vmem:[#allocation43_spill] sm:$0xff] %v4293_v35  ;;  %v1091_v35 = vld [vmem:[#allocation9 + $0x58] sm:$0xff] }
 0x148   : > { %7021 = vst [vmem:[#allocation42_spill] sm:$0xff] %v4291_v34  ;;  %v4297_v36 = vpop.permute.xlu2 %728 }
 0x149   : > { %7023 = vst [vmem:[#allocation44_spill] sm:$0xff] %v4297_v36  ;;  %v1110_v36 = vld [vmem:[#allocation10 + $0x50] sm:$0xff] }
 0x14c   : > { %932 = vrot.lane.b32.xlu0 %v4054_v59, %s3737_s19 }
 0x14d   : > { %934 = vrot.lane.b32.xlu1 %v4079_v23, %s3737_s19 }
 0x14e   : > { %v4305_v38 = vpop.permute.xlu0 %712  ;;  %936 = vrot.lane.b32.xlu2 %v4070_v15, %s3737_s19 }
 0x14f   : > { %v4303_v37 = vpop.permute.xlu1 %714  ;;  %7025 = vst [vmem:[#allocation46_spill] sm:$0xff] %v4305_v38  ;;  %v1096_v38 = vld [vmem:[#allocation9 + $0x80] sm:$0xff] }
 0x150   : > { %7024 = vst [vmem:[#allocation45_spill] sm:$0xff] %v4303_v37  ;;  %v4309_v41 = vpop.permute.xlu2 %768 }
 0x151   : > { %7026 = vst [vmem:[#allocation47_spill] sm:$0xff] %v4309_v41 }
 0x154   : > { %938 = vrot.lane.b32.xlu0 %v4083_v30, %s3737_s19 }
 0x155   : > { %940 = vrot.lane.b32.xlu1 %v4095_v40, %s3737_s19 }
 0x156   : > { %v4317_v13 = vpop.permute.xlu0 %718  ;;  %942 = vrot.lane.b32.xlu2 %v4093_v39, %s3737_s19 }
 0x157   : > { %v4315_v43 = vpop.permute.xlu1 %720  ;;  %7028 = vst [vmem:[#allocation49_spill] sm:$0xff] %v4317_v13 }
 0x158   : > { %7027 = vst [vmem:[#allocation48_spill] sm:$0xff] %v4315_v43  ;;  %v4321_v1 = vpop.permute.xlu2 %774 }
 0x159   : > { %7029 = vst [vmem:[#allocation50_spill] sm:$0xff] %v4321_v1 }
 0x15c   : > { %944 = vrot.lane.b32.xlu0 %v4097_v42, %s3737_s19 }
 0x15d   : > { %946 = vrot.lane.b32.xlu1 %v4105_v44, %s3737_s19 }
 0x15e   : > { %v4329_v8 = vpop.permute.xlu0 %724  ;;  %982 = vrot.lane.b32.xlu2 %v4056_v60, %s3738_s10 }
 0x15f   : > { %v4327_v12 = vpop.permute.xlu1 %726  ;;  %7031 = vst [vmem:[#allocation52_spill] sm:$0xff] %v4329_v8 }
 0x160   : > { %7030 = vst [vmem:[#allocation51_spill] sm:$0xff] %v4327_v12  ;;  %v4333_v41 = vpop.permute.xlu2 %780 }
 0x161   : > { %7032 = vst [vmem:[#allocation53_spill] sm:$0xff] %v4333_v41 }
 0x164   : > { %984 = vrot.lane.b32.xlu0 %v4081_v24, %s3738_s10 }
 0x165   : > { %986 = vrot.lane.b32.xlu1 %v4054_v59, %s3738_s10 }
 0x166   : > { %v4341_v1 = vpop.permute.xlu0 %730  ;;  %988 = vrot.lane.b32.xlu2 %v4079_v23, %s3738_s10 }
 0x167   : > { %v4339_v6 = vpop.permute.xlu1 %766  ;;  %7034 = vst [vmem:[#allocation55_spill] sm:$0xff] %v4341_v1 }
 0x168   : > { %7033 = vst [vmem:[#allocation54_spill] sm:$0xff] %v4339_v6  ;;  %v4345_v12 = vpop.permute.xlu2 %820 }
 0x169   : > { %7035 = vst [vmem:[#allocation56_spill] sm:$0xff] %v4345_v12 }
 0x16c   : > { %990 = vrot.lane.b32.xlu0 %v4070_v15, %s3738_s10 }
 0x16d   : > { %992 = vrot.lane.b32.xlu1 %v4083_v30, %s3738_s10 }
 0x16e   : > { %v4353_v32 = vpop.permute.xlu0 %770  ;;  %994 = vrot.lane.b32.xlu2 %v4095_v40, %s3738_s10 }
 0x16f   : > { %v4351_v41 = vpop.permute.xlu1 %772  ;;  %7037 = vst [vmem:[#allocation58_spill] sm:$0xff] %v4353_v32 }
 0x170   : > { %7036 = vst [vmem:[#allocation57_spill] sm:$0xff] %v4351_v41  ;;  %v4357_v6 = vpop.permute.xlu2 %826 }
 0x171   : > { %7038 = vst [vmem:[#allocation59_spill] sm:$0xff] %v4357_v6 }
 0x174   : > { %996 = vrot.lane.b32.xlu0 %v4093_v39, %s3738_s10 }
 0x175   : > { %998 = vrot.lane.b32.xlu1 %v4097_v42, %s3738_s10 }
 0x176   : > { %v4365_v1 = vpop.permute.xlu0 %776  ;;  %1000 = vrot.lane.b32.xlu2 %v4105_v44, %s3738_s10 }
 0x177   : > { %v4363_v12 = vpop.permute.xlu1 %778  ;;  %7040 = vst [vmem:[#allocation61_spill] sm:$0xff] %v4365_v1 }
 0x178   : > { %7039 = vst [vmem:[#allocation60_spill] sm:$0xff] %v4363_v12  ;;  %v4369_v41 = vpop.permute.xlu2 %832  ;;  %v1090_v12 = vld [vmem:[#allocation9 + $0x50] sm:$0xff] }
 0x179   : > { %7041 = vst [vmem:[#allocation62_spill] sm:$0xff] %v4369_v41  ;;  %v1115_v41 = vld [vmem:[#allocation10 + $0x78] sm:$0xff]  ;;  %v1100_v8 = vmul.f32 %v1090_v12, %v4033_v31 }
 0x17a   : > { %v1125_v13 = vmul.f32 %v4020_v14, %v1115_v41  ;;  %v1111_v12 = vld [vmem:[#allocation10 + $0x58] sm:$0xff]  ;;  %v1122_v41 = vmul.f32 %v4026_v22, %v1112_v27 }
 0x17c   : > { %1036 = vrot.lane.b32.xlu0 %v4056_v60, %s3739_s5 }
 0x17d   : > { %1038 = vrot.lane.b32.xlu1 %v4081_v24, %s3739_s5 }
 0x17e   : > { %v4377_v32 = vpop.permute.xlu0 %782  ;;  %1040 = vrot.lane.b32.xlu2 %v4054_v59, %s3739_s5 }
 0x17f   : > { %v4375_v6 = vpop.permute.xlu1 %784  ;;  %7043 = vst [vmem:[#allocation64_spill] sm:$0xff] %v4377_v32 }
 0x180   : > { %7042 = vst [vmem:[#allocation63_spill] sm:$0xff] %v4375_v6  ;;  %v4381_v1 = vpop.permute.xlu2 %838  ;;  %v1120_v6 = vmul.f32 %v4020_v14, %v1110_v36  ;;  %v1106_v36 = vmul.f32 %v1096_v38, %v4030_v29  ;;  %v1121_v14 = vmul.f32 %v4023_v16, %v1111_v12  ;;  %v1117_v12 = vld [vmem:[#allocation10 + $0x88] sm:$0xff] }
 0x181   : > { %7044 = vst [vmem:[#allocation65_spill] sm:$0xff] %v4381_v1  ;;  %v1105_v1 = vmul.f32 %v1095_v4, %v4033_v31 }
 0x182   : > { %v1130_v43 = vadd.f32 %v1120_v6, %v1100_v8  ;;  %v1126_v6 = vmul.f32 %v4023_v16, %v1116_v26  ;;  %v1101_v8 = vmul.f32 %v1091_v35, %v4030_v29  ;;  %v1093_v29 = vld [vmem:[#allocation9 + $0x68] sm:$0xff] }
 0x183   : > { %v1135_v34 = vadd.f32 %v1125_v13, %v1105_v1  ;;  %v1113_v16 = vld [vmem:[#allocation10 + $0x68] sm:$0xff] }
 0x184   : > { %1042 = vrot.lane.b32.xlu0 %v4079_v23, %s3739_s5  ;;  %v1140_v4 = vmul.f32 0.1, %v1130_v43  ;;  %v1131_v26 = vadd.f32 %v1121_v14, %v1101_v8  ;;  %v1097_v35 = vld [vmem:[#allocation9 + $0x88] sm:$0xff]  ;;  %v1123_v7 = vmul.f32 %v4048_v46, %v1113_v16  ;;  %v1119_v16 = vld [vmem:[#allocation10 + $0x98] sm:$0xff] }
 0x185   : > { %1044 = vrot.lane.b32.xlu1 %v4070_v15, %s3739_s5  ;;  %v1145_v13 = vmul.f32 0.1, %v1135_v34 }
 0x186   : > { %v4391_v37 = vpop.permute.xlu0 %822  ;;  %1046 = vrot.lane.b32.xlu2 %v4083_v30, %s3739_s5 }
 0x187   : > { %v4389_v32 = vpop.permute.xlu1 %824  ;;  %7046 = vst [vmem:[#allocation67_spill] sm:$0xff] %v4391_v37  ;;  %v1136_v37 = vadd.f32 %v1126_v6, %v1106_v36  ;;  %v1107_v36 = vmul.f32 %v1097_v35, %v4035_v33  ;;  %v1094_v35 = vld [vmem:[#allocation9 + $0x70] sm:$0xff] }
 0x188   : > { %7045 = vst [vmem:[#allocation66_spill] sm:$0xff] %v4389_v32  ;;  %v4397_v20 = vpop.permute.xlu2 %878  ;;  %v1092_v32 = vld [vmem:[#allocation9 + $0x60] sm:$0xff] }
 0x189   : > { %7047 = vst [vmem:[#allocation68_spill] sm:$0xff] %v4397_v20  ;;  %v1102_v38 = vmul.f32 %v1092_v32, %v4035_v33  ;;  %v4415_v20 = vmax.f32 %v1130_v43, %v1140_v4  ;;  %v1098_v32 = vld [vmem:[#allocation9 + $0x90] sm:$0xff]  ;;  %v1146_v27 = vmul.f32 0.1, %v1136_v37  ;;  %v1141_v43 = vmul.f32 0.1, %v1131_v26 }
 0x18a   : > { %v1108_v14 = vmul.f32 %v1098_v32, %v4050_v49 }
 0x18c   : > { %1048 = vrot.lane.b32.xlu0 %v4095_v40, %s3739_s5 }
 0x18d   : > { %1050 = vrot.lane.b32.xlu1 %v4093_v39, %s3739_s5 }
 0x18e   : > { %v4409_v1 = vpop.permute.xlu0 %828  ;;  %1052 = vrot.lane.b32.xlu2 %v4097_v42, %s3739_s5  ;;  %v1103_v42 = vmul.f32 %v1093_v29, %v4050_v49 }
 0x18f   : > { %v4407_v31 = vpop.permute.xlu1 %830  ;;  %7049 = vst [vmem:[#allocation70_spill] sm:$0xff] %v4409_v1  ;;  %v1132_v1 = vadd.f32 %v1122_v41, %v1102_v38  ;;  %v4439_v41 = vmax.f32 %v1131_v26, %v1141_v43 }
 0x190   : > { %7048 = vst [vmem:[#allocation69_spill] sm:$0xff] %v4407_v31  ;;  %v4417_v25 = vpop.permute.xlu2 %884  ;;  %v4419_v31 = vmax.f32 %v1135_v34, %v1145_v13  ;;  %v1127_v34 = vmul.f32 %v4026_v22, %v1117_v12  ;;  %v1128_v13 = vmul.f32 %v4048_v46, %v1118_v11  ;;  %v1133_v38 = vadd.f32 %v1123_v7, %v1103_v42  ;;  %v1099_v22 = vld [vmem:[#allocation9 + $0x98] sm:$0xff]  ;;  %v1114_v12 = vld [vmem:[#allocation10 + $0x70] sm:$0xff] }
 0x191   : > { %7050 = vst [vmem:[#allocation71_spill] sm:$0xff] %v4417_v25  ;;  %v1142_v8 = vmul.f32 0.1, %v1132_v1  ;;  %v1109_v49 = vmul.f32 %v1099_v22, %v4064_v5  ;;  %v1129_v7 = vmul.f32 %v4073_v18, %v1119_v16  ;;  %v1104_v11 = vmul.f32 %v1094_v35, %v4064_v5 }
 0x192   : > { %v1137_v33 = vadd.f32 %v1127_v34, %v1107_v36 }
 0x193   : > { %v4443_v25 = vmax.f32 %v1132_v1, %v1142_v8  ;;  %v1139_v43 = vadd.f32 %v1129_v7, %v1109_v49 }
 0x194   : > { %1054 = vrot.lane.b32.xlu0 %v4105_v44, %s3739_s5  ;;  %v4437_v44 = vmax.f32 %v1136_v37, %v1146_v27  ;;  %v1147_v46 = vmul.f32 0.1, %v1137_v33  ;;  %v1124_v37 = vmul.f32 %v4073_v18, %v1114_v12 }
 0x195   : > { %1184 = vrot.lane.b32.xlu1 %v4415_v20, %s3730_s9  ;;  %v1149_v5 = vmul.f32 0.1, %v1139_v43 }
 0x196   : > { %v4431_v6 = vpop.permute.xlu0 %834  ;;  %1186 = vrot.lane.b32.xlu2 %v4419_v31, %s3730_s9  ;;  %v4461_v27 = vmax.f32 %v1137_v33, %v1147_v46  ;;  %v1134_v36 = vadd.f32 %v1124_v37, %v1104_v11 }
 0x197   : > { %v4429_v4 = vpop.permute.xlu1 %836  ;;  %7052 = vst [vmem:[#allocation73_spill] sm:$0xff] %v4431_v6  ;;  %v1138_v6 = vadd.f32 %v1128_v13, %v1108_v14  ;;  %v4477_v13 = vmax.f32 %v1139_v43, %v1149_v5 }
 0x198   : > { %7051 = vst [vmem:[#allocation72_spill] sm:$0xff] %v4429_v4  ;;  %v4441_v29 = vpop.permute.xlu2 %890  ;;  %v1143_v4 = vmul.f32 0.1, %v1133_v38  ;;  %v1144_v18 = vmul.f32 0.1, %v1134_v36 }
 0x199   : > { %7053 = vst [vmem:[#allocation74_spill] sm:$0xff] %v4441_v29  ;;  %v1148_v42 = vmul.f32 0.1, %v1138_v6  ;;  %v580_v29 = vld [vmem:[#allocation12 + $0x80] sm:$0xff] }
 0x19a   : > { %v4459_v32 = vmax.f32 %v1133_v38, %v1143_v4  ;;  %v4479_v38 = vmax.f32 %v1134_v36, %v1144_v18 }
 0x19b   : > { %v4465_v8 = vmax.f32 %v1138_v6, %v1148_v42 }
 0x19c   : > { %1188 = vrot.lane.b32.xlu0 %v4439_v41, %s3730_s9 }
 0x19d   : > { %1190 = vrot.lane.b32.xlu1 %v4437_v44, %s3730_s9 }
 0x19e   : > { %v4455_v1 = vpop.permute.xlu0 %874  ;;  %1192 = vrot.lane.b32.xlu2 %v4443_v25, %s3730_s9 }
 0x19f   : > { %v4453_v26 = vpop.permute.xlu1 %876 }
 0x1a0   : > { %v4463_v34 = vpop.permute.xlu2 %930 }
 0x1a1   : > { %7054 = vst [vmem:[#allocation75_spill] sm:$0xff] %v4463_v34 }
 0x1a4   : > { %1194 = vrot.lane.b32.xlu0 %v4461_v27, %s3730_s9 }
 0x1a5   : > { %1196 = vrot.lane.b32.xlu1 %v4459_v32, %s3730_s9 }
 0x1a6   : > { %v4473_v4 = vpop.permute.xlu0 %880  ;;  %1198 = vrot.lane.b32.xlu2 %v4465_v8, %s3730_s9 }
 0x1a7   : > { %v4471_v14 = vpop.permute.xlu1 %882 }
 0x1a8   : > { %v4481_v6 = vpop.permute.xlu2 %936 }
 0x1a9   : > { %7055 = vst [vmem:[#allocation76_spill] sm:$0xff] %v4481_v6  ;;  %v533_v6 = vld [vmem:[#allocation12 + $0x38] sm:$0xff] }
 0x1ac   : > { %1200 = vrot.lane.b32.xlu0 %v4479_v38, %s3730_s9 }
 0x1ad   : > { %1202 = vrot.lane.b32.xlu1 %v4477_v13, %s3730_s9 }
 0x1ae   : > { %v4489_v22 = vpop.permute.xlu0 %886  ;;  %1236 = vrot.lane.b32.xlu2 %v4415_v20, %s3731_s24 }
 0x1af   : > { %v4487_v33 = vpop.permute.xlu1 %888 }
 0x1b0   : > { %7056 = vst [vmem:[#allocation77_spill] sm:$0xff] %v4487_v33  ;;  %v4493_v16 = vpop.permute.xlu2 %942  ;;  %v581_v33 = vld [vmem:[#allocation12 + $0x88] sm:$0xff] }
 0x1b1   : > { %7057 = vst [vmem:[#allocation78_spill] sm:$0xff] %v4493_v16 }
 0x1b4   : > { %1238 = vrot.lane.b32.xlu0 %v4419_v31, %s3731_s24 }
 0x1b5   : > { %1240 = vrot.lane.b32.xlu1 %v4439_v41, %s3731_s24 }
 0x1b6   : > { %v4501_v12 = vpop.permute.xlu0 %892  ;;  %1242 = vrot.lane.b32.xlu2 %v4437_v44, %s3731_s24 }
 0x1b7   : > { %v4499_v35 = vpop.permute.xlu1 %928  ;;  %7058 = vst [vmem:[#allocation79_spill] sm:$0xff] %v4501_v12  ;;  %v532_v12 = vld [vmem:[#allocation12 + $0x30] sm:$0xff] }
 0x1b8   : > { %v4505_v49 = vpop.permute.xlu2 %982 }
 0x1b9   : > { %7059 = vst [vmem:[#allocation80_spill] sm:$0xff] %v4505_v49 }
 0x1bc   : > { %1244 = vrot.lane.b32.xlu0 %v4443_v25, %s3731_s24 }
 0x1bd   : > { %1246 = vrot.lane.b32.xlu1 %v4461_v27, %s3731_s24 }
 0x1be   : > { %v4513_v7 = vpop.permute.xlu0 %932  ;;  %1248 = vrot.lane.b32.xlu2 %v4459_v32, %s3731_s24 }
 0x1bf   : > { %v4511_v46 = vpop.permute.xlu1 %934 }
 0x1c0   : > { %7060 = vst [vmem:[#allocation81_spill] sm:$0xff] %v4511_v46  ;;  %v4517_v11 = vpop.permute.xlu2 %988 }
 0x1c1   : > { %7061 = vst [vmem:[#allocation82_spill] sm:$0xff] %v4517_v11 }
 0x1c4   : > { %1250 = vrot.lane.b32.xlu0 %v4465_v8, %s3731_s24 }
 0x1c5   : > { %1252 = vrot.lane.b32.xlu1 %v4479_v38, %s3731_s24 }
 0x1c6   : > { %v4525_v42 = vpop.permute.xlu0 %938  ;;  %1254 = vrot.lane.b32.xlu2 %v4477_v13, %s3731_s24 }
 0x1c7   : > { %v4523_v37 = vpop.permute.xlu1 %940  ;;  %7063 = vst [vmem:[#allocation84_spill] sm:$0xff] %v4525_v42 }
 0x1c8   : > { %7062 = vst [vmem:[#allocation83_spill] sm:$0xff] %v4523_v37  ;;  %v4529_v43 = vpop.permute.xlu2 %994 }
 0x1c9   : > { %7064 = vst [vmem:[#allocation85_spill] sm:$0xff] %v4529_v43 }
 0x1cc   : > { %1288 = vrot.lane.b32.xlu0 %v4415_v20, %s3732_s20 }
 0x1cd   : > { %1290 = vrot.lane.b32.xlu1 %v4419_v31, %s3732_s20 }
 0x1ce   : > { %v4537_v5 = vpop.permute.xlu0 %944  ;;  %1292 = vrot.lane.b32.xlu2 %v4439_v41, %s3732_s20 }
 0x1cf   : > { %v4535_v36 = vpop.permute.xlu1 %946  ;;  %7066 = vst [vmem:[#allocation87_spill] sm:$0xff] %v4537_v5 }
 0x1d0   : > { %7065 = vst [vmem:[#allocation86_spill] sm:$0xff] %v4535_v36  ;;  %v4541_v18 = vpop.permute.xlu2 %1000 }
 0x1d1   : > { %7067 = vst [vmem:[#allocation88_spill] sm:$0xff] %v4541_v18 }
 0x1d4   : > { %1294 = vrot.lane.b32.xlu0 %v4437_v44, %s3732_s20 }
 0x1d5   : > { %1296 = vrot.lane.b32.xlu1 %v4443_v25, %s3732_s20 }
 0x1d6   : > { %v4549_v43 = vpop.permute.xlu0 %984  ;;  %1298 = vrot.lane.b32.xlu2 %v4461_v27, %s3732_s20 }
 0x1d7   : > { %v4547_v11 = vpop.permute.xlu1 %986  ;;  %7069 = vst [vmem:[#allocation90_spill] sm:$0xff] %v4549_v43 }
 0x1d8   : > { %7068 = vst [vmem:[#allocation89_spill] sm:$0xff] %v4547_v11  ;;  %v4553_v36 = vpop.permute.xlu2 %1040 }
 0x1d9   : > { %7070 = vst [vmem:[#allocation91_spill] sm:$0xff] %v4553_v36 }
 0x1dc   : > { %1300 = vrot.lane.b32.xlu0 %v4459_v32, %s3732_s20 }
 0x1dd   : > { %1302 = vrot.lane.b32.xlu1 %v4465_v8, %s3732_s20 }
 0x1de   : > { %v4561_v16 = vpop.permute.xlu0 %990  ;;  %1304 = vrot.lane.b32.xlu2 %v4479_v38, %s3732_s20 }
 0x1df   : > { %v4559_v18 = vpop.permute.xlu1 %992  ;;  %7072 = vst [vmem:[#allocation93_spill] sm:$0xff] %v4561_v16 }
 0x1e0   : > { %7071 = vst [vmem:[#allocation92_spill] sm:$0xff] %v4559_v18  ;;  %v4565_v49 = vpop.permute.xlu2 %1046 }
 0x1e1   : > { %7073 = vst [vmem:[#allocation94_spill] sm:$0xff] %v4565_v49 }
 0x1e4   : > { %1306 = vrot.lane.b32.xlu0 %v4477_v13, %s3732_s20 }
 0x1e5   : > { %1340 = vrot.lane.b32.xlu1 %v4415_v20, %s3733_s15 }
 0x1e6   : > { %v4573_v43 = vpop.permute.xlu0 %996  ;;  %1342 = vrot.lane.b32.xlu2 %v4419_v31, %s3733_s15 }
 0x1e7   : > { %v4571_v36 = vpop.permute.xlu1 %998  ;;  %7075 = vst [vmem:[#allocation96_spill] sm:$0xff] %v4573_v43 }
 0x1e8   : > { %7074 = vst [vmem:[#allocation95_spill] sm:$0xff] %v4571_v36  ;;  %v4577_v18 = vpop.permute.xlu2 %1052 }
 0x1e9   : > { %7076 = vst [vmem:[#allocation97_spill] sm:$0xff] %v4577_v18 }
 0x1ec   : > { %1344 = vrot.lane.b32.xlu0 %v4439_v41, %s3733_s15 }
 0x1ed   : > { %1346 = vrot.lane.b32.xlu1 %v4437_v44, %s3733_s15 }
 0x1ee   : > { %v4585_v16 = vpop.permute.xlu0 %1036  ;;  %1348 = vrot.lane.b32.xlu2 %v4443_v25, %s3733_s15 }
 0x1ef   : > { %v4583_v49 = vpop.permute.xlu1 %1038  ;;  %7078 = vst [vmem:[#allocation99_spill] sm:$0xff] %v4585_v16 }
 0x1f0   : > { %7077 = vst [vmem:[#allocation98_spill] sm:$0xff] %v4583_v49  ;;  %v4589_v36 = vpop.permute.xlu2 %1186 }
 0x1f1   : > { %7079 = vst [vmem:[#allocation100_spill] sm:$0xff] %v4589_v36 }
 0x1f4   : > { %1350 = vrot.lane.b32.xlu0 %v4461_v27, %s3733_s15 }
 0x1f5   : > { %1352 = vrot.lane.b32.xlu1 %v4459_v32, %s3733_s15 }
 0x1f6   : > { %v4597_v43 = vpop.permute.xlu0 %1042  ;;  %1354 = vrot.lane.b32.xlu2 %v4465_v8, %s3733_s15 }
 0x1f7   : > { %v4595_v18 = vpop.permute.xlu1 %1044  ;;  %7081 = vst [vmem:[#allocation102_spill] sm:$0xff] %v4597_v43 }
 0x1f8   : > { %7080 = vst [vmem:[#allocation101_spill] sm:$0xff] %v4595_v18  ;;  %v4601_v49 = vpop.permute.xlu2 %1192 }
 0x1f9   : > { %7082 = vst [vmem:[#allocation103_spill] sm:$0xff] %v4601_v49 }
 0x1fc   : > { %1356 = vrot.lane.b32.xlu0 %v4479_v38, %s3733_s15 }
 0x1fd   : > { %1358 = vrot.lane.b32.xlu1 %v4477_v13, %s3733_s15 }
 0x1fe   : > { %v4609_v16 = vpop.permute.xlu0 %1048  ;;  %1392 = vrot.lane.b32.xlu2 %v4415_v20, %s3734_s21 }
 0x1ff   : > { %v4607_v36 = vpop.permute.xlu1 %1050  ;;  %7084 = vst [vmem:[#allocation105_spill] sm:$0xff] %v4609_v16 }
 0x200   : > { %7083 = vst [vmem:[#allocation104_spill] sm:$0xff] %v4607_v36  ;;  %v4613_v18 = vpop.permute.xlu2 %1198 }
 0x201   : > { %7085 = vst [vmem:[#allocation106_spill] sm:$0xff] %v4613_v18 }
 0x204   : > { %1394 = vrot.lane.b32.xlu0 %v4419_v31, %s3734_s21 }
 0x205   : > { %1396 = vrot.lane.b32.xlu1 %v4439_v41, %s3734_s21 }
 0x206   : > { %v4621_v43 = vpop.permute.xlu0 %1054  ;;  %1398 = vrot.lane.b32.xlu2 %v4437_v44, %s3734_s21 }
 0x207   : > { %v4619_v49 = vpop.permute.xlu1 %1184  ;;  %7087 = vst [vmem:[#allocation108_spill] sm:$0xff] %v4621_v43 }
 0x208   : > { %7086 = vst [vmem:[#allocation107_spill] sm:$0xff] %v4619_v49  ;;  %v4625_v36 = vpop.permute.xlu2 %1236 }
 0x209   : > { %7088 = vst [vmem:[#allocation109_spill] sm:$0xff] %v4625_v36 }
 0x20c   : > { %1400 = vrot.lane.b32.xlu0 %v4443_v25, %s3734_s21 }
 0x20d   : > { %1402 = vrot.lane.b32.xlu1 %v4461_v27, %s3734_s21 }
 0x20e   : > { %v4633_v16 = vpop.permute.xlu0 %1188  ;;  %1404 = vrot.lane.b32.xlu2 %v4459_v32, %s3734_s21 }
 0x20f   : > { %v4631_v18 = vpop.permute.xlu1 %1190  ;;  %7090 = vst [vmem:[#allocation111_spill] sm:$0xff] %v4633_v16 }
 0x210   : > { %7089 = vst [vmem:[#allocation110_spill] sm:$0xff] %v4631_v18  ;;  %v4637_v49 = vpop.permute.xlu2 %1242 }
 0x211   : > { %7091 = vst [vmem:[#allocation112_spill] sm:$0xff] %v4637_v49 }
 0x214   : > { %1406 = vrot.lane.b32.xlu0 %v4465_v8, %s3734_s21 }
 0x215   : > { %1408 = vrot.lane.b32.xlu1 %v4479_v38, %s3734_s21 }
 0x216   : > { %v4645_v43 = vpop.permute.xlu0 %1194  ;;  %1410 = vrot.lane.b32.xlu2 %v4477_v13, %s3734_s21 }
 0x217   : > { %v4643_v36 = vpop.permute.xlu1 %1196  ;;  %7093 = vst [vmem:[#allocation114_spill] sm:$0xff] %v4645_v43 }
 0x218   : > { %7092 = vst [vmem:[#allocation113_spill] sm:$0xff] %v4643_v36  ;;  %v4649_v18 = vpop.permute.xlu2 %1248 }
 0x219   : > { %7094 = vst [vmem:[#allocation115_spill] sm:$0xff] %v4649_v18 }
 0x21c   : > { %1444 = vrot.lane.b32.xlu0 %v4415_v20, %s3735_s18 }
 0x21d   : > { %1446 = vrot.lane.b32.xlu1 %v4419_v31, %s3735_s18 }
 0x21e   : > { %v4657_v16 = vpop.permute.xlu0 %1200  ;;  %1448 = vrot.lane.b32.xlu2 %v4439_v41, %s3735_s18 }
 0x21f   : > { %v4655_v49 = vpop.permute.xlu1 %1202  ;;  %7096 = vst [vmem:[#allocation117_spill] sm:$0xff] %v4657_v16 }
 0x220   : > { %7095 = vst [vmem:[#allocation116_spill] sm:$0xff] %v4655_v49  ;;  %v4661_v36 = vpop.permute.xlu2 %1254 }
 0x221   : > { %7097 = vst [vmem:[#allocation118_spill] sm:$0xff] %v4661_v36 }
 0x224   : > { %1450 = vrot.lane.b32.xlu0 %v4437_v44, %s3735_s18 }
 0x225   : > { %1452 = vrot.lane.b32.xlu1 %v4443_v25, %s3735_s18 }
 0x226   : > { %v4669_v43 = vpop.permute.xlu0 %1238  ;;  %1454 = vrot.lane.b32.xlu2 %v4461_v27, %s3735_s18 }
 0x227   : > { %v4667_v18 = vpop.permute.xlu1 %1240  ;;  %7099 = vst [vmem:[#allocation120_spill] sm:$0xff] %v4669_v43 }
 0x228   : > { %7098 = vst [vmem:[#allocation119_spill] sm:$0xff] %v4667_v18  ;;  %v4673_v49 = vpop.permute.xlu2 %1292 }
 0x229   : > { %7100 = vst [vmem:[#allocation121_spill] sm:$0xff] %v4673_v49 }
 0x22c   : > { %1456 = vrot.lane.b32.xlu0 %v4459_v32, %s3735_s18 }
 0x22d   : > { %1458 = vrot.lane.b32.xlu1 %v4465_v8, %s3735_s18 }
 0x22e   : > { %v4681_v16 = vpop.permute.xlu0 %1244  ;;  %1460 = vrot.lane.b32.xlu2 %v4479_v38, %s3735_s18 }
 0x22f   : > { %v4679_v36 = vpop.permute.xlu1 %1246  ;;  %7102 = vst [vmem:[#allocation123_spill] sm:$0xff] %v4681_v16 }
 0x230   : > { %7101 = vst [vmem:[#allocation122_spill] sm:$0xff] %v4679_v36  ;;  %v4685_v18 = vpop.permute.xlu2 %1298 }
 0x231   : > { %7103 = vst [vmem:[#allocation124_spill] sm:$0xff] %v4685_v18 }
 0x234   : > { %1462 = vrot.lane.b32.xlu0 %v4477_v13, %s3735_s18 }
 0x235   : > { %1496 = vrot.lane.b32.xlu1 %v4415_v20, %s3736_s22 }
 0x236   : > { %v4693_v43 = vpop.permute.xlu0 %1250  ;;  %1498 = vrot.lane.b32.xlu2 %v4419_v31, %s3736_s22 }
 0x237   : > { %v4691_v49 = vpop.permute.xlu1 %1252  ;;  %7105 = vst [vmem:[#allocation126_spill] sm:$0xff] %v4693_v43 }
 0x238   : > { %7104 = vst [vmem:[#allocation125_spill] sm:$0xff] %v4691_v49  ;;  %v4697_v36 = vpop.permute.xlu2 %1304 }
 0x239   : > { %7106 = vst [vmem:[#allocation127_spill] sm:$0xff] %v4697_v36 }
 0x23c   : > { %1500 = vrot.lane.b32.xlu0 %v4439_v41, %s3736_s22 }
 0x23d   : > { %1502 = vrot.lane.b32.xlu1 %v4437_v44, %s3736_s22 }
 0x23e   : > { %v4705_v16 = vpop.permute.xlu0 %1288  ;;  %1504 = vrot.lane.b32.xlu2 %v4443_v25, %s3736_s22 }
 0x23f   : > { %v4703_v18 = vpop.permute.xlu1 %1290  ;;  %7108 = vst [vmem:[#allocation129_spill] sm:$0xff] %v4705_v16 }
 0x240   : > { %7107 = vst [vmem:[#allocation128_spill] sm:$0xff] %v4703_v18  ;;  %v4709_v49 = vpop.permute.xlu2 %1342 }
 0x241   : > { %7109 = vst [vmem:[#allocation130_spill] sm:$0xff] %v4709_v49 }
 0x244   : > { %1506 = vrot.lane.b32.xlu0 %v4461_v27, %s3736_s22 }
 0x245   : > { %1508 = vrot.lane.b32.xlu1 %v4459_v32, %s3736_s22 }
 0x246   : > { %v4717_v43 = vpop.permute.xlu0 %1294  ;;  %1510 = vrot.lane.b32.xlu2 %v4465_v8, %s3736_s22 }
 0x247   : > { %v4715_v36 = vpop.permute.xlu1 %1296  ;;  %7111 = vst [vmem:[#allocation132_spill] sm:$0xff] %v4717_v43 }
 0x248   : > { %7110 = vst [vmem:[#allocation131_spill] sm:$0xff] %v4715_v36  ;;  %v4721_v18 = vpop.permute.xlu2 %1348 }
 0x249   : > { %7112 = vst [vmem:[#allocation133_spill] sm:$0xff] %v4721_v18 }
 0x24c   : > { %1512 = vrot.lane.b32.xlu0 %v4479_v38, %s3736_s22 }
 0x24d   : > { %1514 = vrot.lane.b32.xlu1 %v4477_v13, %s3736_s22 }
 0x24e   : > { %v4729_v16 = vpop.permute.xlu0 %1300  ;;  %1548 = vrot.lane.b32.xlu2 %v4415_v20, %s3737_s19 }
 0x24f   : > { %v4727_v49 = vpop.permute.xlu1 %1302  ;;  %7114 = vst [vmem:[#allocation135_spill] sm:$0xff] %v4729_v16 }
 0x250   : > { %7113 = vst [vmem:[#allocation134_spill] sm:$0xff] %v4727_v49  ;;  %v4733_v36 = vpop.permute.xlu2 %1354 }
 0x251   : > { %7115 = vst [vmem:[#allocation136_spill] sm:$0xff] %v4733_v36 }
 0x254   : > { %1550 = vrot.lane.b32.xlu0 %v4419_v31, %s3737_s19 }
 0x255   : > { %1552 = vrot.lane.b32.xlu1 %v4439_v41, %s3737_s19 }
 0x256   : > { %v4741_v43 = vpop.permute.xlu0 %1306  ;;  %1554 = vrot.lane.b32.xlu2 %v4437_v44, %s3737_s19 }
 0x257   : > { %v4739_v18 = vpop.permute.xlu1 %1340  ;;  %7117 = vst [vmem:[#allocation138_spill] sm:$0xff] %v4741_v43  ;;  %v531_v43 = vld [vmem:[#allocation12 + $0x28] sm:$0xff] }
 0x258   : > { %7116 = vst [vmem:[#allocation137_spill] sm:$0xff] %v4739_v18  ;;  %v4745_v49 = vpop.permute.xlu2 %1392 }
 0x259   : > { %7118 = vst [vmem:[#allocation139_spill] sm:$0xff] %v4745_v49  ;;  %v527_v49 = vld [vmem:[#allocation12 + $0x8] sm:$0xff] }
 0x25a   : > { %v535_v46 = vmul.f32 %v527_v49, %v4054_v59  ;;  %v577_v59 = vsel %vm570_vm15, %v4185_v51, %v4183_v50 }
 0x25c   : > { %1556 = vrot.lane.b32.xlu0 %v4443_v25, %s3737_s19 }
 0x25d   : > { %1558 = vrot.lane.b32.xlu1 %v4461_v27, %s3737_s19 }
 0x25e   : > { %v4753_v16 = vpop.permute.xlu0 %1344  ;;  %1560 = vrot.lane.b32.xlu2 %v4459_v32, %s3737_s19 }
 0x25f   : > { %v4751_v36 = vpop.permute.xlu1 %1346  ;;  %7120 = vst [vmem:[#allocation141_spill] sm:$0xff] %v4753_v16  ;;  %v530_v16 = vld [vmem:[#allocation12 + $0x20] sm:$0xff] }
 0x260   : > { %7119 = vst [vmem:[#allocation140_spill] sm:$0xff] %v4751_v36  ;;  %v4757_v18 = vpop.permute.xlu2 %1398  ;;  %v526_v36 = vld [vmem:[#allocation12] sm:$0xff]  ;;  %v542_v42 = vmul.f32 %v530_v16, %v4081_v24  ;;  %v544_v24 = vmul.f32 %v532_v12, %v4083_v30  ;;  %v578_v30 = vsel %vm570_vm15, %v4197_v54, %v4195_v53  ;;  %v585_v12 = vld [vmem:[#allocation12 + $0xa8] sm:$0xff]  ;;  %v583_v54 = vld [vmem:[#allocation12 + $0x98] sm:$0xff] }
 0x261   : > { %7121 = vst [vmem:[#allocation142_spill] sm:$0xff] %v4757_v18  ;;  %v543_v18 = vmul.f32 %v531_v43, %v4079_v23  ;;  %v534_v37 = vmul.f32 %v526_v36, %v4056_v60  ;;  %v545_v43 = vmul.f32 %v533_v6, %v4093_v39  ;;  %v588_v36 = vmul.f32 %v580_v29, %v577_v59 }
 0x262   : > { %v573_v39 = vsel %vm570_vm15, %v4161_v45, %v4209_v57  ;;  %v576_v29 = vsel %vm570_vm15, %v4195_v53, %v4169_v47 }
 0x263   : > { %v547_v60 = vadd.f32 %v543_v18, %v535_v46  ;;  %v546_v16 = vadd.f32 %v542_v42, %v534_v37  ;;  %v571_v42 = vsel %vm570_vm15, %v4209_v57, %v4177_v48  ;;  %v631_v18 = vsel %vm624_vm0, %v4219_v61, %v4233_v3  ;;  %v635_v61 = vld [vmem:[#allocation12 + $0x108] sm:$0xff] }
 0x264   : > { %1562 = vrot.lane.b32.xlu0 %v4465_v8, %s3737_s19  ;;  %v572_v48 = vsel %vm570_vm15, %v4207_v56, %v4221_v62  ;;  %v591_v57 = vmul.f32 %v583_v54, %v571_v42 }
 0x265   : > { %1564 = vrot.lane.b32.xlu1 %v4479_v38, %s3737_s19  ;;  %v592_v59 = vadd.f32 %v588_v36, %v546_v16  ;;  %v636_v16 = vld [vmem:[#allocation12 + $0x110] sm:$0xff] }
 0x266   : > { %v4765_v5 = vpop.permute.xlu0 %1350  ;;  %1566 = vrot.lane.b32.xlu2 %v4477_v13, %s3737_s19 }
 0x267   : > { %v4763_v11 = vpop.permute.xlu1 %1352  ;;  %7123 = vst [vmem:[#allocation144_spill] sm:$0xff] %v4765_v5  ;;  %v529_v5 = vld [vmem:[#allocation12 + $0x18] sm:$0xff] }
 0x268   : > { %7122 = vst [vmem:[#allocation143_spill] sm:$0xff] %v4763_v11  ;;  %v4769_v34 = vpop.permute.xlu2 %1404  ;;  %v528_v11 = vld [vmem:[#allocation12 + $0x10] sm:$0xff]  ;;  %v537_v49 = vmul.f32 %v529_v5, %v4095_v40  ;;  %v634_v5 = vld [vmem:[#allocation12 + $0x100] sm:$0xff] }
 0x269   : > { %7124 = vst [vmem:[#allocation145_spill] sm:$0xff] %v4769_v34  ;;  %v575_v34 = vsel %vm570_vm15, %v4183_v50, %v4161_v45  ;;  %v536_v23 = vmul.f32 %v528_v11, %v4070_v15  ;;  %v584_v15 = vld [vmem:[#allocation12 + $0xa0] sm:$0xff]  ;;  %v582_v40 = vld [vmem:[#allocation12 + $0x90] sm:$0xff]  ;;  %v7127_v11 = vlaneseq }
 0x26a   : > { %v589_v46 = vmul.f32 %v581_v33, %v575_v34  ;;  %v397_v33 = vld [vmem:[%s3983_s6] sm:$0x1]  ;;  %v596_v37 = vmul.f32 %v584_v15, %v578_v30  ;;  %v590_v45 = vmul.f32 %v582_v40, %v573_v39  ;;  %v574_v15 = vsel %vm570_vm15, %v4169_v47, %v4207_v56  ;;  %v587_v30 = vld [vmem:[#allocation12 + $0xb8] sm:$0xff] }
 0x26b   : > { %v548_v34 = vadd.f32 %v544_v24, %v536_v23  ;;  %vm400_vm1 = vcmp.lt.s32.totalorder %v7127_v11, 128  ;;  %v549_v23 = vadd.f32 %v545_v43, %v537_v49  ;;  %v597_v24 = vmul.f32 %v585_v12, %v576_v29  ;;  %v586_v11 = vld [vmem:[#allocation12 + $0xb0] sm:$0xff]  ;;  %v637_v39 = vld [vmem:[#allocation12 + $0x118] sm:$0xff] }
 0x26c   : > { %1600 = vrot.lane.b32.xlu0 %v4415_v20, %s3738_s10  ;;  %402 = vst.msk [vmem:[#allocation2 + $0x8] sm:$0x1] %vm400_vm1, %v397_v33  ;;  %v593_v53 = vadd.f32 %v589_v46, %v547_v60  ;;  %v629_v60 = vsel %vm624_vm0, %v4233_v3, %v4201_v55  ;;  %v642_v47 = vmul.f32 %v634_v5, %v631_v18  ;;  %v639_v33 = vld [vmem:[#allocation12 + $0x128] sm:$0xff]  ;;  %v688_v5 = vld [vmem:[#allocation12 + $0x180] sm:$0xff] }
 0x26d   : > { %1602 = vrot.lane.b32.xlu1 %v4419_v31, %s3738_s10  ;;  %v627_v56 = vsel %vm624_vm0, %v4201_v55, %v4243_v9  ;;  %v600_v62 = vadd.f32 %v596_v37, %v592_v59  ;;  %v594_v49 = vadd.f32 %v590_v45, %v548_v34  ;;  %v598_v36 = vmul.f32 %v586_v11, %v574_v15  ;;  %v638_v55 = vld [vmem:[#allocation12 + $0x120] sm:$0xff]  ;;  %v689_v18 = vld [vmem:[#allocation12 + $0x188] sm:$0xff]  ;;  %v640_v15 = vld [vmem:[#allocation12 + $0x130] sm:$0xff] }
 0x26e   : > { %v4795_v51 = vpop.permute.xlu0 %1356  ;;  %1604 = vrot.lane.b32.xlu2 %v4439_v41, %s3738_s10  ;;  %v599_v40 = vmul.f32 %v587_v30, %v572_v48  ;;  %v625_v3 = vsel %vm624_vm0, %v4243_v9, %v4257_v19  ;;  %v632_v12 = vsel %vm624_vm0, %v4189_v52, %v4231_v0  ;;  %v643_v29 = vmul.f32 %v635_v61, %v629_v60 }
 0x26f   : > { %v4793_v50 = vpop.permute.xlu1 %1358  ;;  %v644_v34 = vmul.f32 %v636_v16, %v627_v56  ;;  %v630_v11 = vsel %vm624_vm0, %v4231_v0, %v4245_v10  ;;  %v601_v54 = vadd.f32 %v597_v24, %v593_v53  ;;  %v595_v9 = vadd.f32 %v591_v57, %v549_v23  ;;  %v690_v16 = vld [vmem:[#allocation12 + $0x190] sm:$0xff]  ;;  %v7130_v56 = vld [vmem:[#allocation36_spill] sm:$0xff] }
 0x270   : > { %7125 = vst [vmem:[#allocation146_spill] sm:$0xff] %v4793_v50  ;;  %v4807_v6 = vpop.permute.xlu2 %1410  ;;  %v646_v19 = vadd.f32 %v642_v47, %v600_v62  ;;  %v602_v42 = vadd.f32 %v598_v36, %v594_v49  ;;  %v645_v45 = vmul.f32 %v637_v39, %v625_v3  ;;  %v685_v52 = vsel %vm678_vm2, %v4225_v63, %v4267_v21  ;;  %v641_v63 = vld [vmem:[#allocation12 + $0x138] sm:$0xff]  ;;  %v7133_v39 = vld [vmem:[#allocation38_spill] sm:$0xff] }
 0x271   : > { %7126 = vst [vmem:[#allocation147_spill] sm:$0xff] %v4807_v6  ;;  %v683_v0 = vsel %vm678_vm2, %v4267_v21, %v4281_v28  ;;  %v650_v59 = vmul.f32 %v638_v55, %v632_v12  ;;  %v628_v53 = vsel %vm624_vm0, %v4245_v10, %v4213_v58  ;;  %v651_v23 = vmul.f32 %v639_v33, %v630_v11  ;;  %v693_v55 = vld [vmem:[#allocation12 + $0x1a8] sm:$0xff]  ;;  %v7134_v12 = vld [vmem:[#allocation40_spill] sm:$0xff]  ;;  %v800_v6 = vld [vmem:[#allocation12 + $0x2a0] sm:$0xff] }
 0x272   : > { %v603_v24 = vadd.f32 %v599_v40, %v595_v9  ;;  %v647_v30 = vadd.f32 %v643_v29, %v601_v54  ;;  %v648_v48 = vadd.f32 %v644_v34, %v602_v42  ;;  %v626_v21 = vsel %vm624_vm0, %v4213_v58, %v4255_v17  ;;  %v692_v17 = vld [vmem:[#allocation12 + $0x1a0] sm:$0xff]  ;;  %v7132_v40 = vld [vmem:[#allocation35_spill] sm:$0xff]  ;;  %v691_v29 = vld [vmem:[#allocation12 + $0x198] sm:$0xff] }
 0x273   : > { %v654_v57 = vadd.f32 %v650_v59, %v646_v19  ;;  %v696_v61 = vmul.f32 %v688_v5, %v685_v52  ;;  %v697_v60 = vmul.f32 %v689_v18, %v683_v0  ;;  %v652_v10 = vmul.f32 %v640_v15, %v628_v53  ;;  %v7135_v34 = vld [vmem:[#allocation42_spill] sm:$0xff]  ;;  %v694_v9 = vld [vmem:[#allocation12 + $0x1b0] sm:$0xff]  ;;  %v742_v59 = vld [vmem:[#allocation12 + $0x200] sm:$0xff] }
 0x274   : > { %1606 = vrot.lane.b32.xlu0 %v4437_v44, %s3738_s10  ;;  %v649_v47 = vadd.f32 %v645_v45, %v603_v24  ;;  %v681_v62 = vsel %vm678_vm2, %v4281_v28, %v7130_v56  ;;  %v655_v58 = vadd.f32 %v651_v23, %v647_v30  ;;  %v686_v3 = vsel %vm678_vm2, %v7133_v39, %v7132_v40  ;;  %v7136_v19 = vld [vmem:[#allocation43_spill] sm:$0xff]  ;;  %v7139_v53 = vld [vmem:[#allocation46_spill] sm:$0xff] }
 0x275   : > { %1608 = vrot.lane.b32.xlu1 %v4443_v25, %s3738_s10  ;;  %v684_v28 = vsel %vm678_vm2, %v7132_v40, %v7134_v12  ;;  %v679_v33 = vsel %vm678_vm2, %v7130_v56, %v7135_v34  ;;  %v656_v11 = vadd.f32 %v652_v10, %v648_v48  ;;  %v653_v54 = vmul.f32 %v641_v63, %v626_v21  ;;  %v7138_v15 = vld [vmem:[#allocation39_spill] sm:$0xff]  ;;  %v695_v21 = vld [vmem:[#allocation12 + $0x1b8] sm:$0xff]  ;;  %v7140_v10 = vld [vmem:[#allocation37_spill] sm:$0xff] }
 0x276   : > { %v4845_v46 = vpop.permute.xlu0 %1394  ;;  %1610 = vrot.lane.b32.xlu2 %v4461_v27, %s3738_s10  ;;  %v682_v42 = vsel %vm678_vm2, %v7134_v12, %v7136_v19  ;;  %v4915_v5 = vstv %s1755_s26  ;;  %v700_v52 = vadd.f32 %v696_v61, %v654_v57  ;;  %v698_v18 = vmul.f32 %v690_v16, %v681_v62  ;;  %v743_v57 = vld [vmem:[#allocation12 + $0x208] sm:$0xff]  ;;  %v7141_v61 = vld [vmem:[#allocation48_spill] sm:$0xff] }
 0x277   : > { %v4843_v43 = vpop.permute.xlu1 %1396  ;;  %7128 = vst [vmem:[#allocation148_spill] sm:$0xff] %v4845_v46  ;;  %v701_v0 = vadd.f32 %v697_v60, %v655_v58  ;;  %v739_v23 = vsel %vm732_vm3, %v7139_v53, %v7138_v15  ;;  %v704_v24 = vmul.f32 %v692_v17, %v686_v3  ;;  %v705_v30 = vmul.f32 %v693_v55, %v684_v28  ;;  %v746_v58 = vld [vmem:[#allocation12 + $0x220] sm:$0xff]  ;;  %v744_v3 = vld [vmem:[#allocation12 + $0x210] sm:$0xff]  ;;  %v7144_v55 = vld [vmem:[#allocation52_spill] sm:$0xff] }
 0x278   : > { %v4862_v37 = vpop.permute.xlu2 %1448  ;;  %v657_v48 = vadd.f32 %v653_v54, %v649_v47  ;;  %v699_v63 = vmul.f32 %v691_v29, %v679_v33  ;;  %v680_v56 = vsel %vm678_vm2, %v7136_v19, %v7140_v10  ;;  %v706_v40 = vmul.f32 %v694_v9, %v682_v42  ;;  %v7142_v47 = vld [vmem:[#allocation49_spill] sm:$0xff]  ;;  %v7145_v33 = vld [vmem:[#allocation31_spill] sm:$0xff] }
 0x279   : > { %7129 = vst [vmem:[#allocation149_spill] sm:$0xff] %v4862_v37  ;;  %v737_v60 = vsel %vm732_vm3, %v7138_v15, %v7141_v61  ;;  %v1757_v16 = vadd.s32 %v4915_v5, %v4001_v2  ;;  %v750_v62 = vmul.f32 %v742_v59, %v739_v23  ;;  %v7143_v17 = vld [vmem:[#allocation45_spill] sm:$0xff]  ;;  %v735_v12 = vsel %vm732_vm3, %v7141_v61, %v7144_v55  ;;  %v745_v59 = vld [vmem:[#allocation12 + $0x218] sm:$0xff]  ;;  %v7152_v61 = vld [vmem:[#allocation51_spill] sm:$0xff] }
 0x27a   : > { %v740_v39 = vsel %vm732_vm3, %v7143_v17, %v7142_v47  ;;  %v708_v28 = vadd.f32 %v704_v24, %v700_v52  ;;  %v702_v29 = vadd.f32 %v698_v18, %v656_v11  ;;  %v709_v34 = vadd.f32 %v705_v30, %v701_v0  ;;  %v7146_v15 = vld [vmem:[#allocation44_spill] sm:$0xff]  ;;  %v747_v24 = vld [vmem:[#allocation12 + $0x228] sm:$0xff]  ;;  %v7149_v30 = vld [vmem:[#allocation41_spill] sm:$0xff] }
 0x27b   : > { %v1758_v54 = vadd.s32 %v4915_v5, %v7145_v33  ;;  %v703_v9 = vadd.f32 %v699_v63, %v657_v48  ;;  %v707_v19 = vmul.f32 %v695_v21, %v680_v56  ;;  %v751_v42 = vmul.f32 %v743_v57, %v737_v60  ;;  %v749_v56 = vld [vmem:[#allocation12 + $0x238] sm:$0xff]  ;;  %v7151_v57 = vld [vmem:[#allocation55_spill] sm:$0xff] }
 0x27c   : > { %1612 = vrot.lane.b32.xlu0 %v4459_v32, %s3738_s10  ;;  %v733_v53 = vsel %vm732_vm3, %v7144_v55, %v7146_v15  ;;  %v758_v11 = vmul.f32 %v746_v58, %v740_v39  ;;  %v752_v52 = vmul.f32 %v744_v3, %v735_v12  ;;  %vm1762_vm4 = vcmp.ge.s32.totalorder %v1757_v16, 0  ;;  %v4966_v58 = vld [vmem:[#allocation2 + $0x4] sm:$0x1f]  ;;  %v1793_v46 = vld [vmem:[#allocation9 + $0x30] sm:$0xff] }
 0x27d   : > { %1614 = vrot.lane.b32.xlu1 %v4465_v8, %s3738_s10  ;;  %vm1767_vm5 = vcmp.lt.s32.totalorder %v1757_v16, 1600  ;;  %v710_v18 = vadd.f32 %v706_v40, %v702_v29  ;;  %v754_v0 = vadd.f32 %v750_v62, %v708_v28  ;;  %v738_v48 = vsel %vm732_vm3, %v7142_v47, %v7149_v30  ;;  %v748_v62 = vld [vmem:[#allocation12 + $0x230] sm:$0xff]  ;;  %v1787_v28 = vld [vmem:[#allocation9] sm:$0xff]  ;;  %v7156_v15 = vld [vmem:[#allocation58_spill] sm:$0xff] }
 0x27e   : > { %v4893_v36 = vpop.permute.xlu0 %1400  ;;  %1616 = vrot.lane.b32.xlu2 %v4479_v38, %s3738_s10  ;;  %v753_v21 = vmul.f32 %v745_v59, %v733_v53  ;;  %v734_v60 = vsel %vm732_vm3, %v7152_v61, %v7151_v57  ;;  %vm1763_vm7 = vcmp.ge.s32.totalorder %v1758_v54, 0  ;;  %vm1768_vm8 = vcmp.lt.s32.totalorder %v1758_v54, 1600  ;;  %vm4974_vm9 = vmand %vm1762_vm4, %vm1767_vm5  ;;  %v1818_v29 = vld [vmem:[#allocation10] sm:$0xff]  ;;  %v7155_v59 = vld [vmem:[#allocation50_spill] sm:$0xff] }
 0x27f   : > { %v4891_v49 = vpop.permute.xlu1 %1402  ;;  %v711_v40 = vadd.f32 %v707_v19, %v703_v9  ;;  %v736_v47 = vsel %vm732_vm3, %v7149_v30, %v7152_v61  ;;  %v755_v39 = vadd.f32 %v751_v42, %v709_v34  ;;  %v759_v3 = vmul.f32 %v747_v24, %v738_v48  ;;  %v796_v9 = vld [vmem:[#allocation12 + $0x280] sm:$0xff]  ;;  %v797_v19 = vld [vmem:[#allocation12 + $0x288] sm:$0xff]  ;;  %vm4992_vm10 = vmand %vm1763_vm7, %vm1768_vm8 }
 0x280   : > { %7131 = vst [vmem:[#allocation36_spill] sm:$0xff] %v4891_v49  ;;  %v4913_v45 = vpop.permute.xlu2 %1454  ;;  %v762_v55 = vadd.f32 %v758_v11, %v754_v0  ;;  %v756_v12 = vadd.f32 %v752_v52, %v710_v18  ;;  %v761_v33 = vmul.f32 %v749_v56, %v734_v60  ;;  %v791_v53 = vsel %vm786_vm6, %v7156_v15, %v7155_v59  ;;  %v7157_v16 = vld [vmem:[#allocation54_spill] sm:$0xff]  ;;  %v798_v48 = vld [vmem:[#allocation12 + $0x290] sm:$0xff]  ;;  %v7164_v56 = vld [vmem:[#allocation60_spill] sm:$0xff] }
 0x281   : > { %7137 = vst [vmem:[#allocation35_spill] sm:$0xff] %v4913_v45  ;;  %v793_v30 = vsel %vm786_vm6, %v7157_v16, %v7156_v15  ;;  %v4997_v42 = vperm.slane %v4966_v58, 0  ;;  %v760_v11 = vmul.f32 %v748_v62, %v736_v47  ;;  %v757_v52 = vadd.f32 %v753_v21, %v711_v40  ;;  %v1788_v21 = vld [vmem:[#allocation9 + $0x8] sm:$0xff]  ;;  %v7167_v60 = vld [vmem:[#allocation32_spill] sm:$0xff]  ;;  %v7172_v49 = vld [vmem:[#allocation61_spill] sm:$0xff] }
 0x282   : > { %v5000_v18 = vperm.slane %v4966_v58, 1  ;;  %v7162_v0 = vmov 0.0   ;;  %v789_v54 = vsel %vm786_vm6, %v7155_v59, %v7164_v56  ;;  %v1759_v40 = vadd.s32 %v4915_v5, %v7167_v60  ;;  %v1823_v34 = vld [vmem:[#allocation10 + $0x28] sm:$0xff] }
 0x283   : > { %7160 = vst [vmem:[#allocation43_spill] sm:$0xff] %v4997_v42  ;;  %v5005_v24 = vsel %vm4974_vm9, 1.0, %v7162_v0  ;;  %v1808_v62 = vmul.f32 %v4997_v42, %v1787_v28  ;;  %v763_v17 = vadd.f32 %v759_v3, %v755_v39  ;;  %v804_v15 = vmul.f32 %v796_v9, %v793_v30  ;;  %v7171_v28 = vld [vmem:[#allocation53_spill] sm:$0xff]  ;;  %v801_v9 = vld [vmem:[#allocation12 + $0x2a8] sm:$0xff] }
 0x284   : > { %1618 = vrot.lane.b32.xlu0 %v4477_v13, %s3738_s10  ;;  %7161 = vst [vmem:[#allocation39_spill] sm:$0xff] %v5000_v18  ;;  %v1828_v47 = vmul.f32 %v5005_v24, %v1818_v29  ;;  %v805_v16 = vmul.f32 %v797_v19, %v791_v53  ;;  %v5024_v59 = vsel %vm4992_vm10, 1.0, %v7162_v0  ;;  %v765_v45 = vadd.f32 %v761_v33, %v757_v52  ;;  %v7174_v19 = vld [vmem:[#allocation64_spill] sm:$0xff]  ;;  %v1792_v30 = vld [vmem:[#allocation9 + $0x28] sm:$0xff] }
 0x285   : > { %1652 = vrot.lane.b32.xlu1 %v4415_v20, %s3739_s5  ;;  %7163 = vst [vmem:[#allocation46_spill] sm:$0xff] %v5005_v24  ;;  %v764_v37 = vadd.f32 %v760_v11, %v756_v12  ;;  %v790_v39 = vsel %vm786_vm6, %v7172_v49, %v7171_v28  ;;  %v806_v29 = vmul.f32 %v798_v48, %v789_v54  ;;  %v802_v11 = vld [vmem:[#allocation12 + $0x2b0] sm:$0xff]  ;;  %v799_v52 = vld [vmem:[#allocation12 + $0x298] sm:$0xff]  ;;  %vm1764_vm11 = vcmp.ge.s32.totalorder %v1759_v40, 0 }
 0x286   : > { %v4951_v10 = vpop.permute.xlu0 %1406  ;;  %1654 = vrot.lane.b32.xlu2 %v4419_v31, %s3739_s5  ;;  %7168 = vst [vmem:[#allocation49_spill] sm:$0xff] %v5024_v59  ;;  %v787_v53 = vsel %vm786_vm6, %v7164_v56, %v7174_v19  ;;  %v1809_v12 = vmul.f32 %v5000_v18, %v1788_v21  ;;  %vm1769_vm12 = vcmp.lt.s32.totalorder %v1759_v40, 1600  ;;  %v1838_v48 = vadd.f32 %v1828_v47, %v1808_v62  ;;  %v7176_v62 = vld [vmem:[#allocation63_spill] sm:$0xff] }
 0x287   : > { %v4949_v23 = vpop.permute.xlu1 %1408  ;;  %7148 = vst [vmem:[#allocation40_spill] sm:$0xff] %v4951_v10  ;;  %v809_v10 = vadd.f32 %v805_v16, %v763_v17  ;;  %v814_v21 = vmul.f32 %v802_v11, %v790_v39  ;;  %v788_v47 = vsel %vm786_vm6, %v7171_v28, %v7176_v62  ;;  %v807_v17 = vmul.f32 %v799_v52, %v787_v53  ;;  %vm5061_vm14 = vmand %vm1764_vm11, %vm1769_vm12  ;;  %v803_v16 = vld [vmem:[#allocation12 + $0x2b8] sm:$0xff]  ;;  %v7185_v62 = vld [vmem:[#allocation66_spill] sm:$0xff] }
 0x288   : > { %7147 = vst [vmem:[#allocation38_spill] sm:$0xff] %v4949_v23  ;;  %v4960_v63 = vpop.permute.xlu2 %1460  ;;  %v1824_v23 = vld [vmem:[#allocation10 + $0x30] sm:$0xff]  ;;  %v1814_v39 = vmul.f32 %v5000_v18, %v1793_v46  ;;  %v5074_v40 = vperm.slane %v4966_v58, 2  ;;  %v5083_v11 = vsel %vm5061_vm14, 1.0, %v7162_v0  ;;  %v1794_v46 = vld [vmem:[#allocation9 + $0x38] sm:$0xff]  ;;  %vm894_vm9 = vcmp.lt.s32.totalorder %v4001_v2, 121 }
 0x289   : > { %7150 = vst [vmem:[#allocation42_spill] sm:$0xff] %v4960_v63  ;;  %v1819_v63 = vld [vmem:[#allocation10 + $0x8] sm:$0xff]  ;;  %v1834_v28 = vmul.f32 %v5024_v59, %v1824_v23  ;;  %v1825_v23 = vld [vmem:[#allocation10 + $0x38] sm:$0xff]  ;;  %vm948_vm11 = vcmp.lt.s32.totalorder %v4001_v2, 120  ;;  %vm1002_vm12 = vcmp.lt.s32.totalorder %v4001_v2, 119  ;;  %vm1056_vm14 = vcmp.lt.s32.totalorder %v4001_v2, 118 }
 0x28a   : > { %7181 = vst [vmem:[#allocation44_spill] sm:$0xff] %v5074_v40 }
 0x28b   : > { %7184 = vst [vmem:[#allocation55_spill] sm:$0xff] %v5083_v11 }
 0x28c   : > { %1656 = vrot.lane.b32.xlu0 %v4439_v41, %s3739_s5 }
 0x28d   : > { %1658 = vrot.lane.b32.xlu1 %v4437_v44, %s3739_s5 }
 0x28e   : > { %v5013_v61 = vpop.permute.xlu0 %1444  ;;  %1660 = vrot.lane.b32.xlu2 %v4443_v25, %s3739_s5 }
 0x28f   : > { %v5011_v57 = vpop.permute.xlu1 %1446  ;;  %7166 = vst [vmem:[#allocation48_spill] sm:$0xff] %v5013_v61  ;;  %v7170_v61 = vld [vmem:[#allocation47_spill] sm:$0xff] }
 0x290   : > { %7165 = vst [vmem:[#allocation37_spill] sm:$0xff] %v5011_v57  ;;  %v7169_v57 = vld [vmem:[#allocation57_spill] sm:$0xff]  ;;  %v5034_v3 = vpop.permute.xlu2 %1498 }
 0x291   : > { %v794_v60 = vsel %vm786_vm6, %v7170_v61, %v7169_v57  ;;  %7173 = vst [vmem:[#allocation45_spill] sm:$0xff] %v5034_v3  ;;  %v792_v33 = vsel %vm786_vm6, %v7169_v57, %v7172_v49  ;;  %v1829_v61 = vmul.f32 %v5024_v59, %v1819_v63  ;;  %v808_v3 = vadd.f32 %v804_v15, %v762_v55  ;;  %v7175_v49 = vld [vmem:[#allocation33_spill] sm:$0xff] }
 0x292   : > { %v812_v54 = vmul.f32 %v800_v6, %v794_v60  ;;  %v1760_v57 = vadd.s32 %v4915_v5, %v7175_v49  ;;  %v813_v56 = vmul.f32 %v801_v9, %v792_v33  ;;  %v1813_v63 = vmul.f32 %v4997_v42, %v1792_v30 }
 0x293   : > { %v1833_v6 = vmul.f32 %v5005_v24, %v1823_v34  ;;  %v810_v55 = vadd.f32 %v806_v29, %v764_v37  ;;  %v1839_v33 = vadd.f32 %v1829_v61, %v1809_v12  ;;  %v1848_v37 = vmul.f32 0.1, %v1838_v48  ;;  %v7182_v29 = vld [vmem:[#allocation34_spill] sm:$0xff] }
 0x294   : > { %1662 = vrot.lane.b32.xlu0 %v4461_v27, %s3739_s5  ;;  %v1761_v19 = vadd.s32 %v4915_v5, %v7182_v29  ;;  %vm1765_vm1 = vcmp.ge.s32.totalorder %v1760_v57, 0  ;;  %vm1770_vm4 = vcmp.lt.s32.totalorder %v1760_v57, 1600  ;;  %v817_v53 = vadd.f32 %v813_v56, %v809_v10  ;;  %v7186_v5 = vld [vmem:[#allocation56_spill] sm:$0xff]  ;;  %v850_v56 = vld [vmem:[#allocation12 + $0x300] sm:$0xff] }
 0x295   : > { %1664 = vrot.lane.b32.xlu1 %v4459_v32, %s3739_s5  ;;  %v816_v30 = vadd.f32 %v812_v54, %v808_v3  ;;  %v1843_v34 = vadd.f32 %v1833_v6, %v1813_v63  ;;  %v5085_v52 = vadd.f32 %v814_v21, %v810_v55  ;;  %v815_v61 = vmul.f32 %v803_v16, %v788_v47  ;;  %v1789_v3 = vld [vmem:[#allocation9 + $0x10] sm:$0xff]  ;;  %v851_v63 = vld [vmem:[#allocation12 + $0x308] sm:$0xff]  ;;  %vm5099_vm5 = vmand %vm1765_vm1, %vm1770_vm4 }
 0x296   : > { %v5067_v9 = vpop.permute.xlu0 %1450  ;;  %1666 = vrot.lane.b32.xlu2 %v4465_v8, %s3739_s5  ;;  %v811_v49 = vadd.f32 %v807_v17, %v765_v45  ;;  %v847_v10 = vsel %vm840_vm13, %v7186_v5, %v7185_v62  ;;  %v1820_v54 = vld [vmem:[#allocation10 + $0x10] sm:$0xff]  ;;  %v7187_v6 = vld [vmem:[#allocation70_spill] sm:$0xff]  ;;  %v1849_v29 = vmul.f32 0.1, %v1839_v33  ;;  %v5095_v59 = vmax.f32 %v1838_v48, %v1848_v37  ;;  %v1790_v17 = vld [vmem:[#allocation9 + $0x18] sm:$0xff] }
 0x297   : > { %v5065_v60 = vpop.permute.xlu1 %1452  ;;  %7180 = vst [vmem:[#allocation31_spill] sm:$0xff] %v5067_v9  ;;  %v845_v15 = vsel %vm840_vm13, %v7185_v62, %v7187_v6  ;;  %v1844_v55 = vadd.f32 %v1834_v28, %v1814_v39  ;;  %v1815_v21 = vmul.f32 %v5074_v40, %v1794_v46  ;;  %v1835_v47 = vmul.f32 %v5083_v11, %v1825_v23  ;;  %v1821_v16 = vld [vmem:[#allocation10 + $0x18] sm:$0xff]  ;;  %v854_v46 = vld [vmem:[#allocation12 + $0x320] sm:$0xff]  ;;  %v7191_v23 = vld [vmem:[#allocation59_spill] sm:$0xff] }
 0x298   : > { %7179 = vst [vmem:[#allocation52_spill] sm:$0xff] %v5065_v60  ;;  %v5078_v12 = vpop.permute.xlu2 %1504  ;;  %vm1766_vm7 = vcmp.ge.s32.totalorder %v1761_v19, 0  ;;  %vm1771_vm8 = vcmp.lt.s32.totalorder %v1761_v19, 1600  ;;  %v1853_v48 = vmul.f32 0.1, %v1843_v34  ;;  %v1810_v57 = vmul.f32 %v5074_v40, %v1789_v3  ;;  %v7192_v62 = vld [vmem:[#allocation67_spill] sm:$0xff] }
 0x299   : > { %7183 = vst [vmem:[#allocation41_spill] sm:$0xff] %v5078_v12  ;;  %v1830_v37 = vmul.f32 %v5083_v11, %v1820_v54  ;;  %v5112_v39 = vperm.slane %v4966_v58, 3  ;;  %v858_v28 = vmul.f32 %v850_v56, %v847_v10  ;;  %v848_v5 = vsel %vm840_vm13, %v7192_v62, %v7191_v23  ;;  %vm5132_vm10 = vmand %vm1766_vm7, %vm1771_vm8  ;;  %v7198_v45 = vld [vmem:[#allocation69_spill] sm:$0xff]  ;;  %v7201_v60 = vld [vmem:[#allocation62_spill] sm:$0xff] }
 0x29a   : > { %v859_v18 = vmul.f32 %v851_v63, %v845_v15  ;;  %v1854_v54 = vmul.f32 0.1, %v1844_v55  ;;  %v855_v15 = vld [vmem:[#allocation12 + $0x328] sm:$0xff]  ;;  %v846_v62 = vsel %vm840_vm13, %v7191_v23, %v7198_v45  ;;  %v819_v11 = vadd.f32 %v815_v61, %v811_v49  ;;  %v1795_v49 = vld [vmem:[#allocation9 + $0x40] sm:$0xff] }
 0x29b   : > { %7190 = vst [vmem:[#allocation51_spill] sm:$0xff] %v5112_v39  ;;  %v1811_v56 = vmul.f32 %v5112_v39, %v1790_v17  ;;  %v1845_v40 = vadd.f32 %v1835_v47, %v1815_v21  ;;  %v5143_v24 = vperm.slane %v4966_v58, 4  ;;  %v866_v19 = vmul.f32 %v854_v46, %v848_v5  ;;  %v852_v21 = vld [vmem:[#allocation12 + $0x310] sm:$0xff]  ;;  %v853_v47 = vld [vmem:[#allocation12 + $0x318] sm:$0xff]  ;;  %v1796_v46 = vld [vmem:[#allocation9 + $0x48] sm:$0xff] }
 0x29c   : > { %1668 = vrot.lane.b32.xlu0 %v4479_v38, %s3739_s5  ;;  %v5145_v42 = vmax.f32 %v1839_v33, %v1849_v29  ;;  %v5147_v12 = vmax.f32 %v1843_v34, %v1853_v48  ;;  %v843_v23 = vsel %vm840_vm13, %v7187_v6, %v7201_v60  ;;  %v863_v61 = vadd.f32 %v859_v18, %v817_v53  ;;  %v1822_v33 = vld [vmem:[#allocation10 + $0x20] sm:$0xff]  ;;  %v7203_v48 = vld [vmem:[#allocation72_spill] sm:$0xff]  ;;  %v1827_v5 = vld [vmem:[#allocation10 + $0x48] sm:$0xff] }
 0x29d   : > { %1670 = vrot.lane.b32.xlu1 %v4477_v13, %s3739_s5  ;;  %v5121_v13 = vsel %vm5099_vm5, 1.0, %v7162_v0  ;;  %7199 = vst [vmem:[#allocation60_spill] sm:$0xff] %v5143_v24  ;;  %v5158_v58 = vsel %vm5132_vm10, 1.0, %v7162_v0  ;;  %v1826_v34 = vld [vmem:[#allocation10 + $0x40] sm:$0xff]  ;;  %v867_v29 = vmul.f32 %v855_v15, %v846_v62  ;;  %v7204_v18 = vld [vmem:[#allocation68_spill] sm:$0xff]  ;;  %v860_v15 = vmul.f32 %v852_v21, %v843_v23 }
 0x29e   : > { %7193 = vst [vmem:[#allocation50_spill] sm:$0xff] %v5121_v13  ;;  %v5126_v3 = vpop.permute.xlu0 %1456  ;;  %1892 = vrot.lane.b32.xlu2 %v5095_v59, %s3730_s9  ;;  %v1831_v63 = vmul.f32 %v5121_v13, %v1821_v16  ;;  %v1791_v16 = vld [vmem:[#allocation9 + $0x20] sm:$0xff]  ;;  %v901_v0 = vsel %vm894_vm9, %v4455_v1, %v7204_v18  ;;  %v899_v53 = vsel %vm894_vm9, %v7204_v18, %v4471_v14  ;;  %v857_v21 = vld [vmem:[#allocation12 + $0x338] sm:$0xff]  ;;  %vm1744_vm1 = vcmask 1040384  }
 0x29f   : > { %v5124_v38 = vpop.permute.xlu1 %1458  ;;  %7195 = vst [vmem:[#allocation54_spill] sm:$0xff] %v5126_v3  ;;  %v862_v3 = vadd.f32 %v858_v28, %v816_v30  ;;  %v841_v30 = vsel %vm840_vm13, %v7201_v60, %v7203_v48  ;;  %v1812_v28 = vmul.f32 %v5143_v24, %v1791_v16  ;;  %v904_v10 = vld [vmem:[#allocation12 + $0x380] sm:$0xff]  ;;  %v905_v60 = vld [vmem:[#allocation12 + $0x388] sm:$0xff]  ;;  %v1832_v1 = vmul.f32 %v5158_v58, %v1822_v33  ;;  %v856_v48 = vld [vmem:[#allocation12 + $0x330] sm:$0xff] }
 0x2a0   : > { %7194 = vst [vmem:[#allocation58_spill] sm:$0xff] %v5124_v38  ;;  %v1840_v38 = vadd.f32 %v1830_v37, %v1810_v57  ;;  %v5149_v17 = vpop.permute.xlu2 %1510  ;;  %v5164_v57 = vmax.f32 %v1844_v55, %v1854_v54  ;;  %v1841_v6 = vadd.f32 %v1831_v63, %v1811_v56  ;;  %v1855_v37 = vmul.f32 0.1, %v1845_v40  ;;  %v7205_v18 = vld [vmem:[#allocation73_spill] sm:$0xff] }
 0x2a1   : > { %7200 = vst [vmem:[#allocation32_spill] sm:$0xff] %v5149_v17  ;;  %v1816_v54 = vmul.f32 %v5112_v39, %v1795_v49  ;;  %v1836_v56 = vmul.f32 %v5121_v13, %v1826_v34  ;;  %v870_v63 = vadd.f32 %v866_v19, %v862_v3  ;;  %v861_v62 = vmul.f32 %v853_v47, %v841_v30  ;;  %v7207_v19 = vld [vmem:[#allocation65_spill] sm:$0xff] }
 0x2a2   : > { %7202 = vst [vmem:[#allocation57_spill] sm:$0xff] %v5158_v58  ;;  %v1850_v55 = vmul.f32 0.1, %v1840_v38  ;;  %v871_v16 = vadd.f32 %v867_v29, %v863_v61  ;;  %v844_v17 = vsel %vm840_vm13, %v7198_v45, %v7205_v18  ;;  %v1851_v33 = vmul.f32 0.1, %v1841_v6  ;;  %v908_v45 = vld [vmem:[#allocation12 + $0x3a0] sm:$0xff] }
 0x2a3   : > { %v1817_v49 = vmul.f32 %v5143_v24, %v1796_v46  ;;  %v1837_v3 = vmul.f32 %v5158_v58, %v1827_v5  ;;  %v842_v23 = vsel %vm840_vm13, %v7205_v18, %v7207_v19  ;;  %v912_v61 = vmul.f32 %v904_v10, %v901_v0  ;;  %v7208_v18 = vld [vmem:[#allocation71_spill] sm:$0xff]  ;;  %v7211_v19 = vld [vmem:[#allocation76_spill] sm:$0xff] }
 0x2a4   : > { %1894 = vrot.lane.b32.xlu0 %v5147_v12, %s3730_s9  ;;  %v913_v34 = vmul.f32 %v905_v60, %v899_v53  ;;  %v902_v29 = vsel %vm894_vm9, %v4453_v26, %v4473_v4  ;;  %v5202_v47 = vmax.f32 %v1845_v40, %v1855_v37  ;;  %v5204_v30 = vmax.f32 %v1840_v38, %v1850_v55  ;;  %v909_v53 = vld [vmem:[#allocation12 + $0x3a8] sm:$0xff]  ;;  %v906_v10 = vld [vmem:[#allocation12 + $0x390] sm:$0xff]  ;;  %v958_v55 = vld [vmem:[#allocation12 + $0x400] sm:$0xff] }
 0x2a5   : > { %1896 = vrot.lane.b32.xlu1 %v5145_v42, %s3730_s9  ;;  %v1842_v46 = vadd.f32 %v1832_v1, %v1812_v28  ;;  %v1846_v5 = vadd.f32 %v1836_v56, %v1816_v54  ;;  %v865_v24 = vadd.f32 %v861_v62, %v819_v11  ;;  %v868_v13 = vmul.f32 %v856_v48, %v844_v17  ;;  %v7209_v62 = vld [vmem:[#allocation74_spill] sm:$0xff] }
 0x2a6   : > { %v5188_v50 = vpop.permute.xlu0 %1462  ;;  %1898 = vrot.lane.b32.xlu2 %v5164_v57, %s3730_s9  ;;  %v900_v0 = vsel %vm894_vm9, %v4473_v4, %v7208_v18  ;;  %v920_v26 = vmul.f32 %v908_v45, %v902_v29  ;;  %v897_v40 = vsel %vm894_vm9, %v4471_v14, %v4489_v22  ;;  %v5217_v38 = vmax.f32 %v1841_v6, %v1851_v33  ;;  %v7212_v45 = vld [vmem:[#allocation79_spill] sm:$0xff] }
 0x2a7   : > { %v5186_v9 = vpop.permute.xlu1 %1496  ;;  %7206 = vst [vmem:[#allocation47_spill] sm:$0xff] %v5188_v50  ;;  %v1847_v37 = vadd.f32 %v1837_v3, %v1817_v49  ;;  %v864_v11 = vadd.f32 %v860_v15, %v5085_v52  ;;  %v869_v17 = vmul.f32 %v857_v21, %v842_v23  ;;  %v917_v28 = vadd.f32 %v913_v34, %v871_v16  ;;  %v959_v3 = vld [vmem:[#allocation12 + $0x408] sm:$0xff]  ;;  %v911_v34 = vld [vmem:[#allocation12 + $0x3b8] sm:$0xff] }
 0x2a8   : > { %v5206_v58 = vpop.permute.xlu2 %1548  ;;  %v916_v60 = vadd.f32 %v912_v61, %v870_v63  ;;  %v955_v4 = vsel %vm948_vm11, %v4499_v35, %v4513_v7  ;;  %v1852_v14 = vmul.f32 0.1, %v1842_v46  ;;  %v1856_v6 = vmul.f32 0.1, %v1846_v5  ;;  %v907_v63 = vld [vmem:[#allocation12 + $0x398] sm:$0xff]  ;;  %v910_v61 = vld [vmem:[#allocation12 + $0x3b0] sm:$0xff] }
 0x2a9   : > { %v872_v1 = vadd.f32 %v868_v13, %v864_v11  ;;  %v921_v54 = vmul.f32 %v909_v53, %v900_v0  ;;  %v914_v52 = vmul.f32 %v906_v10, %v897_v40  ;;  %v873_v56 = vadd.f32 %v869_v17, %v865_v24  ;;  %v7210_v13 = vld [vmem:[#allocation77_spill] sm:$0xff]  ;;  %v960_v10 = vld [vmem:[#allocation12 + $0x410] sm:$0xff]  ;;  %v963_v11 = vld [vmem:[#allocation12 + $0x428] sm:$0xff] }
 0x2aa   : > { %v924_v15 = vadd.f32 %v920_v26, %v916_v60  ;;  %v895_v16 = vsel %vm894_vm9, %v4489_v22, %v7209_v62  ;;  %v1857_v33 = vmul.f32 0.1, %v1847_v37  ;;  %v898_v24 = vsel %vm894_vm9, %v7208_v18, %v7210_v13  ;;  %v7216_v17 = vld [vmem:[#allocation84_spill] sm:$0xff] }
 0x2ab   : > { %v925_v49 = vadd.f32 %v921_v54, %v917_v28  ;;  %v953_v22 = vsel %vm948_vm11, %v4513_v7, %v7211_v19  ;;  %v966_v23 = vmul.f32 %v958_v55, %v955_v4  ;;  %v896_v29 = vsel %vm894_vm9, %v7210_v13, %v7212_v45  ;;  %v7215_v7 = vld [vmem:[#allocation83_spill] sm:$0xff]  ;;  %v7217_v28 = vld [vmem:[#allocation81_spill] sm:$0xff] }
 0x2ac   : > { %1900 = vrot.lane.b32.xlu0 %v5204_v30, %s3730_s9  ;;  %v5251_v21 = vmax.f32 %v1842_v46, %v1852_v14  ;;  %v5253_v0 = vmax.f32 %v1846_v5, %v1856_v6  ;;  %v915_v53 = vmul.f32 %v907_v63, %v895_v16  ;;  %v918_v26 = vadd.f32 %v914_v52, %v872_v1  ;;  %v962_v46 = vld [vmem:[#allocation12 + $0x420] sm:$0xff]  ;;  %v7218_v5 = vld [vmem:[#allocation75_spill] sm:$0xff]  ;;  %v961_v14 = vld [vmem:[#allocation12 + $0x418] sm:$0xff] }
 0x2ad   : > { %1902 = vrot.lane.b32.xlu1 %v5202_v47, %s3730_s9  ;;  %v951_v40 = vsel %vm948_vm11, %v7211_v19, %v7215_v7  ;;  %v954_v60 = vsel %vm948_vm11, %v7217_v28, %v7216_v17  ;;  %v956_v55 = vsel %vm948_vm11, %v7218_v5, %v7217_v28  ;;  %v967_v4 = vmul.f32 %v959_v3, %v953_v22  ;;  %v7219_v6 = vld [vmem:[#allocation87_spill] sm:$0xff]  ;;  %v1012_v16 = vld [vmem:[#allocation12 + $0x480] sm:$0xff]  ;;  %v7221_v19 = vld [vmem:[#allocation80_spill] sm:$0xff] }
 0x2ae   : > { %v5234_v48 = vpop.permute.xlu0 %1500  ;;  %1904 = vrot.lane.b32.xlu2 %v5217_v38, %s3730_s9  ;;  %7213 = vst [vmem:[#allocation53_spill] sm:$0xff] %v5253_v0  ;;  %v949_v1 = vsel %vm948_vm11, %v7215_v7, %v7219_v6  ;;  %v5273_v54 = vmax.f32 %v1847_v37, %v1857_v33  ;;  %v922_v52 = vmul.f32 %v910_v61, %v898_v24  ;;  %v7220_v13 = vld [vmem:[#allocation89_spill] sm:$0xff]  ;;  %v1013_v3 = vld [vmem:[#allocation12 + $0x488] sm:$0xff]  ;;  %v964_v33 = vld [vmem:[#allocation12 + $0x430] sm:$0xff]  ;;  %vm1746_vm4 = vcmask 1042434  }
 0x2af   : > { %v5232_v35 = vpop.permute.xlu1 %1502  ;;  %v923_v63 = vmul.f32 %v911_v34, %v896_v29  ;;  %v970_v62 = vadd.f32 %v966_v23, %v924_v15  ;;  %v1009_v45 = vsel %vm1002_vm12, %v7221_v19, %v7220_v13  ;;  %v968_v39 = vmul.f32 %v960_v10, %v951_v40  ;;  %v7222_v22 = vld [vmem:[#allocation93_spill] sm:$0xff]  ;;  %v7223_v24 = vld [vmem:[#allocation78_spill] sm:$0xff]  ;;  %v7230_v19 = vld [vmem:[#allocation92_spill] sm:$0xff] }
 0x2b0   : > { %v5255_v18 = vpop.permute.xlu2 %1554  ;;  %v975_v28 = vmul.f32 %v963_v11, %v954_v60  ;;  %v1007_v5 = vsel %vm1002_vm12, %v7220_v13, %v7222_v22  ;;  %v919_v37 = vadd.f32 %v915_v53, %v873_v56  ;;  %v974_v15 = vmul.f32 %v962_v46, %v956_v55  ;;  %v1014_v53 = vld [vmem:[#allocation12 + $0x490] sm:$0xff]  ;;  %v7224_v60 = vld [vmem:[#allocation85_spill] sm:$0xff]  ;;  %v7226_v6 = vld [vmem:[#allocation86_spill] sm:$0xff] }
 0x2b1   : > { %7214 = vst [vmem:[#allocation61_spill] sm:$0xff] %v5255_v18  ;;  %v952_v23 = vsel %vm948_vm11, %v7216_v17, %v7223_v24  ;;  %v969_v61 = vmul.f32 %v961_v14, %v949_v1  ;;  %v971_v34 = vadd.f32 %v967_v4, %v925_v49  ;;  %v926_v29 = vadd.f32 %v922_v52, %v918_v26  ;;  %v965_v14 = vld [vmem:[#allocation12 + $0x438] sm:$0xff]  ;;  %v1018_v13 = vld [vmem:[#allocation12 + $0x4b0] sm:$0xff] }
 0x2b2   : > { %v1020_v10 = vmul.f32 %v1012_v16, %v1009_v45  ;;  %v927_v11 = vadd.f32 %v923_v63, %v919_v37  ;;  %v978_v56 = vadd.f32 %v974_v15, %v970_v62  ;;  %v1005_v46 = vsel %vm1002_vm12, %v7222_v22, %v7224_v60  ;;  %v7227_v63 = vld [vmem:[#allocation82_spill] sm:$0xff]  ;;  %v1015_v15 = vld [vmem:[#allocation12 + $0x498] sm:$0xff] }
 0x2b3   : > { %v1021_v17 = vmul.f32 %v1013_v3, %v1007_v5  ;;  %v972_v55 = vadd.f32 %v968_v39, %v926_v29  ;;  %v976_v49 = vmul.f32 %v964_v33, %v952_v23  ;;  %v979_v26 = vadd.f32 %v975_v28, %v971_v34  ;;  %v7228_v62 = vld [vmem:[#allocation90_spill] sm:$0xff]  ;;  %v7229_v39 = vld [vmem:[#allocation96_spill] sm:$0xff]  ;;  %v1016_v3 = vld [vmem:[#allocation12 + $0x4a0] sm:$0xff] }
 0x2b4   : > { %1906 = vrot.lane.b32.xlu0 %v5253_v0, %s3730_s9  ;;  %v950_v1 = vsel %vm948_vm11, %v7223_v24, %v7226_v6  ;;  %v973_v52 = vadd.f32 %v969_v61, %v927_v11  ;;  %v1010_v16 = vsel %vm1002_vm12, %v7228_v62, %v7227_v63  ;;  %v1006_v45 = vsel %vm1002_vm12, %v7230_v19, %v7229_v39  ;;  %v1017_v22 = vld [vmem:[#allocation12 + $0x4a8] sm:$0xff]  ;;  %v7231_v33 = vld [vmem:[#allocation95_spill] sm:$0xff]  ;;  %v1066_v61 = vld [vmem:[#allocation12 + $0x500] sm:$0xff] }
 0x2b5   : > { %1908 = vrot.lane.b32.xlu1 %v5251_v21, %s3730_s9  ;;  %v1024_v28 = vadd.f32 %v1020_v10, %v978_v56  ;;  %v1008_v5 = vsel %vm1002_vm12, %v7227_v63, %v7230_v19  ;;  %v1022_v37 = vmul.f32 %v1014_v53, %v1005_v46  ;;  %v1003_v24 = vsel %vm1002_vm12, %v7224_v60, %v7231_v33  ;;  %v7232_v34 = vld [vmem:[#allocation91_spill] sm:$0xff]  ;;  %v1067_v11 = vld [vmem:[#allocation12 + $0x508] sm:$0xff]  ;;  %v7234_v56 = vld [vmem:[#allocation101_spill] sm:$0xff] }
 0x2b6   : > { %v5293_v40 = vpop.permute.xlu0 %1506  ;;  %1910 = vrot.lane.b32.xlu2 %v5273_v54, %s3730_s9  ;;  %v1025_v23 = vadd.f32 %v1021_v17, %v979_v26  ;;  %v7233_v29 = vld [vmem:[#allocation99_spill] sm:$0xff]  ;;  %v1061_v6 = vsel %vm1056_vm14, %v7232_v34, %v7234_v56  ;;  %v7235_v46 = vld [vmem:[#allocation105_spill] sm:$0xff]  ;;  %v980_v60 = vadd.f32 %v976_v49, %v972_v55  ;;  %v977_v17 = vmul.f32 %v965_v14, %v950_v1 }
 0x2b7   : > { %v5291_v7 = vpop.permute.xlu1 %1508  ;;  %v1063_v10 = vsel %vm1056_vm14, %v7233_v29, %v7232_v34  ;;  %v1068_v53 = vld [vmem:[#allocation12 + $0x510] sm:$0xff]  ;;  %v1059_v63 = vsel %vm1056_vm14, %v7234_v56, %v7235_v46  ;;  %v1030_v26 = vmul.f32 %v1018_v13, %v1006_v45  ;;  %v1028_v62 = vmul.f32 %v1016_v3, %v1010_v16  ;;  %v1070_v29 = vld [vmem:[#allocation12 + $0x520] sm:$0xff]  ;;  %v7236_v34 = vld [vmem:[#allocation102_spill] sm:$0xff] }
 0x2b8   : > { %v5302_v4 = vpop.permute.xlu2 %1560  ;;  %v1029_v19 = vmul.f32 %v1017_v22, %v1008_v5  ;;  %v1023_v33 = vmul.f32 %v1015_v15, %v1003_v24  ;;  %v1026_v50 = vadd.f32 %v1022_v37, %v980_v60  ;;  %v1074_v56 = vmul.f32 %v1066_v61, %v1063_v10  ;;  %v403_v16 = vld [vmem:[#allocation3] sm:$0x1]  ;;  %v1019_v22 = vld [vmem:[#allocation12 + $0x4b8] sm:$0xff]  ;;  %v1160_v15 = vld [vmem:[#allocation12 + $0x40] sm:$0xff] }
 0x2b9   : > { %7225 = vst [vmem:[#allocation64_spill] sm:$0xff] %v5302_v4  ;;  %v7237_v4 = vld [vmem:[#allocation98_spill] sm:$0xff]  ;;  %v1075_v55 = vmul.f32 %v1067_v11, %v1061_v6  ;;  %v1076_v49 = vmul.f32 %v1068_v53, %v1059_v63  ;;  %v1032_v13 = vadd.f32 %v1028_v62, %v1024_v28  ;;  %v981_v45 = vadd.f32 %v977_v17, %v973_v52  ;;  %v7238_v5 = vld [vmem:[#allocation88_spill] sm:$0xff]  ;;  %v7239_v10 = vld [vmem:[#allocation97_spill] sm:$0xff] }
 0x2ba   : > { %v1064_v18 = vsel %vm1056_vm14, %v7237_v4, %v7236_v34  ;;  %v1033_v3 = vadd.f32 %v1029_v19, %v1025_v23  ;;  %3264 = vpush %v403_v16  ;;  %v1004_v4 = vsel %vm1002_vm12, %v7229_v39, %v7238_v5  ;;  %v1034_v37 = vadd.f32 %v1030_v26, %v1026_v50  ;;  %v1069_v61 = vld [vmem:[#allocation12 + $0x518] sm:$0xff]  ;;  %v1071_v28 = vld [vmem:[#allocation12 + $0x528] sm:$0xff]  ;;  %v1072_v63 = vld [vmem:[#allocation12 + $0x530] sm:$0xff] }
 0x2bb   : > { %v1082_v24 = vmul.f32 %v1070_v29, %v1064_v18  ;;  %v1057_v11 = vsel %vm1056_vm14, %v7235_v46, %v7239_v10  ;;  %v1027_v52 = vadd.f32 %v1023_v33, %v981_v45  ;;  %v7241_v23 = vld [vmem:[#allocation94_spill] sm:$0xff]  ;;  %v7242_v39 = vld [vmem:[#allocation104_spill] sm:$0xff]  ;;  %v1078_v18 = vadd.f32 %v1074_v56, %v1032_v13  ;;  %v1162_v16 = vld [vmem:[#allocation12 + $0x50] sm:$0xff] }
 0x2bc   : > { %1944 = vrot.lane.b32.xlu0 %v5095_v59, %s3731_s24  ;;  %v1062_v53 = vsel %vm1056_vm14, %v7236_v34, %v7241_v23  ;;  %v1060_v50 = vsel %vm1056_vm14, %v7241_v23, %v7242_v39  ;;  %v1079_v60 = vadd.f32 %v1075_v55, %v1033_v3  ;;  %v1080_v17 = vadd.f32 %v1076_v49, %v1034_v37  ;;  %v1073_v26 = vld [vmem:[#allocation12 + $0x538] sm:$0xff]  ;;  %v1161_v33 = vld [vmem:[#allocation12 + $0x48] sm:$0xff]  ;;  %v1164_v49 = vld [vmem:[#allocation12 + $0x60] sm:$0xff] }
 0x2bd   : > { %1946 = vrot.lane.b32.xlu1 %v5147_v12, %s3731_s24  ;;  %v7243_v46 = vld [vmem:[#allocation108_spill] sm:$0xff]  ;;  %v1031_v19 = vmul.f32 %v1019_v22, %v1004_v4  ;;  %v1168_v29 = vmul.f32 %v1160_v15, %v4415_v20  ;;  %v1077_v34 = vmul.f32 %v1069_v61, %v1057_v11  ;;  %v1083_v45 = vmul.f32 %v1071_v28, %v1062_v53  ;;  %v1165_v20 = vld [vmem:[#allocation12 + $0x68] sm:$0xff]  ;;  %v1166_v37 = vld [vmem:[#allocation12 + $0x70] sm:$0xff] }
 0x2be   : > { %v5346_v1 = vpop.permute.xlu0 %1512  ;;  %1948 = vrot.lane.b32.xlu2 %v5145_v42, %s3731_s24  ;;  %v1058_v62 = vsel %vm1056_vm14, %v7242_v39, %v7243_v46  ;;  %v1086_v5 = vadd.f32 %v1082_v24, %v1078_v18  ;;  %v1084_v10 = vmul.f32 %v1072_v63, %v1060_v50  ;;  %v1169_v13 = vmul.f32 %v1161_v33, %v4439_v41  ;;  %v1163_v4 = vld [vmem:[#allocation12 + $0x58] sm:$0xff]  ;;  %v1212_v23 = vld [vmem:[#allocation12 + $0xc0] sm:$0xff]  ;;  %v7244_v41 = vld [vmem:[#allocation111_spill] sm:$0xff] }
 0x2bf   : > { %v5344_v14 = vpop.permute.xlu1 %1514  ;;  %v1035_v56 = vadd.f32 %v1031_v19, %v1027_v52  ;;  %v1085_v55 = vmul.f32 %v1073_v26, %v1058_v62  ;;  %v1087_v3 = vadd.f32 %v1083_v45, %v1079_v60  ;;  %v1170_v15 = vmul.f32 %v1162_v16, %v4443_v25  ;;  %v7245_v53 = vld [vmem:[#allocation107_spill] sm:$0xff]  ;;  %v1213_v46 = vld [vmem:[#allocation12 + $0xc8] sm:$0xff] }
 0x2c0   : > { %v5358_v6 = vpop.permute.xlu2 %1566  ;;  %v1088_v22 = vadd.f32 %v1084_v10, %v1080_v17  ;;  %v1172_v52 = vadd.f32 %v1168_v29, %v1086_v5  ;;  %v1176_v28 = vmul.f32 %v1164_v49, %v4419_v31  ;;  %v1210_v63 = vsel %vm570_vm15, %v7245_v53, %v7244_v41  ;;  %v1167_v17 = vld [vmem:[#allocation12 + $0x78] sm:$0xff]  ;;  %v7246_v62 = vld [vmem:[#allocation103_spill] sm:$0xff]  ;;  %v7247_v29 = vld [vmem:[#allocation113_spill] sm:$0xff] }
 0x2c1   : > { %7240 = vst [vmem:[#allocation33_spill] sm:$0xff] %v5358_v6  ;;  %v1081_v11 = vadd.f32 %v1077_v34, %v1035_v56  ;;  %v1171_v25 = vmul.f32 %v1163_v4, %v4459_v32  ;;  %v1177_v18 = vmul.f32 %v1165_v20, %v4437_v44  ;;  %v1178_v60 = vmul.f32 %v1166_v37, %v4461_v27  ;;  %v1214_v19 = vld [vmem:[#allocation12 + $0xd0] sm:$0xff]  ;;  %v1217_v44 = vld [vmem:[#allocation12 + $0xe8] sm:$0xff]  ;;  %v1216_v4 = vld [vmem:[#allocation12 + $0xe0] sm:$0xff] }
 0x2c2   : > { %v1173_v26 = vadd.f32 %v1169_v13, %v1087_v3  ;;  %v1208_v31 = vsel %vm570_vm15, %v7244_v41, %v7246_v62  ;;  %v1174_v33 = vadd.f32 %v1170_v15, %v1088_v22  ;;  %v1206_v32 = vsel %vm570_vm15, %v7246_v62, %v7247_v29  ;;  %v7248_v45 = vld [vmem:[#allocation114_spill] sm:$0xff]  ;;  %v1215_v13 = vld [vmem:[#allocation12 + $0xd8] sm:$0xff]  ;;  %v7250_v3 = vld [vmem:[#allocation117_spill] sm:$0xff] }
 0x2c3   : > { %v1089_v50 = vadd.f32 %v1085_v55, %v1081_v11  ;;  %v1220_v34 = vmul.f32 %v1212_v23, %v1210_v63  ;;  %v1180_v16 = vadd.f32 %v1176_v28, %v1172_v52  ;;  %v7249_v27 = vld [vmem:[#allocation110_spill] sm:$0xff]  ;;  %v1179_v10 = vmul.f32 %v1167_v17, %v4465_v8  ;;  %v7251_v20 = vld [vmem:[#allocation100_spill] sm:$0xff]  ;;  %v1264_v41 = vld [vmem:[#allocation12 + $0x140] sm:$0xff] }
 0x2c4   : > { %1950 = vrot.lane.b32.xlu0 %v5164_v57, %s3731_s24  ;;  %v1209_v5 = vsel %vm570_vm15, %v7249_v27, %v7248_v45  ;;  %v1221_v55 = vmul.f32 %v1213_v46, %v1208_v31  ;;  %v1222_v49 = vmul.f32 %v1214_v19, %v1206_v32  ;;  %v1204_v22 = vsel %vm570_vm15, %v7247_v29, %v7250_v3  ;;  %v7252_v53 = vld [vmem:[#allocation119_spill] sm:$0xff]  ;;  %v7253_v63 = vld [vmem:[#allocation109_spill] sm:$0xff] }
 0x2c5   : > { %1952 = vrot.lane.b32.xlu1 %v5204_v30, %s3731_s24  ;;  %v1175_v56 = vadd.f32 %v1171_v25, %v1089_v50  ;;  %v1211_v8 = vsel %vm570_vm15, %v7251_v20, %v7249_v27  ;;  %v1181_v37 = vadd.f32 %v1177_v18, %v1173_v26  ;;  %v1182_v15 = vadd.f32 %v1178_v60, %v1174_v33  ;;  %v1265_v50 = vld [vmem:[#allocation12 + $0x148] sm:$0xff]  ;;  %v7254_v17 = vld [vmem:[#allocation123_spill] sm:$0xff] }
 0x2c6   : > { %v5381_v61 = vpop.permute.xlu0 %1550  ;;  %1954 = vrot.lane.b32.xlu2 %v5202_v47, %s3731_s24  ;;  %v1224_v28 = vadd.f32 %v1220_v34, %v1180_v16  ;;  %v1229_v23 = vmul.f32 %v1217_v44, %v1209_v5  ;;  %v1262_v25 = vsel %vm624_vm0, %v7253_v63, %v7252_v53  ;;  %v1260_v18 = vsel %vm624_vm0, %v7252_v53, %v7254_v17  ;;  %v1218_v60 = vld [vmem:[#allocation12 + $0xf0] sm:$0xff]  ;;  %v7255_v26 = vld [vmem:[#allocation106_spill] sm:$0xff]  ;;  %v1219_v34 = vld [vmem:[#allocation12 + $0xf8] sm:$0xff] }
 0x2c7   : > { %v5379_v24 = vpop.permute.xlu1 %1552  ;;  %v1207_v46 = vsel %vm570_vm15, %v7248_v45, %v7255_v26  ;;  %v1223_v62 = vmul.f32 %v1215_v13, %v1204_v22  ;;  %v1228_v19 = vmul.f32 %v1216_v4, %v1211_v8  ;;  %v1225_v33 = vadd.f32 %v1221_v55, %v1181_v37  ;;  %v7256_v16 = vld [vmem:[#allocation116_spill] sm:$0xff]  ;;  %v1266_v5 = vld [vmem:[#allocation12 + $0x150] sm:$0xff]  ;;  %v7259_v37 = vld [vmem:[#allocation126_spill] sm:$0xff] }
 0x2c8   : > { %v5390_v39 = vpop.permute.xlu2 %1604  ;;  %v1226_v29 = vadd.f32 %v1222_v49, %v1182_v15  ;;  %v1183_v32 = vadd.f32 %v1179_v10, %v1175_v56  ;;  %v1205_v44 = vsel %vm570_vm15, %v7255_v26, %v7256_v16  ;;  %v1272_v27 = vmul.f32 %v1264_v41, %v1262_v25  ;;  %v7257_v3 = vld [vmem:[#allocation115_spill] sm:$0xff]  ;;  %v1267_v49 = vld [vmem:[#allocation12 + $0x158] sm:$0xff]  ;;  %v7258_v10 = vld [vmem:[#allocation125_spill] sm:$0xff] }
 0x2c9   : > { %v1258_v45 = vsel %vm624_vm0, %v7254_v17, %v7257_v3  ;;  %v1273_v13 = vmul.f32 %v1265_v50, %v1260_v18  ;;  %v1230_v22 = vmul.f32 %v1218_v60, %v1207_v46  ;;  %v1233_v20 = vadd.f32 %v1229_v23, %v1225_v33  ;;  %v1270_v8 = vld [vmem:[#allocation12 + $0x170] sm:$0xff]  ;;  %v7260_v15 = vld [vmem:[#allocation122_spill] sm:$0xff]  ;;  %v1268_v53 = vld [vmem:[#allocation12 + $0x160] sm:$0xff] }
 0x2ca   : > { %v1232_v4 = vadd.f32 %v1228_v19, %v1224_v28  ;;  %v1227_v55 = vadd.f32 %v1223_v62, %v1183_v32  ;;  %v1256_v56 = vsel %vm624_vm0, %v7257_v3, %v7258_v10  ;;  %v1259_v41 = vsel %vm624_vm0, %v7260_v15, %v7259_v37  ;;  %v7261_v63 = vld [vmem:[#allocation112_spill] sm:$0xff]  ;;  %v1269_v60 = vld [vmem:[#allocation12 + $0x168] sm:$0xff]  ;;  %v1316_v62 = vld [vmem:[#allocation12 + $0x1c0] sm:$0xff] }
 0x2cb   : > { %v1234_v28 = vadd.f32 %v1230_v22, %v1226_v29  ;;  %v1231_v23 = vmul.f32 %v1219_v34, %v1205_v44  ;;  %v7262_v25 = vld [vmem:[#allocation120_spill] sm:$0xff]  ;;  %v1274_v17 = vmul.f32 %v1266_v5, %v1258_v45  ;;  %v1261_v26 = vsel %vm624_vm0, %v7261_v63, %v7260_v15  ;;  %v7263_v19 = vld [vmem:[#allocation121_spill] sm:$0xff]  ;;  %v7266_v5 = vld [vmem:[#allocation131_spill] sm:$0xff] }
 0x2cc   : > { %1956 = vrot.lane.b32.xlu0 %v5217_v38, %s3731_s24  ;;  %v1263_v50 = vsel %vm624_vm0, %v7262_v25, %v7261_v63  ;;  %v1276_v18 = vadd.f32 %v1272_v27, %v1232_v4  ;;  %v1277_v46 = vadd.f32 %v1273_v13, %v1233_v20  ;;  %v7264_v33 = vld [vmem:[#allocation129_spill] sm:$0xff]  ;;  %v1275_v16 = vmul.f32 %v1267_v49, %v1256_v56  ;;  %v1317_v27 = vld [vmem:[#allocation12 + $0x1c8] sm:$0xff]  ;;  %v1318_v45 = vld [vmem:[#allocation12 + $0x1d0] sm:$0xff] }
 0x2cd   : > { %1958 = vrot.lane.b32.xlu1 %v5253_v0, %s3731_s24  ;;  %v1314_v29 = vsel %vm678_vm2, %v7264_v33, %v7263_v19  ;;  %v1282_v44 = vmul.f32 %v1270_v8, %v1259_v41  ;;  %v1312_v3 = vsel %vm678_vm2, %v7263_v19, %v7266_v5  ;;  %v7267_v13 = vld [vmem:[#allocation135_spill] sm:$0xff]  ;;  %v1280_v20 = vmul.f32 %v1268_v53, %v1263_v50  ;;  %v1271_v10 = vld [vmem:[#allocation12 + $0x178] sm:$0xff]  ;;  %v7268_v15 = vld [vmem:[#allocation118_spill] sm:$0xff] }
 0x2ce   : > { %v5422_v52 = vpop.permute.xlu0 %1556  ;;  %1960 = vrot.lane.b32.xlu2 %v5251_v21, %s3731_s24  ;;  %v1310_v22 = vsel %vm678_vm2, %v7266_v5, %v7267_v13  ;;  %v1235_v4 = vadd.f32 %v1231_v23, %v1227_v55  ;;  %v1257_v49 = vsel %vm624_vm0, %v7259_v37, %v7268_v15  ;;  %v1281_v8 = vmul.f32 %v1269_v60, %v1261_v26  ;;  %v1320_v25 = vld [vmem:[#allocation12 + $0x1e0] sm:$0xff]  ;;  %v7270_v19 = vld [vmem:[#allocation132_spill] sm:$0xff]  ;;  %v7272_v23 = vld [vmem:[#allocation127_spill] sm:$0xff] }
 0x2cf   : > { %v5420_v11 = vpop.permute.xlu1 %1558  ;;  %v1278_v41 = vadd.f32 %v1274_v17, %v1234_v28  ;;  %v1324_v63 = vmul.f32 %v1316_v62, %v1314_v29  ;;  %v7271_v33 = vld [vmem:[#allocation128_spill] sm:$0xff]  ;;  %v1284_v5 = vadd.f32 %v1280_v20, %v1276_v18  ;;  %v1325_v53 = vmul.f32 %v1317_v27, %v1312_v3  ;;  %v7273_v62 = vld [vmem:[#allocation138_spill] sm:$0xff]  ;;  %v1368_v18 = vld [vmem:[#allocation12 + $0x240] sm:$0xff] }
 0x2d0   : > { %v5438_v31 = vpop.permute.xlu2 %1610  ;;  %v1315_v6 = vsel %vm678_vm2, %v7271_v33, %v7270_v19  ;;  %v1319_v55 = vld [vmem:[#allocation12 + $0x1d8] sm:$0xff]  ;;  %v1308_v50 = vsel %vm678_vm2, %v7267_v13, %v7272_v23  ;;  %v1326_v37 = vmul.f32 %v1318_v45, %v1310_v22  ;;  %v1279_v15 = vadd.f32 %v1275_v16, %v1235_v4  ;;  %v7274_v29 = vld [vmem:[#allocation134_spill] sm:$0xff]  ;;  %v7275_v27 = vld [vmem:[#allocation141_spill] sm:$0xff] }
 0x2d1   : > { %v1286_v60 = vadd.f32 %v1282_v44, %v1278_v41  ;;  %v1285_v28 = vadd.f32 %v1281_v8, %v1277_v46  ;;  %v1332_v17 = vmul.f32 %v1320_v25, %v1315_v6  ;;  %v1323_v26 = vld [vmem:[#allocation12 + $0x1f8] sm:$0xff]  ;;  %v1309_v33 = vsel %vm678_vm2, %v7274_v29, %v7273_v62  ;;  %v7276_v3 = vld [vmem:[#allocation137_spill] sm:$0xff]  ;;  %v1321_v6 = vld [vmem:[#allocation12 + $0x1e8] sm:$0xff] }
 0x2d2   : > { %v1366_v20 = vsel %vm732_vm3, %v7276_v3, %v7275_v27  ;;  %v1328_v46 = vadd.f32 %v1324_v63, %v1284_v5  ;;  %v7277_v16 = vld [vmem:[#allocation124_spill] sm:$0xff]  ;;  %v1322_v45 = vld [vmem:[#allocation12 + $0x1f0] sm:$0xff]  ;;  %v1327_v22 = vmul.f32 %v1319_v55, %v1308_v50  ;;  %v7279_v41 = vld [vmem:[#allocation133_spill] sm:$0xff]  ;;  %v1335_v55 = vmul.f32 %v1323_v26, %v1309_v33 }
 0x2d3   : > { %v1313_v44 = vsel %vm678_vm2, %v7270_v19, %v7277_v16  ;;  %v1311_v13 = vsel %vm678_vm2, %v7277_v16, %v7274_v29  ;;  %v1329_v4 = vadd.f32 %v1325_v53, %v1285_v28  ;;  %v7278_v8 = vld [vmem:[#allocation143_spill] sm:$0xff]  ;;  %v1371_v25 = vld [vmem:[#allocation12 + $0x258] sm:$0xff]  ;;  %v1369_v50 = vld [vmem:[#allocation12 + $0x248] sm:$0xff]  ;;  %vm1748_vm5 = vcmask 1041408  }
 0x2d4   : > { %1962 = vrot.lane.b32.xlu0 %v5273_v54, %s3731_s24  ;;  %v1362_v63 = vsel %vm732_vm3, %v7279_v41, %v7278_v8  ;;  %v1360_v19 = vsel %vm732_vm3, %v7278_v8, %v4795_v51  ;;  %v1333_v28 = vmul.f32 %v1321_v6, %v1313_v44  ;;  %v1336_v62 = vadd.f32 %v1332_v17, %v1328_v46  ;;  %v1372_v51 = vld [vmem:[#allocation12 + $0x260] sm:$0xff]  ;;  %v7280_v3 = vld [vmem:[#allocation140_spill] sm:$0xff]  ;;  %v7281_v16 = vld [vmem:[#allocation130_spill] sm:$0xff] }
 0x2d5   : > { %1996 = vrot.lane.b32.xlu1 %v5095_v59, %s3732_s20  ;;  %v1334_v29 = vmul.f32 %v1322_v45, %v1311_v13  ;;  %v1367_v8 = vsel %vm732_vm3, %v7281_v16, %v7280_v3  ;;  %v1373_v26 = vld [vmem:[#allocation12 + $0x268] sm:$0xff]  ;;  %v7283_v33 = vld [vmem:[#allocation144_spill] sm:$0xff]  ;;  %v1420_v6 = vld [vmem:[#allocation12 + $0x2c0] sm:$0xff] }
 0x2d6   : > { %v5474_v34 = vpop.permute.xlu0 %1562  ;;  %1998 = vrot.lane.b32.xlu2 %v5147_v12, %s3732_s20  ;;  %v7284_v44 = vld [vmem:[#allocation139_spill] sm:$0xff]  ;;  %v1424_v16 = vld [vmem:[#allocation12 + $0x2e0] sm:$0xff] }
 0x2d7   : > { %v5472_v32 = vpop.permute.xlu1 %1564  ;;  %v1418_v45 = vsel %vm786_vm6, %v7284_v44, %v4843_v43 }
 0x2d8   : > { %7265 = vst [vmem:[#allocation63_spill] sm:$0xff] %v5472_v32  ;;  %v5490_v56 = vpop.permute.xlu2 %1616 }
 0x2d9   : > { %7269 = vst [vmem:[#allocation34_spill] sm:$0xff] %v5490_v56  ;;  %v1283_v56 = vmul.f32 %v1271_v10, %v1257_v49  ;;  %v1330_v10 = vadd.f32 %v1326_v37, %v1286_v60  ;;  %v1370_v49 = vld [vmem:[#allocation12 + $0x250] sm:$0xff]  ;;  %v1364_v37 = vsel %vm732_vm3, %v7275_v27, %v7279_v41  ;;  %v1376_v60 = vmul.f32 %v1368_v18, %v1366_v20 }
 0x2da   : > { %v1365_v27 = vsel %vm732_vm3, %v7280_v3, %v7283_v33  ;;  %v1379_v18 = vmul.f32 %v1371_v25, %v1360_v19  ;;  %v1337_v20 = vadd.f32 %v1333_v28, %v1329_v4  ;;  %v1377_v17 = vmul.f32 %v1369_v50, %v1364_v37  ;;  %v7285_v25 = vld [vmem:[#allocation136_spill] sm:$0xff]  ;;  %v7286_v50 = vld [vmem:[#allocation146_spill] sm:$0xff] }
 0x2db   : > { %v1287_v53 = vadd.f32 %v1283_v56, %v1279_v15  ;;  %v1378_v15 = vmul.f32 %v1370_v49, %v1362_v63  ;;  %v1338_v46 = vadd.f32 %v1334_v29, %v1330_v10  ;;  %v1384_v41 = vmul.f32 %v1372_v51, %v1367_v8  ;;  %v1421_v49 = vld [vmem:[#allocation12 + $0x2c8] sm:$0xff]  ;;  %v1375_v19 = vld [vmem:[#allocation12 + $0x278] sm:$0xff]  ;;  %v7288_v29 = vld [vmem:[#allocation145_spill] sm:$0xff] }
 0x2dc   : > { %2000 = vrot.lane.b32.xlu0 %v5145_v42, %s3732_s20  ;;  %v1416_v63 = vsel %vm786_vm6, %v4843_v43, %v4893_v36  ;;  %v1363_v4 = vsel %vm732_vm3, %v7283_v33, %v7285_v25  ;;  %v1385_v10 = vmul.f32 %v1373_v26, %v1365_v27  ;;  %v1423_v28 = vld [vmem:[#allocation12 + $0x2d8] sm:$0xff]  ;;  %v1381_v3 = vadd.f32 %v1377_v17, %v1337_v20  ;;  %v7289_v8 = vld [vmem:[#allocation142_spill] sm:$0xff] }
 0x2dd   : > { %2002 = vrot.lane.b32.xlu1 %v5164_v57, %s3732_s20  ;;  %v1331_v56 = vadd.f32 %v1327_v22, %v1287_v53  ;;  %v1380_v22 = vadd.f32 %v1376_v60, %v1336_v62  ;;  %v1374_v53 = vld [vmem:[#allocation12 + $0x270] sm:$0xff]  ;;  %v1382_v43 = vadd.f32 %v1378_v15, %v1338_v46  ;;  %v1428_v60 = vmul.f32 %v1420_v6, %v1418_v45  ;;  %v7287_v62 = vld [vmem:[#allocation38_spill] sm:$0xff] }
 0x2de   : > { %v5530_v23 = vpop.permute.xlu0 %1600  ;;  %2004 = vrot.lane.b32.xlu2 %v5204_v30, %s3732_s20  ;;  %v1412_v51 = vsel %vm786_vm6, %v7288_v29, %v7287_v62  ;;  %v1429_v33 = vmul.f32 %v1421_v49, %v1416_v63  ;;  %v1386_v15 = vmul.f32 %v1374_v53, %v1363_v4  ;;  %v1422_v6 = vld [vmem:[#allocation12 + $0x2d0] sm:$0xff]  ;;  %v1414_v20 = vsel %vm786_vm6, %v4893_v36, %v7288_v29  ;;  %v7291_v49 = vld [vmem:[#allocation40_spill] sm:$0xff]  ;;  %v7293_v62 = vld [vmem:[#allocation149_spill] sm:$0xff] }
 0x2df   : > { %v5528_v5 = vpop.permute.xlu1 %1602  ;;  %v1339_v13 = vadd.f32 %v1335_v55, %v1331_v56  ;;  %v1361_v55 = vsel %vm732_vm3, %v7285_v25, %v7286_v50  ;;  %v7290_v56 = vld [vmem:[#allocation148_spill] sm:$0xff]  ;;  %v1388_v46 = vadd.f32 %v1384_v41, %v1380_v22  ;;  %v1389_v17 = vadd.f32 %v1385_v10, %v1381_v3  ;;  %v1472_v50 = vld [vmem:[#allocation12 + $0x340] sm:$0xff]  ;;  %v1425_v10 = vld [vmem:[#allocation12 + $0x2e8] sm:$0xff] }
 0x2e0   : > { %v5542_v32 = vpop.permute.xlu2 %1654  ;;  %v1419_v26 = vsel %vm786_vm6, %v7290_v56, %v7289_v8  ;;  %v1431_v45 = vmul.f32 %v1423_v28, %v1412_v51  ;;  %v7292_v63 = vld [vmem:[#allocation36_spill] sm:$0xff]  ;;  %v1390_v53 = vadd.f32 %v1386_v15, %v1382_v43  ;;  %v1430_v28 = vmul.f32 %v1422_v6, %v1414_v20  ;;  %v1476_v51 = vld [vmem:[#allocation12 + $0x360] sm:$0xff]  ;;  %v7296_v3 = vld [vmem:[#allocation31_spill] sm:$0xff] }
 0x2e1   : > { %7282 = vst [vmem:[#allocation66_spill] sm:$0xff] %v5542_v32  ;;  %v1383_v37 = vadd.f32 %v1379_v18, %v1339_v13  ;;  %v1387_v18 = vmul.f32 %v1375_v19, %v1361_v55  ;;  %v1426_v13 = vld [vmem:[#allocation12 + $0x2f0] sm:$0xff]  ;;  %v1415_v25 = vsel %vm786_vm6, %v7292_v63, %v7291_v49  ;;  %v7294_v56 = vld [vmem:[#allocation48_spill] sm:$0xff]  ;;  %v1432_v4 = vadd.f32 %v1428_v60, %v1388_v46  ;;  %v1524_v46 = vld [vmem:[#allocation12 + $0x3c0] sm:$0xff] }
 0x2e2   : > { %v1470_v41 = vsel %vm840_vm13, %v7294_v56, %v7293_v62  ;;  %v1436_v19 = vmul.f32 %v1424_v16, %v1419_v26  ;;  %v1417_v55 = vsel %vm786_vm6, %v7289_v8, %v7292_v63  ;;  %v1433_v29 = vadd.f32 %v1429_v33, %v1389_v17  ;;  %v1427_v32 = vld [vmem:[#allocation12 + $0x2f8] sm:$0xff]  ;;  %v1473_v16 = vld [vmem:[#allocation12 + $0x348] sm:$0xff]  ;;  %v1474_v15 = vld [vmem:[#allocation12 + $0x350] sm:$0xff] }
 0x2e3   : > { %v1391_v36 = vadd.f32 %v1387_v18, %v1383_v37  ;;  %v1438_v37 = vmul.f32 %v1426_v13, %v1415_v25  ;;  %v1480_v60 = vmul.f32 %v1472_v50, %v1470_v41  ;;  %v7299_v26 = vld [vmem:[#allocation52_spill] sm:$0xff]  ;;  %v7300_v18 = vld [vmem:[#allocation54_spill] sm:$0xff]  ;;  %v1522_v6 = vsel %vm894_vm9, %v5186_v9, %v5234_v48  ;;  %v7301_v50 = vld [vmem:[#allocation35_spill] sm:$0xff] }
 0x2e4   : > { %2006 = vrot.lane.b32.xlu0 %v5202_v47, %s3732_s20  ;;  %v1468_v8 = vsel %vm840_vm13, %v7293_v62, %v7299_v26  ;;  %v1440_v20 = vadd.f32 %v1436_v19, %v1432_v4  ;;  %v1437_v17 = vmul.f32 %v1425_v10, %v1417_v55  ;;  %v1434_v13 = vadd.f32 %v1430_v28, %v1390_v53  ;;  %v1477_v25 = vld [vmem:[#allocation12 + $0x368] sm:$0xff]  ;;  %v1475_v10 = vld [vmem:[#allocation12 + $0x358] sm:$0xff] }
 0x2e5   : > { %2008 = vrot.lane.b32.xlu1 %v5217_v38, %s3732_s20  ;;  %v1435_v33 = vadd.f32 %v1431_v45, %v1391_v36  ;;  %v1481_v63 = vmul.f32 %v1473_v16, %v1468_v8  ;;  %v1469_v62 = vsel %vm840_vm13, %v7296_v3, %v7301_v50  ;;  %v1532_v19 = vmul.f32 %v1524_v46, %v1522_v6  ;;  %v7302_v55 = vld [vmem:[#allocation42_spill] sm:$0xff]  ;;  %v1576_v6 = vld [vmem:[#allocation12 + $0x440] sm:$0xff] }
 0x2e6   : > { %v5578_v44 = vpop.permute.xlu0 %1606  ;;  %2010 = vrot.lane.b32.xlu2 %v5253_v0, %s3732_s20  ;;  %v7297_v0 = vld [vmem:[#allocation37_spill] sm:$0xff]  ;;  %v1442_v36 = vadd.f32 %v1438_v37, %v1434_v13  ;;  %v1464_v28 = vsel %vm840_vm13, %v7300_v18, %v7302_v55  ;;  %v7303_v16 = vld [vmem:[#allocation58_spill] sm:$0xff] }
 0x2e7   : > { %v5576_v27 = vpop.permute.xlu1 %1608  ;;  %v1471_v56 = vsel %vm840_vm13, %v7297_v0, %v7296_v3  ;;  %v1466_v0 = vsel %vm840_vm13, %v7299_v26, %v7300_v18  ;;  %v1489_v3 = vmul.f32 %v1477_v25, %v1469_v62  ;;  %v1525_v26 = vld [vmem:[#allocation12 + $0x3c8] sm:$0xff]  ;;  %v7304_v37 = vld [vmem:[#allocation41_spill] sm:$0xff]  ;;  %v7306_v25 = vld [vmem:[#allocation47_spill] sm:$0xff] }
 0x2e8   : > { %v5594_v22 = vpop.permute.xlu2 %1660  ;;  %v1488_v45 = vmul.f32 %v1476_v51, %v1471_v56  ;;  %v1482_v4 = vmul.f32 %v1474_v15, %v1466_v0  ;;  %v7305_v15 = vld [vmem:[#allocation45_spill] sm:$0xff]  ;;  %v1526_v0 = vld [vmem:[#allocation12 + $0x3d0] sm:$0xff]  ;;  %v1518_v46 = vsel %vm894_vm9, %v7304_v37, %v5291_v7  ;;  %v1529_v13 = vld [vmem:[#allocation12 + $0x3e8] sm:$0xff] }
 0x2e9   : > { %7295 = vst [vmem:[#allocation56_spill] sm:$0xff] %v5594_v22  ;;  %v7298_v22 = vld [vmem:[#allocation147_spill] sm:$0xff]  ;;  %v1523_v18 = vsel %vm894_vm9, %v7305_v15, %v5232_v35 }
 0x2ea   : > { %v1413_v43 = vsel %vm786_vm6, %v7291_v49, %v7298_v22  ;;  %v1484_v22 = vadd.f32 %v1480_v60, %v1440_v20  ;;  %v1467_v60 = vsel %vm840_vm13, %v7301_v50, %v7303_v16  ;;  %v1574_v20 = vsel %vm948_vm11, %v5206_v58, %v5379_v24  ;;  %v1479_v58 = vld [vmem:[#allocation12 + $0x378] sm:$0xff] }
 0x2eb   : > { %v1439_v49 = vmul.f32 %v1427_v32, %v1413_v43  ;;  %v1441_v32 = vadd.f32 %v1437_v17, %v1433_v29  ;;  %v1478_v43 = vld [vmem:[#allocation12 + $0x370] sm:$0xff]  ;;  %v1520_v29 = vsel %vm894_vm9, %v5234_v48, %v7304_v37  ;;  %v1483_v48 = vmul.f32 %v1475_v10, %v1464_v28  ;;  %s3265_s14 = spop %3264 }
 0x2ec   : > { %2012 = vrot.lane.b32.xlu0 %v5251_v21, %s3732_s20  ;;  %v1492_v56 = vadd.f32 %v1488_v45, %v1484_v22  ;;  %v1486_v17 = vadd.f32 %v1482_v4, %v1442_v36  ;;  %v1465_v50 = vsel %vm840_vm13, %v7303_v16, %v7306_v25  ;;  %v1533_v62 = vmul.f32 %v1525_v26, %v1520_v29  ;;  %v1577_v36 = vld [vmem:[#allocation12 + $0x448] sm:$0xff]  ;;  %v7307_v26 = vld [vmem:[#allocation61_spill] sm:$0xff]  ;;  %v1582_v25 = vld [vmem:[#allocation12 + $0x470] sm:$0xff] }
 0x2ed   : > { %2014 = vrot.lane.b32.xlu1 %v5273_v54, %s3732_s20  ;;  %v1443_v53 = vadd.f32 %v1439_v49, %v1435_v33  ;;  %v1485_v8 = vadd.f32 %v1481_v63, %v1441_v32  ;;  %v1528_v33 = vld [vmem:[#allocation12 + $0x3e0] sm:$0xff]  ;;  %v1521_v49 = vsel %vm894_vm9, %v5232_v35, %v5293_v40  ;;  %v1490_v63 = vmul.f32 %v1478_v43, %v1467_v60 }
 0x2ee   : > { %v5630_v9 = vpop.permute.xlu0 %1612  ;;  %2048 = vrot.lane.b32.xlu2 %v5095_v59, %s3733_s15  ;;  %v1536_v45 = vadd.f32 %v1532_v19, %v1492_v56  ;;  %v1540_v22 = vmul.f32 %v1528_v33, %v1523_v18  ;;  %v1534_v4 = vmul.f32 %v1526_v0, %v1518_v46  ;;  %v1584_v19 = vmul.f32 %v1576_v6, %v1574_v20  ;;  %v1580_v60 = vld [vmem:[#allocation12 + $0x460] sm:$0xff]  ;;  %v1530_v18 = vld [vmem:[#allocation12 + $0x3f0] sm:$0xff]  ;;  %v7308_v0 = vld [vmem:[#allocation32_spill] sm:$0xff] }
 0x2ef   : > { %v5628_v41 = vpop.permute.xlu1 %1614  ;;  %v1572_v35 = vsel %vm948_vm11, %v5379_v24, %v5422_v52  ;;  %v1493_v32 = vadd.f32 %v1489_v3, %v1485_v8  ;;  %v1541_v10 = vmul.f32 %v1529_v13, %v1521_v49  ;;  %v1487_v56 = vadd.f32 %v1483_v48, %v1443_v53  ;;  %v1628_v3 = vld [vmem:[#allocation12 + $0x4c0] sm:$0xff]  ;;  %v7309_v20 = vld [vmem:[#allocation64_spill] sm:$0xff] }
 0x2f0   : > { %v5638_v51 = vpop.permute.xlu2 %1666  ;;  %v1494_v43 = vadd.f32 %v1490_v63, %v1486_v17  ;;  %v1544_v16 = vadd.f32 %v1540_v22, %v1536_v45  ;;  %v1575_v37 = vsel %vm948_vm11, %v5381_v61, %v7307_v26  ;;  %v1491_v29 = vmul.f32 %v1479_v58, %v1465_v50  ;;  %v1578_v61 = vld [vmem:[#allocation12 + $0x450] sm:$0xff]  ;;  %v1527_v45 = vld [vmem:[#allocation12 + $0x3d8] sm:$0xff]  ;;  %v1632_v49 = vld [vmem:[#allocation12 + $0x4e0] sm:$0xff] }
 0x2f1   : > { %v1537_v33 = vadd.f32 %v1533_v62, %v1493_v32  ;;  %v1585_v24 = vmul.f32 %v1577_v36, %v1572_v35  ;;  %v1626_v8 = vsel %vm1002_vm12, %v5530_v23, %v5390_v39  ;;  %v1519_v46 = vsel %vm894_vm9, %v5293_v40, %v7308_v0  ;;  %v1581_v63 = vld [vmem:[#allocation12 + $0x468] sm:$0xff]  ;;  %v1680_v32 = vld [vmem:[#allocation12 + $0x540] sm:$0xff] }
 0x2f2   : > { %v1538_v53 = vadd.f32 %v1534_v4, %v1494_v43  ;;  %v1588_v6 = vadd.f32 %v1584_v19, %v1544_v16  ;;  %v1570_v48 = vsel %vm948_vm11, %v5422_v52, %v7309_v20  ;;  %v1516_v23 = vsel %vm894_vm9, %v5291_v7, %v5346_v1  ;;  %v1629_v1 = vld [vmem:[#allocation12 + $0x4c8] sm:$0xff] }
 0x2f3   : > { %v1545_v17 = vadd.f32 %v1541_v10, %v1537_v33  ;;  %v1592_v13 = vmul.f32 %v1580_v60, %v1575_v37  ;;  %v1627_v40 = vsel %vm1002_vm12, %v5528_v5, %v5578_v44  ;;  %v1573_v52 = vsel %vm948_vm11, %v7307_v26, %v5420_v11 }
 0x2f4   : > { %2050 = vrot.lane.b32.xlu0 %v5147_v12, %s3733_s15  ;;  %v1571_v50 = vsel %vm948_vm11, %v5420_v11, %v5474_v34  ;;  %v1636_v7 = vmul.f32 %v1628_v3, %v1626_v8  ;;  %v1624_v62 = vsel %vm1002_vm12, %v5390_v39, %v5576_v27  ;;  %v1542_v5 = vmul.f32 %v1530_v18, %v1519_v46  ;;  %v1630_v11 = vld [vmem:[#allocation12 + $0x4d0] sm:$0xff]  ;;  %v1531_v3 = vld [vmem:[#allocation12 + $0x3f8] sm:$0xff] }
 0x2f5   : > { %2052 = vrot.lane.b32.xlu1 %v5145_v42, %s3733_s15  ;;  %v1586_v58 = vmul.f32 %v1578_v61, %v1570_v48  ;;  %v1589_v22 = vadd.f32 %v1585_v24, %v1545_v17  ;;  %v1535_v4 = vmul.f32 %v1527_v45, %v1516_v23  ;;  %v1596_v19 = vadd.f32 %v1592_v13, %v1588_v6  ;;  %v1633_v48 = vld [vmem:[#allocation12 + $0x4e8] sm:$0xff]  ;;  %v1579_v17 = vld [vmem:[#allocation12 + $0x458] sm:$0xff]  ;;  %v7311_v45 = vld [vmem:[#allocation63_spill] sm:$0xff] }
 0x2f6   : > { %v5676_v28 = vpop.permute.xlu0 %1618  ;;  %2054 = vrot.lane.b32.xlu2 %v5164_v57, %s3733_s15  ;;  %v1644_v36 = vmul.f32 %v1632_v49, %v1627_v40  ;;  %v1622_v35 = vsel %vm1002_vm12, %v5576_v27, %v5630_v9  ;;  %v1546_v39 = vadd.f32 %v1542_v5, %v1538_v53  ;;  %v1593_v10 = vmul.f32 %v1581_v63, %v1573_v52  ;;  %v1684_v40 = vld [vmem:[#allocation12 + $0x560] sm:$0xff]  ;;  %v7312_v63 = vld [vmem:[#allocation66_spill] sm:$0xff] }
 0x2f7   : > { %v1653_v55 = vpop.permute.xlu1 %1652  ;;  %v1594_v43 = vmul.f32 %v1582_v25, %v1571_v50  ;;  %v1637_v16 = vmul.f32 %v1629_v1, %v1624_v62  ;;  %v1495_v37 = vadd.f32 %v1491_v29, %v1487_v56  ;;  %v1517_v33 = vsel %vm894_vm9, %v7308_v0, %v5344_v14  ;;  %v1681_v14 = vld [vmem:[#allocation12 + $0x548] sm:$0xff]  ;;  %v7310_v0 = vld [vmem:[#allocation56_spill] sm:$0xff]  ;;  %v1634_v25 = vld [vmem:[#allocation12 + $0x4f0] sm:$0xff] }
 0x2f8   : > { %v5688_v15 = vpop.permute.xlu2 %1892  ;;  %v1640_v24 = vadd.f32 %v1636_v7, %v1596_v19  ;;  %v1590_v8 = vadd.f32 %v1586_v58, %v1546_v39  ;;  %v1597_v53 = vadd.f32 %v1593_v10, %v1589_v22  ;;  %v1638_v18 = vmul.f32 %v1630_v11, %v1622_v35  ;;  %v1682_v19 = vld [vmem:[#allocation12 + $0x550] sm:$0xff]  ;;  %v7314_v11 = vld [vmem:[#allocation33_spill] sm:$0xff]  ;;  %v7315_v39 = vld [vmem:[#allocation34_spill] sm:$0xff] }
 0x2f9   : > { %v1539_v61 = vadd.f32 %v1535_v4, %v1495_v37  ;;  %v1625_v56 = vsel %vm1002_vm12, %v5578_v44, %v5438_v31  ;;  %v1568_v23 = vsel %vm948_vm11, %v7309_v20, %v7311_v45  ;;  %v1543_v44 = vmul.f32 %v1531_v3, %v1517_v33  ;;  %v7313_v20 = vld [vmem:[#allocation53_spill] sm:$0xff]  ;;  %v1686_v33 = vld [vmem:[#allocation12 + $0x570] sm:$0xff] }
 0x2fa   : > { %v1648_v29 = vadd.f32 %v1644_v36, %v1640_v24  ;;  %v1598_v13 = vadd.f32 %v1594_v43, %v1590_v8  ;;  %v1641_v49 = vadd.f32 %v1637_v16, %v1597_v53  ;;  %v1623_v50 = vsel %vm1002_vm12, %v5438_v31, %v5628_v41  ;;  %v1685_v36 = vld [vmem:[#allocation12 + $0x568] sm:$0xff] }
 0x2fb   : > { %v1645_v1 = vmul.f32 %v1633_v48, %v1625_v56  ;;  %v1547_v58 = vadd.f32 %v1543_v44, %v1539_v61  ;;  %v1587_v22 = vmul.f32 %v1579_v17, %v1568_v23  ;;  %v1569_v31 = vsel %vm948_vm11, %v5474_v34, %v7314_v11  ;;  %v1635_v48 = vld [vmem:[#allocation12 + $0x4f8] sm:$0xff] }
 0x2fc   : > { %2056 = vrot.lane.b32.xlu0 %v5204_v30, %s3733_s15  ;;  %v1642_v62 = vadd.f32 %v1638_v18, %v1598_v13  ;;  %v1620_v10 = vsel %vm1002_vm12, %v5630_v9, %v7315_v39  ;;  %v1631_v9 = vld [vmem:[#allocation12 + $0x4d8] sm:$0xff]  ;;  %v1621_v56 = vsel %vm1002_vm12, %v5628_v41, %v5676_v28 }
 0x2fd   : > { %2058 = vrot.lane.b32.xlu1 %v5202_v47, %s3733_s15  ;;  %v1649_v35 = vadd.f32 %v1645_v1, %v1641_v49  ;;  %v1591_v61 = vadd.f32 %v1587_v22, %v1547_v58  ;;  %v1647_v49 = vmul.f32 %v1635_v48, %v1621_v56  ;;  %v1683_v41 = vld [vmem:[#allocation12 + $0x558] sm:$0xff] }
 0x2fe   : > { %v1657_v26 = vpop.permute.xlu0 %1656  ;;  %2060 = vrot.lane.b32.xlu2 %v5217_v38, %s3733_s15 }
 0x2ff   : > { %v1659_v60 = vpop.permute.xlu1 %1658  ;;  %v1678_v27 = vsel %vm1056_vm14, %v1653_v55, %v1657_v26  ;;  %v1676_v55 = vsel %vm1056_vm14, %v1657_v26, %v7310_v0 }
 0x300   : > { %v1688_v46 = vmul.f32 %v1680_v32, %v1678_v27  ;;  %v5734_v6 = vpop.permute.xlu2 %1898  ;;  %v1679_v52 = vsel %vm1056_vm14, %v7312_v63, %v1659_v60  ;;  %v1689_v5 = vmul.f32 %v1681_v14, %v1676_v55  ;;  %v1646_v32 = vmul.f32 %v1634_v25, %v1623_v50  ;;  %v1583_v27 = vld [vmem:[#allocation12 + $0x478] sm:$0xff] }
 0x301   : > { %v1696_v4 = vmul.f32 %v1684_v40, %v1679_v52  ;;  %v1595_v55 = vmul.f32 %v1583_v27, %v1569_v31 }
 0x302   : > { %v1692_v7 = vadd.f32 %v1688_v46, %v1648_v29  ;;  %v1693_v3 = vadd.f32 %v1689_v5, %v1649_v35  ;;  %v1650_v8 = vadd.f32 %v1646_v32, %v1642_v62  ;;  %v1687_v62 = vld [vmem:[#allocation12 + $0x578] sm:$0xff] }
 0x303   : > { %v1599_v13 = vadd.f32 %v1595_v55, %v1591_v61 }
 0x304   : > { %2062 = vrot.lane.b32.xlu0 %v7313_v20, %s3733_s15  ;;  %v1700_v26 = vadd.f32 %v1696_v4, %v1692_v7 }
 0x305   : > { %2064 = vrot.lane.b32.xlu1 %v5251_v21, %s3733_s15 }
 0x306   : > { %v1663_v16 = vpop.permute.xlu0 %1662  ;;  %2066 = vrot.lane.b32.xlu2 %v5273_v54, %s3733_s15  ;;  %v1704_v17 = vrot.slane %v1700_v26, 4 }
 0x307   : > { %v1665_v43 = vpop.permute.xlu1 %1664  ;;  %v1675_v34 = vsel %vm1056_vm14, %v1663_v16, %v5638_v51  ;;  %v1677_v24 = vsel %vm1056_vm14, %v1659_v60, %v1663_v16  ;;  %v1639_v60 = vmul.f32 %v1631_v9, %v1620_v10 }
 0x308   : > { %v1674_v37 = vsel %vm1056_vm14, %v7310_v0, %v1665_v43  ;;  %v1697_v18 = vmul.f32 %v1685_v36, %v1677_v24  ;;  %v5776_v46 = vpop.permute.xlu2 %1904  ;;  %v1698_v14 = vmul.f32 %v1686_v33, %v1675_v34  ;;  %v1705_v25 = vadd.f32 %v1704_v17, %v1700_v26 }
 0x309   : > { %v1690_v53 = vmul.f32 %v1682_v19, %v1674_v37  ;;  %v1643_v44 = vadd.f32 %v1639_v60, %v1599_v13 }
 0x30a   : > { %v1701_v0 = vadd.f32 %v1697_v18, %v1693_v3  ;;  %v1706_v11 = vrot.slane %v1705_v25, 2 }
 0x30b   : > { %v1694_v29 = vadd.f32 %v1690_v53, %v1650_v8  ;;  %v1651_v22 = vadd.f32 %v1647_v49, %v1643_v44  ;;  %v5807_v8 = vstv %s3265_s14 }
 0x30c   : > { %v1710_v23 = vrot.slane %v1701_v0, 4  ;;  %2100 = vrot.lane.b32.xlu0 %v5095_v59, %s3734_s21  ;;  %v1707_v16 = vadd.f32 %v1706_v11, %v1705_v25  ;;  %7316 = vst [vmem:[#allocation70_spill] sm:$0xff] %v5807_v8  ;;  %v7317_v25 = vlaneseq }
 0x30d   : > { %v1702_v45 = vadd.f32 %v1698_v14, %v1694_v29  ;;  %2102 = vrot.lane.b32.xlu1 %v5147_v12, %s3734_s21 }
 0x30e   : > { %v1711_v40 = vadd.f32 %v1710_v23, %v1701_v0  ;;  %v1669_v28 = vpop.permute.xlu0 %1668  ;;  %2104 = vrot.lane.b32.xlu2 %v5145_v42, %s3734_s21  ;;  %v1708_v27 = vrot.slane %v1707_v16, 1  ;;  %vm5842_vm7 = vcmp.lt.s32.totalorder %v7317_v25, 512  ;;  %v1869_v25 = vld [vmem:[#allocation12 + $0x8] sm:$0xff] }
 0x30f   : > { %v1716_v63 = vrot.slane %v1702_v45, 4  ;;  %v1671_v52 = vpop.permute.xlu1 %1670  ;;  %v1672_v50 = vsel %vm1056_vm14, %v1665_v43, %v1669_v28 }
 0x310   : > { %v1712_v7 = vrot.slane %v1711_v40, 2  ;;  %v1673_v5 = vsel %vm1056_vm14, %v5638_v51, %v1671_v52  ;;  %v5793_v58 = vpop.permute.xlu2 %1910  ;;  %v1691_v4 = vmul.f32 %v1683_v41, %v1672_v50  ;;  %v1709_v56 = vadd.f32 %v1708_v27, %v1707_v16 }
 0x311   : > { %v1717_v1 = vadd.f32 %v1716_v63, %v1702_v45  ;;  %v1699_v31 = vmul.f32 %v1687_v62, %v1673_v5  ;;  %v7318_v50 = vmov 0 }
 0x312   : > { %v1713_v19 = vadd.f32 %v1712_v7, %v1711_v40  ;;  %v1695_v35 = vadd.f32 %v1691_v4, %v1651_v22  ;;  %v1729_v60 = vadd.f32 %v5807_v8, %v1709_v56  ;;  %v7319_v50 = vsel %vm5842_vm7, 4294967295, %v7318_v50 }
 0x313   : > { %v1718_v36 = vrot.slane %v1717_v1, 2  ;;  %7320 = vst [vmem:[#allocation59_spill] sm:$0xff] %v7319_v50  ;;  %v1870_v50 = vld [vmem:[#allocation12 + $0x10] sm:$0xff]  ;;  %v7356_v2 = vld [vmem:[#allocation70_spill] sm:$0xff] }
 0x314   : > { %2106 = vrot.lane.b32.xlu0 %v5164_v57, %s3734_s21  ;;  %v1714_v39 = vrot.slane %v1713_v19, 1  ;;  %v1703_v10 = vadd.f32 %v1699_v31, %v1695_v35 }
 0x315   : > { %v1719_v32 = vadd.f32 %v1718_v36, %v1717_v1  ;;  %2108 = vrot.lane.b32.xlu1 %v5204_v30, %s3734_s21 }
 0x316   : > { %v5801_v51 = vpop.permute.xlu0 %1894  ;;  %2110 = vrot.lane.b32.xlu2 %v5202_v47, %s3734_s21  ;;  %v1722_v37 = vrot.slane %v1703_v10, 4  ;;  %v1715_v34 = vadd.f32 %v1714_v39, %v1713_v19 }
 0x317   : > { %v5799_v43 = vpop.permute.xlu1 %1896  ;;  %v1720_v26 = vrot.slane %v1719_v32, 1 }
 0x318   : > { %v5805_v33 = vpop.permute.xlu2 %1948  ;;  %v1723_v24 = vadd.f32 %v1722_v37, %v1703_v10  ;;  %v1730_v18 = vadd.f32 %v5807_v8, %v1715_v34 }
 0x319   : > { %v1721_v9 = vadd.f32 %v1720_v26, %v1719_v32 }
 0x31a   : > { %v1724_v3 = vrot.slane %v1723_v24, 2  ;;  %3410 = vtanh.f32 %v1730_v18 }
 0x31b   : > { %v1731_v14 = vadd.f32 %v5807_v8, %v1721_v9 }
 0x31c   : > { %2112 = vrot.lane.b32.xlu0 %v5217_v38, %s3734_s21  ;;  %v1725_v53 = vadd.f32 %v1724_v3, %v1723_v24 }
 0x31d   : > { %2114 = vrot.lane.b32.xlu1 %v7313_v20, %s3734_s21  ;;  %3412 = vtanh.f32 %v1731_v14 }
 0x31e   : > { %v5816_v48 = vpop.permute.xlu0 %1900  ;;  %2116 = vrot.lane.b32.xlu2 %v5251_v21, %s3734_s21  ;;  %v1726_v29 = vrot.slane %v1725_v53, 1 }
 0x31f   : > { %v5814_v61 = vpop.permute.xlu1 %1902 }
 0x320   : > { %v5821_v0 = vpop.permute.xlu2 %1954  ;;  %v1727_v55 = vadd.f32 %v1726_v29, %v1725_v53  ;;  %v3411_v13 = vpop.eup %3410 }
 0x321   : > { %v1741_v63 = vrot.slane %v3411_v13, 7 }
 0x322   : > { %v1732_v17 = vadd.f32 %v5807_v8, %v1727_v55  ;;  %v1874_v8 = vld [vmem:[#allocation12 + $0x30] sm:$0xff] }
 0x323   : > { %v3413_v40 = vpop.eup %3412 }
 0x324   : > { %2118 = vrot.lane.b32.xlu0 %v5273_v54, %s3734_s21  ;;  %3414 = vtanh.f32 %v1732_v17  ;;  %v1742_v41 = vrot.slane %v3413_v40, 6 }
 0x325   : > { %2152 = vrot.lane.b32.xlu1 %v5095_v59, %s3735_s18  ;;  %3416 = vtanh.f32 %v1729_v60 }
 0x326   : > { %v5831_v23 = vpop.permute.xlu0 %1906  ;;  %2154 = vrot.lane.b32.xlu2 %v5147_v12, %s3735_s18 }
 0x327   : > { %v5829_v45 = vpop.permute.xlu1 %1908 }
 0x328   : > { %v5835_v49 = vpop.permute.xlu2 %1960 }
 0x32a   : > { %v3415_v52 = vpop.eup %3414 }
 0x32b   : > { %v1743_v28 = vrot.slane %v3415_v52, 5  ;;  %v3417_v44 = vpop.eup %3416  ;;  %v1868_v52 = vld [vmem:[#allocation12] sm:$0xff] }
 0x32c   : > { %2156 = vrot.lane.b32.xlu0 %v5145_v42, %s3735_s18  ;;  %v1745_v62 = vsel %vm1744_vm1, %v3417_v44, %v1741_v63 }
 0x32d   : > { %2158 = vrot.lane.b32.xlu1 %v5164_v57, %s3735_s18  ;;  %v1747_v5 = vsel %vm1746_vm4, %v1742_v41, %v1743_v28  ;;  %v1872_v41 = vld [vmem:[#allocation12 + $0x20] sm:$0xff]  ;;  %v1876_v28 = vmul.f32 %v1868_v52, %v5095_v59  ;;  %v1875_v52 = vld [vmem:[#allocation12 + $0x38] sm:$0xff] }
 0x32e   : > { %v5848_v1 = vpop.permute.xlu0 %1944  ;;  %2160 = vrot.lane.b32.xlu2 %v5204_v30, %s3735_s18  ;;  %v1749_v22 = vsel %vm1748_vm5, %v1745_v62, %v1747_v5  ;;  %v1884_v44 = vmul.f32 %v1872_v41, %v5147_v12  ;;  %v1873_v62 = vld [vmem:[#allocation12 + $0x28] sm:$0xff]  ;;  %v1920_v5 = vld [vmem:[#allocation12 + $0x80] sm:$0xff] }
 0x32f   : > { %v5846_v7 = vpop.permute.xlu1 %1946  ;;  %1753 = vst.msk [vmem:[%s5859_s23] sm:$0xf] %vm5842_vm7, %v1749_v22  ;;  %v1918_v22 = vsel %vm570_vm15, %v5688_v15, %v5799_v43  ;;  %v1916_v15 = vsel %vm570_vm15, %v5799_v43, %v5816_v48  ;;  %v1914_v43 = vsel %vm570_vm15, %v5816_v48, %v5776_v46  ;;  %v1917_v48 = vsel %vm570_vm15, %v5734_v6, %v5814_v61 }
 0x330   : > { %v5855_v4 = vpop.permute.xlu2 %1998 }
 0x334   : > { %2162 = vrot.lane.b32.xlu0 %v5202_v47, %s3735_s18 }
 0x335   : > { %2164 = vrot.lane.b32.xlu1 %v5217_v38, %s3735_s18 }
 0x336   : > { %v5870_v36 = vpop.permute.xlu0 %1950  ;;  %2166 = vrot.lane.b32.xlu2 %v7313_v20, %s3735_s18 }
 0x337   : > { %v5868_v19 = vpop.permute.xlu1 %1952 }
 0x338   : > { %v5874_v11 = vpop.permute.xlu2 %2004 }
 0x33c   : > { %2168 = vrot.lane.b32.xlu0 %v5251_v21, %s3735_s18 }
 0x33d   : > { %2170 = vrot.lane.b32.xlu1 %v5273_v54, %s3735_s18 }
 0x33e   : > { %v5882_v35 = vpop.permute.xlu0 %1956  ;;  %2204 = vrot.lane.b32.xlu2 %v5095_v59, %s3736_s22 }
 0x33f   : > { %v5880_v31 = vpop.permute.xlu1 %1958 }
 0x340   : > { %v5886_v32 = vpop.permute.xlu2 %2010 }
 0x344   : > { %2206 = vrot.lane.b32.xlu0 %v5147_v12, %s3736_s22 }
 0x345   : > { %2208 = vrot.lane.b32.xlu1 %v5145_v42, %s3736_s22 }
 0x346   : > { %v5894_v10 = vpop.permute.xlu0 %1962  ;;  %2210 = vrot.lane.b32.xlu2 %v5164_v57, %s3736_s22 }
 0x347   : > { %v5892_v39 = vpop.permute.xlu1 %1996 }
 0x348   : > { %v5898_v16 = vpop.permute.xlu2 %2048 }
 0x34c   : > { %2212 = vrot.lane.b32.xlu0 %v5204_v30, %s3736_s22 }
 0x34d   : > { %2214 = vrot.lane.b32.xlu1 %v5202_v47, %s3736_s22 }
 0x34e   : > { %v5906_v37 = vpop.permute.xlu0 %2000  ;;  %2216 = vrot.lane.b32.xlu2 %v5217_v38, %s3736_s22 }
 0x34f   : > { %v5904_v26 = vpop.permute.xlu1 %2002 }
 0x350   : > { %v5910_v34 = vpop.permute.xlu2 %2054 }
 0x351   : > { %7321 = vst [vmem:[#allocation67_spill] sm:$0xff] %v5910_v34  ;;  %v1924_v34 = vld [vmem:[#allocation12 + $0xa0] sm:$0xff] }
 0x354   : > { %2218 = vrot.lane.b32.xlu0 %v7313_v20, %s3736_s22 }
 0x355   : > { %2220 = vrot.lane.b32.xlu1 %v5251_v21, %s3736_s22 }
 0x356   : > { %v5918_v27 = vpop.permute.xlu0 %2006  ;;  %2222 = vrot.lane.b32.xlu2 %v5273_v54, %s3736_s22 }
 0x357   : > { %v5916_v24 = vpop.permute.xlu1 %2008 }
 0x358   : > { %v5922_v9 = vpop.permute.xlu2 %2060 }
 0x359   : > { %7322 = vst [vmem:[#allocation69_spill] sm:$0xff] %v5922_v9  ;;  %v1921_v9 = vld [vmem:[#allocation12 + $0x88] sm:$0xff] }
 0x35c   : > { %2256 = vrot.lane.b32.xlu0 %v5095_v59, %s3737_s19 }
 0x35d   : > { %2258 = vrot.lane.b32.xlu1 %v5147_v12, %s3737_s19 }
 0x35e   : > { %v5930_v53 = vpop.permute.xlu0 %2012  ;;  %2260 = vrot.lane.b32.xlu2 %v5145_v42, %s3737_s19 }
 0x35f   : > { %v5928_v3 = vpop.permute.xlu1 %2014 }
 0x360   : > { %v5934_v18 = vpop.permute.xlu2 %2066 }
 0x361   : > { %7323 = vst [vmem:[#allocation62_spill] sm:$0xff] %v5934_v18  ;;  %v1885_v18 = vmul.f32 %v1873_v62, %v5164_v57  ;;  %v1922_v62 = vld [vmem:[#allocation12 + $0x90] sm:$0xff] }
 0x364   : > { %2262 = vrot.lane.b32.xlu0 %v5164_v57, %s3737_s19 }
 0x365   : > { %2264 = vrot.lane.b32.xlu1 %v5204_v30, %s3737_s19 }
 0x366   : > { %v5942_v29 = vpop.permute.xlu0 %2050  ;;  %2266 = vrot.lane.b32.xlu2 %v5202_v47, %s3737_s19 }
 0x367   : > { %v5940_v56 = vpop.permute.xlu1 %2052  ;;  %7324 = vst [vmem:[#allocation72_spill] sm:$0xff] %v5942_v29 }
 0x368   : > { %v5946_v14 = vpop.permute.xlu2 %2104 }
 0x369   : > { %7325 = vst [vmem:[#allocation68_spill] sm:$0xff] %v5946_v14  ;;  %v1888_v14 = vadd.f32 %v1884_v44, %v1876_v28  ;;  %v1919_v28 = vsel %vm570_vm15, %v5801_v51, %v5734_v6 }
 0x36a   : > { %v1936_v51 = vmul.f32 %v1924_v34, %v1919_v28  ;;  %v1968_v34 = vsel %vm624_vm0, %v5805_v33, %v5868_v19  ;;  %v1976_v28 = vld [vmem:[#allocation12 + $0x120] sm:$0xff] }
 0x36c   : > { %2268 = vrot.lane.b32.xlu0 %v5217_v38, %s3737_s19 }
 0x36d   : > { %2270 = vrot.lane.b32.xlu1 %v7313_v20, %s3737_s19 }
 0x36e   : > { %v5954_v60 = vpop.permute.xlu0 %2056  ;;  %2272 = vrot.lane.b32.xlu2 %v5251_v21, %s3737_s19 }
 0x36f   : > { %v5952_v55 = vpop.permute.xlu1 %2058 }
 0x370   : > { %7326 = vst [vmem:[#allocation73_spill] sm:$0xff] %v5952_v55  ;;  %v5958_v17 = vpop.permute.xlu2 %2110 }
 0x371   : > { %7327 = vst [vmem:[#allocation65_spill] sm:$0xff] %v5958_v17 }
 0x374   : > { %2274 = vrot.lane.b32.xlu0 %v5273_v54, %s3737_s19 }
 0x375   : > { %2308 = vrot.lane.b32.xlu1 %v5095_v59, %s3738_s10 }
 0x376   : > { %v5966_v40 = vpop.permute.xlu0 %2062  ;;  %2310 = vrot.lane.b32.xlu2 %v5147_v12, %s3738_s10 }
 0x377   : > { %v5964_v13 = vpop.permute.xlu1 %2064  ;;  %7329 = vst [vmem:[#allocation74_spill] sm:$0xff] %v5966_v40  ;;  %v1877_v40 = vmul.f32 %v1869_v25, %v5145_v42  ;;  %v1887_v25 = vmul.f32 %v1875_v52, %v7313_v20 }
 0x378   : > { %7328 = vst [vmem:[#allocation71_spill] sm:$0xff] %v5964_v13  ;;  %v5970_v63 = vpop.permute.xlu2 %2116  ;;  %v1928_v13 = vmul.f32 %v1920_v5, %v1918_v22  ;;  %v1923_v5 = vld [vmem:[#allocation12 + $0x98] sm:$0xff]  ;;  %v1930_v22 = vmul.f32 %v1922_v62, %v1914_v43 }
 0x379   : > { %7330 = vst [vmem:[#allocation77_spill] sm:$0xff] %v5970_v63  ;;  %v1871_v63 = vld [vmem:[#allocation12 + $0x18] sm:$0xff]  ;;  %v1889_v44 = vadd.f32 %v1885_v18, %v1877_v40  ;;  %v1925_v18 = vld [vmem:[#allocation12 + $0xa8] sm:$0xff] }
 0x37a   : > { %v1879_v29 = vmul.f32 %v1871_v63, %v5217_v38  ;;  %v1932_v63 = vadd.f32 %v1928_v13, %v1888_v14 }
 0x37c   : > { %2312 = vrot.lane.b32.xlu0 %v5145_v42, %s3738_s10  ;;  %v1891_v40 = vadd.f32 %v1887_v25, %v1879_v29  ;;  %v1926_v29 = vld [vmem:[#allocation12 + $0xb0] sm:$0xff]  ;;  %v1927_v25 = vld [vmem:[#allocation12 + $0xb8] sm:$0xff] }
 0x37d   : > { %2314 = vrot.lane.b32.xlu1 %v5164_v57, %s3738_s10 }
 0x37e   : > { %v5984_v41 = vpop.permute.xlu0 %2100  ;;  %2316 = vrot.lane.b32.xlu2 %v5204_v30, %s3738_s10 }
 0x37f   : > { %v5982_v17 = vpop.permute.xlu1 %2102  ;;  %7332 = vst [vmem:[#allocation79_spill] sm:$0xff] %v5984_v41  ;;  %v1886_v41 = vmul.f32 %v1874_v8, %v5202_v47  ;;  %v1912_v8 = vsel %vm570_vm15, %v5776_v46, %v5829_v45  ;;  %v1970_v46 = vsel %vm624_vm0, %v5848_v1, %v5805_v33  ;;  %v1973_v45 = vld [vmem:[#allocation12 + $0x108] sm:$0xff]  ;;  %v1915_v1 = vsel %vm570_vm15, %v5814_v61, %v5831_v23  ;;  %v1975_v61 = vld [vmem:[#allocation12 + $0x118] sm:$0xff] }
 0x380   : > { %7331 = vst [vmem:[#allocation76_spill] sm:$0xff] %v5982_v17  ;;  %v5994_v55 = vpop.permute.xlu2 %2154  ;;  %v1878_v17 = vmul.f32 %v1870_v50, %v5204_v30  ;;  %v1929_v50 = vmul.f32 %v1921_v9, %v1916_v15  ;;  %v1931_v52 = vmul.f32 %v1923_v5, %v1912_v8  ;;  %v1972_v15 = vld [vmem:[#allocation12 + $0x100] sm:$0xff]  ;;  %v1913_v33 = vsel %vm570_vm15, %v5831_v23, %v5793_v58  ;;  %v1974_v5 = vld [vmem:[#allocation12 + $0x110] sm:$0xff] }
 0x381   : > { %v1980_v43 = vmul.f32 %v1972_v15, %v1970_v46  ;;  %v1964_v8 = vsel %vm624_vm0, %v5882_v35, %v5835_v49  ;;  %v1966_v58 = vsel %vm624_vm0, %v5868_v19, %v5882_v35  ;;  %v1939_v15 = vmul.f32 %v1927_v25, %v1913_v33 }
 0x382   : > { %v1890_v9 = vadd.f32 %v1886_v41, %v1878_v17  ;;  %v1933_v6 = vadd.f32 %v1929_v50, %v1889_v44  ;;  %v1940_v17 = vadd.f32 %v1936_v51, %v1932_v63  ;;  %v1937_v41 = vmul.f32 %v1925_v18, %v1917_v48 }
 0x383   : > { %v1971_v44 = vsel %vm624_vm0, %v5846_v7, %v5870_v36  ;;  %v1981_v50 = vmul.f32 %v1973_v45, %v1968_v34  ;;  %v1935_v63 = vadd.f32 %v1931_v52, %v1891_v40  ;;  %v1938_v51 = vmul.f32 %v1926_v29, %v1915_v1  ;;  %v2024_v7 = vld [vmem:[#allocation12 + $0x180] sm:$0xff]  ;;  %v1979_v45 = vld [vmem:[#allocation12 + $0x138] sm:$0xff]  ;;  %v1977_v34 = vld [vmem:[#allocation12 + $0x128] sm:$0xff] }
 0x384   : > { %2318 = vrot.lane.b32.xlu0 %v5202_v47, %s3738_s10  ;;  %v1934_v23 = vadd.f32 %v1930_v22, %v1890_v9  ;;  %v2022_v18 = vsel %vm678_vm2, %v5892_v39, %v5906_v37  ;;  %v1941_v48 = vadd.f32 %v1937_v41, %v1933_v6  ;;  %v1988_v46 = vmul.f32 %v1976_v28, %v1971_v44  ;;  %v2025_v22 = vld [vmem:[#allocation12 + $0x188] sm:$0xff]  ;;  %v2027_v1 = vld [vmem:[#allocation12 + $0x198] sm:$0xff] }
 0x385   : > { %2320 = vrot.lane.b32.xlu1 %v5217_v38, %s3738_s10  ;;  %v1965_v49 = vsel %vm624_vm0, %v5880_v31, %v5894_v10  ;;  %v1969_v19 = vsel %vm624_vm0, %v5870_v36, %v5821_v0  ;;  %v1982_v35 = vmul.f32 %v1974_v5, %v1966_v58  ;;  %v1983_v9 = vmul.f32 %v1975_v61, %v1964_v8  ;;  %v2028_v61 = vld [vmem:[#allocation12 + $0x1a0] sm:$0xff] }
 0x386   : > { %v6030_v13 = vpop.permute.xlu0 %2106  ;;  %2322 = vrot.lane.b32.xlu2 %v7313_v20, %s3738_s10  ;;  %v1984_v39 = vadd.f32 %v1980_v43, %v1940_v17  ;;  %v1985_v40 = vadd.f32 %v1981_v50, %v1941_v48  ;;  %v2020_v10 = vsel %vm678_vm2, %v5906_v37, %v5874_v11  ;;  %v2032_v52 = vmul.f32 %v2024_v7, %v2022_v18  ;;  %v1978_v37 = vld [vmem:[#allocation12 + $0x130] sm:$0xff]  ;;  %v2029_v43 = vld [vmem:[#allocation12 + $0x1a8] sm:$0xff] }
 0x387   : > { %v6028_v14 = vpop.permute.xlu1 %2108  ;;  %v1942_v6 = vadd.f32 %v1938_v51, %v1934_v23  ;;  %v1943_v29 = vadd.f32 %v1939_v15, %v1935_v63  ;;  %v1991_v36 = vmul.f32 %v1979_v45, %v1965_v49  ;;  %v2016_v41 = vsel %vm678_vm2, %v5916_v24, %v5930_v53  ;;  %v2026_v7 = vld [vmem:[#allocation12 + $0x190] sm:$0xff]  ;;  %v2077_v49 = vld [vmem:[#allocation12 + $0x208] sm:$0xff] }
 0x388   : > { %v6046_v62 = vpop.permute.xlu2 %2160  ;;  %v1989_v33 = vmul.f32 %v1977_v34, %v1969_v19  ;;  %v1992_v28 = vadd.f32 %v1988_v46, %v1984_v39  ;;  %v1967_v44 = vsel %vm624_vm0, %v5821_v0, %v5880_v31  ;;  %v2021_v53 = vsel %vm678_vm2, %v5904_v26, %v5918_v27  ;;  %v2031_v46 = vld [vmem:[#allocation12 + $0x1b8] sm:$0xff] }
 0x389   : > { %v1986_v50 = vadd.f32 %v1982_v35, %v1942_v6  ;;  %v1987_v5 = vadd.f32 %v1983_v9, %v1943_v29  ;;  %v2033_v8 = vmul.f32 %v2025_v22, %v2020_v10  ;;  %v2035_v0 = vmul.f32 %v2027_v1, %v2016_v41  ;;  %v2437_v39 = vld [vmem:[#allocation10 + $0x78] sm:$0xff]  ;;  %v2030_v22 = vld [vmem:[#allocation12 + $0x1b0] sm:$0xff]  ;;  %v7335_v41 = vld [vmem:[#allocation73_spill] sm:$0xff] }
 0x38a   : > { %v1993_v23 = vadd.f32 %v1989_v33, %v1985_v40  ;;  %v2036_v63 = vadd.f32 %v2032_v52, %v1992_v28  ;;  %v1990_v31 = vmul.f32 %v1978_v37, %v1967_v44  ;;  %v2018_v18 = vsel %vm678_vm2, %v5874_v11, %v5916_v24  ;;  %v2412_v40 = vld [vmem:[#allocation9 + $0x50] sm:$0xff]  ;;  %v7336_v28 = vld [vmem:[#allocation69_spill] sm:$0xff]  ;;  %v2079_v44 = vld [vmem:[#allocation12 + $0x218] sm:$0xff] }
 0x38b   : > { %v1995_v51 = vadd.f32 %v1991_v36, %v1987_v5  ;;  %v2041_v48 = vmul.f32 %v2029_v43, %v2021_v53  ;;  %v2074_v45 = vsel %vm732_vm3, %v5898_v16, %v5940_v56  ;;  %v2072_v11 = vsel %vm732_vm3, %v5940_v56, %v5954_v60  ;;  %v2432_v56 = vld [vmem:[#allocation10 + $0x50] sm:$0xff]  ;;  %v2080_v36 = vld [vmem:[#allocation12 + $0x220] sm:$0xff]  ;;  %v2081_v53 = vld [vmem:[#allocation12 + $0x228] sm:$0xff] }
 0x38c   : > { %2324 = vrot.lane.b32.xlu0 %v5251_v21, %s3738_s10  ;;  %v1994_v24 = vadd.f32 %v1990_v31, %v1986_v50  ;;  %v2037_v34 = vadd.f32 %v2033_v8, %v1993_v23  ;;  %v2034_v19 = vmul.f32 %v2026_v7, %v2018_v18  ;;  %v2019_v16 = vsel %vm678_vm2, %v5918_v27, %v5886_v32  ;;  %v7333_v1 = vld [vmem:[#allocation67_spill] sm:$0xff]  ;;  %v7339_v8 = vld [vmem:[#allocation46_spill] sm:$0xff]  ;;  %v7340_v18 = vld [vmem:[#allocation68_spill] sm:$0xff] }
 0x38d   : > { %2326 = vrot.lane.b32.xlu1 %v5273_v54, %s3738_s10  ;;  %v2039_v35 = vadd.f32 %v2035_v0, %v1995_v51  ;;  %v2073_v33 = vsel %vm732_vm3, %v7333_v1, %v7335_v41  ;;  %v2070_v37 = vsel %vm732_vm3, %v5954_v60, %v7336_v28  ;;  %v7337_v43 = vld [vmem:[#allocation71_spill] sm:$0xff]  ;;  %v2447_v23 = vmul.f32 %v7339_v8, %v2437_v39  ;;  %v2129_v7 = vld [vmem:[#allocation12 + $0x288] sm:$0xff] }
 0x38e   : > { %v6082_v17 = vpop.permute.xlu0 %2112  ;;  %2360 = vrot.lane.b32.xlu2 %v5095_v59, %s3739_s5  ;;  %v2023_v59 = vsel %vm678_vm2, %v5855_v4, %v5904_v26  ;;  %v2017_v4 = vsel %vm678_vm2, %v5886_v32, %v5928_v3  ;;  %v2076_v26 = vld [vmem:[#allocation12 + $0x200] sm:$0xff]  ;;  %v2417_v3 = vld [vmem:[#allocation9 + $0x78] sm:$0xff]  ;;  %v2045_v10 = vadd.f32 %v2041_v48, %v2037_v34  ;;  %v2078_v50 = vld [vmem:[#allocation12 + $0x210] sm:$0xff]  ;;  %v2442_v0 = vmul.f32 %v7339_v8, %v2432_v56 }
 0x38f   : > { %v6080_v25 = vpop.permute.xlu1 %2114  ;;  %v2040_v15 = vmul.f32 %v2028_v61, %v2023_v59  ;;  %v2043_v52 = vmul.f32 %v2031_v46, %v2017_v4  ;;  %v2084_v6 = vmul.f32 %v2076_v26, %v2074_v45  ;;  %v7334_v32 = vld [vmem:[#allocation72_spill] sm:$0xff]  ;;  %v7338_v61 = vld [vmem:[#allocation43_spill] sm:$0xff]  ;;  %v2038_v31 = vadd.f32 %v2034_v19, %v1994_v24  ;;  %v7341_v39 = vld [vmem:[#allocation62_spill] sm:$0xff] }
 0x390   : > { %v6098_v58 = vpop.permute.xlu2 %2166  ;;  %v2075_v27 = vsel %vm732_vm3, %v7334_v32, %v7333_v1  ;;  %v2427_v59 = vmul.f32 %v2417_v3, %v7338_v61  ;;  %v2042_v60 = vmul.f32 %v2030_v22, %v2019_v16  ;;  %v2124_v48 = vsel %vm786_vm6, %v7340_v18, %v6028_v14  ;;  %v2413_v45 = vld [vmem:[#allocation9 + $0x58] sm:$0xff]  ;;  %v2082_v3 = vld [vmem:[#allocation12 + $0x230] sm:$0xff] }
 0x391   : > { %v2044_v9 = vadd.f32 %v2040_v15, %v2036_v63  ;;  %v2422_v63 = vmul.f32 %v2412_v40, %v7338_v61  ;;  %v2047_v51 = vadd.f32 %v2043_v52, %v2039_v35  ;;  %v2092_v46 = vmul.f32 %v2080_v36, %v2075_v27  ;;  %v7342_v40 = vld [vmem:[#allocation74_spill] sm:$0xff]  ;;  %v2083_v16 = vld [vmem:[#allocation12 + $0x238] sm:$0xff]  ;;  %v7344_v36 = vld [vmem:[#allocation49_spill] sm:$0xff] }
 0x392   : > { %v2086_v34 = vmul.f32 %v2078_v50, %v2070_v37  ;;  %v2069_v24 = vsel %vm732_vm3, %v7342_v40, %v7341_v39  ;;  %v2071_v19 = vsel %vm732_vm3, %v7335_v41, %v7342_v40  ;;  %v2137_v35 = vmul.f32 %v2129_v7, %v2124_v48  ;;  %v2434_v37 = vld [vmem:[#allocation10 + $0x60] sm:$0xff]  ;;  %v2133_v50 = vld [vmem:[#allocation12 + $0x2a8] sm:$0xff]  ;;  %v2134_v39 = vld [vmem:[#allocation12 + $0x2b0] sm:$0xff] }
 0x393   : > { %v2088_v15 = vadd.f32 %v2084_v6, %v2044_v9  ;;  %v2457_v9 = vadd.f32 %v2447_v23, %v2427_v59  ;;  %v2452_v56 = vadd.f32 %v2442_v0, %v2422_v63  ;;  %v2046_v22 = vadd.f32 %v2042_v60, %v2038_v31  ;;  %v7343_v6 = vld [vmem:[#allocation39_spill] sm:$0xff]  ;;  %v7346_v61 = vld [vmem:[#allocation65_spill] sm:$0xff] }
 0x394   : > { %2362 = vrot.lane.b32.xlu0 %v5147_v12, %s3739_s5  ;;  %v2122_v52 = vsel %vm786_vm6, %v6028_v14, %v6082_v17  ;;  %v2095_v14 = vmul.f32 %v2083_v16, %v2069_v24  ;;  %v2125_v59 = vsel %vm786_vm6, %v6030_v13, %v7346_v61  ;;  %v2418_v31 = vld [vmem:[#allocation9 + $0x80] sm:$0xff]  ;;  %v2123_v40 = vsel %vm786_vm6, %v7346_v61, %v6080_v25  ;;  %v2419_v16 = vld [vmem:[#allocation9 + $0x88] sm:$0xff] }
 0x395   : > { %2364 = vrot.lane.b32.xlu1 %v5145_v42, %s3739_s5  ;;  %v2085_v42 = vmul.f32 %v2077_v49, %v2072_v11  ;;  %v2433_v49 = vld [vmem:[#allocation10 + $0x58] sm:$0xff]  ;;  %v2093_v11 = vmul.f32 %v2081_v53, %v2073_v33  ;;  %v6174_v32 = vadd.f32 %v2092_v46, %v2088_v15  ;;  %v2467_v63 = vmul.f32 0.1, %v2457_v9  ;;  %v2438_v60 = vld [vmem:[#allocation10 + $0x80] sm:$0xff]  ;;  %v7348_v15 = vld [vmem:[#allocation55_spill] sm:$0xff] }
 0x396   : > { %v6126_v12 = vpop.permute.xlu0 %2118  ;;  %2366 = vrot.lane.b32.xlu2 %v5164_v57, %s3739_s5  ;;  %v2068_v57 = vsel %vm732_vm3, %v7336_v28, %v7337_v43  ;;  %v2443_v1 = vmul.f32 %v7344_v36, %v2433_v49  ;;  %v2414_v28 = vld [vmem:[#allocation9 + $0x60] sm:$0xff]  ;;  %v2444_v46 = vmul.f32 %v7348_v15, %v2434_v37  ;;  %v2428_v24 = vmul.f32 %v2418_v31, %v7343_v6 }
 0x397   : > { %v6124_v29 = vpop.permute.xlu1 %2152  ;;  %v2089_v4 = vadd.f32 %v2085_v42, %v2045_v10  ;;  %v2087_v26 = vmul.f32 %v2079_v44, %v2068_v57  ;;  %v2130_v10 = vld [vmem:[#allocation12 + $0x290] sm:$0xff]  ;;  %v2423_v42 = vmul.f32 %v2413_v45, %v7343_v6  ;;  %v2090_v44 = vadd.f32 %v2086_v34, %v2046_v22  ;;  %v2128_v43 = vld [vmem:[#allocation12 + $0x280] sm:$0xff] }
 0x398   : > { %v6146_v5 = vpop.permute.xlu2 %2204  ;;  %v7345_v57 = vld [vmem:[#allocation79_spill] sm:$0xff]  ;;  %v2138_v23 = vmul.f32 %v2130_v10, %v2122_v52  ;;  %v2121_v31 = vsel %vm786_vm6, %v6080_v25, %v6126_v12 }
 0x399   : > { %v2091_v27 = vadd.f32 %v2087_v26, %v2047_v51  ;;  %v2097_v41 = vadd.f32 %v2093_v11, %v2089_v4  ;;  %v2126_v53 = vsel %vm786_vm6, %v7345_v57, %v7340_v18  ;;  %v2181_v51 = vld [vmem:[#allocation12 + $0x308] sm:$0xff]  ;;  %v7347_v18 = vld [vmem:[#allocation44_spill] sm:$0xff]  ;;  %v2453_v4 = vadd.f32 %v2443_v1, %v2423_v42  ;;  %v2182_v42 = vld [vmem:[#allocation12 + $0x310] sm:$0xff] }
 0x39a   : > { %v2424_v48 = vmul.f32 %v2414_v28, %v7347_v18  ;;  %v6200_v49 = vmul.f32 %v2128_v43, %v2126_v53  ;;  %v7349_v11 = vld [vmem:[#allocation76_spill] sm:$0xff]  ;;  %v2185_v1 = vld [vmem:[#allocation12 + $0x328] sm:$0xff]  ;;  %v7350_v28 = vld [vmem:[#allocation77_spill] sm:$0xff] }
 0x39b   : > { %v2141_v8 = vadd.f32 %v2137_v35, %v2097_v41  ;;  %v6198_v45 = vadd.f32 %v2095_v14, %v2091_v27  ;;  %v6206_v34 = vsel %vm786_vm6, %v7349_v11, %v6030_v13  ;;  %v2439_v35 = vld [vmem:[#allocation10 + $0x88] sm:$0xff]  ;;  %v6218_v13 = vmax.f32 %v2457_v9, %v2467_v63  ;;  %v2131_v41 = vld [vmem:[#allocation12 + $0x298] sm:$0xff]  ;;  %v2186_v14 = vld [vmem:[#allocation12 + $0x330] sm:$0xff] }
 0x39c   : > { %2368 = vrot.lane.b32.xlu0 %v5204_v30, %s3739_s5  ;;  %v2454_v6 = vadd.f32 %v2444_v46, %v2424_v48  ;;  %v2120_v37 = vsel %vm786_vm6, %v6082_v17, %v7350_v28  ;;  %v2449_v9 = vmul.f32 %v7348_v15, %v2439_v35  ;;  %v2415_v63 = vld [vmem:[#allocation9 + $0x68] sm:$0xff]  ;;  %v2436_v35 = vld [vmem:[#allocation10 + $0x70] sm:$0xff] }
 0x39d   : > { %2370 = vrot.lane.b32.xlu1 %v5202_v47, %s3739_s5  ;;  %v2094_v47 = vmul.f32 %v2082_v3, %v2071_v19  ;;  %v2145_v3 = vmul.f32 %v2133_v50, %v2125_v59  ;;  %v2448_v19 = vmul.f32 %v7344_v36, %v2438_v60  ;;  %v2146_v36 = vmul.f32 %v2134_v39, %v2123_v40  ;;  %v7352_v40 = vld [vmem:[#allocation50_spill] sm:$0xff] }
 0x39e   : > { %v6178_v30 = vpop.permute.xlu0 %2156  ;;  %2372 = vrot.lane.b32.xlu2 %v5217_v38, %s3739_s5  ;;  %v2462_v38 = vmul.f32 0.1, %v2452_v56  ;;  %v2464_v60 = vmul.f32 0.1, %v2454_v6 }
 0x39f   : > { %v6176_v33 = vpop.permute.xlu1 %2158  ;;  %v2176_v7 = vsel %vm840_vm13, %v6178_v30, %v6046_v62  ;;  %v2098_v26 = vadd.f32 %v2094_v47, %v2090_v44  ;;  %v2149_v52 = vadd.f32 %v2145_v3, %v2141_v8  ;;  %v2463_v47 = vmul.f32 0.1, %v2453_v4  ;;  %v2420_v8 = vld [vmem:[#allocation9 + $0x90] sm:$0xff] }
 0x3a0   : > { %v6190_v0 = vpop.permute.xlu2 %2210  ;;  %v2189_v10 = vmul.f32 %v2181_v51, %v2176_v7  ;;  %v6220_v27 = vmax.f32 %v2452_v56, %v2462_v38  ;;  %v2458_v57 = vadd.f32 %v2448_v19, %v2428_v24  ;;  %v2135_v38 = vld [vmem:[#allocation12 + $0x2b8] sm:$0xff]  ;;  %v2435_v51 = vld [vmem:[#allocation10 + $0x68] sm:$0xff]  ;;  %v7351_v3 = vld [vmem:[#allocation51_spill] sm:$0xff]  ;;  %v6267_v28 = vmax.f32 %v2454_v6, %v2464_v60 }
 0x3a1   : > { %v2142_v22 = vadd.f32 %v2138_v23, %v2098_v26  ;;  %v2440_v23 = vld [vmem:[#allocation10 + $0x90] sm:$0xff]  ;;  %v6245_v7 = vmax.f32 %v2453_v4, %v2463_v47  ;;  %v2430_v39 = vmul.f32 %v2420_v8, %v7351_v3  ;;  %v2425_v19 = vmul.f32 %v2415_v63, %v7351_v3  ;;  %v2183_v47 = vld [vmem:[#allocation12 + $0x318] sm:$0xff]  ;;  %v2184_v63 = vld [vmem:[#allocation12 + $0x320] sm:$0xff] }
 0x3a2   : > { %v2193_v53 = vadd.f32 %v2189_v10, %v2149_v52  ;;  %v2468_v11 = vmul.f32 0.1, %v2458_v57  ;;  %v2450_v24 = vmul.f32 %v7352_v40, %v2440_v23  ;;  %v2147_v25 = vmul.f32 %v2135_v38, %v2121_v31 }
 0x3a3   : > { %v2445_v4 = vmul.f32 %v7352_v40, %v2435_v51 }
 0x3a4   : > { %2374 = vrot.lane.b32.xlu0 %v7313_v20, %s3739_s5  ;;  %v2429_v20 = vmul.f32 %v2419_v16, %v7347_v18  ;;  %v2132_v18 = vld [vmem:[#allocation12 + $0x2a0] sm:$0xff]  ;;  %v2416_v16 = vld [vmem:[#allocation9 + $0x70] sm:$0xff]  ;;  %v2460_v6 = vadd.f32 %v2450_v24, %v2430_v39 }
 0x3a5   : > { %2376 = vrot.lane.b32.xlu1 %v5251_v21, %s3739_s5  ;;  %v2144_v10 = vmul.f32 %v2132_v18, %v6206_v34  ;;  %v7354_v34 = vld [vmem:[#allocation57_spill] sm:$0xff] }
 0x3a6   : > { %v2163_v44 = vpop.permute.xlu0 %2162  ;;  %2378 = vrot.lane.b32.xlu2 %v5273_v54, %s3739_s5  ;;  %v2150_v54 = vadd.f32 %v2146_v36, %v2142_v22  ;;  %v2459_v26 = vadd.f32 %v2449_v9, %v2429_v20  ;;  %v2140_v22 = vadd.f32 %v6200_v49, %v6174_v32  ;;  %v7353_v32 = vld [vmem:[#allocation60_spill] sm:$0xff]  ;;  %v2232_v18 = vld [vmem:[#allocation12 + $0x380] sm:$0xff] }
 0x3a7   : > { %v2165_v21 = vpop.permute.xlu1 %2164  ;;  %v2175_v43 = vsel %vm840_vm13, %v2163_v44, %v6098_v58  ;;  %v2177_v17 = vsel %vm840_vm13, %v6176_v33, %v2163_v44  ;;  %v2426_v49 = vmul.f32 %v2416_v16, %v7353_v32  ;;  %v2446_v44 = vmul.f32 %v7354_v34, %v2436_v35 }
 0x3a8   : > { %v2174_v56 = vsel %vm840_vm13, %v6046_v62, %v2165_v21  ;;  %v2197_v61 = vmul.f32 %v2185_v1, %v2177_v17  ;;  %v6239_v59 = vpop.permute.xlu2 %2216  ;;  %v2139_v62 = vmul.f32 %v2131_v41, %v2120_v37  ;;  %v2198_v15 = vmul.f32 %v2186_v14, %v2175_v43 }
 0x3a9   : > { %v2190_v50 = vmul.f32 %v2182_v42, %v2174_v56  ;;  %v2180_v42 = vld [vmem:[#allocation12 + $0x300] sm:$0xff]  ;;  %v2178_v1 = vsel %vm840_vm13, %v6124_v29, %v6178_v30  ;;  %v2469_v37 = vmul.f32 0.1, %v2459_v26  ;;  %v6278_v30 = vmax.f32 %v2458_v57, %v2468_v11 }
 0x3aa   : > { %v6247_v46 = vadd.f32 %v2197_v61, %v2193_v53  ;;  %v2143_v52 = vadd.f32 %v2139_v62, %v6198_v45  ;;  %v2187_v45 = vld [vmem:[#allocation12 + $0x338] sm:$0xff]  ;;  %v2188_v56 = vmul.f32 %v2180_v42, %v2178_v1  ;;  %v2455_v43 = vadd.f32 %v2445_v4, %v2425_v19  ;;  %v2236_v11 = vld [vmem:[#allocation12 + $0x3a0] sm:$0xff]  ;;  %v2234_v42 = vld [vmem:[#allocation12 + $0x390] sm:$0xff] }
 0x3ab   : > { %v2194_v48 = vadd.f32 %v2190_v50, %v2150_v54  ;;  %v2421_v53 = vld [vmem:[#allocation9 + $0x98] sm:$0xff]  ;;  %v2148_v54 = vadd.f32 %v2144_v10, %v2140_v22  ;;  %v6282_v23 = vmax.f32 %v2459_v26, %v2469_v37  ;;  %v2470_v57 = vmul.f32 0.1, %v2460_v6 }
 0x3ac   : > { %2506 = vrot.lane.b32.xlu0 %v6220_v27, %s3730_s9  ;;  %v2151_v9 = vadd.f32 %v2147_v25, %v2143_v52  ;;  %v2441_v50 = vld [vmem:[#allocation10 + $0x98] sm:$0xff]  ;;  %v2431_v62 = vmul.f32 %v2421_v53, %v7353_v32  ;;  %v2465_v31 = vmul.f32 0.1, %v2455_v43  ;;  %v2233_v52 = vld [vmem:[#allocation12 + $0x388] sm:$0xff] }
 0x3ad   : > { %v6252_v12 = vadd.f32 %v2198_v15, %v2194_v48  ;;  %2508 = vrot.lane.b32.xlu1 %v6218_v13, %s3730_s9  ;;  %v2192_v38 = vadd.f32 %v2188_v56, %v2148_v54  ;;  %v2451_v60 = vmul.f32 %v7354_v34, %v2441_v50  ;;  %v6302_v39 = vmax.f32 %v2460_v6, %v2470_v57  ;;  %v2238_v56 = vld [vmem:[#allocation12 + $0x3b0] sm:$0xff]  ;;  %v2239_v53 = vld [vmem:[#allocation12 + $0x3b8] sm:$0xff] }
 0x3ae   : > { %v2169_v41 = vpop.permute.xlu0 %2168  ;;  %2510 = vrot.lane.b32.xlu2 %v6245_v7, %s3730_s9  ;;  %v6304_v19 = vmax.f32 %v2455_v43, %v2465_v31 }
 0x3af   : > { %v2171_v36 = vpop.permute.xlu1 %2170  ;;  %v2172_v29 = vsel %vm840_vm13, %v2165_v21, %v2169_v41  ;;  %v2179_v21 = vsel %vm840_vm13, %v5994_v55, %v6176_v33  ;;  %v2461_v16 = vadd.f32 %v2451_v60, %v2431_v62 }
 0x3b0   : > { %v2173_v20 = vsel %vm840_vm13, %v6098_v58, %v2171_v36  ;;  %v2191_v14 = vmul.f32 %v2183_v47, %v2172_v29  ;;  %v6280_v17 = vpop.permute.xlu2 %2222  ;;  %v2456_v58 = vadd.f32 %v2446_v44, %v2426_v49  ;;  %v2196_v48 = vmul.f32 %v2184_v63, %v2179_v21  ;;  %v2237_v36 = vld [vmem:[#allocation12 + $0x3a8] sm:$0xff] }
 0x3b1   : > { %v2199_v61 = vmul.f32 %v2187_v45, %v2173_v20 }
 0x3b2   : > { %v2195_v8 = vadd.f32 %v2191_v14, %v2151_v9  ;;  %v2466_v55 = vmul.f32 0.1, %v2456_v58  ;;  %v2200_v40 = vadd.f32 %v2196_v48, %v2192_v38  ;;  %v2235_v9 = vld [vmem:[#allocation12 + $0x398] sm:$0xff]  ;;  %v2288_v48 = vld [vmem:[#allocation12 + $0x420] sm:$0xff] }
 0x3b4   : > { %2512 = vrot.lane.b32.xlu0 %v6278_v30, %s3730_s9  ;;  %v2203_v51 = vadd.f32 %v2199_v61, %v2195_v8  ;;  %v6306_v22 = vmax.f32 %v2456_v58, %v2466_v55 }
 0x3b5   : > { %2514 = vrot.lane.b32.xlu1 %v6267_v28, %s3730_s9 }
 0x3b6   : > { %v2207_v26 = vpop.permute.xlu0 %2206  ;;  %2516 = vrot.lane.b32.xlu2 %v6282_v23, %s3730_s9 }
 0x3b7   : > { %v2209_v15 = vpop.permute.xlu1 %2208  ;;  %v2231_v3 = vsel %vm894_vm9, %v2207_v26, %v6190_v0 }
 0x3b8   : > { %v2230_v33 = vsel %vm894_vm9, %v6146_v5, %v2209_v15  ;;  %v2261_v35 = vpop.permute.xlu2 %2260  ;;  %v2248_v4 = vmul.f32 %v2236_v11, %v2231_v3  ;;  %v2471_v5 = vmul.f32 0.1, %v2461_v16 }
 0x3b9   : > { %v2240_v24 = vmul.f32 %v2232_v18, %v2230_v33  ;;  %v2285_v18 = vld [vmem:[#allocation12 + $0x408] sm:$0xff] }
 0x3ba   : > { %v6322_v44 = vmax.f32 %v2461_v16, %v2471_v5  ;;  %v2289_v33 = vld [vmem:[#allocation12 + $0x428] sm:$0xff] }
 0x3bb   : > { %v2244_v25 = vadd.f32 %v2240_v24, %v2200_v40 }
 0x3bc   : > { %2518 = vrot.lane.b32.xlu0 %v6304_v19, %s3730_s9 }
 0x3bd   : > { %v2252_v10 = vadd.f32 %v2248_v4, %v2244_v25  ;;  %2520 = vrot.lane.b32.xlu1 %v6302_v39, %s3730_s9 }
 0x3be   : > { %v2213_v47 = vpop.permute.xlu0 %2212  ;;  %2522 = vrot.lane.b32.xlu2 %v6306_v22, %s3730_s9 }
 0x3bf   : > { %v2215_v1 = vpop.permute.xlu1 %2214  ;;  %v2226_v37 = vsel %vm894_vm9, %v2213_v47, %v6239_v59  ;;  %v2228_v32 = vsel %vm894_vm9, %v2209_v15, %v2213_v47  ;;  %v2290_v47 = vld [vmem:[#allocation12 + $0x430] sm:$0xff] }
 0x3c0   : > { %v2229_v41 = vsel %vm894_vm9, %v6190_v0, %v2215_v1  ;;  %v2241_v49 = vmul.f32 %v2233_v52, %v2228_v32  ;;  %v2242_v34 = vmul.f32 %v2234_v42, %v2226_v37  ;;  %v2267_v45 = vpop.permute.xlu2 %2266  ;;  %v2287_v52 = vld [vmem:[#allocation12 + $0x418] sm:$0xff] }
 0x3c1   : > { %v2249_v20 = vmul.f32 %v2237_v36, %v2229_v41 }
 0x3c2   : > { %v2245_v29 = vadd.f32 %v2241_v49, %v6247_v46  ;;  %v2246_v6 = vadd.f32 %v2242_v34, %v6252_v12 }
 0x3c4   : > { %2524 = vrot.lane.b32.xlu0 %v6322_v44, %s3730_s9  ;;  %v2253_v0 = vadd.f32 %v2249_v20, %v2245_v29  ;;  %s3083_s9 = scalar_lea.hbm %s7357_s13, %s3082_s29 }
 0x3c5   : > { %2558 = vrot.lane.b32.xlu1 %v6220_v27, %s3731_s24 }
 0x3c6   : > { %v2219_v43 = vpop.permute.xlu0 %2218  ;;  %2560 = vrot.lane.b32.xlu2 %v6218_v13, %s3731_s24 }
 0x3c7   : > { %v2221_v14 = vpop.permute.xlu1 %2220  ;;  %v2225_v12 = vsel %vm894_vm9, %v2219_v43, %v6280_v17  ;;  %v2227_v54 = vsel %vm894_vm9, %v2215_v1, %v2219_v43 }
 0x3c8   : > { %v2224_v46 = vsel %vm894_vm9, %v6239_v59, %v2221_v14  ;;  %v2250_v61 = vmul.f32 %v2238_v56, %v2227_v54  ;;  %v2273_v8 = vpop.permute.xlu2 %2272  ;;  %v2251_v63 = vmul.f32 %v2239_v53, %v2225_v12  ;;  %v2284_v59 = vld [vmem:[#allocation12 + $0x400] sm:$0xff]  ;;  %v2337_v54 = vld [vmem:[#allocation12 + $0x488] sm:$0xff] }
 0x3c9   : > { %v2243_v50 = vmul.f32 %v2235_v9, %v2224_v46  ;;  %v2336_v12 = vld [vmem:[#allocation12 + $0x480] sm:$0xff] }
 0x3ca   : > { %v2254_v21 = vadd.f32 %v2250_v61, %v2246_v6 }
 0x3cb   : > { %v2247_v58 = vadd.f32 %v2243_v50, %v2203_v51 }
 0x3cc   : > { %2562 = vrot.lane.b32.xlu0 %v6245_v7, %s3731_s24 }
 0x3cd   : > { %v2255_v57 = vadd.f32 %v2251_v63, %v2247_v58  ;;  %2564 = vrot.lane.b32.xlu1 %v6278_v30, %s3731_s24 }
 0x3ce   : > { %v2257_v38 = vpop.permute.xlu0 %2256  ;;  %2566 = vrot.lane.b32.xlu2 %v6267_v28, %s3731_s24 }
 0x3cf   : > { %v2259_v62 = vpop.permute.xlu1 %2258  ;;  %v2282_v17 = vsel %vm948_vm11, %v2257_v38, %v2261_v35 }
 0x3d0   : > { %v2292_v31 = vmul.f32 %v2284_v59, %v2282_v17  ;;  %v2311_v60 = vpop.permute.xlu2 %2310 }
 0x3d2   : > { %v2296_v51 = vadd.f32 %v2292_v31, %v2252_v10 }
 0x3d4   : > { %2568 = vrot.lane.b32.xlu0 %v6282_v23, %s3731_s24 }
 0x3d5   : > { %2570 = vrot.lane.b32.xlu1 %v6304_v19, %s3731_s24 }
 0x3d6   : > { %v2263_v26 = vpop.permute.xlu0 %2262  ;;  %2572 = vrot.lane.b32.xlu2 %v6302_v39, %s3731_s24 }
 0x3d7   : > { %v2265_v15 = vpop.permute.xlu1 %2264  ;;  %v2281_v11 = vsel %vm948_vm11, %v2263_v26, %v2267_v45  ;;  %v2283_v3 = vsel %vm948_vm11, %v2259_v62, %v2263_v26 }
 0x3d8   : > { %v2280_v55 = vsel %vm948_vm11, %v2261_v35, %v2265_v15  ;;  %v2300_v24 = vmul.f32 %v2288_v48, %v2283_v3  ;;  %v2317_v16 = vpop.permute.xlu2 %2316  ;;  %v2301_v4 = vmul.f32 %v2289_v33, %v2281_v11  ;;  %v2286_v35 = vld [vmem:[#allocation12 + $0x410] sm:$0xff] }
 0x3d9   : > { %v2293_v40 = vmul.f32 %v2285_v18, %v2280_v55  ;;  %v2341_v18 = vld [vmem:[#allocation12 + $0x4a8] sm:$0xff]  ;;  %v2342_v55 = vld [vmem:[#allocation12 + $0x4b0] sm:$0xff] }
 0x3da   : > { %v2304_v10 = vadd.f32 %v2300_v24, %v2296_v51 }
 0x3db   : > { %v2297_v25 = vadd.f32 %v2293_v40, %v2253_v0 }
 0x3dc   : > { %2574 = vrot.lane.b32.xlu0 %v6306_v22, %s3731_s24 }
 0x3dd   : > { %v2305_v5 = vadd.f32 %v2301_v4, %v2297_v25  ;;  %2576 = vrot.lane.b32.xlu1 %v6322_v44, %s3731_s24  ;;  %s3085_s24 = sshll.u32 %s5859_s23, 4  ;;  %s3086_s24 = int_to_ptr.vmem [resolvable:$true] %s3085_s24 }
 0x3de   : > { %v2269_v1 = vpop.permute.xlu0 %2268  ;;  %2610 = vrot.lane.b32.xlu2 %v6220_v27, %s3732_s20 }
 0x3df   : > { %v2271_v42 = vpop.permute.xlu1 %2270  ;;  %v2276_v41 = vsel %vm948_vm11, %v2269_v1, %v2273_v8  ;;  %v2278_v37 = vsel %vm948_vm11, %v2265_v15, %v2269_v1  ;;  %v2340_v8 = vld [vmem:[#allocation12 + $0x4a0] sm:$0xff] }
 0x3e0   : > { %v2279_v36 = vsel %vm948_vm11, %v2267_v45, %v2271_v42  ;;  %v2294_v32 = vmul.f32 %v2286_v35, %v2278_v37  ;;  %v2295_v49 = vmul.f32 %v2287_v52, %v2276_v41  ;;  %v2323_v34 = vpop.permute.xlu2 %2322  ;;  %v2291_v45 = vld [vmem:[#allocation12 + $0x438] sm:$0xff] }
 0x3e1   : > { %v2302_v20 = vmul.f32 %v2290_v47, %v2279_v36 }
 0x3e2   : > { %v2298_v29 = vadd.f32 %v2294_v32, %v2254_v21  ;;  %v2299_v6 = vadd.f32 %v2295_v49, %v2255_v57 }
 0x3e4   : > { %2612 = vrot.lane.b32.xlu0 %v6218_v13, %s3732_s20  ;;  %v2306_v0 = vadd.f32 %v2302_v20, %v2298_v29  ;;  %v2388_v20 = vld [vmem:[#allocation12 + $0x500] sm:$0xff] }
 0x3e5   : > { %2614 = vrot.lane.b32.xlu1 %v6245_v7, %s3732_s20 }
 0x3e6   : > { %v2275_v56 = vpop.permute.xlu0 %2274  ;;  %2616 = vrot.lane.b32.xlu2 %v6278_v30, %s3732_s20 }
 0x3e7   : > { %v2309_v9 = vpop.permute.xlu1 %2308  ;;  %v2277_v14 = vsel %vm948_vm11, %v2271_v42, %v2275_v56  ;;  %v2343_v42 = vld [vmem:[#allocation12 + $0x4b8] sm:$0xff] }
 0x3e8   : > { %v2303_v43 = vmul.f32 %v2291_v45, %v2277_v14  ;;  %v2361_v46 = vpop.permute.xlu2 %2360 }
 0x3ea   : > { %v2307_v53 = vadd.f32 %v2303_v43, %v2299_v6 }
 0x3ec   : > { %2618 = vrot.lane.b32.xlu0 %v6267_v28, %s3732_s20 }
 0x3ed   : > { %2620 = vrot.lane.b32.xlu1 %v6282_v23, %s3732_s20 }
 0x3ee   : > { %v2313_v61 = vpop.permute.xlu0 %2312  ;;  %2622 = vrot.lane.b32.xlu2 %v6304_v19, %s3732_s20 }
 0x3ef   : > { %v2315_v50 = vpop.permute.xlu1 %2314  ;;  %v2332_v63 = vsel %vm1002_vm12, %v2313_v61, %v2317_v16  ;;  %v2334_v21 = vsel %vm1002_vm12, %v2309_v9, %v2313_v61  ;;  %v2393_v61 = vld [vmem:[#allocation12 + $0x528] sm:$0xff] }
 0x3f0   : > { %v2335_v58 = vsel %vm1002_vm12, %v2311_v60, %v2315_v50  ;;  %v2344_v57 = vmul.f32 %v2336_v12, %v2334_v21  ;;  %v2345_v59 = vmul.f32 %v2337_v54, %v2332_v63  ;;  %v2367_v62 = vpop.permute.xlu2 %2366  ;;  %v2338_v60 = vld [vmem:[#allocation12 + $0x490] sm:$0xff]  ;;  %v2389_v12 = vld [vmem:[#allocation12 + $0x508] sm:$0xff] }
 0x3f1   : > { %v2352_v38 = vmul.f32 %v2340_v8, %v2335_v58  ;;  %v2390_v54 = vld [vmem:[#allocation12 + $0x510] sm:$0xff] }
 0x3f2   : > { %v2348_v17 = vadd.f32 %v2344_v57, %v2304_v10  ;;  %v2349_v31 = vadd.f32 %v2345_v59, %v2305_v5 }
 0x3f4   : > { %2624 = vrot.lane.b32.xlu0 %v6302_v39, %s3732_s20  ;;  %v2356_v51 = vadd.f32 %v2352_v38, %v2348_v17 }
 0x3f5   : > { %2626 = vrot.lane.b32.xlu1 %v6306_v22, %s3732_s20 }
 0x3f6   : > { %v2319_v15 = vpop.permute.xlu0 %2318  ;;  %2628 = vrot.lane.b32.xlu2 %v6322_v44, %s3732_s20  ;;  %s3087_s20 = sshll.u32 %s3083_s9, 4  ;;  %s3088_s20 = int_to_ptr.hbm [resolvable:$true] %s3087_s20 }
 0x3f7   : > { %v2321_v48 = vpop.permute.xlu1 %2320  ;;  %v2331_v33 = vsel %vm1002_vm12, %v2319_v15, %v2323_v34  ;;  %v2333_v11 = vsel %vm1002_vm12, %v2315_v50, %v2319_v15 }
 0x3f8   : > { %v2330_v26 = vsel %vm1002_vm12, %v2317_v16, %v2321_v48  ;;  %v2353_v40 = vmul.f32 %v2341_v18, %v2333_v11  ;;  %v2373_v24 = vpop.permute.xlu2 %2372  ;;  %v2354_v4 = vmul.f32 %v2342_v55, %v2331_v33  ;;  %v2339_v16 = vld [vmem:[#allocation12 + $0x498] sm:$0xff]  ;;  %v2394_v18 = vld [vmem:[#allocation12 + $0x530] sm:$0xff] }
 0x3f9   : > { %v2346_v3 = vmul.f32 %v2338_v60, %v2330_v26  ;;  %v2391_v60 = vld [vmem:[#allocation12 + $0x518] sm:$0xff] }
 0x3fa   : > { %v2357_v10 = vadd.f32 %v2353_v40, %v2349_v31  ;;  %v2395_v55 = vld [vmem:[#allocation12 + $0x538] sm:$0xff] }
 0x3fb   : > { %v2350_v25 = vadd.f32 %v2346_v3, %v2306_v0  ;;  %v2392_v0 = vld [vmem:[#allocation12 + $0x520] sm:$0xff] }
 0x3fc   : > { %2662 = vrot.lane.b32.xlu0 %v6220_v27, %s3733_s15 }
 0x3fd   : > { %v2358_v5 = vadd.f32 %v2354_v4, %v2350_v25  ;;  %2664 = vrot.lane.b32.xlu1 %v6218_v13, %s3733_s15 }
 0x3fe   : > { %v2325_v52 = vpop.permute.xlu0 %2324  ;;  %2666 = vrot.lane.b32.xlu2 %v6245_v7, %s3733_s15 }
 0x3ff   : > { %v2327_v35 = vpop.permute.xlu1 %2326  ;;  %v2328_v47 = vsel %vm1002_vm12, %v2321_v48, %v2325_v52 }
 0x400   : > { %v2329_v1 = vsel %vm1002_vm12, %v2323_v34, %v2327_v35  ;;  %v2347_v36 = vmul.f32 %v2339_v16, %v2328_v47  ;;  %v2379_v41 = vpop.permute.xlu2 %2378  ;;  %v2483_v47 = vld [vmem:[#allocation12 + $0x48] sm:$0xff] }
 0x401   : > { %v2355_v37 = vmul.f32 %v2343_v42, %v2329_v1  ;;  %v2534_v1 = vld [vmem:[#allocation12 + $0xc0] sm:$0xff] }
 0x402   : > { %v2351_v32 = vadd.f32 %v2347_v36, %v2307_v53 }
 0x404   : > { %2668 = vrot.lane.b32.xlu0 %v6278_v30, %s3733_s15  ;;  %v2359_v49 = vadd.f32 %v2355_v37, %v2351_v32 }
 0x405   : > { %2670 = vrot.lane.b32.xlu1 %v6267_v28, %s3733_s15 }
 0x406   : > { %v2363_v6 = vpop.permute.xlu0 %2362  ;;  %2672 = vrot.lane.b32.xlu2 %v6282_v23, %s3733_s15 }
 0x407   : > { %v2365_v29 = vpop.permute.xlu1 %2364  ;;  %v2387_v45 = vsel %vm1056_vm14, %v2363_v6, %v2367_v62  ;;  %v2487_v6 = vld [vmem:[#allocation12 + $0x68] sm:$0xff] }
 0x408   : > { %v2386_v34 = vsel %vm1056_vm14, %v2361_v46, %v2365_v29  ;;  %v6424_v56 = vpop.permute.xlu2 %2510  ;;  %v2404_v43 = vmul.f32 %v2392_v0, %v2387_v45  ;;  %v2484_v0 = vld [vmem:[#allocation12 + $0x50] sm:$0xff]  ;;  %v2499_v45 = vmul.f32 %v2487_v6, %v6278_v30 }
 0x409   : > { %v2396_v9 = vmul.f32 %v2388_v20, %v2386_v34  ;;  %v2491_v20 = vmul.f32 %v2483_v47, %v6245_v7 }
 0x40b   : > { %v2400_v14 = vadd.f32 %v2396_v9, %v2356_v51 }
 0x40c   : > { %2674 = vrot.lane.b32.xlu0 %v6304_v19, %s3733_s15 }
 0x40d   : > { %v2408_v53 = vadd.f32 %v2404_v43, %v2400_v14  ;;  %2676 = vrot.lane.b32.xlu1 %v6302_v39, %s3733_s15  ;;  %v2485_v14 = vld [vmem:[#allocation12 + $0x58] sm:$0xff]  ;;  %v2535_v43 = vld [vmem:[#allocation12 + $0xc8] sm:$0xff] }
 0x40e   : > { %v2369_v46 = vpop.permute.xlu0 %2368  ;;  %2678 = vrot.lane.b32.xlu2 %v6306_v22, %s3733_s15 }
 0x40f   : > { %v2371_v50 = vpop.permute.xlu1 %2370  ;;  %v2382_v58 = vsel %vm1056_vm14, %v2369_v46, %v2373_v24  ;;  %v2384_v63 = vsel %vm1056_vm14, %v2365_v29, %v2369_v46 }
 0x410   : > { %v2385_v8 = vsel %vm1056_vm14, %v2367_v62, %v2371_v50  ;;  %v2397_v21 = vmul.f32 %v2389_v12, %v2384_v63  ;;  %v2398_v57 = vmul.f32 %v2390_v54, %v2382_v58  ;;  %v6438_v59 = vpop.permute.xlu2 %2516  ;;  %v2482_v62 = vld [vmem:[#allocation12 + $0x40] sm:$0xff]  ;;  %v2493_v63 = vmul.f32 %v2485_v14, %v6304_v19 }
 0x411   : > { %v2405_v38 = vmul.f32 %v2393_v61, %v2385_v8  ;;  %v2490_v3 = vmul.f32 %v2482_v62, %v6220_v27  ;;  %v2539_v61 = vld [vmem:[#allocation12 + $0xe8] sm:$0xff] }
 0x412   : > { %v2401_v17 = vadd.f32 %v2397_v21, %v2357_v10  ;;  %v2402_v31 = vadd.f32 %v2398_v57, %v2358_v5  ;;  %v2486_v10 = vld [vmem:[#allocation12 + $0x60] sm:$0xff] }
 0x413   : > { %v2494_v52 = vadd.f32 %v2490_v3, %v2408_v53  ;;  %v2538_v53 = vld [vmem:[#allocation12 + $0xe0] sm:$0xff] }
 0x414   : > { %v2409_v51 = vadd.f32 %v2405_v38, %v2401_v17  ;;  %2680 = vrot.lane.b32.xlu0 %v6322_v44, %s3733_s15  ;;  %v2488_v17 = vld [vmem:[#allocation12 + $0x70] sm:$0xff]  ;;  %s3071_s15 = scalar_lea.sflag [#allocation6], %s3971_s11 }
 0x415   : > { %2714 = vrot.lane.b32.xlu1 %v6220_v27, %s3734_s21 }
 0x416   : > { %v2375_v15 = vpop.permute.xlu0 %2374  ;;  %2716 = vrot.lane.b32.xlu2 %v6218_v13, %s3734_s21  ;;  %v2495_v9 = vadd.f32 %v2491_v20, %v2409_v51 }
 0x417   : > { %v2377_v48 = vpop.permute.xlu1 %2376  ;;  %v2381_v33 = vsel %vm1056_vm14, %v2375_v15, %v2379_v41  ;;  %v2383_v11 = vsel %vm1056_vm14, %v2371_v50, %v2375_v15  ;;  %v2492_v50 = vmul.f32 %v2484_v0, %v6267_v28  ;;  %v2586_v0 = vld [vmem:[#allocation12 + $0x140] sm:$0xff] }
 0x418   : > { %v2380_v26 = vsel %vm1056_vm14, %v2373_v24, %v2377_v48  ;;  %v2406_v25 = vmul.f32 %v2394_v18, %v2383_v11  ;;  %v6453_v4 = vpop.permute.xlu2 %2522  ;;  %v2407_v16 = vmul.f32 %v2395_v55, %v2381_v33  ;;  %v2498_v24 = vmul.f32 %v2486_v10, %v6218_v13  ;;  %v2536_v33 = vld [vmem:[#allocation12 + $0xd0] sm:$0xff]  ;;  %v2537_v11 = vld [vmem:[#allocation12 + $0xd8] sm:$0xff] }
 0x419   : > { %v2399_v40 = vmul.f32 %v2391_v60, %v2380_v26  ;;  %v2503_v21 = vadd.f32 %v2499_v45, %v2495_v9  ;;  %v2500_v18 = vmul.f32 %v2488_v17, %v6282_v23  ;;  %v2587_v45 = vld [vmem:[#allocation12 + $0x148] sm:$0xff] }
 0x41a   : > { %v2410_v35 = vadd.f32 %v2406_v25, %v2402_v31  ;;  %v2502_v32 = vadd.f32 %v2498_v24, %v2494_v52  ;;  %v2489_v31 = vld [vmem:[#allocation12 + $0x78] sm:$0xff]  ;;  %v2540_v25 = vld [vmem:[#allocation12 + $0xf0] sm:$0xff] }
 0x41b   : > { %v2403_v5 = vadd.f32 %v2399_v40, %v2359_v49  ;;  %v2501_v48 = vmul.f32 %v2489_v31, %v6302_v39 }
 0x41c   : > { %2718 = vrot.lane.b32.xlu0 %v6245_v7, %s3734_s21  ;;  %v2496_v15 = vadd.f32 %v2492_v50, %v2410_v35 }
 0x41d   : > { %v2411_v42 = vadd.f32 %v2407_v16, %v2403_v5  ;;  %2720 = vrot.lane.b32.xlu1 %v6278_v30, %s3734_s21 }
 0x41e   : > { %v2507_v41 = vpop.permute.xlu0 %2506  ;;  %2722 = vrot.lane.b32.xlu2 %v6267_v28, %s3734_s21  ;;  %v2504_v35 = vadd.f32 %v2500_v18, %v2496_v15 }
 0x41f   : > { %v2509_v36 = vpop.permute.xlu1 %2508  ;;  %v2532_v37 = vsel %vm570_vm15, %v2507_v41, %v6424_v56  ;;  %v2497_v26 = vadd.f32 %v2493_v63, %v2411_v42 }
 0x420   : > { %v2542_v49 = vmul.f32 %v2534_v1, %v2532_v37  ;;  %v6466_v29 = vpop.permute.xlu2 %2560  ;;  %v2541_v37 = vld [vmem:[#allocation12 + $0xf8] sm:$0xff] }
 0x421   : > { %v2505_v52 = vadd.f32 %v2501_v48, %v2497_v26 }
 0x422   : > { %v2546_v34 = vadd.f32 %v2542_v49, %v2502_v32 }
 0x424   : > { %2724 = vrot.lane.b32.xlu0 %v6282_v23, %s3734_s21 }
 0x425   : > { %2726 = vrot.lane.b32.xlu1 %v6304_v19, %s3734_s21 }
 0x426   : > { %v2513_v54 = vpop.permute.xlu0 %2512  ;;  %2728 = vrot.lane.b32.xlu2 %v6302_v39, %s3734_s21 }
 0x427   : > { %v2515_v12 = vpop.permute.xlu1 %2514  ;;  %v2531_v8 = vsel %vm570_vm15, %v2513_v54, %v6438_v59  ;;  %v2533_v58 = vsel %vm570_vm15, %v2509_v36, %v2513_v54 }
 0x428   : > { %v2530_v46 = vsel %vm570_vm15, %v6424_v56, %v2515_v12  ;;  %v2550_v38 = vmul.f32 %v2538_v53, %v2533_v58  ;;  %v6485_v51 = vpop.permute.xlu2 %2566  ;;  %v2551_v60 = vmul.f32 %v2539_v61, %v2531_v8 }
 0x429   : > { %v2543_v57 = vmul.f32 %v2535_v43, %v2530_v46  ;;  %v2590_v43 = vld [vmem:[#allocation12 + $0x160] sm:$0xff] }
 0x42a   : > { %v2554_v56 = vadd.f32 %v2550_v38, %v2546_v34 }
 0x42b   : > { %v2547_v62 = vadd.f32 %v2543_v57, %v2503_v21  ;;  %v2588_v21 = vld [vmem:[#allocation12 + $0x150] sm:$0xff]  ;;  %v2591_v57 = vld [vmem:[#allocation12 + $0x168] sm:$0xff] }
 0x42c   : > { %2730 = vrot.lane.b32.xlu0 %v6306_v22, %s3734_s21 }
 0x42d   : > { %v2555_v55 = vadd.f32 %v2551_v60, %v2547_v62  ;;  %2732 = vrot.lane.b32.xlu1 %v6322_v44, %s3734_s21  ;;  %v2592_v62 = vld [vmem:[#allocation12 + $0x170] sm:$0xff]  ;;  %s3597_s21 = sshra.s32 %s3088_s20, 4  ;;  %s3598_s21 = int_to_ptr.hbm [resolvable:$true] %s3597_s21 }
 0x42e   : > { %v2519_v40 = vpop.permute.xlu0 %2518  ;;  %2766 = vrot.lane.b32.xlu2 %v6220_v27, %s3735_s18  ;;  %p3604_p2 = scmp.lt.s32.totalorder %s3598_s21, %s7357_s13 }
 0x42f   : > { %v2521_v3 = vpop.permute.xlu1 %2520  ;;  %v2526_v5 = vsel %vm570_vm15, %v2519_v40, %v6453_v4  ;;  %v2528_v16 = vsel %vm570_vm15, %v2515_v12, %v2519_v40 }
 0x430   : > { %v2529_v10 = vsel %vm570_vm15, %v6438_v59, %v2521_v3  ;;  %v2544_v42 = vmul.f32 %v2536_v33, %v2528_v16  ;;  %v2545_v24 = vmul.f32 %v2537_v11, %v2526_v5  ;;  %v2573_v1 = vpop.permute.xlu2 %2572 }
 0x431   : > { %v2552_v47 = vmul.f32 %v2540_v25, %v2529_v10  ;;  %v2593_v25 = vld [vmem:[#allocation12 + $0x178] sm:$0xff] }
 0x432   : > { %v2548_v36 = vadd.f32 %v2544_v42, %v2504_v35  ;;  %v2549_v41 = vadd.f32 %v2545_v24, %v2505_v52 }
 0x434   : > { %2768 = vrot.lane.b32.xlu0 %v6218_v13, %s3735_s18  ;;  %v2556_v59 = vadd.f32 %v2552_v47, %v2548_v36  ;;  %v2638_v47 = vld [vmem:[#allocation12 + $0x1c0] sm:$0xff] }
 0x435   : > { %2770 = vrot.lane.b32.xlu1 %v6245_v7, %s3735_s18 }
 0x436   : > { %v2525_v32 = vpop.permute.xlu0 %2524  ;;  %2772 = vrot.lane.b32.xlu2 %v6278_v30, %s3735_s18 }
 0x437   : > { %v2559_v4 = vpop.permute.xlu1 %2558  ;;  %v2527_v49 = vsel %vm570_vm15, %v2521_v3, %v2525_v32 }
 0x438   : > { %v2553_v20 = vmul.f32 %v2541_v37, %v2527_v49  ;;  %v2611_v6 = vpop.permute.xlu2 %2610 }
 0x43a   : > { %v2557_v34 = vadd.f32 %v2553_v20, %v2549_v41 }
 0x43c   : > { %2774 = vrot.lane.b32.xlu0 %v6267_v28, %s3735_s18 }
 0x43d   : > { %2776 = vrot.lane.b32.xlu1 %v6282_v23, %s3735_s18 }
 0x43e   : > { %v2563_v14 = vpop.permute.xlu0 %2562  ;;  %2778 = vrot.lane.b32.xlu2 %v6304_v19, %s3735_s18 }
 0x43f   : > { %v2565_v9 = vpop.permute.xlu1 %2564  ;;  %v2582_v12 = vsel %vm624_vm0, %v2563_v14, %v6485_v51  ;;  %v2584_v54 = vsel %vm624_vm0, %v2559_v4, %v2563_v14 }
 0x440   : > { %v2585_v53 = vsel %vm624_vm0, %v6466_v29, %v2565_v9  ;;  %v2594_v50 = vmul.f32 %v2586_v0, %v2584_v54  ;;  %v2595_v46 = vmul.f32 %v2587_v45, %v2582_v12  ;;  %v2617_v61 = vpop.permute.xlu2 %2616  ;;  %v2639_v0 = vld [vmem:[#allocation12 + $0x1c8] sm:$0xff]  ;;  %v2640_v45 = vld [vmem:[#allocation12 + $0x1d0] sm:$0xff] }
 0x441   : > { %v2602_v8 = vmul.f32 %v2590_v43, %v2585_v53 }
 0x442   : > { %v2598_v58 = vadd.f32 %v2594_v50, %v2554_v56  ;;  %v2599_v63 = vadd.f32 %v2595_v46, %v2555_v55 }
 0x444   : > { %2780 = vrot.lane.b32.xlu0 %v6302_v39, %s3735_s18  ;;  %v2606_v29 = vadd.f32 %v2602_v8, %v2598_v58 }
 0x445   : > { %2782 = vrot.lane.b32.xlu1 %v6306_v22, %s3735_s18 }
 0x446   : > { %v2569_v17 = vpop.permute.xlu0 %2568  ;;  %2784 = vrot.lane.b32.xlu2 %v6322_v44, %s3735_s18  ;;  %s3599_s18 = scalar_lea.hbm %s3598_s21, 8 }
 0x447   : > { %v2571_v38 = vpop.permute.xlu1 %2570  ;;  %v2581_v60 = vsel %vm624_vm0, %v2569_v17, %v2573_v1  ;;  %v2583_v56 = vsel %vm624_vm0, %v2565_v9, %v2569_v17  ;;  %p3600_p6 = scmp.ne.s32.totalorder %s3598_s21, %s3599_s18 }
 0x448   : > { %v2580_v31 = vsel %vm624_vm0, %v6485_v51, %v2571_v38  ;;  %v2603_v48 = vmul.f32 %v2591_v57, %v2583_v56  ;;  %v2623_v15 = vpop.permute.xlu2 %2622  ;;  %v2604_v55 = vmul.f32 %v2592_v62, %v2581_v60  ;;  %v2589_v51 = vld [vmem:[#allocation12 + $0x158] sm:$0xff] }
 0x449   : > { %v2596_v18 = vmul.f32 %v2588_v21, %v2580_v31  ;;  %v2644_v21 = vld [vmem:[#allocation12 + $0x1f0] sm:$0xff]  ;;  %v2645_v31 = vld [vmem:[#allocation12 + $0x1f8] sm:$0xff]  ;;  %p3601_p13 = pnand %p3600_p6, %p3905_p4 }
 0x44a   : > { %v2607_v33 = vadd.f32 %v2603_v48, %v2599_v63 }
 0x44b   : > { %v2600_v26 = vadd.f32 %v2596_v18, %v2556_v59  ;;  %v2642_v59 = vld [vmem:[#allocation12 + $0x1e0] sm:$0xff]  ;;  %p3602_p0 = pneg %p3601_p13 }
 0x44c   : > { %2818 = vrot.lane.b32.xlu0 %v6220_v27, %s3736_s22 }
 0x44d   : > { %v2608_v11 = vadd.f32 %v2604_v55, %v2600_v26  ;;  %2820 = vrot.lane.b32.xlu1 %v6218_v13, %s3736_s22 }
 0x44e   : > { %v2575_v40 = vpop.permute.xlu0 %2574  ;;  %2822 = vrot.lane.b32.xlu2 %v6245_v7, %s3736_s22 }
 0x44f   : > { %v2577_v3 = vpop.permute.xlu1 %2576  ;;  %v2578_v5 = vsel %vm624_vm0, %v2571_v38, %v2575_v40 }
 0x450   : > { %v2579_v10 = vsel %vm624_vm0, %v2573_v1, %v2577_v3  ;;  %v2597_v16 = vmul.f32 %v2589_v51, %v2578_v5  ;;  %v2629_v35 = vpop.permute.xlu2 %2628 }
 0x451   : > { %v2605_v52 = vmul.f32 %v2593_v25, %v2579_v10 }
 0x452   : > { %v2601_v42 = vadd.f32 %v2597_v16, %v2557_v34  ;;  %v2691_v16 = vld [vmem:[#allocation12 + $0x248] sm:$0xff] }
 0x454   : > { %2824 = vrot.lane.b32.xlu0 %v6278_v30, %s3736_s22  ;;  %v2609_v24 = vadd.f32 %v2605_v52, %v2601_v42 }
 0x455   : > { %2826 = vrot.lane.b32.xlu1 %v6267_v28, %s3736_s22 }
 0x456   : > { %v2613_v41 = vpop.permute.xlu0 %2612  ;;  %2828 = vrot.lane.b32.xlu2 %v6282_v23, %s3736_s22 }
 0x457   : > { %v2615_v36 = vpop.permute.xlu1 %2614  ;;  %v2637_v37 = vsel %vm678_vm2, %v2613_v41, %v2617_v61 }
 0x458   : > { %v2636_v1 = vsel %vm678_vm2, %v2611_v6, %v2615_v36  ;;  %v2667_v32 = vpop.permute.xlu2 %2666  ;;  %v2654_v20 = vmul.f32 %v2642_v59, %v2637_v37  ;;  %v2643_v6 = vld [vmem:[#allocation12 + $0x1e8] sm:$0xff] }
 0x459   : > { %v2646_v4 = vmul.f32 %v2638_v47, %v2636_v1  ;;  %v2695_v47 = vld [vmem:[#allocation12 + $0x268] sm:$0xff] }
 0x45b   : > { %v2650_v49 = vadd.f32 %v2646_v4, %v2606_v29 }
 0x45c   : > { %2830 = vrot.lane.b32.xlu0 %v6304_v19, %s3736_s22 }
 0x45d   : > { %v2658_v34 = vadd.f32 %v2654_v20, %v2650_v49  ;;  %2832 = vrot.lane.b32.xlu1 %v6302_v39, %s3736_s22 }
 0x45e   : > { %v2619_v14 = vpop.permute.xlu0 %2618  ;;  %2834 = vrot.lane.b32.xlu2 %v6306_v22, %s3736_s22 }
 0x45f   : > { %v2621_v9 = vpop.permute.xlu1 %2620  ;;  %v2632_v53 = vsel %vm678_vm2, %v2619_v14, %v2623_v15  ;;  %v2634_v12 = vsel %vm678_vm2, %v2615_v36, %v2619_v14  ;;  %v2696_v14 = vld [vmem:[#allocation12 + $0x270] sm:$0xff] }
 0x460   : > { %v2635_v43 = vsel %vm678_vm2, %v2617_v61, %v2621_v9  ;;  %v2647_v54 = vmul.f32 %v2639_v0, %v2634_v12  ;;  %v2648_v50 = vmul.f32 %v2640_v45, %v2632_v53  ;;  %v2673_v46 = vpop.permute.xlu2 %2672  ;;  %v2641_v61 = vld [vmem:[#allocation12 + $0x1d8] sm:$0xff] }
 0x461   : > { %v2655_v8 = vmul.f32 %v2643_v6, %v2635_v43  ;;  %v2693_v0 = vld [vmem:[#allocation12 + $0x258] sm:$0xff] }
 0x462   : > { %v2651_v58 = vadd.f32 %v2647_v54, %v2607_v33  ;;  %v2652_v63 = vadd.f32 %v2648_v50, %v2608_v11 }
 0x464   : > { %2836 = vrot.lane.b32.xlu0 %v6322_v44, %s3736_s22  ;;  %v2659_v29 = vadd.f32 %v2655_v8, %v2651_v58 }
 0x465   : > { %2870 = vrot.lane.b32.xlu1 %v6220_v27, %s3737_s19 }
 0x466   : > { %v2625_v38 = vpop.permute.xlu0 %2624  ;;  %2872 = vrot.lane.b32.xlu2 %v6218_v13, %s3737_s19 }
 0x467   : > { %v2627_v57 = vpop.permute.xlu1 %2626  ;;  %v2631_v62 = vsel %vm678_vm2, %v2625_v38, %v2629_v35  ;;  %v2633_v60 = vsel %vm678_vm2, %v2621_v9, %v2625_v38  ;;  %v2694_v35 = vld [vmem:[#allocation12 + $0x260] sm:$0xff] }
 0x468   : > { %v2630_v17 = vsel %vm678_vm2, %v2623_v15, %v2627_v57  ;;  %v2656_v18 = vmul.f32 %v2644_v21, %v2633_v60  ;;  %v2679_v48 = vpop.permute.xlu2 %2678  ;;  %v2657_v55 = vmul.f32 %v2645_v31, %v2631_v62  ;;  %v2690_v15 = vld [vmem:[#allocation12 + $0x240] sm:$0xff]  ;;  %v2743_v60 = vld [vmem:[#allocation12 + $0x2c8] sm:$0xff] }
 0x469   : > { %v2649_v56 = vmul.f32 %v2641_v61, %v2630_v17  ;;  %v2742_v62 = vld [vmem:[#allocation12 + $0x2c0] sm:$0xff] }
 0x46a   : > { %v2660_v33 = vadd.f32 %v2656_v18, %v2652_v63 }
 0x46b   : > { %v2653_v26 = vadd.f32 %v2649_v56, %v2609_v24 }
 0x46c   : > { %2874 = vrot.lane.b32.xlu0 %v6245_v7, %s3737_s19 }
 0x46d   : > { %v2661_v11 = vadd.f32 %v2657_v55, %v2653_v26  ;;  %2876 = vrot.lane.b32.xlu1 %v6278_v30, %s3737_s19 }
 0x46e   : > { %v2663_v3 = vpop.permute.xlu0 %2662  ;;  %2878 = vrot.lane.b32.xlu2 %v6267_v28, %s3737_s19 }
 0x46f   : > { %v2665_v51 = vpop.permute.xlu1 %2664  ;;  %v2688_v40 = vsel %vm732_vm3, %v2663_v3, %v2667_v32 }
 0x470   : > { %v2698_v25 = vmul.f32 %v2690_v15, %v2688_v40  ;;  %v2717_v10 = vpop.permute.xlu2 %2716 }
 0x472   : > { %v2702_v5 = vadd.f32 %v2698_v25, %v2658_v34 }
 0x474   : > { %2882 = vrot.lane.b32.xlu0 %v6304_v19, %s3737_s19 }
 0x475   : > { %2886 = vrot.lane.b32.xlu1 %v6306_v22, %s3737_s19 }
 0x476   : > { %v2669_v42 = vpop.permute.xlu0 %2668  ;;  %2880 = vrot.lane.b32.xlu2 %v6282_v23, %s3737_s19 }
 0x477   : > { %v2671_v52 = vpop.permute.xlu1 %2670  ;;  %v2687_v36 = vsel %vm732_vm3, %v2669_v42, %v2673_v46  ;;  %v2689_v41 = vsel %vm732_vm3, %v2665_v51, %v2669_v42 }
 0x478   : > { %v2686_v24 = vsel %vm732_vm3, %v2667_v32, %v2671_v52  ;;  %v2706_v59 = vmul.f32 %v2694_v35, %v2689_v41  ;;  %v2723_v37 = vpop.permute.xlu2 %2722  ;;  %v2707_v49 = vmul.f32 %v2695_v47, %v2687_v36  ;;  %v2692_v32 = vld [vmem:[#allocation12 + $0x250] sm:$0xff] }
 0x479   : > { %v2699_v1 = vmul.f32 %v2691_v16, %v2686_v24  ;;  %v2747_v16 = vld [vmem:[#allocation12 + $0x2e8] sm:$0xff]  ;;  %v2748_v24 = vld [vmem:[#allocation12 + $0x2f0] sm:$0xff] }
 0x47a   : > { %v2710_v20 = vadd.f32 %v2706_v59, %v2702_v5 }
 0x47b   : > { %v2703_v4 = vadd.f32 %v2699_v1, %v2659_v29 }
 0x47c   : > { %2884 = vrot.lane.b32.xlu0 %v6302_v39, %s3737_s19 }
 0x47d   : > { %v2711_v34 = vadd.f32 %v2707_v49, %v2703_v4  ;;  %2888 = vrot.lane.b32.xlu1 %v6322_v44, %s3737_s19 }
 0x47e   : > { %v2675_v9 = vpop.permute.xlu0 %2674  ;;  %2926 = vrot.lane.b32.xlu2 %v6245_v7, %s3738_s10 }
 0x47f   : > { %v2677_v45 = vpop.permute.xlu1 %2676  ;;  %v2682_v43 = vsel %vm732_vm3, %v2675_v9, %v2679_v48  ;;  %v2684_v53 = vsel %vm732_vm3, %v2671_v52, %v2675_v9  ;;  %v2746_v48 = vld [vmem:[#allocation12 + $0x2e0] sm:$0xff] }
 0x480   : > { %v2685_v6 = vsel %vm732_vm3, %v2673_v46, %v2677_v45  ;;  %v2700_v12 = vmul.f32 %v2692_v32, %v2684_v53  ;;  %v2701_v54 = vmul.f32 %v2693_v0, %v2682_v43  ;;  %v2729_v50 = vpop.permute.xlu2 %2728  ;;  %v2697_v46 = vld [vmem:[#allocation12 + $0x278] sm:$0xff] }
 0x481   : > { %v2708_v8 = vmul.f32 %v2696_v14, %v2685_v6 }
 0x482   : > { %v2704_v58 = vadd.f32 %v2700_v12, %v2660_v33  ;;  %v2705_v63 = vadd.f32 %v2701_v54, %v2661_v11  ;;  %v2794_v12 = vld [vmem:[#allocation12 + $0x340] sm:$0xff] }
 0x484   : > { %2930 = vrot.lane.b32.xlu0 %v6267_v28, %s3738_s10  ;;  %v2712_v29 = vadd.f32 %v2708_v8, %v2704_v58  ;;  %v2798_v8 = vld [vmem:[#allocation12 + $0x360] sm:$0xff] }
 0x485   : > { %2934 = vrot.lane.b32.xlu1 %v6304_v19, %s3738_s10 }
 0x486   : > { %v2681_v21 = vpop.permute.xlu0 %2680  ;;  %2938 = vrot.lane.b32.xlu2 %v6306_v22, %s3738_s10 }
 0x487   : > { %v2715_v61 = vpop.permute.xlu1 %2714  ;;  %v2683_v57 = vsel %vm732_vm3, %v2677_v45, %v2681_v21  ;;  %v2749_v45 = vld [vmem:[#allocation12 + $0x2f8] sm:$0xff] }
 0x488   : > { %v2709_v38 = vmul.f32 %v2697_v46, %v2683_v57  ;;  %v2767_v17 = vpop.permute.xlu2 %2766 }
 0x48a   : > { %v2713_v31 = vadd.f32 %v2709_v38, %v2705_v63  ;;  %v2799_v38 = vld [vmem:[#allocation12 + $0x368] sm:$0xff] }
 0x48c   : > { %2922 = vrot.lane.b32.xlu0 %v6220_v27, %s3738_s10 }
 0x48d   : > { %2928 = vrot.lane.b32.xlu1 %v6278_v30, %s3738_s10 }
 0x48e   : > { %v2719_v18 = vpop.permute.xlu0 %2718  ;;  %2932 = vrot.lane.b32.xlu2 %v6282_v23, %s3738_s10 }
 0x48f   : > { %v2721_v56 = vpop.permute.xlu1 %2720  ;;  %v2738_v55 = vsel %vm786_vm6, %v2719_v18, %v2723_v37  ;;  %v2740_v33 = vsel %vm786_vm6, %v2715_v61, %v2719_v18 }
 0x490   : > { %v2741_v26 = vsel %vm786_vm6, %v2717_v10, %v2721_v56  ;;  %v2750_v11 = vmul.f32 %v2742_v62, %v2740_v33  ;;  %v2751_v15 = vmul.f32 %v2743_v60, %v2738_v55  ;;  %v2773_v51 = vpop.permute.xlu2 %2772  ;;  %v2744_v10 = vld [vmem:[#allocation12 + $0x2d0] sm:$0xff] }
 0x491   : > { %v2758_v3 = vmul.f32 %v2746_v48, %v2741_v26  ;;  %v2797_v26 = vld [vmem:[#allocation12 + $0x358] sm:$0xff]  ;;  %v2800_v55 = vld [vmem:[#allocation12 + $0x370] sm:$0xff] }
 0x492   : > { %v2754_v40 = vadd.f32 %v2750_v11, %v2710_v20  ;;  %v2755_v25 = vadd.f32 %v2751_v15, %v2711_v34 }
 0x494   : > { %2936 = vrot.lane.b32.xlu0 %v6302_v39, %s3738_s10  ;;  %v2762_v5 = vadd.f32 %v2758_v3, %v2754_v40 }
 0x495   : > { %2940 = vrot.lane.b32.xlu1 %v6322_v44, %s3738_s10 }
 0x496   : > { %v2725_v52 = vpop.permute.xlu0 %2724  ;;  %2924 = vrot.lane.b32.xlu2 %v6218_v13, %s3738_s10  ;;  %s3603_s10 = scalar_lea.hbm %s7357_s13, 32 }
 0x497   : > { %v2727_v35 = vpop.permute.xlu1 %2726  ;;  %v2737_v47 = vsel %vm786_vm6, %v2725_v52, %v2729_v50  ;;  %v2739_v36 = vsel %vm786_vm6, %v2721_v56, %v2725_v52  ;;  %p3605_p7 = scmp.lt.s32.totalorder %s3603_s10, %s3599_s18 }
 0x498   : > { %v2736_v42 = vsel %vm786_vm6, %v2723_v37, %v2727_v35  ;;  %v2759_v1 = vmul.f32 %v2747_v16, %v2739_v36  ;;  %v2779_v59 = vpop.permute.xlu2 %2778  ;;  %v2760_v49 = vmul.f32 %v2748_v24, %v2737_v47  ;;  %v2745_v37 = vld [vmem:[#allocation12 + $0x2d8] sm:$0xff] }
 0x499   : > { %v2752_v41 = vmul.f32 %v2744_v10, %v2736_v42  ;;  %v2846_v42 = vld [vmem:[#allocation12 + $0x3c0] sm:$0xff]  ;;  %p3606_p11 = por %p3605_p7, %p3604_p2 }
 0x49a   : > { %v2763_v20 = vadd.f32 %v2759_v1, %v2755_v25 }
 0x49b   : > { %v2756_v4 = vadd.f32 %v2752_v41, %v2712_v29  ;;  %p3607_p12 = pnand %p3606_p11, %p3602_p0 }
 0x49c   : > { %2978 = vrot.lane.b32.xlu0 %v6245_v7, %s3739_s5 }
 0x49d   : > { %v2764_v34 = vadd.f32 %v2760_v49, %v2756_v4  ;;  %2982 = vrot.lane.b32.xlu1 %v6267_v28, %s3739_s5  ;;  %v2847_v4 = vld [vmem:[#allocation12 + $0x3c8] sm:$0xff]  ;;  %v2850_v49 = vld [vmem:[#allocation12 + $0x3e0] sm:$0xff] }
 0x49e   : > { %v2731_v0 = vpop.permute.xlu0 %2730  ;;  %2986 = vrot.lane.b32.xlu2 %v6304_v19, %s3739_s5 }
 0x49f   : > { %v2733_v32 = vpop.permute.xlu1 %2732  ;;  %v2734_v14 = vsel %vm786_vm6, %v2727_v35, %v2731_v0 }
 0x4a0   : > { %v2735_v9 = vsel %vm786_vm6, %v2729_v50, %v2733_v32  ;;  %v2753_v6 = vmul.f32 %v2745_v37, %v2734_v14  ;;  %v2785_v43 = vpop.permute.xlu2 %2784  ;;  %v2851_v32 = vld [vmem:[#allocation12 + $0x3e8] sm:$0xff] }
 0x4a1   : > { %v2761_v53 = vmul.f32 %v2749_v45, %v2735_v9 }
 0x4a2   : > { %v2757_v28 = vadd.f32 %v2753_v6, %v2713_v31 }
 0x4a4   : > { %2990 = vrot.lane.b32.xlu0 %v6306_v22, %s3739_s5  ;;  %v2765_v7 = vadd.f32 %v2761_v53, %v2757_v28  ;;  %v2795_v22 = vld [vmem:[#allocation12 + $0x348] sm:$0xff] }
 0x4a5   : > { %2974 = vrot.lane.b32.xlu1 %v6220_v27, %s3739_s5 }
 0x4a6   : > { %v2769_v54 = vpop.permute.xlu0 %2768  ;;  %2980 = vrot.lane.b32.xlu2 %v6278_v30, %s3739_s5  ;;  %v2796_v30 = vld [vmem:[#allocation12 + $0x350] sm:$0xff] }
 0x4a7   : > { %v2771_v19 = vpop.permute.xlu1 %2770  ;;  %v2793_v58 = vsel %vm840_vm13, %v2769_v54, %v2773_v51 }
 0x4a8   : > { %v2792_v50 = vsel %vm840_vm13, %v2767_v17, %v2771_v19  ;;  %v2823_v29 = vpop.permute.xlu2 %2822  ;;  %v2810_v46 = vmul.f32 %v2798_v8, %v2793_v58  ;;  %v2852_v8 = vld [vmem:[#allocation12 + $0x3f0] sm:$0xff] }
 0x4a9   : > { %v2802_v63 = vmul.f32 %v2794_v12, %v2792_v50  ;;  %v2849_v12 = vld [vmem:[#allocation12 + $0x3d8] sm:$0xff] }
 0x4ab   : > { %v2806_v27 = vadd.f32 %v2802_v63, %v2762_v5 }
 0x4ac   : > { %2984 = vrot.lane.b32.xlu0 %v6282_v23, %s3739_s5 }
 0x4ad   : > { %v2814_v61 = vadd.f32 %v2810_v46, %v2806_v27  ;;  %2988 = vrot.lane.b32.xlu1 %v6302_v39, %s3739_s5 }
 0x4ae   : > { %v2775_v57 = vpop.permute.xlu0 %2774  ;;  %2992 = vrot.lane.b32.xlu2 %v6322_v44, %s3739_s5 }
 0x4af   : > { %v2777_v21 = vpop.permute.xlu1 %2776  ;;  %v2788_v31 = vsel %vm840_vm13, %v2775_v57, %v2779_v59  ;;  %v2790_v39 = vsel %vm840_vm13, %v2771_v19, %v2775_v57  ;;  %v2853_v57 = vld [vmem:[#allocation12 + $0x3f8] sm:$0xff] }
 0x4b0   : > { %v2791_v17 = vsel %vm840_vm13, %v2773_v51, %v2777_v21  ;;  %v2803_v62 = vmul.f32 %v2795_v22, %v2790_v39  ;;  %v2804_v60 = vmul.f32 %v2796_v30, %v2788_v31  ;;  %v2829_v23 = vpop.permute.xlu2 %2828  ;;  %v2801_v51 = vld [vmem:[#allocation12 + $0x378] sm:$0xff] }
 0x4b1   : > { %v2811_v56 = vmul.f32 %v2799_v38, %v2791_v17 }
 0x4b2   : > { %v2807_v18 = vadd.f32 %v2803_v62, %v2763_v20  ;;  %v2808_v48 = vadd.f32 %v2804_v60, %v2764_v34 }
 0x4b4   : > { %2976 = vrot.lane.b32.xlu0 %v6218_v13, %s3739_s5  ;;  %v2815_v44 = vadd.f32 %v2811_v56, %v2807_v18 }
 0x4b6   : > { %v2781_v11 = vpop.permute.xlu0 %2780 }
 0x4b7   : > { %v2783_v33 = vpop.permute.xlu1 %2782  ;;  %v2787_v3 = vsel %vm840_vm13, %v2781_v11, %v2785_v43  ;;  %v2789_v40 = vsel %vm840_vm13, %v2777_v21, %v2781_v11 }
 0x4b8   : > { %v2786_v15 = vsel %vm840_vm13, %v2779_v59, %v2783_v33  ;;  %v2812_v5 = vmul.f32 %v2800_v55, %v2789_v40  ;;  %v2835_v10 = vpop.permute.xlu2 %2834  ;;  %v2813_v13 = vmul.f32 %v2801_v51, %v2787_v3 }
 0x4b9   : > { %v2805_v25 = vmul.f32 %v2797_v26, %v2786_v15 }
 0x4ba   : > { %v2816_v35 = vadd.f32 %v2812_v5, %v2808_v48  ;;  %v2902_v48 = vld [vmem:[#allocation12 + $0x460] sm:$0xff] }
 0x4bb   : > { %v2809_v16 = vadd.f32 %v2805_v25, %v2765_v7  ;;  %v2848_v7 = vld [vmem:[#allocation12 + $0x3d0] sm:$0xff] }
 0x4bd   : > { %v2817_v52 = vadd.f32 %v2813_v13, %v2809_v16 }
 0x4be   : > { %v2819_v47 = vpop.permute.xlu0 %2818 }
 0x4bf   : > { %v2821_v24 = vpop.permute.xlu1 %2820  ;;  %v2844_v36 = vsel %vm894_vm9, %v2819_v47, %v2823_v29 }
 0x4c0   : > { %v2854_v41 = vmul.f32 %v2846_v42, %v2844_v36  ;;  %v2873_v59 = vpop.permute.xlu2 %2872 }
 0x4c2   : > { %v2858_v1 = vadd.f32 %v2854_v41, %v2814_v61 }
 0x4c6   : > { %v2825_v34 = vpop.permute.xlu0 %2824 }
 0x4c7   : > { %v2827_v20 = vpop.permute.xlu1 %2826  ;;  %v2843_v0 = vsel %vm894_vm9, %v2825_v34, %v2829_v23  ;;  %v2845_v45 = vsel %vm894_vm9, %v2821_v24, %v2825_v34  ;;  %v2903_v34 = vld [vmem:[#allocation12 + $0x468] sm:$0xff] }
 0x4c8   : > { %v2842_v37 = vsel %vm894_vm9, %v2823_v29, %v2827_v20  ;;  %v2862_v14 = vmul.f32 %v2850_v49, %v2845_v45  ;;  %v2863_v43 = vmul.f32 %v2851_v32, %v2843_v0  ;;  %v2879_v19 = vpop.permute.xlu2 %2878  ;;  %v2901_v45 = vld [vmem:[#allocation12 + $0x458] sm:$0xff] }
 0x4c9   : > { %v2855_v9 = vmul.f32 %v2847_v4, %v2842_v37  ;;  %v2900_v4 = vld [vmem:[#allocation12 + $0x450] sm:$0xff] }
 0x4ca   : > { %v2866_v53 = vadd.f32 %v2862_v14, %v2858_v1  ;;  %v2899_v1 = vld [vmem:[#allocation12 + $0x448] sm:$0xff] }
 0x4cb   : > { %v2859_v6 = vadd.f32 %v2855_v9, %v2815_v44 }
 0x4cd   : > { %v6694_v28 = vadd.f32 %v2863_v43, %v2859_v6  ;;  %v2904_v6 = vld [vmem:[#allocation12 + $0x470] sm:$0xff] }
 0x4ce   : > { %v2831_v50 = vpop.permute.xlu0 %2830 }
 0x4cf   : > { %v2833_v54 = vpop.permute.xlu1 %2832  ;;  %v2838_v63 = vsel %vm894_vm9, %v2831_v50, %v2835_v10  ;;  %v2840_v29 = vsel %vm894_vm9, %v2827_v20, %v2831_v50  ;;  %v2951_v50 = vld [vmem:[#allocation12 + $0x4c8] sm:$0xff] }
 0x4d0   : > { %v2841_v58 = vsel %vm894_vm9, %v2829_v23, %v2833_v54  ;;  %v2856_v27 = vmul.f32 %v2848_v7, %v2840_v29  ;;  %v2857_v46 = vmul.f32 %v2849_v12, %v2838_v63  ;;  %v2881_v39 = vpop.permute.xlu2 %2880  ;;  %v2898_v23 = vld [vmem:[#allocation12 + $0x440] sm:$0xff]  ;;  %v2905_v7 = vld [vmem:[#allocation12 + $0x478] sm:$0xff] }
 0x4d1   : > { %v2864_v61 = vmul.f32 %v2852_v8, %v2841_v58  ;;  %v2952_v8 = vld [vmem:[#allocation12 + $0x4d0] sm:$0xff] }
 0x4d2   : > { %v2860_v22 = vadd.f32 %v2856_v27, %v2816_v35  ;;  %v2861_v30 = vadd.f32 %v2857_v46, %v2817_v52 }
 0x4d4   : > { %v2868_v21 = vadd.f32 %v2864_v61, %v2860_v22 }
 0x4d6   : > { %v2837_v17 = vpop.permute.xlu0 %2836 }
 0x4d7   : > { %v2871_v38 = vpop.permute.xlu1 %2870  ;;  %v2839_v31 = vsel %vm894_vm9, %v2833_v54, %v2837_v17 }
 0x4d8   : > { %v2865_v62 = vmul.f32 %v2853_v57, %v2839_v31  ;;  %v6708_v33 = vpop.permute.xlu2 %2926  ;;  %v2956_v31 = vld [vmem:[#allocation12 + $0x4f0] sm:$0xff] }
 0x4da   : > { %v2869_v60 = vadd.f32 %v2865_v62, %v2861_v30  ;;  %v2953_v30 = vld [vmem:[#allocation12 + $0x4d8] sm:$0xff] }
 0x4de   : > { %v2875_v18 = vpop.permute.xlu0 %2874 }
 0x4df   : > { %v2877_v56 = vpop.permute.xlu1 %2876  ;;  %v2896_v26 = vsel %vm948_vm11, %v2871_v38, %v2875_v18  ;;  %v2955_v38 = vld [vmem:[#allocation12 + $0x4e8] sm:$0xff] }
 0x4e0   : > { %v2897_v44 = vsel %vm948_vm11, %v2873_v59, %v2877_v56  ;;  %v2906_v55 = vmul.f32 %v2898_v23, %v2896_v26  ;;  %v2939_v25 = vpop.permute.xlu2 %2938  ;;  %v2894_v59 = vsel %vm948_vm11, %v2875_v18, %v2879_v19  ;;  %v2895_v37 = vsel %vm948_vm11, %v2877_v56, %v2881_v39  ;;  %v3004_v26 = vld [vmem:[#allocation12 + $0x550] sm:$0xff] }
 0x4e1   : > { %v2914_v11 = vmul.f32 %v2902_v48, %v2897_v44  ;;  %v2907_v20 = vmul.f32 %v2899_v1, %v2894_v59  ;;  %v2957_v48 = vld [vmem:[#allocation12 + $0x4f8] sm:$0xff] }
 0x4e2   : > { %v2910_v15 = vadd.f32 %v2906_v55, %v2866_v53  ;;  %v2915_v53 = vmul.f32 %v2903_v34, %v2895_v37 }
 0x4e4   : > { %v6710_v51 = vadd.f32 %v2914_v11, %v2910_v15  ;;  %v3003_v11 = vld [vmem:[#allocation12 + $0x548] sm:$0xff] }
 0x4e6   : > { %v2883_v40 = vpop.permute.xlu0 %2882 }
 0x4e7   : > { %v2887_v3 = vpop.permute.xlu1 %2886  ;;  %v2892_v49 = vsel %vm948_vm11, %v2879_v19, %v2883_v40  ;;  %v2911_v19 = vadd.f32 %v2907_v20, %v6694_v28 }
 0x4e8   : > { %v2933_v16 = vpop.permute.xlu2 %2932  ;;  %v2890_v9 = vsel %vm948_vm11, %v2883_v40, %v2887_v3  ;;  %v2908_v14 = vmul.f32 %v2900_v4, %v2892_v49 }
 0x4e9   : > { %v2909_v54 = vmul.f32 %v2901_v45, %v2890_v9  ;;  %v2919_v62 = vadd.f32 %v2915_v53, %v2911_v19  ;;  %v3009_v45 = vld [vmem:[#allocation12 + $0x578] sm:$0xff]  ;;  %v3007_v9 = vld [vmem:[#allocation12 + $0x568] sm:$0xff] }
 0x4ea   : > { %v2912_v46 = vadd.f32 %v2908_v14, %v2868_v21  ;;  %v3008_v14 = vld [vmem:[#allocation12 + $0x570] sm:$0xff] }
 0x4eb   : > { %v2913_v23 = vadd.f32 %v2909_v54, %v2869_v60 }
 0x4ee   : > { %v2885_v10 = vpop.permute.xlu0 %2884 }
 0x4ef   : > { %v2889_v5 = vpop.permute.xlu1 %2888  ;;  %v2893_v43 = vsel %vm948_vm11, %v2881_v39, %v2885_v10 }
 0x4f0   : > { %v6714_v24 = vpop.permute.xlu2 %2924  ;;  %v2891_v12 = vsel %vm948_vm11, %v2885_v10, %v2889_v5  ;;  %v2916_v27 = vmul.f32 %v2904_v6, %v2893_v43  ;;  %v2954_v6 = vld [vmem:[#allocation12 + $0x4e0] sm:$0xff] }
 0x4f1   : > { %v2917_v61 = vmul.f32 %v2905_v7, %v2891_v12 }
 0x4f2   : > { %v2920_v18 = vadd.f32 %v2916_v27, %v2912_v46 }
 0x4f3   : > { %v2921_v60 = vadd.f32 %v2917_v61, %v2913_v23 }
 0x4f6   : > { %v2931_v35 = vpop.permute.xlu0 %2930 }
 0x4f7   : > { %v2935_v13 = vpop.permute.xlu1 %2934  ;;  %v2946_v63 = vsel %vm1002_vm12, %v6708_v33, %v2931_v35 }
 0x4f8   : > { %v2987_v41 = vpop.permute.xlu2 %2986  ;;  %v2944_v58 = vsel %vm1002_vm12, %v2931_v35, %v2935_v13  ;;  %v2942_v22 = vsel %vm1002_vm12, %v2935_v13, %v2939_v25  ;;  %v2959_v28 = vmul.f32 %v2951_v50, %v2946_v63  ;;  %v2950_v35 = vld [vmem:[#allocation12 + $0x4c0] sm:$0xff] }
 0x4f9   : > { %v2960_v57 = vmul.f32 %v2952_v8, %v2944_v58  ;;  %v2961_v3 = vmul.f32 %v2953_v30, %v2942_v22 }
 0x4fa   : > { %v2963_v5 = vadd.f32 %v2959_v28, %v2919_v62 }
 0x4fb   : > { %v2964_v10 = vadd.f32 %v2960_v57, %v2920_v18  ;;  %v2965_v4 = vadd.f32 %v2961_v3, %v2921_v60 }
 0x4fe   : > { %v2923_v42 = vpop.permute.xlu0 %2922 }
 0x4ff   : > { %v6712_v52 = vpop.permute.xlu1 %2928 }
 0x500   : > { %v6736_v29 = vpop.permute.xlu2 %2980  ;;  %v2947_v17 = vsel %vm1002_vm12, %v6712_v52, %v2933_v16 }
 0x501   : > { %v2967_v40 = vmul.f32 %v2955_v38, %v2947_v17 }
 0x503   : > { %v2971_v49 = vadd.f32 %v2967_v40, %v2963_v5 }
 0x506   : > { %v2937_v36 = vpop.permute.xlu0 %2936 }
 0x507   : > { %v2941_v47 = vpop.permute.xlu1 %2940  ;;  %v2945_v39 = vsel %vm1002_vm12, %v2933_v16, %v2937_v36  ;;  %v3005_v16 = vld [vmem:[#allocation12 + $0x558] sm:$0xff] }
 0x508   : > { %v2943_v44 = vsel %vm1002_vm12, %v2937_v36, %v2941_v47  ;;  %v2968_v25 = vmul.f32 %v2956_v31, %v2945_v39  ;;  %v2948_v47 = vsel %vm1002_vm12, %v2923_v42, %v6708_v33  ;;  %v2993_v37 = vpop.permute.xlu2 %2992  ;;  %v3006_v31 = vld [vmem:[#allocation12 + $0x560] sm:$0xff] }
 0x509   : > { %v2969_v36 = vmul.f32 %v2957_v48, %v2943_v44 }
 0x50a   : > { %v2972_v20 = vadd.f32 %v2968_v25, %v2964_v10 }
 0x50b   : > { %v2973_v43 = vadd.f32 %v2969_v36, %v2965_v4 }
 0x50e   : > { %v6722_v0 = vpop.permute.xlu0 %2978 }
 0x50f   : > { %v2983_v32 = vpop.permute.xlu1 %2982 }
 0x510   : > { %v2996_v55 = vsel %vm1056_vm14, %v2983_v32, %v2987_v41  ;;  %v2998_v15 = vsel %vm1056_vm14, %v6722_v0, %v2983_v32  ;;  %v2958_v32 = vmul.f32 %v2950_v35, %v2948_v47 }
 0x511   : > { %v3012_v1 = vmul.f32 %v3004_v26, %v2996_v55  ;;  %v3011_v59 = vmul.f32 %v3003_v11, %v2998_v15 }
 0x512   : > { %v2962_v27 = vadd.f32 %v2958_v32, %v6710_v51 }
 0x513   : > { %v3016_v33 = vadd.f32 %v3012_v1, %v2972_v20  ;;  %v3015_v42 = vadd.f32 %v3011_v59, %v2971_v49 }
 0x516   : > { %v2991_v21 = vpop.permute.xlu0 %2990 }
 0x517   : > { %v2975_v56 = vpop.permute.xlu1 %2974  ;;  %v2994_v13 = vsel %vm1056_vm14, %v2987_v41, %v2991_v21  ;;  %v2949_v41 = vsel %vm1002_vm12, %v6714_v24, %v6712_v52  ;;  %v3002_v52 = vld [vmem:[#allocation12 + $0x540] sm:$0xff] }
 0x518   : > { %v3013_v34 = vmul.f32 %v3005_v16, %v2994_v13  ;;  %v3000_v12 = vsel %vm1056_vm14, %v2975_v56, %v6722_v0  ;;  %v2966_v46 = vmul.f32 %v2954_v6, %v2949_v41 }
 0x519   : > { %v3010_v30 = vmul.f32 %v3002_v52, %v3000_v12 }
 0x51a   : > { %v3017_v24 = vadd.f32 %v3013_v34, %v2973_v43  ;;  %v2970_v17 = vadd.f32 %v2966_v46, %v2962_v27 }
 0x51c   : > { %v3014_v21 = vadd.f32 %v3010_v30, %v2970_v17 }
 0x51e   : > { %v2985_v7 = vpop.permute.xlu0 %2984 }
 0x51f   : > { %v2989_v53 = vpop.permute.xlu1 %2988  ;;  %v2999_v50 = vsel %vm1056_vm14, %v6736_v29, %v2985_v7 }
 0x520   : > { %v2995_v19 = vsel %vm1056_vm14, %v2989_v53, %v2993_v37  ;;  %v2997_v54 = vsel %vm1056_vm14, %v2985_v7, %v2989_v53  ;;  %v3019_v58 = vmul.f32 %v3007_v9, %v2999_v50 }
 0x521   : > { %v3021_v8 = vmul.f32 %v3009_v45, %v2995_v19  ;;  %v3020_v63 = vmul.f32 %v3008_v14, %v2997_v54 }
 0x522   : > { %v3023_v0 = vadd.f32 %v3019_v58, %v3015_v42 }
 0x523   : > { %v3025_v61 = vadd.f32 %v3021_v8, %v3017_v24  ;;  %v3024_v22 = vadd.f32 %v3020_v63, %v3016_v33 }
 0x524   : > { %v3032_v57 = vrot.slane %v3023_v0, 4 }
 0x525   : > { %v3044_v28 = vrot.slane %v3025_v61, 4  ;;  %v3038_v38 = vrot.slane %v3024_v22, 4 }
 0x526   : > { %v3033_v62 = vadd.f32 %v3032_v57, %v3023_v0  ;;  %v2977_v56 = vpop.permute.xlu0 %2976 }
 0x527   : > { %v3045_v39 = vadd.f32 %v3044_v28, %v3025_v61  ;;  %v3039_v23 = vadd.f32 %v3038_v38, %v3024_v22  ;;  %v3001_v18 = vsel %vm1056_vm14, %v2977_v56, %v6736_v29 }
 0x528   : > { %v3034_v48 = vrot.slane %v3033_v62, 2  ;;  %v3018_v26 = vmul.f32 %v3006_v31, %v3001_v18 }
 0x529   : > { %v3046_v51 = vrot.slane %v3045_v39, 2  ;;  %v3040_v44 = vrot.slane %v3039_v23, 2 }
 0x52a   : > { %v3035_v11 = vadd.f32 %v3034_v48, %v3033_v62  ;;  %v3022_v3 = vadd.f32 %v3018_v26, %v3014_v21 }
 0x52b   : > { %v3047_v55 = vadd.f32 %v3046_v51, %v3045_v39  ;;  %v3041_v15 = vadd.f32 %v3040_v44, %v3039_v23 }
 0x52c   : > { %v3036_v25 = vrot.slane %v3035_v11, 1  ;;  %v3026_v5 = vrot.slane %v3022_v3, 4 }
 0x52d   : > { %v3048_v40 = vrot.slane %v3047_v55, 1  ;;  %v3042_v60 = vrot.slane %v3041_v15, 1 }
 0x52e   : > { %v3037_v16 = vadd.f32 %v3036_v25, %v3035_v11  ;;  %v3027_v35 = vadd.f32 %v3026_v5, %v3022_v3 }
 0x52f   : > { %v3049_v10 = vadd.f32 %v3048_v40, %v3047_v55  ;;  %v3043_v13 = vadd.f32 %v3042_v60, %v3041_v15 }
 0x530   : > { %v3028_v36 = vrot.slane %v3027_v35, 2  ;;  %v3051_v1 = vadd.f32 %v3037_v16, %v7356_v2 }
 0x531   : > { %v3053_v29 = vadd.f32 %v3049_v10, %v7356_v2  ;;  %v3052_v47 = vadd.f32 %v3043_v13, %v7356_v2 }
 0x532   : > { %v3029_v59 = vadd.f32 %v3028_v36, %v3027_v35 }
 0x533   : > { %3418 = vtanh.f32 %v3053_v29 }
 0x534   : > { %3420 = vtanh.f32 %v3052_v47  ;;  %v3030_v4 = vrot.slane %v3029_v59, 1 }
 0x535   : > { %3422 = vtanh.f32 %v3051_v1 }
 0x536   : > { %v3031_v49 = vadd.f32 %v3030_v4, %v3029_v59 }
 0x538   : > { %v3050_v34 = vadd.f32 %v3031_v49, %v7356_v2 }
 0x539   : > { %v3419_v20 = vpop.eup %3418 }
 0x53a   : > { %v3064_v37 = vrot.slane %v3419_v20, 5  ;;  %v3421_v32 = vpop.eup %3420  ;;  %3424 = vtanh.f32 %v3050_v34 }
 0x53b   : > { %v3063_v45 = vrot.slane %v3421_v32, 6  ;;  %v3423_v9 = vpop.eup %3422 }
 0x53c   : > { %v3062_v6 = vrot.slane %v3423_v9, 7 }
 0x53d   : > { %v3066_v14 = vsel %vm1746_vm4, %v3063_v45, %v3064_v37 }
 0x540   : > { %v3425_v41 = vpop.eup %3424 }
 0x541   : > { %v3065_v43 = vsel %vm1744_vm1, %v3425_v41, %v3062_v6 }
 0x542   : > { %v3067_v33 = vsel %vm1748_vm5, %v3065_v43, %v3066_v14 }
 0x543   : > { %3069 = vst.msk [vmem:[%s5859_s23 + $0x4] sm:$0xf] %vm5842_vm7, %v3067_v33 }
 0x544   : > { %3610 = shalt.err (!%p3607_p12)
}
 0x545   : > { %3281 = dma.vmem_to_hbm [thread:$0]  (%p3905_p4), %s3086_s24, 128, %s3088_s20, %s3071_s15  }
 0x546 PF: > { %s7360_s11 = sld [smem:[#allocation20_spill]]  ;;  %p3303_p8 = scmp.ge.s32.totalorder %s3719_s8, 2 }
 0x548   : > { %p3294_p9 = pnand %p3303_p8, %p3916_p3 }
 0x54a   : > { %p3295_p1 = pneg %p3294_p9 }
 0x54c   : > { %s3099_s23 = sand.u32 1, %s7360_s11  }
 0x54d   : > { %s3100_s16 = scalar_lea.sflag [#allocation6], %s3099_s23 }
 0x54e   : > { %3672 = dma.done.wait (%p3295_p1), %s3100_s16, 128  }
 0x54f   : > { %3674 = vsyncadd (%p3295_p1), %s3100_s16, 4294967168  ;;  %s28_s8 = sadd.s32 1, %s3719_s8   ;;  %s7362_s23 = sld [smem:[#allocation19_spill]] }
 0x550   : > { %p25_p10 = scmp.ge.s32.totalorder %s28_s8, 6   ;;  %s7363_s12 = sld [smem:[#allocation27_spill]] }
 0x551   : > { %s7364_s3 = sld [smem:[#allocation26_spill]]  ;;  %s7368_s24 = smov %s3687_s25 }
 0x552   : > { %s7365_s5 = sld [smem:[#allocation23_spill]]  ;;  %s7370_s26 = smov %s3695_s27 }
 0x553   : > { %s7366_s30 = sld [smem:[#allocation24_spill]]  ;;  %s7371_s27 = smov %s3699_s28 }
 0x554   : > { %s7367_s6 = sld [smem:[#allocation25_spill]]  ;;  %s7373_s29 = smov %s3715_s7 }
 0x556   : > { %s7369_s25 = smov %s7363_s12  ;;  %27 = sbr.rel (!%p25_p10) target bundleno = 15 (0xf), region = 124 }
 0x557   : > { %s7372_s28 = smov %s7364_s3 }
 0x55a   : > { %s7374_s7 = smov %s7367_s6 }
 0x55b   :  { %3106 = vsyncpa [#allocation5], 1 }
 0x55c   :  { %3108 = vsyncpa [#allocation5 + $0x1], 1 }
 0x55d   :  { %3109 = vsyncpa [#allocation8], 1 }
 0x55e   :  { %3111 = vsyncpa [#allocation8 + $0x1], 1 }
 0x55f   :  { %3112 = vsyncpa [#allocation11], 1 }
 0x560   :  { %3113 = vsyncpa [#allocation6], 1 }
 0x561   :  { %3115 = vsyncpa [#allocation6 + $0x1], 1 }

</bundles_post_ra>
